<compile_context>
chip_gen: v6e
topology: v6e:2x2x1
jax: 0.10.0
libtpu: 0.0.40
codegen_flags: <defaults>
</compile_context>

<pallas_src>
import functools
import numpy as np

import jax
import jax.numpy as jnp
from jax.experimental import pallas as pl
from jax.experimental.pallas import tpu as pltpu

_EPS = 1e-5
_TM_MAX = 256
_TN_MAX = 256
_LAYER_CFG = ((64, 2, 1), (128, 2, 2), (256, 2, 2), (512, 2, 2))


# ----------------------------- small helpers -----------------------------

def _round_up(x, m):
    return (x + m - 1) // m * m


def _pad_ch(c):
    return _round_up(c, 128)


def _choose_tk(K):
    """Largest multiple-of-128 divisor of K that is <= 512, or K itself."""
    if K % 128 != 0:
        return K
    for cand in (512, 384, 256, 128):
        if cand <= K and K % cand == 0:
            return cand
    return K


# ----------------------------- Pallas kernels -----------------------------

def _mm_kernel(x_ref, w_ref, b_ref, o_ref, acc_ref, *, act):
    """Tiled matmul: out = act(x @ w + bias), K-reduction over grid axis 2."""
    @pl.when(pl.program_id(2) == 0)
    def _():
        acc_ref[...] = jnp.zeros_like(acc_ref)

    acc_ref[...] += jnp.dot(x_ref[...], w_ref[...],
                            preferred_element_type=jnp.float32)

    @pl.when(pl.program_id(2) == pl.num_programs(2) - 1)
    def _():
        out = acc_ref[...] + b_ref[...]
        if act == "relu":
            out = jnp.maximum(out, 0.0)
        o_ref[...] = out.astype(o_ref.dtype)


def _mm_res_kernel(x_ref, w_ref, b_ref, r_ref, o_ref, acc_ref):
    """Tiled matmul: out = relu(x @ w + bias + residual)  (BasicBlock tail)."""
    @pl.when(pl.program_id(2) == 0)
    def _():
        acc_ref[...] = jnp.zeros_like(acc_ref)

    acc_ref[...] += jnp.dot(x_ref[...], w_ref[...],
                            preferred_element_type=jnp.float32)

    @pl.when(pl.program_id(2) == pl.num_programs(2) - 1)
    def _():
        out = acc_ref[...] + b_ref[...] + r_ref[...].astype(jnp.float32)
        o_ref[...] = jnp.maximum(out, 0.0).astype(o_ref.dtype)


def _maxk_kernel(*refs):
    """Element-wise max over k*k shifted-window inputs (lane-dense, C>=128)."""
    in_refs, o_ref = refs[:-1], refs[-1]
    acc = in_refs[0][...]
    for r in in_refs[1:]:
        acc = jnp.maximum(acc, r[...])
    o_ref[...] = acc


def _pool_fc_sigmoid_kernel(x_ref, w_ref, b_ref, o_ref, *, inv):
    """Fused adaptive-avg-pool(1x1) + Linear + sigmoid."""
    pooled = jnp.sum(x_ref[...].astype(jnp.float32), axis=1) * inv        # (B, C)
    logits = jnp.dot(pooled.astype(jnp.bfloat16), w_ref[...],
                     preferred_element_type=jnp.float32) + b_ref[...]
    o_ref[...] = jax.nn.sigmoid(logits)


# ----------------------------- pallas_call wrappers -----------------------------

def matmul_bias_act(x, w, bias, *, act="relu", residual=None,
                    out_dtype=jnp.bfloat16):
    """x:(M,K) bf16, w:(K,N) bf16 (BN scale folded), bias:(N,) f32.
       N must be a multiple of 128 (guaranteed by channel padding)."""
    M, K = x.shape
    _, N = w.shape

    tm = min(_TM_MAX, _round_up(M, 8))
    M_pad = _round_up(M, tm)
    tn = min(_TN_MAX, N)
    tk = _choose_tk(K)

    if M_pad != M:
        x = jnp.pad(x, ((0, M_pad - M), (0, 0)))
        if residual is not None:
            residual = jnp.pad(residual, ((0, M_pad - M), (0, 0)))

    grid = (M_pad // tm, N // tn, K // tk)
    b2 = bias.reshape(1, N).astype(jnp.float32)

    in_specs = [
        pl.BlockSpec((tm, tk), lambda i, j, k: (i, k)),
        pl.BlockSpec((tk, tn), lambda i, j, k: (k, j)),
        pl.BlockSpec((1, tn), lambda i, j, k: (0, j)),
    ]
    args = [x, w, b2]
    if residual is not None:
        in_specs.append(pl.BlockSpec((tm, tn), lambda i, j, k: (i, j)))
        args.append(residual)
        kernel = _mm_res_kernel
    else:
        kernel = functools.partial(_mm_kernel, act=act)

    bytes_accessed = int(x.size * x.dtype.itemsize
                         + w.size * w.dtype.itemsize
                         + b2.size * 4
                         + M_pad * N * jnp.dtype(out_dtype).itemsize)
    if residual is not None:
        bytes_accessed += int(residual.size * residual.dtype.itemsize)

    out = pl.pallas_call(
        kernel,
        out_shape=jax.ShapeDtypeStruct((M_pad, N), out_dtype),
        grid_spec=pltpu.PrefetchScalarGridSpec(
            num_scalar_prefetch=0,
            grid=grid,
            in_specs=in_specs,
            out_specs=pl.BlockSpec((tm, tn), lambda i, j, k: (i, j)),
            scratch_shapes=[pltpu.VMEM((tm, tn), jnp.float32)]),
        compiler_params=pltpu.CompilerParams(
            dimension_semantics=("parallel", "parallel", "arbitrary"),
            vmem_limit_bytes=32 * 1024 * 1024),
        cost_estimate=pl.CostEstimate(
            flops=2 * M_pad * N * K,
            transcendentals=0,
            bytes_accessed=bytes_accessed),
    )(*args)

    return out[:M] if M_pad != M else out


# ----------------------------- conv / pool ops -----------------------------

def im2col(x, k, stride, pad):
    """x: (B,H,W,C) -> patches (B*Ho*Wo, k*k*C) ordered (kh, kw, cin)."""
    B, H, W, C = x.shape
    xp = jnp.pad(x, ((0, 0), (pad, pad), (pad, pad), (0, 0)))
    Ho = (H + 2 * pad - k) // stride + 1
    Wo = (W + 2 * pad - k) // stride + 1
    cols = []
    for di in range(k):
        for dj in range(k):
            cols.append(xp[:, di:di + stride * Ho:stride,
                           dj:dj + stride * Wo:stride, :])
    patches = jnp.concatenate(cols, axis=-1)            # (B, Ho, Wo, k*k*C)
    return patches.reshape(B * Ho * Wo, k * k * C), Ho, Wo


def conv_bn_act(x, w, bias, *, stride, pad, act="relu", residual=None):
    """Conv2d(bias=False) with BN scale pre-folded into w, + bias, (+res), + act."""
    B = x.shape[0]
    k = w.shape[0]
    cout = w.shape[3]
    patches, Ho, Wo = im2col(x, k, stride, pad)
    wm = w.reshape(-1, cout)                             # (k*k*cin, cout), bf16
    res = None if residual is None else residual.reshape(-1, cout)
    out = matmul_bias_act(patches, wm, bias, act=act, residual=res)
    return out.reshape(B, Ho, Wo, cout)


def maxpool(x, k=3, stride=2, pad=1):
    B, H, W, C = x.shape
    xp = jnp.pad(x, ((0, 0), (pad, pad), (pad, pad), (0, 0)),
                 constant_values=float("-inf"))
    Ho = (H + 2 * pad - k) // stride + 1
    Wo = (W + 2 * pad - k) // stride + 1
    M = B * Ho * Wo

    taps = [xp[:, di:di + stride * Ho:stride,
               dj:dj + stride * Wo:stride, :].reshape(M, C)
            for di in range(k) for dj in range(k)]

    tm = min(1024, _round_up(M, 8))
    M_pad = _round_up(M, tm)
    if M_pad != M:
        taps = [jnp.pad(t, ((0, M_pad - M), (0, 0))) for t in taps]

    out = pl.pallas_call(
        _maxk_kernel,
        out_shape=jax.ShapeDtypeStruct((M_pad, C), x.dtype),
        grid_spec=pltpu.PrefetchScalarGridSpec(
            num_scalar_prefetch=0,
            grid=(M_pad // tm,),
            in_specs=[pl.BlockSpec((tm, C), lambda i: (i, 0))] * (k * k),
            out_specs=pl.BlockSpec((tm, C), lambda i: (i, 0))),
        compiler_params=pltpu.CompilerParams(
            dimension_semantics=("parallel",)),
    )(*taps)
    return out[:M].reshape(B, Ho, Wo, C)


def pool_fc_sigmoid(h, w, b):
    """h: (B, HW, 512) bf16, w: (512, N_pad) bf16, b: (N_pad,) f32 -> (B, N_pad) f32."""
    B, HW, C = h.shape
    N = w.shape[1]
    return pl.pallas_call(
        functools.partial(_pool_fc_sigmoid_kernel, inv=1.0 / HW),
        out_shape=jax.ShapeDtypeStruct((B, N), jnp.float32),
        in_specs=[pl.BlockSpec(memory_space=pltpu.MemorySpace.VMEM)] * 3,
        out_specs=pl.BlockSpec(memory_space=pltpu.MemorySpace.VMEM),
    )(h, w, b.reshape(1, N).astype(jnp.float32))


# ----------------------------- parameters -----------------------------

def _conv_w(key, k, cin, cout):
    fan_in = k * k * cin
    return jax.random.normal(key, (k, k, cin, cout), jnp.float32) / np.sqrt(fan_in)


def _fold_bn(w, c):
    """Eval-mode BN with fresh running stats folded into the conv weight."""
    gamma = jnp.ones((c,), jnp.float32)
    beta = jnp.zeros((c,), jnp.float32)
    mean = jnp.zeros((c,), jnp.float32)
    var = jnp.ones((c,), jnp.float32)
    scale = gamma / jnp.sqrt(var + _EPS)
    return w * scale[None, None, None, :], beta - mean * scale


def _pad_conv(w, b, cin_pad, cout_pad):
    """Zero-pad channels to lane-dense multiples of 128; weights stored bf16."""
    k, _, cin, cout = w.shape
    wp = jnp.zeros((k, k, cin_pad, cout_pad), jnp.float32)
    wp = wp.at[:, :, :cin, :cout].set(w)
    bp = jnp.zeros((cout_pad,), jnp.float32).at[:cout].set(b)
    return wp.astype(jnp.bfloat16), bp


def init_params(key, num_class, input_size):
    params = {}

    key, k0 = jax.random.split(key)
    w1f, b1 = _fold_bn(_conv_w(k0, 3, 1, input_size), input_size)
    params['conv1_w'], params['conv1_b'] = _pad_conv(w1f, b1, 1, _pad_ch(input_size))

    in_log = input_size
    for li, (planes, nblocks, stride) in enumerate(_LAYER_CFG, start=1):
        blocks = []
        for s in [stride] + [1] * (nblocks - 1):
            key, k1, k2, k3 = jax.random.split(key, 4)
            cin_p, cout_p = _pad_ch(in_log), _pad_ch(planes)
            blk = {}
            wf, bf = _fold_bn(_conv_w(k1, 3, in_log, planes), planes)
            blk['w1'], blk['b1'] = _pad_conv(wf, bf, cin_p, cout_p)
            wf, bf = _fold_bn(_conv_w(k2, 3, planes, planes), planes)
            blk['w2'], blk['b2'] = _pad_conv(wf, bf, cout_p, cout_p)
            if s != 1 or in_log != planes:
                wf, bf = _fold_bn(_conv_w(k3, 1, in_log, planes), planes)
                blk['ws'], blk['bs'] = _pad_conv(wf, bf, cin_p, cout_p)
            blocks.append(blk)
            in_log = planes
        params[f'layer{li}'] = blocks

    key, kf = jax.random.split(key)
    n_pad = _pad_ch(num_class)
    fc_w = jax.random.normal(kf, (512, num_class), jnp.float32) / np.sqrt(512.0)
    params['fc_w'] = (jnp.zeros((512, n_pad), jnp.float32)
                      .at[:, :num_class].set(fc_w).astype(jnp.bfloat16))
    params['fc_b'] = jnp.zeros((n_pad,), jnp.float32)
    return params


# ----------------------------- model -----------------------------

def basic_block(x, p, stride):
    out = conv_bn_act(x, p['w1'], p['b1'], stride=stride, pad=1, act="relu")
    if 'ws' in p:
        sc = conv_bn_act(x, p['ws'], p['bs'], stride=stride, pad=0, act="none")
    else:
        sc = x
    # conv2 + bn2 + residual add + relu fused in one tiled Pallas matmul kernel
    return conv_bn_act(out, p['w2'], p['b2'], stride=1, pad=1, residual=sc)


def resnet_forward(params, x, num_class):
    # x: (B, T, F).  PyTorch: x.transpose(2,1).unsqueeze(1) -> (B, 1, F, T)
    # here NHWC -> (B, H=F, W=T, C=1), trunk runs in bf16.
    h = jnp.transpose(x, (0, 2, 1))[..., None].astype(jnp.bfloat16)
    h = conv_bn_act(h, params['conv1_w'], params['conv1_b'],
                    stride=2, pad=3, act="relu")
    h = maxpool(h, k=3, stride=2, pad=1)
    for li, (_, nblocks, stride) in enumerate(_LAYER_CFG, start=1):
        strides = [stride] + [1] * (nblocks - 1)
        for blk, s in zip(params[f'layer{li}'], strides):
            h = basic_block(h, blk, s)
    B, H, W, C = h.shape
    probs = pool_fc_sigmoid(h.reshape(B, H * W, C),
                            params['fc_w'], params['fc_b'])
    return probs[:, :num_class]


# ----------------------------- main -----------------------------

if __name__ == "__main__":
    num_class = 4
    input_size = 8          # conv1 out-channels / initial in_planes
    B, T, F = 2, 16, 16     # (batch, time, feature) audio-style input

    key = jax.random.PRNGKey(0)
    key, kx = jax.random.split(key)
    x = jax.random.normal(kx, (B, T, F), jnp.float32)

    params = init_params(key, num_class, input_size)

    fwd = jax.jit(resnet_forward, static_argnames="num_class")
    out = fwd(params, x, num_class=num_class)
    out = jax.block_until_ready(out)

    assert out.shape == (B, num_class), out.shape
    assert bool(jnp.all(jnp.isfinite(out)))
    assert bool(jnp.all((out >= 0.0) & (out <= 1.0)))   # sigmoid output range
    print("KERNEL_OK")
</pallas_src>

<mosaic_0001>
module attributes {stable_mosaic.version = 11 : i64} {
  func.func @_mm_kernel(%arg0: i32, %arg1: i32, %arg2: i32, %arg3: memref<200x9xbf16, #tpu.memory_space<vmem>>, %arg4: memref<9x128xbf16, #tpu.memory_space<vmem>>, %arg5: memref<1x128xf32, #tpu.memory_space<vmem>>, %arg6: memref<200x128xbf16, #tpu.memory_space<vmem>>, %arg7: memref<200x128xf32, #tpu.memory_space<vmem>>) attributes {dimension_semantics = [#tpu.dimension_semantics<parallel>, #tpu.dimension_semantics<parallel>, #tpu.dimension_semantics<arbitrary>], iteration_bounds = array<i64: 1, 1, 1>, scalar_prefetch = 0 : i64, scratch_operands = 1 : i64, tpu.core_type = #tpu.core_type<tc>, window_params = [{transform_indices = @transform_0, window_bounds = array<i64: 200, 9>}, {transform_indices = @transform_1, window_bounds = array<i64: 9, 128>}, {transform_indices = @transform_2, window_bounds = array<i64: 1, 128>}, {transform_indices = @transform_3, window_bounds = array<i64: 200, 128>}]} {
    %c0_i32 = arith.constant 0 : i32
    %0 = arith.cmpi eq, %arg2, %c0_i32 : i32
    %1 = arith.extui %0 : i1 to i32
    %c0_i32_0 = arith.constant 0 : i32
    %2 = arith.cmpi ne, %1, %c0_i32_0 : i32
    scf.if %2 {
      %cst_10 = arith.constant 0.000000e+00 : f32
      %12 = vector.broadcast %cst_10 : f32 to vector<200x128xf32>
      %c0_11 = arith.constant 0 : index
      %c0_12 = arith.constant 0 : index
      %13 = vector.load %arg7[%c0_11, %c0_12] : memref<200x128xf32, #tpu.memory_space<vmem>>, vector<200x128xf32>
      tpu.vector_store %arg7[%c0_11, %c0_12], %12 {strides = array<i32>} : memref<200x128xf32, #tpu.memory_space<vmem>>, vector<200x128xf32>,
    } else {
    }
    %c0 = arith.constant 0 : index
    %c0_1 = arith.constant 0 : index
    %3 = vector.load %arg7[%c0, %c0_1] : memref<200x128xf32, #tpu.memory_space<vmem>>, vector<200x128xf32>
    %c0_2 = arith.constant 0 : index
    %c0_3 = arith.constant 0 : index
    %4 = vector.load %arg3[%c0_2, %c0_3] : memref<200x9xbf16, #tpu.memory_space<vmem>>, vector<200x9xbf16>
    %c0_4 = arith.constant 0 : index
    %c0_5 = arith.constant 0 : index
    %5 = vector.load %arg4[%c0_4, %c0_5] : memref<9x128xbf16, #tpu.memory_space<vmem>>, vector<9x128xbf16>
    %cst = arith.constant dense<0.000000e+00> : vector<200x128xf32>
    %6 = tpu.matmul %4, %5, %cst {dimension_numbers = #tpu.dot_dimension_numbers<[1], [0], [0], [1], [0, 0, 1, 1], [], []>} : vector<200x9xbf16>, vector<9x128xbf16>, vector<200x128xf32> -> vector<200x128xf32>
    %7 = arith.addf %3, %6 : vector<200x128xf32>
    %c0_6 = arith.constant 0 : index
    %c0_7 = arith.constant 0 : index
    %8 = vector.load %arg7[%c0_6, %c0_7] : memref<200x128xf32, #tpu.memory_space<vmem>>, vector<200x128xf32>
    tpu.vector_store %arg7[%c0_6, %c0_7], %7 {strides = array<i32>} : memref<200x128xf32, #tpu.memory_space<vmem>>, vector<200x128xf32>,
    %c0_i32_8 = arith.constant 0 : i32
    %9 = arith.cmpi eq, %arg2, %c0_i32_8 : i32
    %10 = arith.extui %9 : i1 to i32
    %c0_i32_9 = arith.constant 0 : i32
    %11 = arith.cmpi ne, %10, %c0_i32_9 : i32
    scf.if %11 {
      %c0_10 = arith.constant 0 : index
      %c0_11 = arith.constant 0 : index
      %12 = vector.load %arg7[%c0_10, %c0_11] : memref<200x128xf32, #tpu.memory_space<vmem>>, vector<200x128xf32>
      %c0_12 = arith.constant 0 : index
      %c0_13 = arith.constant 0 : index
      %13 = vector.load %arg5[%c0_12, %c0_13] : memref<1x128xf32, #tpu.memory_space<vmem>>, vector<1x128xf32>
      %14 = vector.broadcast %13 : vector<1x128xf32> to vector<200x128xf32>
      %15 = arith.addf %12, %14 : vector<200x128xf32>
      %cst_14 = arith.constant 0.000000e+00 : f32
      %16 = vector.broadcast %cst_14 : f32 to vector<200x128xf32>
      %17 = arith.maximumf %15, %16 : vector<200x128xf32>
      %18 = arith.truncf %17 : vector<200x128xf32> to vector<200x128xbf16>
      %c0_15 = arith.constant 0 : index
      %c0_16 = arith.constant 0 : index
      %19 = vector.load %arg6[%c0_15, %c0_16] : memref<200x128xbf16, #tpu.memory_space<vmem>>, vector<200x128xbf16>
      tpu.vector_store %arg6[%c0_15, %c0_16], %18 {strides = array<i32>} : memref<200x128xbf16, #tpu.memory_space<vmem>>, vector<200x128xbf16>,
    } else {
    }
    return
  }
  func.func @transform_0(%arg0: i32, %arg1: i32, %arg2: i32) -> (i32, i32) {
    %c0_i32 = arith.constant 0 : i32
    return %arg0, %arg2 : i32, i32
  }
  func.func @transform_1(%arg0: i32, %arg1: i32, %arg2: i32) -> (i32, i32) {
    %c0_i32 = arith.constant 0 : i32
    return %arg2, %arg1 : i32, i32
  }
  func.func @transform_2(%arg0: i32, %arg1: i32, %arg2: i32) -> (i32, i32) {
    %c0_i32 = arith.constant 0 : i32
    %c0_i32_0 = arith.constant 0 : i32
    return %c0_i32, %arg1 : i32, i32
  }
  func.func @transform_3(%arg0: i32, %arg1: i32, %arg2: i32) -> (i32, i32) {
    %c0_i32 = arith.constant 0 : i32
    return %arg0, %arg1 : i32, i32
  }
}

module attributes {stable_mosaic.version = 11 : i64} {
  func.func @_maxk_kernel(%arg0: i32, %arg1: memref<56x128xbf16, #tpu.memory_space<vmem>>, %arg2: memref<56x128xbf16, #tpu.memory_space<vmem>>, %arg3: memref<56x128xbf16, #tpu.memory_space<vmem>>, %arg4: memref<56x128xbf16, #tpu.memory_space<vmem>>, %arg5: memref<56x128xbf16, #tpu.memory_space<vmem>>, %arg6: memref<56x128xbf16, #tpu.memory_space<vmem>>, %arg7: memref<56x128xbf16, #tpu.memory_space<vmem>>, %arg8: memref<56x128xbf16, #tpu.memory_space<vmem>>, %arg9: memref<56x128xbf16, #tpu.memory_space<vmem>>, %arg10: memref<56x128xbf16, #tpu.memory_space<vmem>>) attributes {dimension_semantics = [#tpu.dimension_semantics<parallel>], iteration_bounds = array<i64: 1>, scalar_prefetch = 0 : i64, scratch_operands = 0 : i64, tpu.core_type = #tpu.core_type<tc>, window_params = [{transform_indices = @transform_0, window_bounds = array<i64: 56, 128>}, {transform_indices = @transform_1, window_bounds = array<i64: 56, 128>}, {transform_indices = @transform_2, window_bounds = array<i64: 56, 128>}, {transform_indices = @transform_3, window_bounds = array<i64: 56, 128>}, {transform_indices = @transform_4, window_bounds = array<i64: 56, 128>}, {transform_indices = @transform_5, window_bounds = array<i64: 56, 128>}, {transform_indices = @transform_6, window_bounds = array<i64: 56, 128>}, {transform_indices = @transform_7, window_bounds = array<i64: 56, 128>}, {transform_indices = @transform_8, window_bounds = array<i64: 56, 128>}, {transform_indices = @transform_9, window_bounds = array<i64: 56, 128>}]} {
    %c0 = arith.constant 0 : index
    %c0_0 = arith.constant 0 : index
    %0 = vector.load %arg1[%c0, %c0_0] : memref<56x128xbf16, #tpu.memory_space<vmem>>, vector<56x128xbf16>
    %c0_1 = arith.constant 0 : index
    %c0_2 = arith.constant 0 : index
    %1 = vector.load %arg2[%c0_1, %c0_2] : memref<56x128xbf16, #tpu.memory_space<vmem>>, vector<56x128xbf16>
    %2 = arith.maximumf %0, %1 : vector<56x128xbf16>
    %c0_3 = arith.constant 0 : index
    %c0_4 = arith.constant 0 : index
    %3 = vector.load %arg3[%c0_3, %c0_4] : memref<56x128xbf16, #tpu.memory_space<vmem>>, vector<56x128xbf16>
    %4 = arith.maximumf %2, %3 : vector<56x128xbf16>
    %c0_5 = arith.constant 0 : index
    %c0_6 = arith.constant 0 : index
    %5 = vector.load %arg4[%c0_5, %c0_6] : memref<56x128xbf16, #tpu.memory_space<vmem>>, vector<56x128xbf16>
    %6 = arith.maximumf %4, %5 : vector<56x128xbf16>
    %c0_7 = arith.constant 0 : index
    %c0_8 = arith.constant 0 : index
    %7 = vector.load %arg5[%c0_7, %c0_8] : memref<56x128xbf16, #tpu.memory_space<vmem>>, vector<56x128xbf16>
    %8 = arith.maximumf %6, %7 : vector<56x128xbf16>
    %c0_9 = arith.constant 0 : index
    %c0_10 = arith.constant 0 : index
    %9 = vector.load %arg6[%c0_9, %c0_10] : memref<56x128xbf16, #tpu.memory_space<vmem>>, vector<56x128xbf16>
    %10 = arith.maximumf %8, %9 : vector<56x128xbf16>
    %c0_11 = arith.constant 0 : index
    %c0_12 = arith.constant 0 : index
    %11 = vector.load %arg7[%c0_11, %c0_12] : memref<56x128xbf16, #tpu.memory_space<vmem>>, vector<56x128xbf16>
    %12 = arith.maximumf %10, %11 : vector<56x128xbf16>
    %c0_13 = arith.constant 0 : index
    %c0_14 = arith.constant 0 : index
    %13 = vector.load %arg8[%c0_13, %c0_14] : memref<56x128xbf16, #tpu.memory_space<vmem>>, vector<56x128xbf16>
    %14 = arith.maximumf %12, %13 : vector<56x128xbf16>
    %c0_15 = arith.constant 0 : index
    %c0_16 = arith.constant 0 : index
    %15 = vector.load %arg9[%c0_15, %c0_16] : memref<56x128xbf16, #tpu.memory_space<vmem>>, vector<56x128xbf16>
    %16 = arith.maximumf %14, %15 : vector<56x128xbf16>
    %c0_17 = arith.constant 0 : index
    %c0_18 = arith.constant 0 : index
    %17 = vector.load %arg10[%c0_17, %c0_18] : memref<56x128xbf16, #tpu.memory_space<vmem>>, vector<56x128xbf16>
    tpu.vector_store %arg10[%c0_17, %c0_18], %16 {strides = array<i32>} : memref<56x128xbf16, #tpu.memory_space<vmem>>, vector<56x128xbf16>,
    return
  }
  func.func @transform_0(%arg0: i32) -> (i32, i32) {
    %c0_i32 = arith.constant 0 : i32
    %c0_i32_0 = arith.constant 0 : i32
    return %arg0, %c0_i32 : i32, i32
  }
  func.func @transform_1(%arg0: i32) -> (i32, i32) {
    %c0_i32 = arith.constant 0 : i32
    %c0_i32_0 = arith.constant 0 : i32
    return %arg0, %c0_i32 : i32, i32
  }
  func.func @transform_2(%arg0: i32) -> (i32, i32) {
    %c0_i32 = arith.constant 0 : i32
    %c0_i32_0 = arith.constant 0 : i32
    return %arg0, %c0_i32 : i32, i32
  }
  func.func @transform_3(%arg0: i32) -> (i32, i32) {
    %c0_i32 = arith.constant 0 : i32
    %c0_i32_0 = arith.constant 0 : i32
    return %arg0, %c0_i32 : i32, i32
  }
  func.func @transform_4(%arg0: i32) -> (i32, i32) {
    %c0_i32 = arith.constant 0 : i32
    %c0_i32_0 = arith.constant 0 : i32
    return %arg0, %c0_i32 : i32, i32
  }
  func.func @transform_5(%arg0: i32) -> (i32, i32) {
    %c0_i32 = arith.constant 0 : i32
    %c0_i32_0 = arith.constant 0 : i32
    return %arg0, %c0_i32 : i32, i32
  }
  func.func @transform_6(%arg0: i32) -> (i32, i32) {
    %c0_i32 = arith.constant 0 : i32
    %c0_i32_0 = arith.constant 0 : i32
    return %arg0, %c0_i32 : i32, i32
  }
  func.func @transform_7(%arg0: i32) -> (i32, i32) {
    %c0_i32 = arith.constant 0 : i32
    %c0_i32_0 = arith.constant 0 : i32
    return %arg0, %c0_i32 : i32, i32
  }
  func.func @transform_8(%arg0: i32) -> (i32, i32) {
    %c0_i32 = arith.constant 0 : i32
    %c0_i32_0 = arith.constant 0 : i32
    return %arg0, %c0_i32 : i32, i32
  }
  func.func @transform_9(%arg0: i32) -> (i32, i32) {
    %c0_i32 = arith.constant 0 : i32
    %c0_i32_0 = arith.constant 0 : i32
    return %arg0, %c0_i32 : i32, i32
  }
}

module attributes {stable_mosaic.version = 11 : i64} {
  func.func @_mm_kernel(%arg0: i32, %arg1: i32, %arg2: i32, %arg3: memref<56x128xbf16, #tpu.memory_space<vmem>>, %arg4: memref<128x128xbf16, #tpu.memory_space<vmem>>, %arg5: memref<1x128xf32, #tpu.memory_space<vmem>>, %arg6: memref<56x128xbf16, #tpu.memory_space<vmem>>, %arg7: memref<56x128xf32, #tpu.memory_space<vmem>>) attributes {dimension_semantics = [#tpu.dimension_semantics<parallel>, #tpu.dimension_semantics<parallel>, #tpu.dimension_semantics<arbitrary>], iteration_bounds = array<i64: 1, 1, 1>, scalar_prefetch = 0 : i64, scratch_operands = 1 : i64, tpu.core_type = #tpu.core_type<tc>, window_params = [{transform_indices = @transform_0, window_bounds = array<i64: 56, 128>}, {transform_indices = @transform_1, window_bounds = array<i64: 128, 128>}, {transform_indices = @transform_2, window_bounds = array<i64: 1, 128>}, {transform_indices = @transform_3, window_bounds = array<i64: 56, 128>}]} {
    %c0_i32 = arith.constant 0 : i32
    %0 = arith.cmpi eq, %arg2, %c0_i32 : i32
    %1 = arith.extui %0 : i1 to i32
    %c0_i32_0 = arith.constant 0 : i32
    %2 = arith.cmpi ne, %1, %c0_i32_0 : i32
    scf.if %2 {
      %cst_10 = arith.constant 0.000000e+00 : f32
      %12 = vector.broadcast %cst_10 : f32 to vector<56x128xf32>
      %c0_11 = arith.constant 0 : index
      %c0_12 = arith.constant 0 : index
      %13 = vector.load %arg7[%c0_11, %c0_12] : memref<56x128xf32, #tpu.memory_space<vmem>>, vector<56x128xf32>
      tpu.vector_store %arg7[%c0_11, %c0_12], %12 {strides = array<i32>} : memref<56x128xf32, #tpu.memory_space<vmem>>, vector<56x128xf32>,
    } else {
    }
    %c0 = arith.constant 0 : index
    %c0_1 = arith.constant 0 : index
    %3 = vector.load %arg7[%c0, %c0_1] : memref<56x128xf32, #tpu.memory_space<vmem>>, vector<56x128xf32>
    %c0_2 = arith.constant 0 : index
    %c0_3 = arith.constant 0 : index
    %4 = vector.load %arg3[%c0_2, %c0_3] : memref<56x128xbf16, #tpu.memory_space<vmem>>, vector<56x128xbf16>
    %c0_4 = arith.constant 0 : index
    %c0_5 = arith.constant 0 : index
    %5 = vector.load %arg4[%c0_4, %c0_5] : memref<128x128xbf16, #tpu.memory_space<vmem>>, vector<128x128xbf16>
    %cst = arith.constant dense<0.000000e+00> : vector<56x128xf32>
    %6 = tpu.matmul %4, %5, %cst {dimension_numbers = #tpu.dot_dimension_numbers<[1], [0], [0], [1], [0, 0, 1, 1], [], []>} : vector<56x128xbf16>, vector<128x128xbf16>, vector<56x128xf32> -> vector<56x128xf32>
    %7 = arith.addf %3, %6 : vector<56x128xf32>
    %c0_6 = arith.constant 0 : index
    %c0_7 = arith.constant 0 : index
    %8 = vector.load %arg7[%c0_6, %c0_7] : memref<56x128xf32, #tpu.memory_space<vmem>>, vector<56x128xf32>
    tpu.vector_store %arg7[%c0_6, %c0_7], %7 {strides = array<i32>} : memref<56x128xf32, #tpu.memory_space<vmem>>, vector<56x128xf32>,
    %c0_i32_8 = arith.constant 0 : i32
    %9 = arith.cmpi eq, %arg2, %c0_i32_8 : i32
    %10 = arith.extui %9 : i1 to i32
    %c0_i32_9 = arith.constant 0 : i32
    %11 = arith.cmpi ne, %10, %c0_i32_9 : i32
    scf.if %11 {
      %c0_10 = arith.constant 0 : index
      %c0_11 = arith.constant 0 : index
      %12 = vector.load %arg7[%c0_10, %c0_11] : memref<56x128xf32, #tpu.memory_space<vmem>>, vector<56x128xf32>
      %c0_12 = arith.constant 0 : index
      %c0_13 = arith.constant 0 : index
      %13 = vector.load %arg5[%c0_12, %c0_13] : memref<1x128xf32, #tpu.memory_space<vmem>>, vector<1x128xf32>
      %14 = vector.broadcast %13 : vector<1x128xf32> to vector<56x128xf32>
      %15 = arith.addf %12, %14 : vector<56x128xf32>
      %16 = arith.truncf %15 : vector<56x128xf32> to vector<56x128xbf16>
      %c0_14 = arith.constant 0 : index
      %c0_15 = arith.constant 0 : index
      %17 = vector.load %arg6[%c0_14, %c0_15] : memref<56x128xbf16, #tpu.memory_space<vmem>>, vector<56x128xbf16>
      tpu.vector_store %arg6[%c0_14, %c0_15], %16 {strides = array<i32>} : memref<56x128xbf16, #tpu.memory_space<vmem>>, vector<56x128xbf16>,
    } else {
    }
    return
  }
  func.func @transform_0(%arg0: i32, %arg1: i32, %arg2: i32) -> (i32, i32) {
    %c0_i32 = arith.constant 0 : i32
    return %arg0, %arg2 : i32, i32
  }
  func.func @transform_1(%arg0: i32, %arg1: i32, %arg2: i32) -> (i32, i32) {
    %c0_i32 = arith.constant 0 : i32
    return %arg2, %arg1 : i32, i32
  }
  func.func @transform_2(%arg0: i32, %arg1: i32, %arg2: i32) -> (i32, i32) {
    %c0_i32 = arith.constant 0 : i32
    %c0_i32_0 = arith.constant 0 : i32
    return %c0_i32, %arg1 : i32, i32
  }
  func.func @transform_3(%arg0: i32, %arg1: i32, %arg2: i32) -> (i32, i32) {
    %c0_i32 = arith.constant 0 : i32
    return %arg0, %arg1 : i32, i32
  }
}

module attributes {stable_mosaic.version = 11 : i64} {
  func.func @_mm_kernel(%arg0: i32, %arg1: i32, %arg2: i32, %arg3: memref<56x384xbf16, #tpu.memory_space<vmem>>, %arg4: memref<384x128xbf16, #tpu.memory_space<vmem>>, %arg5: memref<1x128xf32, #tpu.memory_space<vmem>>, %arg6: memref<56x128xbf16, #tpu.memory_space<vmem>>, %arg7: memref<56x128xf32, #tpu.memory_space<vmem>>) attributes {dimension_semantics = [#tpu.dimension_semantics<parallel>, #tpu.dimension_semantics<parallel>, #tpu.dimension_semantics<arbitrary>], iteration_bounds = array<i64: 1, 1, 3>, scalar_prefetch = 0 : i64, scratch_operands = 1 : i64, tpu.core_type = #tpu.core_type<tc>, window_params = [{transform_indices = @transform_0, window_bounds = array<i64: 56, 384>}, {transform_indices = @transform_1, window_bounds = array<i64: 384, 128>}, {transform_indices = @transform_2, window_bounds = array<i64: 1, 128>}, {transform_indices = @transform_3, window_bounds = array<i64: 56, 128>}]} {
    %c0_i32 = arith.constant 0 : i32
    %0 = arith.cmpi eq, %arg2, %c0_i32 : i32
    %1 = arith.extui %0 : i1 to i32
    %c0_i32_0 = arith.constant 0 : i32
    %2 = arith.cmpi ne, %1, %c0_i32_0 : i32
    scf.if %2 {
      %cst_9 = arith.constant 0.000000e+00 : f32
      %12 = vector.broadcast %cst_9 : f32 to vector<56x128xf32>
      %c0_10 = arith.constant 0 : index
      %c0_11 = arith.constant 0 : index
      %13 = vector.load %arg7[%c0_10, %c0_11] : memref<56x128xf32, #tpu.memory_space<vmem>>, vector<56x128xf32>
      tpu.vector_store %arg7[%c0_10, %c0_11], %12 {strides = array<i32>} : memref<56x128xf32, #tpu.memory_space<vmem>>, vector<56x128xf32>,
    } else {
    }
    %c0 = arith.constant 0 : index
    %c0_1 = arith.constant 0 : index
    %3 = vector.load %arg7[%c0, %c0_1] : memref<56x128xf32, #tpu.memory_space<vmem>>, vector<56x128xf32>
    %c0_2 = arith.constant 0 : index
    %c0_3 = arith.constant 0 : index
    %4 = vector.load %arg3[%c0_2, %c0_3] : memref<56x384xbf16, #tpu.memory_space<vmem>>, vector<56x384xbf16>
    %c0_4 = arith.constant 0 : index
    %c0_5 = arith.constant 0 : index
    %5 = vector.load %arg4[%c0_4, %c0_5] : memref<384x128xbf16, #tpu.memory_space<vmem>>, vector<384x128xbf16>
    %cst = arith.constant dense<0.000000e+00> : vector<56x128xf32>
    %6 = tpu.matmul %4, %5, %cst {dimension_numbers = #tpu.dot_dimension_numbers<[1], [0], [0], [1], [0, 0, 1, 1], [], []>} : vector<56x384xbf16>, vector<384x128xbf16>, vector<56x128xf32> -> vector<56x128xf32>
    %7 = arith.addf %3, %6 : vector<56x128xf32>
    %c0_6 = arith.constant 0 : index
    %c0_7 = arith.constant 0 : index
    %8 = vector.load %arg7[%c0_6, %c0_7] : memref<56x128xf32, #tpu.memory_space<vmem>>, vector<56x128xf32>
    tpu.vector_store %arg7[%c0_6, %c0_7], %7 {strides = array<i32>} : memref<56x128xf32, #tpu.memory_space<vmem>>, vector<56x128xf32>,
    %c2_i32 = arith.constant 2 : i32
    %9 = arith.cmpi eq, %arg2, %c2_i32 : i32
    %10 = arith.extui %9 : i1 to i32
    %c0_i32_8 = arith.constant 0 : i32
    %11 = arith.cmpi ne, %10, %c0_i32_8 : i32
    scf.if %11 {
      %c0_9 = arith.constant 0 : index
      %c0_10 = arith.constant 0 : index
      %12 = vector.load %arg7[%c0_9, %c0_10] : memref<56x128xf32, #tpu.memory_space<vmem>>, vector<56x128xf32>
      %c0_11 = arith.constant 0 : index
      %c0_12 = arith.constant 0 : index
      %13 = vector.load %arg5[%c0_11, %c0_12] : memref<1x128xf32, #tpu.memory_space<vmem>>, vector<1x128xf32>
      %14 = vector.broadcast %13 : vector<1x128xf32> to vector<56x128xf32>
      %15 = arith.addf %12, %14 : vector<56x128xf32>
      %cst_13 = arith.constant 0.000000e+00 : f32
      %16 = vector.broadcast %cst_13 : f32 to vector<56x128xf32>
      %17 = arith.maximumf %15, %16 : vector<56x128xf32>
      %18 = arith.truncf %17 : vector<56x128xf32> to vector<56x128xbf16>
      %c0_14 = arith.constant 0 : index
      %c0_15 = arith.constant 0 : index
      %19 = vector.load %arg6[%c0_14, %c0_15] : memref<56x128xbf16, #tpu.memory_space<vmem>>, vector<56x128xbf16>
      tpu.vector_store %arg6[%c0_14, %c0_15], %18 {strides = array<i32>} : memref<56x128xbf16, #tpu.memory_space<vmem>>, vector<56x128xbf16>,
    } else {
    }
    return
  }
  func.func @transform_0(%arg0: i32, %arg1: i32, %arg2: i32) -> (i32, i32) {
    %c0_i32 = arith.constant 0 : i32
    return %arg0, %arg2 : i32, i32
  }
  func.func @transform_1(%arg0: i32, %arg1: i32, %arg2: i32) -> (i32, i32) {
    %c0_i32 = arith.constant 0 : i32
    return %arg2, %arg1 : i32, i32
  }
  func.func @transform_2(%arg0: i32, %arg1: i32, %arg2: i32) -> (i32, i32) {
    %c0_i32 = arith.constant 0 : i32
    %c0_i32_0 = arith.constant 0 : i32
    return %c0_i32, %arg1 : i32, i32
  }
  func.func @transform_3(%arg0: i32, %arg1: i32, %arg2: i32) -> (i32, i32) {
    %c0_i32 = arith.constant 0 : i32
    return %arg0, %arg1 : i32, i32
  }
}

module attributes {stable_mosaic.version = 11 : i64} {
  func.func @_mm_res_kernel(%arg0: i32, %arg1: i32, %arg2: i32, %arg3: memref<56x384xbf16, #tpu.memory_space<vmem>>, %arg4: memref<384x128xbf16, #tpu.memory_space<vmem>>, %arg5: memref<1x128xf32, #tpu.memory_space<vmem>>, %arg6: memref<56x128xbf16, #tpu.memory_space<vmem>>, %arg7: memref<56x128xbf16, #tpu.memory_space<vmem>>, %arg8: memref<56x128xf32, #tpu.memory_space<vmem>>) attributes {dimension_semantics = [#tpu.dimension_semantics<parallel>, #tpu.dimension_semantics<parallel>, #tpu.dimension_semantics<arbitrary>], iteration_bounds = array<i64: 1, 1, 3>, scalar_prefetch = 0 : i64, scratch_operands = 1 : i64, tpu.core_type = #tpu.core_type<tc>, window_params = [{transform_indices = @transform_0, window_bounds = array<i64: 56, 384>}, {transform_indices = @transform_1, window_bounds = array<i64: 384, 128>}, {transform_indices = @transform_2, window_bounds = array<i64: 1, 128>}, {transform_indices = @transform_3, window_bounds = array<i64: 56, 128>}, {transform_indices = @transform_4, window_bounds = array<i64: 56, 128>}]} {
    %c0_i32 = arith.constant 0 : i32
    %0 = arith.cmpi eq, %arg2, %c0_i32 : i32
    %1 = arith.extui %0 : i1 to i32
    %c0_i32_0 = arith.constant 0 : i32
    %2 = arith.cmpi ne, %1, %c0_i32_0 : i32
    scf.if %2 {
      %cst_9 = arith.constant 0.000000e+00 : f32
      %12 = vector.broadcast %cst_9 : f32 to vector<56x128xf32>
      %c0_10 = arith.constant 0 : index
      %c0_11 = arith.constant 0 : index
      %13 = vector.load %arg8[%c0_10, %c0_11] : memref<56x128xf32, #tpu.memory_space<vmem>>, vector<56x128xf32>
      tpu.vector_store %arg8[%c0_10, %c0_11], %12 {strides = array<i32>} : memref<56x128xf32, #tpu.memory_space<vmem>>, vector<56x128xf32>,
    } else {
    }
    %c0 = arith.constant 0 : index
    %c0_1 = arith.constant 0 : index
    %3 = vector.load %arg8[%c0, %c0_1] : memref<56x128xf32, #tpu.memory_space<vmem>>, vector<56x128xf32>
    %c0_2 = arith.constant 0 : index
    %c0_3 = arith.constant 0 : index
    %4 = vector.load %arg3[%c0_2, %c0_3] : memref<56x384xbf16, #tpu.memory_space<vmem>>, vector<56x384xbf16>
    %c0_4 = arith.constant 0 : index
    %c0_5 = arith.constant 0 : index
    %5 = vector.load %arg4[%c0_4, %c0_5] : memref<384x128xbf16, #tpu.memory_space<vmem>>, vector<384x128xbf16>
    %cst = arith.constant dense<0.000000e+00> : vector<56x128xf32>
    %6 = tpu.matmul %4, %5, %cst {dimension_numbers = #tpu.dot_dimension_numbers<[1], [0], [0], [1], [0, 0, 1, 1], [], []>} : vector<56x384xbf16>, vector<384x128xbf16>, vector<56x128xf32> -> vector<56x128xf32>
    %7 = arith.addf %3, %6 : vector<56x128xf32>
    %c0_6 = arith.constant 0 : index
    %c0_7 = arith.constant 0 : index
    %8 = vector.load %arg8[%c0_6, %c0_7] : memref<56x128xf32, #tpu.memory_space<vmem>>, vector<56x128xf32>
    tpu.vector_store %arg8[%c0_6, %c0_7], %7 {strides = array<i32>} : memref<56x128xf32, #tpu.memory_space<vmem>>, vector<56x128xf32>,
    %c2_i32 = arith.constant 2 : i32
    %9 = arith.cmpi eq, %arg2, %c2_i32 : i32
    %10 = arith.extui %9 : i1 to i32
    %c0_i32_8 = arith.constant 0 : i32
    %11 = arith.cmpi ne, %10, %c0_i32_8 : i32
    scf.if %11 {
      %c0_9 = arith.constant 0 : index
      %c0_10 = arith.constant 0 : index
      %12 = vector.load %arg8[%c0_9, %c0_10] : memref<56x128xf32, #tpu.memory_space<vmem>>, vector<56x128xf32>
      %c0_11 = arith.constant 0 : index
      %c0_12 = arith.constant 0 : index
      %13 = vector.load %arg5[%c0_11, %c0_12] : memref<1x128xf32, #tpu.memory_space<vmem>>, vector<1x128xf32>
      %14 = vector.broadcast %13 : vector<1x128xf32> to vector<56x128xf32>
      %15 = arith.addf %12, %14 : vector<56x128xf32>
      %c0_13 = arith.constant 0 : index
      %c0_14 = arith.constant 0 : index
      %16 = vector.load %arg6[%c0_13, %c0_14] : memref<56x128xbf16, #tpu.memory_space<vmem>>, vector<56x128xbf16>
      %17 = arith.extf %16 : vector<56x128xbf16> to vector<56x128xf32>
      %18 = arith.addf %15, %17 : vector<56x128xf32>
      %cst_15 = arith.constant 0.000000e+00 : f32
      %19 = vector.broadcast %cst_15 : f32 to vector<56x128xf32>
      %20 = arith.maximumf %18, %19 : vector<56x128xf32>
      %21 = arith.truncf %20 : vector<56x128xf32> to vector<56x128xbf16>
      %c0_16 = arith.constant 0 : index
      %c0_17 = arith.constant 0 : index
      %22 = vector.load %arg7[%c0_16, %c0_17] : memref<56x128xbf16, #tpu.memory_space<vmem>>, vector<56x128xbf16>
      tpu.vector_store %arg7[%c0_16, %c0_17], %21 {strides = array<i32>} : memref<56x128xbf16, #tpu.memory_space<vmem>>, vector<56x128xbf16>,
    } else {
    }
    return
  }
  func.func @transform_0(%arg0: i32, %arg1: i32, %arg2: i32) -> (i32, i32) {
    %c0_i32 = arith.constant 0 : i32
    return %arg0, %arg2 : i32, i32
  }
  func.func @transform_1(%arg0: i32, %arg1: i32, %arg2: i32) -> (i32, i32) {
    %c0_i32 = arith.constant 0 : i32
    return %arg2, %arg1 : i32, i32
  }
  func.func @transform_2(%arg0: i32, %arg1: i32, %arg2: i32) -> (i32, i32) {
    %c0_i32 = arith.constant 0 : i32
    %c0_i32_0 = arith.constant 0 : i32
    return %c0_i32, %arg1 : i32, i32
  }
  func.func @transform_3(%arg0: i32, %arg1: i32, %arg2: i32) -> (i32, i32) {
    %c0_i32 = arith.constant 0 : i32
    return %arg0, %arg1 : i32, i32
  }
  func.func @transform_4(%arg0: i32, %arg1: i32, %arg2: i32) -> (i32, i32) {
    %c0_i32 = arith.constant 0 : i32
    return %arg0, %arg1 : i32, i32
  }
}

module attributes {stable_mosaic.version = 11 : i64} {
  func.func @_mm_kernel(%arg0: i32, %arg1: i32, %arg2: i32, %arg3: memref<24x384xbf16, #tpu.memory_space<vmem>>, %arg4: memref<384x128xbf16, #tpu.memory_space<vmem>>, %arg5: memref<1x128xf32, #tpu.memory_space<vmem>>, %arg6: memref<24x128xbf16, #tpu.memory_space<vmem>>, %arg7: memref<24x128xf32, #tpu.memory_space<vmem>>) attributes {dimension_semantics = [#tpu.dimension_semantics<parallel>, #tpu.dimension_semantics<parallel>, #tpu.dimension_semantics<arbitrary>], iteration_bounds = array<i64: 1, 1, 3>, scalar_prefetch = 0 : i64, scratch_operands = 1 : i64, tpu.core_type = #tpu.core_type<tc>, window_params = [{transform_indices = @transform_0, window_bounds = array<i64: 24, 384>}, {transform_indices = @transform_1, window_bounds = array<i64: 384, 128>}, {transform_indices = @transform_2, window_bounds = array<i64: 1, 128>}, {transform_indices = @transform_3, window_bounds = array<i64: 24, 128>}]} {
    %c0_i32 = arith.constant 0 : i32
    %0 = arith.cmpi eq, %arg2, %c0_i32 : i32
    %1 = arith.extui %0 : i1 to i32
    %c0_i32_0 = arith.constant 0 : i32
    %2 = arith.cmpi ne, %1, %c0_i32_0 : i32
    scf.if %2 {
      %cst_9 = arith.constant 0.000000e+00 : f32
      %12 = vector.broadcast %cst_9 : f32 to vector<24x128xf32>
      %c0_10 = arith.constant 0 : index
      %c0_11 = arith.constant 0 : index
      %13 = vector.load %arg7[%c0_10, %c0_11] : memref<24x128xf32, #tpu.memory_space<vmem>>, vector<24x128xf32>
      tpu.vector_store %arg7[%c0_10, %c0_11], %12 {strides = array<i32>} : memref<24x128xf32, #tpu.memory_space<vmem>>, vector<24x128xf32>,
    } else {
    }
    %c0 = arith.constant 0 : index
    %c0_1 = arith.constant 0 : index
    %3 = vector.load %arg7[%c0, %c0_1] : memref<24x128xf32, #tpu.memory_space<vmem>>, vector<24x128xf32>
    %c0_2 = arith.constant 0 : index
    %c0_3 = arith.constant 0 : index
    %4 = vector.load %arg3[%c0_2, %c0_3] : memref<24x384xbf16, #tpu.memory_space<vmem>>, vector<24x384xbf16>
    %c0_4 = arith.constant 0 : index
    %c0_5 = arith.constant 0 : index
    %5 = vector.load %arg4[%c0_4, %c0_5] : memref<384x128xbf16, #tpu.memory_space<vmem>>, vector<384x128xbf16>
    %cst = arith.constant dense<0.000000e+00> : vector<24x128xf32>
    %6 = tpu.matmul %4, %5, %cst {dimension_numbers = #tpu.dot_dimension_numbers<[1], [0], [0], [1], [0, 0, 1, 1], [], []>} : vector<24x384xbf16>, vector<384x128xbf16>, vector<24x128xf32> -> vector<24x128xf32>
    %7 = arith.addf %3, %6 : vector<24x128xf32>
    %c0_6 = arith.constant 0 : index
    %c0_7 = arith.constant 0 : index
    %8 = vector.load %arg7[%c0_6, %c0_7] : memref<24x128xf32, #tpu.memory_space<vmem>>, vector<24x128xf32>
    tpu.vector_store %arg7[%c0_6, %c0_7], %7 {strides = array<i32>} : memref<24x128xf32, #tpu.memory_space<vmem>>, vector<24x128xf32>,
    %c2_i32 = arith.constant 2 : i32
    %9 = arith.cmpi eq, %arg2, %c2_i32 : i32
    %10 = arith.extui %9 : i1 to i32
    %c0_i32_8 = arith.constant 0 : i32
    %11 = arith.cmpi ne, %10, %c0_i32_8 : i32
    scf.if %11 {
      %c0_9 = arith.constant 0 : index
      %c0_10 = arith.constant 0 : index
      %12 = vector.load %arg7[%c0_9, %c0_10] : memref<24x128xf32, #tpu.memory_space<vmem>>, vector<24x128xf32>
      %c0_11 = arith.constant 0 : index
      %c0_12 = arith.constant 0 : index
      %13 = vector.load %arg5[%c0_11, %c0_12] : memref<1x128xf32, #tpu.memory_space<vmem>>, vector<1x128xf32>
      %14 = vector.broadcast %13 : vector<1x128xf32> to vector<24x128xf32>
      %15 = arith.addf %12, %14 : vector<24x128xf32>
      %cst_13 = arith.constant 0.000000e+00 : f32
      %16 = vector.broadcast %cst_13 : f32 to vector<24x128xf32>
      %17 = arith.maximumf %15, %16 : vector<24x128xf32>
      %18 = arith.truncf %17 : vector<24x128xf32> to vector<24x128xbf16>
      %c0_14 = arith.constant 0 : index
      %c0_15 = arith.constant 0 : index
      %19 = vector.load %arg6[%c0_14, %c0_15] : memref<24x128xbf16, #tpu.memory_space<vmem>>, vector<24x128xbf16>
      tpu.vector_store %arg6[%c0_14, %c0_15], %18 {strides = array<i32>} : memref<24x128xbf16, #tpu.memory_space<vmem>>, vector<24x128xbf16>,
    } else {
    }
    return
  }
  func.func @transform_0(%arg0: i32, %arg1: i32, %arg2: i32) -> (i32, i32) {
    %c0_i32 = arith.constant 0 : i32
    return %arg0, %arg2 : i32, i32
  }
  func.func @transform_1(%arg0: i32, %arg1: i32, %arg2: i32) -> (i32, i32) {
    %c0_i32 = arith.constant 0 : i32
    return %arg2, %arg1 : i32, i32
  }
  func.func @transform_2(%arg0: i32, %arg1: i32, %arg2: i32) -> (i32, i32) {
    %c0_i32 = arith.constant 0 : i32
    %c0_i32_0 = arith.constant 0 : i32
    return %c0_i32, %arg1 : i32, i32
  }
  func.func @transform_3(%arg0: i32, %arg1: i32, %arg2: i32) -> (i32, i32) {
    %c0_i32 = arith.constant 0 : i32
    return %arg0, %arg1 : i32, i32
  }
}

module attributes {stable_mosaic.version = 11 : i64} {
  func.func @_mm_res_kernel(%arg0: i32, %arg1: i32, %arg2: i32, %arg3: memref<24x384xbf16, #tpu.memory_space<vmem>>, %arg4: memref<384x128xbf16, #tpu.memory_space<vmem>>, %arg5: memref<1x128xf32, #tpu.memory_space<vmem>>, %arg6: memref<24x128xbf16, #tpu.memory_space<vmem>>, %arg7: memref<24x128xbf16, #tpu.memory_space<vmem>>, %arg8: memref<24x128xf32, #tpu.memory_space<vmem>>) attributes {dimension_semantics = [#tpu.dimension_semantics<parallel>, #tpu.dimension_semantics<parallel>, #tpu.dimension_semantics<arbitrary>], iteration_bounds = array<i64: 1, 1, 3>, scalar_prefetch = 0 : i64, scratch_operands = 1 : i64, tpu.core_type = #tpu.core_type<tc>, window_params = [{transform_indices = @transform_0, window_bounds = array<i64: 24, 384>}, {transform_indices = @transform_1, window_bounds = array<i64: 384, 128>}, {transform_indices = @transform_2, window_bounds = array<i64: 1, 128>}, {transform_indices = @transform_3, window_bounds = array<i64: 24, 128>}, {transform_indices = @transform_4, window_bounds = array<i64: 24, 128>}]} {
    %c0_i32 = arith.constant 0 : i32
    %0 = arith.cmpi eq, %arg2, %c0_i32 : i32
    %1 = arith.extui %0 : i1 to i32
    %c0_i32_0 = arith.constant 0 : i32
    %2 = arith.cmpi ne, %1, %c0_i32_0 : i32
    scf.if %2 {
      %cst_9 = arith.constant 0.000000e+00 : f32
      %12 = vector.broadcast %cst_9 : f32 to vector<24x128xf32>
      %c0_10 = arith.constant 0 : index
      %c0_11 = arith.constant 0 : index
      %13 = vector.load %arg8[%c0_10, %c0_11] : memref<24x128xf32, #tpu.memory_space<vmem>>, vector<24x128xf32>
      tpu.vector_store %arg8[%c0_10, %c0_11], %12 {strides = array<i32>} : memref<24x128xf32, #tpu.memory_space<vmem>>, vector<24x128xf32>,
    } else {
    }
    %c0 = arith.constant 0 : index
    %c0_1 = arith.constant 0 : index
    %3 = vector.load %arg8[%c0, %c0_1] : memref<24x128xf32, #tpu.memory_space<vmem>>, vector<24x128xf32>
    %c0_2 = arith.constant 0 : index
    %c0_3 = arith.constant 0 : index
    %4 = vector.load %arg3[%c0_2, %c0_3] : memref<24x384xbf16, #tpu.memory_space<vmem>>, vector<24x384xbf16>
    %c0_4 = arith.constant 0 : index
    %c0_5 = arith.constant 0 : index
    %5 = vector.load %arg4[%c0_4, %c0_5] : memref<384x128xbf16, #tpu.memory_space<vmem>>, vector<384x128xbf16>
    %cst = arith.constant dense<0.000000e+00> : vector<24x128xf32>
    %6 = tpu.matmul %4, %5, %cst {dimension_numbers = #tpu.dot_dimension_numbers<[1], [0], [0], [1], [0, 0, 1, 1], [], []>} : vector<24x384xbf16>, vector<384x128xbf16>, vector<24x128xf32> -> vector<24x128xf32>
    %7 = arith.addf %3, %6 : vector<24x128xf32>
    %c0_6 = arith.constant 0 : index
    %c0_7 = arith.constant 0 : index
    %8 = vector.load %arg8[%c0_6, %c0_7] : memref<24x128xf32, #tpu.memory_space<vmem>>, vector<24x128xf32>
    tpu.vector_store %arg8[%c0_6, %c0_7], %7 {strides = array<i32>} : memref<24x128xf32, #tpu.memory_space<vmem>>, vector<24x128xf32>,
    %c2_i32 = arith.constant 2 : i32
    %9 = arith.cmpi eq, %arg2, %c2_i32 : i32
    %10 = arith.extui %9 : i1 to i32
    %c0_i32_8 = arith.constant 0 : i32
    %11 = arith.cmpi ne, %10, %c0_i32_8 : i32
    scf.if %11 {
      %c0_9 = arith.constant 0 : index
      %c0_10 = arith.constant 0 : index
      %12 = vector.load %arg8[%c0_9, %c0_10] : memref<24x128xf32, #tpu.memory_space<vmem>>, vector<24x128xf32>
      %c0_11 = arith.constant 0 : index
      %c0_12 = arith.constant 0 : index
      %13 = vector.load %arg5[%c0_11, %c0_12] : memref<1x128xf32, #tpu.memory_space<vmem>>, vector<1x128xf32>
      %14 = vector.broadcast %13 : vector<1x128xf32> to vector<24x128xf32>
      %15 = arith.addf %12, %14 : vector<24x128xf32>
      %c0_13 = arith.constant 0 : index
      %c0_14 = arith.constant 0 : index
      %16 = vector.load %arg6[%c0_13, %c0_14] : memref<24x128xbf16, #tpu.memory_space<vmem>>, vector<24x128xbf16>
      %17 = arith.extf %16 : vector<24x128xbf16> to vector<24x128xf32>
      %18 = arith.addf %15, %17 : vector<24x128xf32>
      %cst_15 = arith.constant 0.000000e+00 : f32
      %19 = vector.broadcast %cst_15 : f32 to vector<24x128xf32>
      %20 = arith.maximumf %18, %19 : vector<24x128xf32>
      %21 = arith.truncf %20 : vector<24x128xf32> to vector<24x128xbf16>
      %c0_16 = arith.constant 0 : index
      %c0_17 = arith.constant 0 : index
      %22 = vector.load %arg7[%c0_16, %c0_17] : memref<24x128xbf16, #tpu.memory_space<vmem>>, vector<24x128xbf16>
      tpu.vector_store %arg7[%c0_16, %c0_17], %21 {strides = array<i32>} : memref<24x128xbf16, #tpu.memory_space<vmem>>, vector<24x128xbf16>,
    } else {
    }
    return
  }
  func.func @transform_0(%arg0: i32, %arg1: i32, %arg2: i32) -> (i32, i32) {
    %c0_i32 = arith.constant 0 : i32
    return %arg0, %arg2 : i32, i32
  }
  func.func @transform_1(%arg0: i32, %arg1: i32, %arg2: i32) -> (i32, i32) {
    %c0_i32 = arith.constant 0 : i32
    return %arg2, %arg1 : i32, i32
  }
  func.func @transform_2(%arg0: i32, %arg1: i32, %arg2: i32) -> (i32, i32) {
    %c0_i32 = arith.constant 0 : i32
    %c0_i32_0 = arith.constant 0 : i32
    return %c0_i32, %arg1 : i32, i32
  }
  func.func @transform_3(%arg0: i32, %arg1: i32, %arg2: i32) -> (i32, i32) {
    %c0_i32 = arith.constant 0 : i32
    return %arg0, %arg1 : i32, i32
  }
  func.func @transform_4(%arg0: i32, %arg1: i32, %arg2: i32) -> (i32, i32) {
    %c0_i32 = arith.constant 0 : i32
    return %arg0, %arg1 : i32, i32
  }
}

module attributes {stable_mosaic.version = 11 : i64} {
  func.func @_mm_kernel(%arg0: i32, %arg1: i32, %arg2: i32, %arg3: memref<24x128xbf16, #tpu.memory_space<vmem>>, %arg4: memref<128x128xbf16, #tpu.memory_space<vmem>>, %arg5: memref<1x128xf32, #tpu.memory_space<vmem>>, %arg6: memref<24x128xbf16, #tpu.memory_space<vmem>>, %arg7: memref<24x128xf32, #tpu.memory_space<vmem>>) attributes {dimension_semantics = [#tpu.dimension_semantics<parallel>, #tpu.dimension_semantics<parallel>, #tpu.dimension_semantics<arbitrary>], iteration_bounds = array<i64: 1, 1, 1>, scalar_prefetch = 0 : i64, scratch_operands = 1 : i64, tpu.core_type = #tpu.core_type<tc>, window_params = [{transform_indices = @transform_0, window_bounds = array<i64: 24, 128>}, {transform_indices = @transform_1, window_bounds = array<i64: 128, 128>}, {transform_indices = @transform_2, window_bounds = array<i64: 1, 128>}, {transform_indices = @transform_3, window_bounds = array<i64: 24, 128>}]} {
    %c0_i32 = arith.constant 0 : i32
    %0 = arith.cmpi eq, %arg2, %c0_i32 : i32
    %1 = arith.extui %0 : i1 to i32
    %c0_i32_0 = arith.constant 0 : i32
    %2 = arith.cmpi ne, %1, %c0_i32_0 : i32
    scf.if %2 {
      %cst_10 = arith.constant 0.000000e+00 : f32
      %12 = vector.broadcast %cst_10 : f32 to vector<24x128xf32>
      %c0_11 = arith.constant 0 : index
      %c0_12 = arith.constant 0 : index
      %13 = vector.load %arg7[%c0_11, %c0_12] : memref<24x128xf32, #tpu.memory_space<vmem>>, vector<24x128xf32>
      tpu.vector_store %arg7[%c0_11, %c0_12], %12 {strides = array<i32>} : memref<24x128xf32, #tpu.memory_space<vmem>>, vector<24x128xf32>,
    } else {
    }
    %c0 = arith.constant 0 : index
    %c0_1 = arith.constant 0 : index
    %3 = vector.load %arg7[%c0, %c0_1] : memref<24x128xf32, #tpu.memory_space<vmem>>, vector<24x128xf32>
    %c0_2 = arith.constant 0 : index
    %c0_3 = arith.constant 0 : index
    %4 = vector.load %arg3[%c0_2, %c0_3] : memref<24x128xbf16, #tpu.memory_space<vmem>>, vector<24x128xbf16>
    %c0_4 = arith.constant 0 : index
    %c0_5 = arith.constant 0 : index
    %5 = vector.load %arg4[%c0_4, %c0_5] : memref<128x128xbf16, #tpu.memory_space<vmem>>, vector<128x128xbf16>
    %cst = arith.constant dense<0.000000e+00> : vector<24x128xf32>
    %6 = tpu.matmul %4, %5, %cst {dimension_numbers = #tpu.dot_dimension_numbers<[1], [0], [0], [1], [0, 0, 1, 1], [], []>} : vector<24x128xbf16>, vector<128x128xbf16>, vector<24x128xf32> -> vector<24x128xf32>
    %7 = arith.addf %3, %6 : vector<24x128xf32>
    %c0_6 = arith.constant 0 : index
    %c0_7 = arith.constant 0 : index
    %8 = vector.load %arg7[%c0_6, %c0_7] : memref<24x128xf32, #tpu.memory_space<vmem>>, vector<24x128xf32>
    tpu.vector_store %arg7[%c0_6, %c0_7], %7 {strides = array<i32>} : memref<24x128xf32, #tpu.memory_space<vmem>>, vector<24x128xf32>,
    %c0_i32_8 = arith.constant 0 : i32
    %9 = arith.cmpi eq, %arg2, %c0_i32_8 : i32
    %10 = arith.extui %9 : i1 to i32
    %c0_i32_9 = arith.constant 0 : i32
    %11 = arith.cmpi ne, %10, %c0_i32_9 : i32
    scf.if %11 {
      %c0_10 = arith.constant 0 : index
      %c0_11 = arith.constant 0 : index
      %12 = vector.load %arg7[%c0_10, %c0_11] : memref<24x128xf32, #tpu.memory_space<vmem>>, vector<24x128xf32>
      %c0_12 = arith.constant 0 : index
      %c0_13 = arith.constant 0 : index
      %13 = vector.load %arg5[%c0_12, %c0_13] : memref<1x128xf32, #tpu.memory_space<vmem>>, vector<1x128xf32>
      %14 = vector.broadcast %13 : vector<1x128xf32> to vector<24x128xf32>
      %15 = arith.addf %12, %14 : vector<24x128xf32>
      %16 = arith.truncf %15 : vector<24x128xf32> to vector<24x128xbf16>
      %c0_14 = arith.constant 0 : index
      %c0_15 = arith.constant 0 : index
      %17 = vector.load %arg6[%c0_14, %c0_15] : memref<24x128xbf16, #tpu.memory_space<vmem>>, vector<24x128xbf16>
      tpu.vector_store %arg6[%c0_14, %c0_15], %16 {strides = array<i32>} : memref<24x128xbf16, #tpu.memory_space<vmem>>, vector<24x128xbf16>,
    } else {
    }
    return
  }
  func.func @transform_0(%arg0: i32, %arg1: i32, %arg2: i32) -> (i32, i32) {
    %c0_i32 = arith.constant 0 : i32
    return %arg0, %arg2 : i32, i32
  }
  func.func @transform_1(%arg0: i32, %arg1: i32, %arg2: i32) -> (i32, i32) {
    %c0_i32 = arith.constant 0 : i32
    return %arg2, %arg1 : i32, i32
  }
  func.func @transform_2(%arg0: i32, %arg1: i32, %arg2: i32) -> (i32, i32) {
    %c0_i32 = arith.constant 0 : i32
    %c0_i32_0 = arith.constant 0 : i32
    return %c0_i32, %arg1 : i32, i32
  }
  func.func @transform_3(%arg0: i32, %arg1: i32, %arg2: i32) -> (i32, i32) {
    %c0_i32 = arith.constant 0 : i32
    return %arg0, %arg1 : i32, i32
  }
}

module attributes {stable_mosaic.version = 11 : i64} {
  func.func @_mm_kernel(%arg0: i32, %arg1: i32, %arg2: i32, %arg3: memref<8x384xbf16, #tpu.memory_space<vmem>>, %arg4: memref<384x256xbf16, #tpu.memory_space<vmem>>, %arg5: memref<1x256xf32, #tpu.memory_space<vmem>>, %arg6: memref<8x256xbf16, #tpu.memory_space<vmem>>, %arg7: memref<8x256xf32, #tpu.memory_space<vmem>>) attributes {dimension_semantics = [#tpu.dimension_semantics<parallel>, #tpu.dimension_semantics<parallel>, #tpu.dimension_semantics<arbitrary>], iteration_bounds = array<i64: 1, 1, 3>, scalar_prefetch = 0 : i64, scratch_operands = 1 : i64, tpu.core_type = #tpu.core_type<tc>, window_params = [{transform_indices = @transform_0, window_bounds = array<i64: 8, 384>}, {transform_indices = @transform_1, window_bounds = array<i64: 384, 256>}, {transform_indices = @transform_2, window_bounds = array<i64: 1, 256>}, {transform_indices = @transform_3, window_bounds = array<i64: 8, 256>}]} {
    %c0_i32 = arith.constant 0 : i32
    %0 = arith.cmpi eq, %arg2, %c0_i32 : i32
    %1 = arith.extui %0 : i1 to i32
    %c0_i32_0 = arith.constant 0 : i32
    %2 = arith.cmpi ne, %1, %c0_i32_0 : i32
    scf.if %2 {
      %cst_9 = arith.constant 0.000000e+00 : f32
      %12 = vector.broadcast %cst_9 : f32 to vector<8x256xf32>
      %c0_10 = arith.constant 0 : index
      %c0_11 = arith.constant 0 : index
      %13 = vector.load %arg7[%c0_10, %c0_11] : memref<8x256xf32, #tpu.memory_space<vmem>>, vector<8x256xf32>
      tpu.vector_store %arg7[%c0_10, %c0_11], %12 {strides = array<i32>} : memref<8x256xf32, #tpu.memory_space<vmem>>, vector<8x256xf32>,
    } else {
    }
    %c0 = arith.constant 0 : index
    %c0_1 = arith.constant 0 : index
    %3 = vector.load %arg7[%c0, %c0_1] : memref<8x256xf32, #tpu.memory_space<vmem>>, vector<8x256xf32>
    %c0_2 = arith.constant 0 : index
    %c0_3 = arith.constant 0 : index
    %4 = vector.load %arg3[%c0_2, %c0_3] : memref<8x384xbf16, #tpu.memory_space<vmem>>, vector<8x384xbf16>
    %c0_4 = arith.constant 0 : index
    %c0_5 = arith.constant 0 : index
    %5 = vector.load %arg4[%c0_4, %c0_5] : memref<384x256xbf16, #tpu.memory_space<vmem>>, vector<384x256xbf16>
    %cst = arith.constant dense<0.000000e+00> : vector<8x256xf32>
    %6 = tpu.matmul %4, %5, %cst {dimension_numbers = #tpu.dot_dimension_numbers<[1], [0], [0], [1], [0, 0, 1, 1], [], []>} : vector<8x384xbf16>, vector<384x256xbf16>, vector<8x256xf32> -> vector<8x256xf32>
    %7 = arith.addf %3, %6 : vector<8x256xf32>
    %c0_6 = arith.constant 0 : index
    %c0_7 = arith.constant 0 : index
    %8 = vector.load %arg7[%c0_6, %c0_7] : memref<8x256xf32, #tpu.memory_space<vmem>>, vector<8x256xf32>
    tpu.vector_store %arg7[%c0_6, %c0_7], %7 {strides = array<i32>} : memref<8x256xf32, #tpu.memory_space<vmem>>, vector<8x256xf32>,
    %c2_i32 = arith.constant 2 : i32
    %9 = arith.cmpi eq, %arg2, %c2_i32 : i32
    %10 = arith.extui %9 : i1 to i32
    %c0_i32_8 = arith.constant 0 : i32
    %11 = arith.cmpi ne, %10, %c0_i32_8 : i32
    scf.if %11 {
      %c0_9 = arith.constant 0 : index
      %c0_10 = arith.constant 0 : index
      %12 = vector.load %arg7[%c0_9, %c0_10] : memref<8x256xf32, #tpu.memory_space<vmem>>, vector<8x256xf32>
      %c0_11 = arith.constant 0 : index
      %c0_12 = arith.constant 0 : index
      %13 = vector.load %arg5[%c0_11, %c0_12] : memref<1x256xf32, #tpu.memory_space<vmem>>, vector<1x256xf32>
      %14 = vector.broadcast %13 : vector<1x256xf32> to vector<8x256xf32>
      %15 = arith.addf %12, %14 : vector<8x256xf32>
      %cst_13 = arith.constant 0.000000e+00 : f32
      %16 = vector.broadcast %cst_13 : f32 to vector<8x256xf32>
      %17 = arith.maximumf %15, %16 : vector<8x256xf32>
      %18 = arith.truncf %17 : vector<8x256xf32> to vector<8x256xbf16>
      %c0_14 = arith.constant 0 : index
      %c0_15 = arith.constant 0 : index
      %19 = vector.load %arg6[%c0_14, %c0_15] : memref<8x256xbf16, #tpu.memory_space<vmem>>, vector<8x256xbf16>
      tpu.vector_store %arg6[%c0_14, %c0_15], %18 {strides = array<i32>} : memref<8x256xbf16, #tpu.memory_space<vmem>>, vector<8x256xbf16>,
    } else {
    }
    return
  }
  func.func @transform_0(%arg0: i32, %arg1: i32, %arg2: i32) -> (i32, i32) {
    %c0_i32 = arith.constant 0 : i32
    return %arg0, %arg2 : i32, i32
  }
  func.func @transform_1(%arg0: i32, %arg1: i32, %arg2: i32) -> (i32, i32) {
    %c0_i32 = arith.constant 0 : i32
    return %arg2, %arg1 : i32, i32
  }
  func.func @transform_2(%arg0: i32, %arg1: i32, %arg2: i32) -> (i32, i32) {
    %c0_i32 = arith.constant 0 : i32
    %c0_i32_0 = arith.constant 0 : i32
    return %c0_i32, %arg1 : i32, i32
  }
  func.func @transform_3(%arg0: i32, %arg1: i32, %arg2: i32) -> (i32, i32) {
    %c0_i32 = arith.constant 0 : i32
    return %arg0, %arg1 : i32, i32
  }
}

module attributes {stable_mosaic.version = 11 : i64} {
  func.func @_mm_res_kernel(%arg0: i32, %arg1: i32, %arg2: i32, %arg3: memref<8x384xbf16, #tpu.memory_space<vmem>>, %arg4: memref<384x256xbf16, #tpu.memory_space<vmem>>, %arg5: memref<1x256xf32, #tpu.memory_space<vmem>>, %arg6: memref<8x256xbf16, #tpu.memory_space<vmem>>, %arg7: memref<8x256xbf16, #tpu.memory_space<vmem>>, %arg8: memref<8x256xf32, #tpu.memory_space<vmem>>) attributes {dimension_semantics = [#tpu.dimension_semantics<parallel>, #tpu.dimension_semantics<parallel>, #tpu.dimension_semantics<arbitrary>], iteration_bounds = array<i64: 1, 1, 6>, scalar_prefetch = 0 : i64, scratch_operands = 1 : i64, tpu.core_type = #tpu.core_type<tc>, window_params = [{transform_indices = @transform_0, window_bounds = array<i64: 8, 384>}, {transform_indices = @transform_1, window_bounds = array<i64: 384, 256>}, {transform_indices = @transform_2, window_bounds = array<i64: 1, 256>}, {transform_indices = @transform_3, window_bounds = array<i64: 8, 256>}, {transform_indices = @transform_4, window_bounds = array<i64: 8, 256>}]} {
    %c0_i32 = arith.constant 0 : i32
    %0 = arith.cmpi eq, %arg2, %c0_i32 : i32
    %1 = arith.extui %0 : i1 to i32
    %c0_i32_0 = arith.constant 0 : i32
    %2 = arith.cmpi ne, %1, %c0_i32_0 : i32
    scf.if %2 {
      %cst_9 = arith.constant 0.000000e+00 : f32
      %12 = vector.broadcast %cst_9 : f32 to vector<8x256xf32>
      %c0_10 = arith.constant 0 : index
      %c0_11 = arith.constant 0 : index
      %13 = vector.load %arg8[%c0_10, %c0_11] : memref<8x256xf32, #tpu.memory_space<vmem>>, vector<8x256xf32>
      tpu.vector_store %arg8[%c0_10, %c0_11], %12 {strides = array<i32>} : memref<8x256xf32, #tpu.memory_space<vmem>>, vector<8x256xf32>,
    } else {
    }
    %c0 = arith.constant 0 : index
    %c0_1 = arith.constant 0 : index
    %3 = vector.load %arg8[%c0, %c0_1] : memref<8x256xf32, #tpu.memory_space<vmem>>, vector<8x256xf32>
    %c0_2 = arith.constant 0 : index
    %c0_3 = arith.constant 0 : index
    %4 = vector.load %arg3[%c0_2, %c0_3] : memref<8x384xbf16, #tpu.memory_space<vmem>>, vector<8x384xbf16>
    %c0_4 = arith.constant 0 : index
    %c0_5 = arith.constant 0 : index
    %5 = vector.load %arg4[%c0_4, %c0_5] : memref<384x256xbf16, #tpu.memory_space<vmem>>, vector<384x256xbf16>
    %cst = arith.constant dense<0.000000e+00> : vector<8x256xf32>
    %6 = tpu.matmul %4, %5, %cst {dimension_numbers = #tpu.dot_dimension_numbers<[1], [0], [0], [1], [0, 0, 1, 1], [], []>} : vector<8x384xbf16>, vector<384x256xbf16>, vector<8x256xf32> -> vector<8x256xf32>
    %7 = arith.addf %3, %6 : vector<8x256xf32>
    %c0_6 = arith.constant 0 : index
    %c0_7 = arith.constant 0 : index
    %8 = vector.load %arg8[%c0_6, %c0_7] : memref<8x256xf32, #tpu.memory_space<vmem>>, vector<8x256xf32>
    tpu.vector_store %arg8[%c0_6, %c0_7], %7 {strides = array<i32>} : memref<8x256xf32, #tpu.memory_space<vmem>>, vector<8x256xf32>,
    %c5_i32 = arith.constant 5 : i32
    %9 = arith.cmpi eq, %arg2, %c5_i32 : i32
    %10 = arith.extui %9 : i1 to i32
    %c0_i32_8 = arith.constant 0 : i32
    %11 = arith.cmpi ne, %10, %c0_i32_8 : i32
    scf.if %11 {
      %c0_9 = arith.constant 0 : index
      %c0_10 = arith.constant 0 : index
      %12 = vector.load %arg8[%c0_9, %c0_10] : memref<8x256xf32, #tpu.memory_space<vmem>>, vector<8x256xf32>
      %c0_11 = arith.constant 0 : index
      %c0_12 = arith.constant 0 : index
      %13 = vector.load %arg5[%c0_11, %c0_12] : memref<1x256xf32, #tpu.memory_space<vmem>>, vector<1x256xf32>
      %14 = vector.broadcast %13 : vector<1x256xf32> to vector<8x256xf32>
      %15 = arith.addf %12, %14 : vector<8x256xf32>
      %c0_13 = arith.constant 0 : index
      %c0_14 = arith.constant 0 : index
      %16 = vector.load %arg6[%c0_13, %c0_14] : memref<8x256xbf16, #tpu.memory_space<vmem>>, vector<8x256xbf16>
      %17 = arith.extf %16 : vector<8x256xbf16> to vector<8x256xf32>
      %18 = arith.addf %15, %17 : vector<8x256xf32>
      %cst_15 = arith.constant 0.000000e+00 : f32
      %19 = vector.broadcast %cst_15 : f32 to vector<8x256xf32>
      %20 = arith.maximumf %18, %19 : vector<8x256xf32>
      %21 = arith.truncf %20 : vector<8x256xf32> to vector<8x256xbf16>
      %c0_16 = arith.constant 0 : index
      %c0_17 = arith.constant 0 : index
      %22 = vector.load %arg7[%c0_16, %c0_17] : memref<8x256xbf16, #tpu.memory_space<vmem>>, vector<8x256xbf16>
      tpu.vector_store %arg7[%c0_16, %c0_17], %21 {strides = array<i32>} : memref<8x256xbf16, #tpu.memory_space<vmem>>, vector<8x256xbf16>,
    } else {
    }
    return
  }
  func.func @transform_0(%arg0: i32, %arg1: i32, %arg2: i32) -> (i32, i32) {
    %c0_i32 = arith.constant 0 : i32
    return %arg0, %arg2 : i32, i32
  }
  func.func @transform_1(%arg0: i32, %arg1: i32, %arg2: i32) -> (i32, i32) {
    %c0_i32 = arith.constant 0 : i32
    return %arg2, %arg1 : i32, i32
  }
  func.func @transform_2(%arg0: i32, %arg1: i32, %arg2: i32) -> (i32, i32) {
    %c0_i32 = arith.constant 0 : i32
    %c0_i32_0 = arith.constant 0 : i32
    return %c0_i32, %arg1 : i32, i32
  }
  func.func @transform_3(%arg0: i32, %arg1: i32, %arg2: i32) -> (i32, i32) {
    %c0_i32 = arith.constant 0 : i32
    return %arg0, %arg1 : i32, i32
  }
  func.func @transform_4(%arg0: i32, %arg1: i32, %arg2: i32) -> (i32, i32) {
    %c0_i32 = arith.constant 0 : i32
    return %arg0, %arg1 : i32, i32
  }
}

module attributes {stable_mosaic.version = 11 : i64} {
  func.func @_mm_kernel(%arg0: i32, %arg1: i32, %arg2: i32, %arg3: memref<8x384xbf16, #tpu.memory_space<vmem>>, %arg4: memref<384x256xbf16, #tpu.memory_space<vmem>>, %arg5: memref<1x256xf32, #tpu.memory_space<vmem>>, %arg6: memref<8x256xbf16, #tpu.memory_space<vmem>>, %arg7: memref<8x256xf32, #tpu.memory_space<vmem>>) attributes {dimension_semantics = [#tpu.dimension_semantics<parallel>, #tpu.dimension_semantics<parallel>, #tpu.dimension_semantics<arbitrary>], iteration_bounds = array<i64: 1, 1, 6>, scalar_prefetch = 0 : i64, scratch_operands = 1 : i64, tpu.core_type = #tpu.core_type<tc>, window_params = [{transform_indices = @transform_0, window_bounds = array<i64: 8, 384>}, {transform_indices = @transform_1, window_bounds = array<i64: 384, 256>}, {transform_indices = @transform_2, window_bounds = array<i64: 1, 256>}, {transform_indices = @transform_3, window_bounds = array<i64: 8, 256>}]} {
    %c0_i32 = arith.constant 0 : i32
    %0 = arith.cmpi eq, %arg2, %c0_i32 : i32
    %1 = arith.extui %0 : i1 to i32
    %c0_i32_0 = arith.constant 0 : i32
    %2 = arith.cmpi ne, %1, %c0_i32_0 : i32
    scf.if %2 {
      %cst_9 = arith.constant 0.000000e+00 : f32
      %12 = vector.broadcast %cst_9 : f32 to vector<8x256xf32>
      %c0_10 = arith.constant 0 : index
      %c0_11 = arith.constant 0 : index
      %13 = vector.load %arg7[%c0_10, %c0_11] : memref<8x256xf32, #tpu.memory_space<vmem>>, vector<8x256xf32>
      tpu.vector_store %arg7[%c0_10, %c0_11], %12 {strides = array<i32>} : memref<8x256xf32, #tpu.memory_space<vmem>>, vector<8x256xf32>,
    } else {
    }
    %c0 = arith.constant 0 : index
    %c0_1 = arith.constant 0 : index
    %3 = vector.load %arg7[%c0, %c0_1] : memref<8x256xf32, #tpu.memory_space<vmem>>, vector<8x256xf32>
    %c0_2 = arith.constant 0 : index
    %c0_3 = arith.constant 0 : index
    %4 = vector.load %arg3[%c0_2, %c0_3] : memref<8x384xbf16, #tpu.memory_space<vmem>>, vector<8x384xbf16>
    %c0_4 = arith.constant 0 : index
    %c0_5 = arith.constant 0 : index
    %5 = vector.load %arg4[%c0_4, %c0_5] : memref<384x256xbf16, #tpu.memory_space<vmem>>, vector<384x256xbf16>
    %cst = arith.constant dense<0.000000e+00> : vector<8x256xf32>
    %6 = tpu.matmul %4, %5, %cst {dimension_numbers = #tpu.dot_dimension_numbers<[1], [0], [0], [1], [0, 0, 1, 1], [], []>} : vector<8x384xbf16>, vector<384x256xbf16>, vector<8x256xf32> -> vector<8x256xf32>
    %7 = arith.addf %3, %6 : vector<8x256xf32>
    %c0_6 = arith.constant 0 : index
    %c0_7 = arith.constant 0 : index
    %8 = vector.load %arg7[%c0_6, %c0_7] : memref<8x256xf32, #tpu.memory_space<vmem>>, vector<8x256xf32>
    tpu.vector_store %arg7[%c0_6, %c0_7], %7 {strides = array<i32>} : memref<8x256xf32, #tpu.memory_space<vmem>>, vector<8x256xf32>,
    %c5_i32 = arith.constant 5 : i32
    %9 = arith.cmpi eq, %arg2, %c5_i32 : i32
    %10 = arith.extui %9 : i1 to i32
    %c0_i32_8 = arith.constant 0 : i32
    %11 = arith.cmpi ne, %10, %c0_i32_8 : i32
    scf.if %11 {
      %c0_9 = arith.constant 0 : index
      %c0_10 = arith.constant 0 : index
      %12 = vector.load %arg7[%c0_9, %c0_10] : memref<8x256xf32, #tpu.memory_space<vmem>>, vector<8x256xf32>
      %c0_11 = arith.constant 0 : index
      %c0_12 = arith.constant 0 : index
      %13 = vector.load %arg5[%c0_11, %c0_12] : memref<1x256xf32, #tpu.memory_space<vmem>>, vector<1x256xf32>
      %14 = vector.broadcast %13 : vector<1x256xf32> to vector<8x256xf32>
      %15 = arith.addf %12, %14 : vector<8x256xf32>
      %cst_13 = arith.constant 0.000000e+00 : f32
      %16 = vector.broadcast %cst_13 : f32 to vector<8x256xf32>
      %17 = arith.maximumf %15, %16 : vector<8x256xf32>
      %18 = arith.truncf %17 : vector<8x256xf32> to vector<8x256xbf16>
      %c0_14 = arith.constant 0 : index
      %c0_15 = arith.constant 0 : index
      %19 = vector.load %arg6[%c0_14, %c0_15] : memref<8x256xbf16, #tpu.memory_space<vmem>>, vector<8x256xbf16>
      tpu.vector_store %arg6[%c0_14, %c0_15], %18 {strides = array<i32>} : memref<8x256xbf16, #tpu.memory_space<vmem>>, vector<8x256xbf16>,
    } else {
    }
    return
  }
  func.func @transform_0(%arg0: i32, %arg1: i32, %arg2: i32) -> (i32, i32) {
    %c0_i32 = arith.constant 0 : i32
    return %arg0, %arg2 : i32, i32
  }
  func.func @transform_1(%arg0: i32, %arg1: i32, %arg2: i32) -> (i32, i32) {
    %c0_i32 = arith.constant 0 : i32
    return %arg2, %arg1 : i32, i32
  }
  func.func @transform_2(%arg0: i32, %arg1: i32, %arg2: i32) -> (i32, i32) {
    %c0_i32 = arith.constant 0 : i32
    %c0_i32_0 = arith.constant 0 : i32
    return %c0_i32, %arg1 : i32, i32
  }
  func.func @transform_3(%arg0: i32, %arg1: i32, %arg2: i32) -> (i32, i32) {
    %c0_i32 = arith.constant 0 : i32
    return %arg0, %arg1 : i32, i32
  }
}

module attributes {stable_mosaic.version = 11 : i64} {
  func.func @_mm_kernel(%arg0: i32, %arg1: i32, %arg2: i32, %arg3: memref<8x128xbf16, #tpu.memory_space<vmem>>, %arg4: memref<128x256xbf16, #tpu.memory_space<vmem>>, %arg5: memref<1x256xf32, #tpu.memory_space<vmem>>, %arg6: memref<8x256xbf16, #tpu.memory_space<vmem>>, %arg7: memref<8x256xf32, #tpu.memory_space<vmem>>) attributes {dimension_semantics = [#tpu.dimension_semantics<parallel>, #tpu.dimension_semantics<parallel>, #tpu.dimension_semantics<arbitrary>], iteration_bounds = array<i64: 1, 1, 1>, scalar_prefetch = 0 : i64, scratch_operands = 1 : i64, tpu.core_type = #tpu.core_type<tc>, window_params = [{transform_indices = @transform_0, window_bounds = array<i64: 8, 128>}, {transform_indices = @transform_1, window_bounds = array<i64: 128, 256>}, {transform_indices = @transform_2, window_bounds = array<i64: 1, 256>}, {transform_indices = @transform_3, window_bounds = array<i64: 8, 256>}]} {
    %c0_i32 = arith.constant 0 : i32
    %0 = arith.cmpi eq, %arg2, %c0_i32 : i32
    %1 = arith.extui %0 : i1 to i32
    %c0_i32_0 = arith.constant 0 : i32
    %2 = arith.cmpi ne, %1, %c0_i32_0 : i32
    scf.if %2 {
      %cst_10 = arith.constant 0.000000e+00 : f32
      %12 = vector.broadcast %cst_10 : f32 to vector<8x256xf32>
      %c0_11 = arith.constant 0 : index
      %c0_12 = arith.constant 0 : index
      %13 = vector.load %arg7[%c0_11, %c0_12] : memref<8x256xf32, #tpu.memory_space<vmem>>, vector<8x256xf32>
      tpu.vector_store %arg7[%c0_11, %c0_12], %12 {strides = array<i32>} : memref<8x256xf32, #tpu.memory_space<vmem>>, vector<8x256xf32>,
    } else {
    }
    %c0 = arith.constant 0 : index
    %c0_1 = arith.constant 0 : index
    %3 = vector.load %arg7[%c0, %c0_1] : memref<8x256xf32, #tpu.memory_space<vmem>>, vector<8x256xf32>
    %c0_2 = arith.constant 0 : index
    %c0_3 = arith.constant 0 : index
    %4 = vector.load %arg3[%c0_2, %c0_3] : memref<8x128xbf16, #tpu.memory_space<vmem>>, vector<8x128xbf16>
    %c0_4 = arith.constant 0 : index
    %c0_5 = arith.constant 0 : index
    %5 = vector.load %arg4[%c0_4, %c0_5] : memref<128x256xbf16, #tpu.memory_space<vmem>>, vector<128x256xbf16>
    %cst = arith.constant dense<0.000000e+00> : vector<8x256xf32>
    %6 = tpu.matmul %4, %5, %cst {dimension_numbers = #tpu.dot_dimension_numbers<[1], [0], [0], [1], [0, 0, 1, 1], [], []>} : vector<8x128xbf16>, vector<128x256xbf16>, vector<8x256xf32> -> vector<8x256xf32>
    %7 = arith.addf %3, %6 : vector<8x256xf32>
    %c0_6 = arith.constant 0 : index
    %c0_7 = arith.constant 0 : index
    %8 = vector.load %arg7[%c0_6, %c0_7] : memref<8x256xf32, #tpu.memory_space<vmem>>, vector<8x256xf32>
    tpu.vector_store %arg7[%c0_6, %c0_7], %7 {strides = array<i32>} : memref<8x256xf32, #tpu.memory_space<vmem>>, vector<8x256xf32>,
    %c0_i32_8 = arith.constant 0 : i32
    %9 = arith.cmpi eq, %arg2, %c0_i32_8 : i32
    %10 = arith.extui %9 : i1 to i32
    %c0_i32_9 = arith.constant 0 : i32
    %11 = arith.cmpi ne, %10, %c0_i32_9 : i32
    scf.if %11 {
      %c0_10 = arith.constant 0 : index
      %c0_11 = arith.constant 0 : index
      %12 = vector.load %arg7[%c0_10, %c0_11] : memref<8x256xf32, #tpu.memory_space<vmem>>, vector<8x256xf32>
      %c0_12 = arith.constant 0 : index
      %c0_13 = arith.constant 0 : index
      %13 = vector.load %arg5[%c0_12, %c0_13] : memref<1x256xf32, #tpu.memory_space<vmem>>, vector<1x256xf32>
      %14 = vector.broadcast %13 : vector<1x256xf32> to vector<8x256xf32>
      %15 = arith.addf %12, %14 : vector<8x256xf32>
      %16 = arith.truncf %15 : vector<8x256xf32> to vector<8x256xbf16>
      %c0_14 = arith.constant 0 : index
      %c0_15 = arith.constant 0 : index
      %17 = vector.load %arg6[%c0_14, %c0_15] : memref<8x256xbf16, #tpu.memory_space<vmem>>, vector<8x256xbf16>
      tpu.vector_store %arg6[%c0_14, %c0_15], %16 {strides = array<i32>} : memref<8x256xbf16, #tpu.memory_space<vmem>>, vector<8x256xbf16>,
    } else {
    }
    return
  }
  func.func @transform_0(%arg0: i32, %arg1: i32, %arg2: i32) -> (i32, i32) {
    %c0_i32 = arith.constant 0 : i32
    return %arg0, %arg2 : i32, i32
  }
  func.func @transform_1(%arg0: i32, %arg1: i32, %arg2: i32) -> (i32, i32) {
    %c0_i32 = arith.constant 0 : i32
    return %arg2, %arg1 : i32, i32
  }
  func.func @transform_2(%arg0: i32, %arg1: i32, %arg2: i32) -> (i32, i32) {
    %c0_i32 = arith.constant 0 : i32
    %c0_i32_0 = arith.constant 0 : i32
    return %c0_i32, %arg1 : i32, i32
  }
  func.func @transform_3(%arg0: i32, %arg1: i32, %arg2: i32) -> (i32, i32) {
    %c0_i32 = arith.constant 0 : i32
    return %arg0, %arg1 : i32, i32
  }
}

module attributes {stable_mosaic.version = 11 : i64} {
  func.func @_mm_kernel(%arg0: i32, %arg1: i32, %arg2: i32, %arg3: memref<8x384xbf16, #tpu.memory_space<vmem>>, %arg4: memref<384x256xbf16, #tpu.memory_space<vmem>>, %arg5: memref<1x256xf32, #tpu.memory_space<vmem>>, %arg6: memref<8x256xbf16, #tpu.memory_space<vmem>>, %arg7: memref<8x256xf32, #tpu.memory_space<vmem>>) attributes {dimension_semantics = [#tpu.dimension_semantics<parallel>, #tpu.dimension_semantics<parallel>, #tpu.dimension_semantics<arbitrary>], iteration_bounds = array<i64: 1, 2, 6>, scalar_prefetch = 0 : i64, scratch_operands = 1 : i64, tpu.core_type = #tpu.core_type<tc>, window_params = [{transform_indices = @transform_0, window_bounds = array<i64: 8, 384>}, {transform_indices = @transform_1, window_bounds = array<i64: 384, 256>}, {transform_indices = @transform_2, window_bounds = array<i64: 1, 256>}, {transform_indices = @transform_3, window_bounds = array<i64: 8, 256>}]} {
    %c0_i32 = arith.constant 0 : i32
    %0 = arith.cmpi eq, %arg2, %c0_i32 : i32
    %1 = arith.extui %0 : i1 to i32
    %c0_i32_0 = arith.constant 0 : i32
    %2 = arith.cmpi ne, %1, %c0_i32_0 : i32
    scf.if %2 {
      %cst_9 = arith.constant 0.000000e+00 : f32
      %12 = vector.broadcast %cst_9 : f32 to vector<8x256xf32>
      %c0_10 = arith.constant 0 : index
      %c0_11 = arith.constant 0 : index
      %13 = vector.load %arg7[%c0_10, %c0_11] : memref<8x256xf32, #tpu.memory_space<vmem>>, vector<8x256xf32>
      tpu.vector_store %arg7[%c0_10, %c0_11], %12 {strides = array<i32>} : memref<8x256xf32, #tpu.memory_space<vmem>>, vector<8x256xf32>,
    } else {
    }
    %c0 = arith.constant 0 : index
    %c0_1 = arith.constant 0 : index
    %3 = vector.load %arg7[%c0, %c0_1] : memref<8x256xf32, #tpu.memory_space<vmem>>, vector<8x256xf32>
    %c0_2 = arith.constant 0 : index
    %c0_3 = arith.constant 0 : index
    %4 = vector.load %arg3[%c0_2, %c0_3] : memref<8x384xbf16, #tpu.memory_space<vmem>>, vector<8x384xbf16>
    %c0_4 = arith.constant 0 : index
    %c0_5 = arith.constant 0 : index
    %5 = vector.load %arg4[%c0_4, %c0_5] : memref<384x256xbf16, #tpu.memory_space<vmem>>, vector<384x256xbf16>
    %cst = arith.constant dense<0.000000e+00> : vector<8x256xf32>
    %6 = tpu.matmul %4, %5, %cst {dimension_numbers = #tpu.dot_dimension_numbers<[1], [0], [0], [1], [0, 0, 1, 1], [], []>} : vector<8x384xbf16>, vector<384x256xbf16>, vector<8x256xf32> -> vector<8x256xf32>
    %7 = arith.addf %3, %6 : vector<8x256xf32>
    %c0_6 = arith.constant 0 : index
    %c0_7 = arith.constant 0 : index
    %8 = vector.load %arg7[%c0_6, %c0_7] : memref<8x256xf32, #tpu.memory_space<vmem>>, vector<8x256xf32>
    tpu.vector_store %arg7[%c0_6, %c0_7], %7 {strides = array<i32>} : memref<8x256xf32, #tpu.memory_space<vmem>>, vector<8x256xf32>,
    %c5_i32 = arith.constant 5 : i32
    %9 = arith.cmpi eq, %arg2, %c5_i32 : i32
    %10 = arith.extui %9 : i1 to i32
    %c0_i32_8 = arith.constant 0 : i32
    %11 = arith.cmpi ne, %10, %c0_i32_8 : i32
    scf.if %11 {
      %c0_9 = arith.constant 0 : index
      %c0_10 = arith.constant 0 : index
      %12 = vector.load %arg7[%c0_9, %c0_10] : memref<8x256xf32, #tpu.memory_space<vmem>>, vector<8x256xf32>
      %c0_11 = arith.constant 0 : index
      %c0_12 = arith.constant 0 : index
      %13 = vector.load %arg5[%c0_11, %c0_12] : memref<1x256xf32, #tpu.memory_space<vmem>>, vector<1x256xf32>
      %14 = vector.broadcast %13 : vector<1x256xf32> to vector<8x256xf32>
      %15 = arith.addf %12, %14 : vector<8x256xf32>
      %cst_13 = arith.constant 0.000000e+00 : f32
      %16 = vector.broadcast %cst_13 : f32 to vector<8x256xf32>
      %17 = arith.maximumf %15, %16 : vector<8x256xf32>
      %18 = arith.truncf %17 : vector<8x256xf32> to vector<8x256xbf16>
      %c0_14 = arith.constant 0 : index
      %c0_15 = arith.constant 0 : index
      %19 = vector.load %arg6[%c0_14, %c0_15] : memref<8x256xbf16, #tpu.memory_space<vmem>>, vector<8x256xbf16>
      tpu.vector_store %arg6[%c0_14, %c0_15], %18 {strides = array<i32>} : memref<8x256xbf16, #tpu.memory_space<vmem>>, vector<8x256xbf16>,
    } else {
    }
    return
  }
  func.func @transform_0(%arg0: i32, %arg1: i32, %arg2: i32) -> (i32, i32) {
    %c0_i32 = arith.constant 0 : i32
    return %arg0, %arg2 : i32, i32
  }
  func.func @transform_1(%arg0: i32, %arg1: i32, %arg2: i32) -> (i32, i32) {
    %c0_i32 = arith.constant 0 : i32
    return %arg2, %arg1 : i32, i32
  }
  func.func @transform_2(%arg0: i32, %arg1: i32, %arg2: i32) -> (i32, i32) {
    %c0_i32 = arith.constant 0 : i32
    %c0_i32_0 = arith.constant 0 : i32
    return %c0_i32, %arg1 : i32, i32
  }
  func.func @transform_3(%arg0: i32, %arg1: i32, %arg2: i32) -> (i32, i32) {
    %c0_i32 = arith.constant 0 : i32
    return %arg0, %arg1 : i32, i32
  }
}

module attributes {stable_mosaic.version = 11 : i64} {
  func.func @_mm_kernel(%arg0: i32, %arg1: i32, %arg2: i32, %arg3: memref<8x256xbf16, #tpu.memory_space<vmem>>, %arg4: memref<256x256xbf16, #tpu.memory_space<vmem>>, %arg5: memref<1x256xf32, #tpu.memory_space<vmem>>, %arg6: memref<8x256xbf16, #tpu.memory_space<vmem>>, %arg7: memref<8x256xf32, #tpu.memory_space<vmem>>) attributes {dimension_semantics = [#tpu.dimension_semantics<parallel>, #tpu.dimension_semantics<parallel>, #tpu.dimension_semantics<arbitrary>], iteration_bounds = array<i64: 1, 2, 1>, scalar_prefetch = 0 : i64, scratch_operands = 1 : i64, tpu.core_type = #tpu.core_type<tc>, window_params = [{transform_indices = @transform_0, window_bounds = array<i64: 8, 256>}, {transform_indices = @transform_1, window_bounds = array<i64: 256, 256>}, {transform_indices = @transform_2, window_bounds = array<i64: 1, 256>}, {transform_indices = @transform_3, window_bounds = array<i64: 8, 256>}]} {
    %c0_i32 = arith.constant 0 : i32
    %0 = arith.cmpi eq, %arg2, %c0_i32 : i32
    %1 = arith.extui %0 : i1 to i32
    %c0_i32_0 = arith.constant 0 : i32
    %2 = arith.cmpi ne, %1, %c0_i32_0 : i32
    scf.if %2 {
      %cst_10 = arith.constant 0.000000e+00 : f32
      %12 = vector.broadcast %cst_10 : f32 to vector<8x256xf32>
      %c0_11 = arith.constant 0 : index
      %c0_12 = arith.constant 0 : index
      %13 = vector.load %arg7[%c0_11, %c0_12] : memref<8x256xf32, #tpu.memory_space<vmem>>, vector<8x256xf32>
      tpu.vector_store %arg7[%c0_11, %c0_12], %12 {strides = array<i32>} : memref<8x256xf32, #tpu.memory_space<vmem>>, vector<8x256xf32>,
    } else {
    }
    %c0 = arith.constant 0 : index
    %c0_1 = arith.constant 0 : index
    %3 = vector.load %arg7[%c0, %c0_1] : memref<8x256xf32, #tpu.memory_space<vmem>>, vector<8x256xf32>
    %c0_2 = arith.constant 0 : index
    %c0_3 = arith.constant 0 : index
    %4 = vector.load %arg3[%c0_2, %c0_3] : memref<8x256xbf16, #tpu.memory_space<vmem>>, vector<8x256xbf16>
    %c0_4 = arith.constant 0 : index
    %c0_5 = arith.constant 0 : index
    %5 = vector.load %arg4[%c0_4, %c0_5] : memref<256x256xbf16, #tpu.memory_space<vmem>>, vector<256x256xbf16>
    %cst = arith.constant dense<0.000000e+00> : vector<8x256xf32>
    %6 = tpu.matmul %4, %5, %cst {dimension_numbers = #tpu.dot_dimension_numbers<[1], [0], [0], [1], [0, 0, 1, 1], [], []>} : vector<8x256xbf16>, vector<256x256xbf16>, vector<8x256xf32> -> vector<8x256xf32>
    %7 = arith.addf %3, %6 : vector<8x256xf32>
    %c0_6 = arith.constant 0 : index
    %c0_7 = arith.constant 0 : index
    %8 = vector.load %arg7[%c0_6, %c0_7] : memref<8x256xf32, #tpu.memory_space<vmem>>, vector<8x256xf32>
    tpu.vector_store %arg7[%c0_6, %c0_7], %7 {strides = array<i32>} : memref<8x256xf32, #tpu.memory_space<vmem>>, vector<8x256xf32>,
    %c0_i32_8 = arith.constant 0 : i32
    %9 = arith.cmpi eq, %arg2, %c0_i32_8 : i32
    %10 = arith.extui %9 : i1 to i32
    %c0_i32_9 = arith.constant 0 : i32
    %11 = arith.cmpi ne, %10, %c0_i32_9 : i32
    scf.if %11 {
      %c0_10 = arith.constant 0 : index
      %c0_11 = arith.constant 0 : index
      %12 = vector.load %arg7[%c0_10, %c0_11] : memref<8x256xf32, #tpu.memory_space<vmem>>, vector<8x256xf32>
      %c0_12 = arith.constant 0 : index
      %c0_13 = arith.constant 0 : index
      %13 = vector.load %arg5[%c0_12, %c0_13] : memref<1x256xf32, #tpu.memory_space<vmem>>, vector<1x256xf32>
      %14 = vector.broadcast %13 : vector<1x256xf32> to vector<8x256xf32>
      %15 = arith.addf %12, %14 : vector<8x256xf32>
      %16 = arith.truncf %15 : vector<8x256xf32> to vector<8x256xbf16>
      %c0_14 = arith.constant 0 : index
      %c0_15 = arith.constant 0 : index
      %17 = vector.load %arg6[%c0_14, %c0_15] : memref<8x256xbf16, #tpu.memory_space<vmem>>, vector<8x256xbf16>
      tpu.vector_store %arg6[%c0_14, %c0_15], %16 {strides = array<i32>} : memref<8x256xbf16, #tpu.memory_space<vmem>>, vector<8x256xbf16>,
    } else {
    }
    return
  }
  func.func @transform_0(%arg0: i32, %arg1: i32, %arg2: i32) -> (i32, i32) {
    %c0_i32 = arith.constant 0 : i32
    return %arg0, %arg2 : i32, i32
  }
  func.func @transform_1(%arg0: i32, %arg1: i32, %arg2: i32) -> (i32, i32) {
    %c0_i32 = arith.constant 0 : i32
    return %arg2, %arg1 : i32, i32
  }
  func.func @transform_2(%arg0: i32, %arg1: i32, %arg2: i32) -> (i32, i32) {
    %c0_i32 = arith.constant 0 : i32
    %c0_i32_0 = arith.constant 0 : i32
    return %c0_i32, %arg1 : i32, i32
  }
  func.func @transform_3(%arg0: i32, %arg1: i32, %arg2: i32) -> (i32, i32) {
    %c0_i32 = arith.constant 0 : i32
    return %arg0, %arg1 : i32, i32
  }
}

module attributes {stable_mosaic.version = 11 : i64} {
  func.func @_mm_res_kernel(%arg0: i32, %arg1: i32, %arg2: i32, %arg3: memref<8x512xbf16, #tpu.memory_space<vmem>>, %arg4: memref<512x256xbf16, #tpu.memory_space<vmem>>, %arg5: memref<1x256xf32, #tpu.memory_space<vmem>>, %arg6: memref<8x256xbf16, #tpu.memory_space<vmem>>, %arg7: memref<8x256xbf16, #tpu.memory_space<vmem>>, %arg8: memref<8x256xf32, #tpu.memory_space<vmem>>) attributes {dimension_semantics = [#tpu.dimension_semantics<parallel>, #tpu.dimension_semantics<parallel>, #tpu.dimension_semantics<arbitrary>], iteration_bounds = array<i64: 1, 2, 9>, scalar_prefetch = 0 : i64, scratch_operands = 1 : i64, tpu.core_type = #tpu.core_type<tc>, window_params = [{transform_indices = @transform_0, window_bounds = array<i64: 8, 512>}, {transform_indices = @transform_1, window_bounds = array<i64: 512, 256>}, {transform_indices = @transform_2, window_bounds = array<i64: 1, 256>}, {transform_indices = @transform_3, window_bounds = array<i64: 8, 256>}, {transform_indices = @transform_4, window_bounds = array<i64: 8, 256>}]} {
    %c0_i32 = arith.constant 0 : i32
    %0 = arith.cmpi eq, %arg2, %c0_i32 : i32
    %1 = arith.extui %0 : i1 to i32
    %c0_i32_0 = arith.constant 0 : i32
    %2 = arith.cmpi ne, %1, %c0_i32_0 : i32
    scf.if %2 {
      %cst_9 = arith.constant 0.000000e+00 : f32
      %12 = vector.broadcast %cst_9 : f32 to vector<8x256xf32>
      %c0_10 = arith.constant 0 : index
      %c0_11 = arith.constant 0 : index
      %13 = vector.load %arg8[%c0_10, %c0_11] : memref<8x256xf32, #tpu.memory_space<vmem>>, vector<8x256xf32>
      tpu.vector_store %arg8[%c0_10, %c0_11], %12 {strides = array<i32>} : memref<8x256xf32, #tpu.memory_space<vmem>>, vector<8x256xf32>,
    } else {
    }
    %c0 = arith.constant 0 : index
    %c0_1 = arith.constant 0 : index
    %3 = vector.load %arg8[%c0, %c0_1] : memref<8x256xf32, #tpu.memory_space<vmem>>, vector<8x256xf32>
    %c0_2 = arith.constant 0 : index
    %c0_3 = arith.constant 0 : index
    %4 = vector.load %arg3[%c0_2, %c0_3] : memref<8x512xbf16, #tpu.memory_space<vmem>>, vector<8x512xbf16>
    %c0_4 = arith.constant 0 : index
    %c0_5 = arith.constant 0 : index
    %5 = vector.load %arg4[%c0_4, %c0_5] : memref<512x256xbf16, #tpu.memory_space<vmem>>, vector<512x256xbf16>
    %cst = arith.constant dense<0.000000e+00> : vector<8x256xf32>
    %6 = tpu.matmul %4, %5, %cst {dimension_numbers = #tpu.dot_dimension_numbers<[1], [0], [0], [1], [0, 0, 1, 1], [], []>} : vector<8x512xbf16>, vector<512x256xbf16>, vector<8x256xf32> -> vector<8x256xf32>
    %7 = arith.addf %3, %6 : vector<8x256xf32>
    %c0_6 = arith.constant 0 : index
    %c0_7 = arith.constant 0 : index
    %8 = vector.load %arg8[%c0_6, %c0_7] : memref<8x256xf32, #tpu.memory_space<vmem>>, vector<8x256xf32>
    tpu.vector_store %arg8[%c0_6, %c0_7], %7 {strides = array<i32>} : memref<8x256xf32, #tpu.memory_space<vmem>>, vector<8x256xf32>,
    %c8_i32 = arith.constant 8 : i32
    %9 = arith.cmpi eq, %arg2, %c8_i32 : i32
    %10 = arith.extui %9 : i1 to i32
    %c0_i32_8 = arith.constant 0 : i32
    %11 = arith.cmpi ne, %10, %c0_i32_8 : i32
    scf.if %11 {
      %c0_9 = arith.constant 0 : index
      %c0_10 = arith.constant 0 : index
      %12 = vector.load %arg8[%c0_9, %c0_10] : memref<8x256xf32, #tpu.memory_space<vmem>>, vector<8x256xf32>
      %c0_11 = arith.constant 0 : index
      %c0_12 = arith.constant 0 : index
      %13 = vector.load %arg5[%c0_11, %c0_12] : memref<1x256xf32, #tpu.memory_space<vmem>>, vector<1x256xf32>
      %14 = vector.broadcast %13 : vector<1x256xf32> to vector<8x256xf32>
      %15 = arith.addf %12, %14 : vector<8x256xf32>
      %c0_13 = arith.constant 0 : index
      %c0_14 = arith.constant 0 : index
      %16 = vector.load %arg6[%c0_13, %c0_14] : memref<8x256xbf16, #tpu.memory_space<vmem>>, vector<8x256xbf16>
      %17 = arith.extf %16 : vector<8x256xbf16> to vector<8x256xf32>
      %18 = arith.addf %15, %17 : vector<8x256xf32>
      %cst_15 = arith.constant 0.000000e+00 : f32
      %19 = vector.broadcast %cst_15 : f32 to vector<8x256xf32>
      %20 = arith.maximumf %18, %19 : vector<8x256xf32>
      %21 = arith.truncf %20 : vector<8x256xf32> to vector<8x256xbf16>
      %c0_16 = arith.constant 0 : index
      %c0_17 = arith.constant 0 : index
      %22 = vector.load %arg7[%c0_16, %c0_17] : memref<8x256xbf16, #tpu.memory_space<vmem>>, vector<8x256xbf16>
      tpu.vector_store %arg7[%c0_16, %c0_17], %21 {strides = array<i32>} : memref<8x256xbf16, #tpu.memory_space<vmem>>, vector<8x256xbf16>,
    } else {
    }
    return
  }
  func.func @transform_0(%arg0: i32, %arg1: i32, %arg2: i32) -> (i32, i32) {
    %c0_i32 = arith.constant 0 : i32
    return %arg0, %arg2 : i32, i32
  }
  func.func @transform_1(%arg0: i32, %arg1: i32, %arg2: i32) -> (i32, i32) {
    %c0_i32 = arith.constant 0 : i32
    return %arg2, %arg1 : i32, i32
  }
  func.func @transform_2(%arg0: i32, %arg1: i32, %arg2: i32) -> (i32, i32) {
    %c0_i32 = arith.constant 0 : i32
    %c0_i32_0 = arith.constant 0 : i32
    return %c0_i32, %arg1 : i32, i32
  }
  func.func @transform_3(%arg0: i32, %arg1: i32, %arg2: i32) -> (i32, i32) {
    %c0_i32 = arith.constant 0 : i32
    return %arg0, %arg1 : i32, i32
  }
  func.func @transform_4(%arg0: i32, %arg1: i32, %arg2: i32) -> (i32, i32) {
    %c0_i32 = arith.constant 0 : i32
    return %arg0, %arg1 : i32, i32
  }
}

module attributes {stable_mosaic.version = 11 : i64} {
  func.func @_mm_kernel(%arg0: i32, %arg1: i32, %arg2: i32, %arg3: memref<8x512xbf16, #tpu.memory_space<vmem>>, %arg4: memref<512x256xbf16, #tpu.memory_space<vmem>>, %arg5: memref<1x256xf32, #tpu.memory_space<vmem>>, %arg6: memref<8x256xbf16, #tpu.memory_space<vmem>>, %arg7: memref<8x256xf32, #tpu.memory_space<vmem>>) attributes {dimension_semantics = [#tpu.dimension_semantics<parallel>, #tpu.dimension_semantics<parallel>, #tpu.dimension_semantics<arbitrary>], iteration_bounds = array<i64: 1, 2, 9>, scalar_prefetch = 0 : i64, scratch_operands = 1 : i64, tpu.core_type = #tpu.core_type<tc>, window_params = [{transform_indices = @transform_0, window_bounds = array<i64: 8, 512>}, {transform_indices = @transform_1, window_bounds = array<i64: 512, 256>}, {transform_indices = @transform_2, window_bounds = array<i64: 1, 256>}, {transform_indices = @transform_3, window_bounds = array<i64: 8, 256>}]} {
    %c0_i32 = arith.constant 0 : i32
    %0 = arith.cmpi eq, %arg2, %c0_i32 : i32
    %1 = arith.extui %0 : i1 to i32
    %c0_i32_0 = arith.constant 0 : i32
    %2 = arith.cmpi ne, %1, %c0_i32_0 : i32
    scf.if %2 {
      %cst_9 = arith.constant 0.000000e+00 : f32
      %12 = vector.broadcast %cst_9 : f32 to vector<8x256xf32>
      %c0_10 = arith.constant 0 : index
      %c0_11 = arith.constant 0 : index
      %13 = vector.load %arg7[%c0_10, %c0_11] : memref<8x256xf32, #tpu.memory_space<vmem>>, vector<8x256xf32>
      tpu.vector_store %arg7[%c0_10, %c0_11], %12 {strides = array<i32>} : memref<8x256xf32, #tpu.memory_space<vmem>>, vector<8x256xf32>,
    } else {
    }
    %c0 = arith.constant 0 : index
    %c0_1 = arith.constant 0 : index
    %3 = vector.load %arg7[%c0, %c0_1] : memref<8x256xf32, #tpu.memory_space<vmem>>, vector<8x256xf32>
    %c0_2 = arith.constant 0 : index
    %c0_3 = arith.constant 0 : index
    %4 = vector.load %arg3[%c0_2, %c0_3] : memref<8x512xbf16, #tpu.memory_space<vmem>>, vector<8x512xbf16>
    %c0_4 = arith.constant 0 : index
    %c0_5 = arith.constant 0 : index
    %5 = vector.load %arg4[%c0_4, %c0_5] : memref<512x256xbf16, #tpu.memory_space<vmem>>, vector<512x256xbf16>
    %cst = arith.constant dense<0.000000e+00> : vector<8x256xf32>
    %6 = tpu.matmul %4, %5, %cst {dimension_numbers = #tpu.dot_dimension_numbers<[1], [0], [0], [1], [0, 0, 1, 1], [], []>} : vector<8x512xbf16>, vector<512x256xbf16>, vector<8x256xf32> -> vector<8x256xf32>
    %7 = arith.addf %3, %6 : vector<8x256xf32>
    %c0_6 = arith.constant 0 : index
    %c0_7 = arith.constant 0 : index
    %8 = vector.load %arg7[%c0_6, %c0_7] : memref<8x256xf32, #tpu.memory_space<vmem>>, vector<8x256xf32>
    tpu.vector_store %arg7[%c0_6, %c0_7], %7 {strides = array<i32>} : memref<8x256xf32, #tpu.memory_space<vmem>>, vector<8x256xf32>,
    %c8_i32 = arith.constant 8 : i32
    %9 = arith.cmpi eq, %arg2, %c8_i32 : i32
    %10 = arith.extui %9 : i1 to i32
    %c0_i32_8 = arith.constant 0 : i32
    %11 = arith.cmpi ne, %10, %c0_i32_8 : i32
    scf.if %11 {
      %c0_9 = arith.constant 0 : index
      %c0_10 = arith.constant 0 : index
      %12 = vector.load %arg7[%c0_9, %c0_10] : memref<8x256xf32, #tpu.memory_space<vmem>>, vector<8x256xf32>
      %c0_11 = arith.constant 0 : index
      %c0_12 = arith.constant 0 : index
      %13 = vector.load %arg5[%c0_11, %c0_12] : memref<1x256xf32, #tpu.memory_space<vmem>>, vector<1x256xf32>
      %14 = vector.broadcast %13 : vector<1x256xf32> to vector<8x256xf32>
      %15 = arith.addf %12, %14 : vector<8x256xf32>
      %cst_13 = arith.constant 0.000000e+00 : f32
      %16 = vector.broadcast %cst_13 : f32 to vector<8x256xf32>
      %17 = arith.maximumf %15, %16 : vector<8x256xf32>
      %18 = arith.truncf %17 : vector<8x256xf32> to vector<8x256xbf16>
      %c0_14 = arith.constant 0 : index
      %c0_15 = arith.constant 0 : index
      %19 = vector.load %arg6[%c0_14, %c0_15] : memref<8x256xbf16, #tpu.memory_space<vmem>>, vector<8x256xbf16>
      tpu.vector_store %arg6[%c0_14, %c0_15], %18 {strides = array<i32>} : memref<8x256xbf16, #tpu.memory_space<vmem>>, vector<8x256xbf16>,
    } else {
    }
    return
  }
  func.func @transform_0(%arg0: i32, %arg1: i32, %arg2: i32) -> (i32, i32) {
    %c0_i32 = arith.constant 0 : i32
    return %arg0, %arg2 : i32, i32
  }
  func.func @transform_1(%arg0: i32, %arg1: i32, %arg2: i32) -> (i32, i32) {
    %c0_i32 = arith.constant 0 : i32
    return %arg2, %arg1 : i32, i32
  }
  func.func @transform_2(%arg0: i32, %arg1: i32, %arg2: i32) -> (i32, i32) {
    %c0_i32 = arith.constant 0 : i32
    %c0_i32_0 = arith.constant 0 : i32
    return %c0_i32, %arg1 : i32, i32
  }
  func.func @transform_3(%arg0: i32, %arg1: i32, %arg2: i32) -> (i32, i32) {
    %c0_i32 = arith.constant 0 : i32
    return %arg0, %arg1 : i32, i32
  }
}

module attributes {stable_mosaic.version = 11 : i64} {
  func.func @_pool_fc_sigmoid_kernel(%arg0: memref<2x1x512xbf16, #tpu.memory_space<vmem>>, %arg1: memref<512x128xbf16, #tpu.memory_space<vmem>>, %arg2: memref<1x128xf32, #tpu.memory_space<vmem>>, %arg3: memref<2x128xf32, #tpu.memory_space<vmem>>) attributes {dimension_semantics = [], scalar_prefetch = 0 : i64, scratch_operands = 0 : i64, tpu.core_type = #tpu.core_type<tc>} {
    %c0 = arith.constant 0 : index
    %c0_0 = arith.constant 0 : index
    %c0_1 = arith.constant 0 : index
    %0 = vector.load %arg0[%c0, %c0_0, %c0_1] : memref<2x1x512xbf16, #tpu.memory_space<vmem>>, vector<2x1x512xbf16>
    %1 = arith.extf %0 : vector<2x1x512xbf16> to vector<2x1x512xf32>
    %cst = arith.constant dense<0.000000e+00> : vector<2x512xf32>
    %2 = vector.multi_reduction <add>, %1, %cst [1] : vector<2x1x512xf32> to vector<2x512xf32>
    %cst_2 = arith.constant 1.000000e+00 : f32
    %3 = vector.broadcast %cst_2 : f32 to vector<2x512xf32>
    %4 = arith.mulf %2, %3 : vector<2x512xf32>
    %5 = arith.truncf %4 : vector<2x512xf32> to vector<2x512xbf16>
    %c0_3 = arith.constant 0 : index
    %c0_4 = arith.constant 0 : index
    %6 = vector.load %arg1[%c0_3, %c0_4] : memref<512x128xbf16, #tpu.memory_space<vmem>>, vector<512x128xbf16>
    %cst_5 = arith.constant dense<0.000000e+00> : vector<2x128xf32>
    %7 = tpu.matmul %5, %6, %cst_5 {dimension_numbers = #tpu.dot_dimension_numbers<[1], [0], [0], [1], [0, 0, 1, 1], [], []>} : vector<2x512xbf16>, vector<512x128xbf16>, vector<2x128xf32> -> vector<2x128xf32>
    %c0_6 = arith.constant 0 : index
    %c0_7 = arith.constant 0 : index
    %8 = vector.load %arg2[%c0_6, %c0_7] : memref<1x128xf32, #tpu.memory_space<vmem>>, vector<1x128xf32>
    %9 = vector.broadcast %8 : vector<1x128xf32> to vector<2x128xf32>
    %10 = arith.addf %7, %9 : vector<2x128xf32>
    %11 = arith.negf %10 : vector<2x128xf32>
    %12 = math.exp %11 : vector<2x128xf32>
    %cst_8 = arith.constant 1.000000e+00 : f32
    %13 = vector.broadcast %cst_8 : f32 to vector<2x128xf32>
    %14 = arith.addf %13, %12 : vector<2x128xf32>
    %15 = arith.divf %13, %14 : vector<2x128xf32>
    %c0_9 = arith.constant 0 : index
    %c0_10 = arith.constant 0 : index
    %16 = vector.load %arg3[%c0_9, %c0_10] : memref<2x128xf32, #tpu.memory_space<vmem>>, vector<2x128xf32>
    tpu.vector_store %arg3[%c0_9, %c0_10], %15 {strides = array<i32>} : memref<2x128xf32, #tpu.memory_space<vmem>>, vector<2x128xf32>,
    return
  }
}

</mosaic_0001>

<bundles_post_ra>
// kernel: resnet_forward.24
= control target key start
LH: loop header
LB: loop body
LE: loop exit
PB: predicated region body
PF: predicated region fallthrough
CT: control target
= control target key end

     0   :  { %s433_s0 = inlined_call_operand.vmem [shape: bf16[56,128], index: 0, kind: input, shape index: {}]   ;;  %s434_s1 = inlined_call_operand.vmem [shape: bf16[56,128], index: 1, kind: input, shape index: {}]   ;;  %s435_s2 = inlined_call_operand.vmem [shape: bf16[56,128], index: 2, kind: input, shape index: {}]   ;;  %s436_s3 = inlined_call_operand.vmem [shape: bf16[56,128], index: 3, kind: input, shape index: {}]   ;;  %s437_s4 = inlined_call_operand.vmem [shape: bf16[56,128], index: 4, kind: input, shape index: {}]   ;;  %s438_s5 = inlined_call_operand.vmem [shape: bf16[56,128], index: 5, kind: input, shape index: {}]   ;;  %s439_s6 = inlined_call_operand.vmem [shape: bf16[56,128], index: 6, kind: input, shape index: {}]   ;;  %s440_s7 = inlined_call_operand.vmem [shape: bf16[56,128], index: 7, kind: input, shape index: {}]   ;;  %s441_s8 = inlined_call_operand.vmem [shape: bf16[56,128], index: 8, kind: input, shape index: {}]   ;;  %s442_s9 = inlined_call_operand.vmem [shape: bf16[56,128], index: 9, kind: output, shape index: {}]  }
   0x1   :  { %v32_v0 = vld [vmem:[%s433_s0] sm:$0xf]  ;;  %v33_v1 = vld [vmem:[%s433_s0 + $0x4] sm:$0xf]  ;;  %v34_v18 = vld [vmem:[%s433_s0 + $0x8] sm:$0xf] }
   0x2   :  { %v39_v2 = vld [vmem:[%s434_s1] sm:$0xf]  ;;  %v40_v3 = vld [vmem:[%s434_s1 + $0x4] sm:$0xf]  ;;  %v35_v19 = vld [vmem:[%s433_s0 + $0xc] sm:$0xf] }
   0x3   :  { %v46_v4 = vmax.bf16 %v39_v2, %v32_v0  ;;  %v53_v5 = vld [vmem:[%s435_s2] sm:$0xf]  ;;  %v54_v6 = vld [vmem:[%s435_s2 + $0x4] sm:$0xf]  ;;  %v47_v7 = vmax.bf16 %v40_v3, %v33_v1  ;;  %v41_v20 = vld [vmem:[%s434_s1 + $0x8] sm:$0xf] }
   0x4   :  { %v67_v8 = vld [vmem:[%s436_s3] sm:$0xf]  ;;  %v68_v10 = vld [vmem:[%s436_s3 + $0x4] sm:$0xf]  ;;  %v42_v22 = vld [vmem:[%s434_s1 + $0xc] sm:$0xf]  ;;  %v48_v23 = vmax.bf16 %v41_v20, %v34_v18 }
   0x5   :  { %v60_v9 = vmax.bf16 %v53_v5, %v46_v4  ;;  %v61_v11 = vmax.bf16 %v54_v6, %v47_v7  ;;  %v81_v12 = vld [vmem:[%s437_s4] sm:$0xf]  ;;  %v82_v14 = vld [vmem:[%s437_s4 + $0x4] sm:$0xf]  ;;  %v55_v24 = vld [vmem:[%s435_s2 + $0x8] sm:$0xf]  ;;  %v49_v28 = vmax.bf16 %v42_v22, %v35_v19 }
   0x6   :  { %v95_v15 = vld [vmem:[%s438_s5] sm:$0xf]  ;;  %v96_v16 = vld [vmem:[%s438_s5 + $0x4] sm:$0xf]  ;;  %v56_v25 = vld [vmem:[%s435_s2 + $0xc] sm:$0xf]  ;;  %v62_v33 = vmax.bf16 %v55_v24, %v48_v23 }
   0x7   :  { %v74_v13 = vmax.bf16 %v67_v8, %v60_v9  ;;  %v75_v17 = vmax.bf16 %v68_v10, %v61_v11  ;;  %v109_v27 = vld [vmem:[%s439_s6] sm:$0xf]  ;;  %v69_v29 = vld [vmem:[%s436_s3 + $0x8] sm:$0xf]  ;;  %v110_v31 = vld [vmem:[%s439_s6 + $0x4] sm:$0xf]  ;;  %v63_v38 = vmax.bf16 %v56_v25, %v49_v28 }
   0x8   :  { %v123_v32 = vld [vmem:[%s440_s7] sm:$0xf]  ;;  %v70_v34 = vld [vmem:[%s436_s3 + $0xc] sm:$0xf]  ;;  %v124_v36 = vld [vmem:[%s440_s7 + $0x4] sm:$0xf]  ;;  %v76_v42 = vmax.bf16 %v69_v29, %v62_v33 }
   0x9   :  { %v88_v21 = vmax.bf16 %v81_v12, %v74_v13  ;;  %v89_v26 = vmax.bf16 %v82_v14, %v75_v17  ;;  %v137_v37 = vld [vmem:[%s441_s8] sm:$0xf]  ;;  %v83_v39 = vld [vmem:[%s437_s4 + $0x8] sm:$0xf]  ;;  %v138_v41 = vld [vmem:[%s441_s8 + $0x4] sm:$0xf]  ;;  %v77_v47 = vmax.bf16 %v70_v34, %v63_v38 }
   0xa   :  { %v84_v43 = vld [vmem:[%s437_s4 + $0xc] sm:$0xf]  ;;  %v97_v44 = vld [vmem:[%s438_s5 + $0x8] sm:$0xf]  ;;  %v36_v48 = vld [vmem:[%s433_s0 + $0x10] sm:$0xf]  ;;  %v90_v52 = vmax.bf16 %v83_v39, %v76_v42 }
   0xb   :  { %v102_v30 = vmax.bf16 %v95_v15, %v88_v21  ;;  %v103_v35 = vmax.bf16 %v96_v16, %v89_v26  ;;  %v98_v45 = vld [vmem:[%s438_s5 + $0xc] sm:$0xf]  ;;  %v37_v49 = vld [vmem:[%s433_s0 + $0x14] sm:$0xf]  ;;  %v43_v50 = vld [vmem:[%s434_s1 + $0x10] sm:$0xf]  ;;  %v91_v58 = vmax.bf16 %v84_v43, %v77_v47 }
   0xc   :  { %v44_v53 = vld [vmem:[%s434_s1 + $0x14] sm:$0xf]  ;;  %v50_v54 = vmax.bf16 %v43_v50, %v36_v48  ;;  %v57_v55 = vld [vmem:[%s435_s2 + $0x10] sm:$0xf]  ;;  %v111_v59 = vld [vmem:[%s439_s6 + $0x8] sm:$0xf]  ;;  %v104_v63 = vmax.bf16 %v97_v44, %v90_v52 }
   0xd   :  { %v116_v40 = vmax.bf16 %v109_v27, %v102_v30  ;;  %v117_v46 = vmax.bf16 %v110_v31, %v103_v35  ;;  %v58_v56 = vld [vmem:[%s435_s2 + $0x14] sm:$0xf]  ;;  %v51_v60 = vmax.bf16 %v44_v53, %v37_v49  ;;  %v71_v61 = vld [vmem:[%s436_s3 + $0x10] sm:$0xf]  ;;  %v112_v0 = vld [vmem:[%s439_s6 + $0xc] sm:$0xf]  ;;  %v105_v4 = vmax.bf16 %v98_v45, %v91_v58 }
   0xe   :  { %v64_v1 = vmax.bf16 %v57_v55, %v50_v54  ;;  %v72_v2 = vld [vmem:[%s436_s3 + $0x14] sm:$0xf]  ;;  %v125_v5 = vld [vmem:[%s440_s7 + $0x8] sm:$0xf]  ;;  %v126_v6 = vld [vmem:[%s440_s7 + $0xc] sm:$0xf]  ;;  %v118_v9 = vmax.bf16 %v111_v59, %v104_v63 }
   0xf   :  { %v130_v51 = vmax.bf16 %v123_v32, %v116_v40  ;;  %v131_v57 = vmax.bf16 %v124_v36, %v117_v46  ;;  %v65_v7 = vmax.bf16 %v58_v56, %v51_v60  ;;  %v85_v8 = vld [vmem:[%s437_s4 + $0x10] sm:$0xf]  ;;  %v139_v10 = vld [vmem:[%s441_s8 + $0x8] sm:$0xf]  ;;  %v86_v12 = vld [vmem:[%s437_s4 + $0x14] sm:$0xf]  ;;  %v119_v15 = vmax.bf16 %v112_v0, %v105_v4 }
  0x10   :  { %v78_v11 = vmax.bf16 %v71_v61, %v64_v1  ;;  %v99_v13 = vld [vmem:[%s438_s5 + $0x10] sm:$0xf]  ;;  %v38_v17 = vld [vmem:[%s433_s0 + $0x18] sm:$0xf]  ;;  %v132_v20 = vmax.bf16 %v125_v5, %v118_v9  ;;  %v140_v21 = vld [vmem:[%s441_s8 + $0xc] sm:$0xf] }
  0x11   :  { %v144_v62 = vmax.bf16 %v137_v37, %v130_v51  ;;  %v145_v3 = vmax.bf16 %v138_v41, %v131_v57  ;;  %v79_v16 = vmax.bf16 %v72_v2, %v65_v7  ;;  %v45_v18 = vld [vmem:[%s434_s1 + $0x18] sm:$0xf]  ;;  %v100_v23 = vld [vmem:[%s438_s5 + $0x14] sm:$0xf]  ;;  %v133_v25 = vmax.bf16 %v126_v6, %v119_v15  ;;  %v113_v27 = vld [vmem:[%s439_s6 + $0x10] sm:$0xf] }
  0x12   :  { %v59_v19 = vld [vmem:[%s435_s2 + $0x18] sm:$0xf]  ;;  %v92_v22 = vmax.bf16 %v85_v8, %v78_v11  ;;  %v52_v24 = vmax.bf16 %v45_v18, %v38_v17  ;;  %v146_v29 = vmax.bf16 %v139_v10, %v132_v20  ;;  %v114_v31 = vld [vmem:[%s439_s6 + $0x14] sm:$0xf]  ;;  %v127_v35 = vld [vmem:[%s440_s7 + $0x10] sm:$0xf] }
  0x13   :  { %v177_v14 = vcombine.low %v144_v62, %v145_v3  ;;  %v93_v26 = vmax.bf16 %v86_v12, %v79_v16  ;;  %v73_v28 = vld [vmem:[%s436_s3 + $0x18] sm:$0xf]  ;;  %v147_v33 = vmax.bf16 %v140_v21, %v133_v25  ;;  %v128_v38 = vld [vmem:[%s440_s7 + $0x14] sm:$0xf]  ;;  %v141_v42 = vld [vmem:[%s441_s8 + $0x10] sm:$0xf] }
  0x14   :  { %v106_v30 = vmax.bf16 %v99_v13, %v92_v22  ;;  %v66_v32 = vmax.bf16 %v59_v19, %v52_v24  ;;  %v87_v36 = vld [vmem:[%s437_s4 + $0x18] sm:$0xf]  ;;  %v142_v45 = vld [vmem:[%s441_s8 + $0x14] sm:$0xf] }
  0x15   :  { %166 = vst [vmem:[%s442_s9] sm:$0xff] %v177_v14   ;;  %v107_v34 = vmax.bf16 %v100_v23, %v93_v26  ;;  %v178_v40 = vcombine.low %v146_v29, %v147_v33  ;;  %v101_v43 = vld [vmem:[%s438_s5 + $0x18] sm:$0xf] }
  0x16   :  { %v120_v37 = vmax.bf16 %v113_v27, %v106_v30  ;;  %v80_v39 = vmax.bf16 %v73_v28, %v66_v32  ;;  %v115_v48 = vld [vmem:[%s439_s6 + $0x18] sm:$0xf] }
  0x17   :  { %v121_v41 = vmax.bf16 %v114_v31, %v107_v34  ;;  %179 = vst [vmem:[%s442_s9 + $0x8] sm:$0xff] %v178_v40   ;;  %v129_v52 = vld [vmem:[%s440_s7 + $0x18] sm:$0xf] }
  0x18   :  { %v134_v44 = vmax.bf16 %v127_v35, %v120_v37  ;;  %v94_v46 = vmax.bf16 %v87_v36, %v80_v39  ;;  %v143_v55 = vld [vmem:[%s441_s8 + $0x18] sm:$0xf] }
  0x19   :  { %v135_v47 = vmax.bf16 %v128_v38, %v121_v41 }
  0x1a   :  { %v148_v49 = vmax.bf16 %v141_v42, %v134_v44  ;;  %v108_v50 = vmax.bf16 %v101_v43, %v94_v46 }
  0x1b   :  { %v149_v51 = vmax.bf16 %v142_v45, %v135_v47 }
  0x1c   :  { %v122_v53 = vmax.bf16 %v115_v48, %v108_v50 }
  0x1d   :  { %v180_v54 = vcombine.low %v148_v49, %v149_v51 }
  0x1e   :  { %v136_v56 = vmax.bf16 %v129_v52, %v122_v53 }
  0x1f   :  { %181 = vst [vmem:[%s442_s9 + $0x10] sm:$0xff] %v180_v54  }
  0x20   :  { %v150_v57 = vmax.bf16 %v143_v55, %v136_v56 }
  0x22   :  { %157 = vst [vmem:[%s442_s9 + $0x18] sm:$0xf] %v150_v57 }

// kernel: resnet_forward.23
= control target key start
LH: loop header
LB: loop body
LE: loop exit
PB: predicated region body
PF: predicated region fallthrough
CT: control target
= control target key end

     0   :  { %8 = vsyncpa [#allocation4], 0  ;;  %s884_s12 = smov [#allocation3]   ;;  %s1045_s0 = inlined_call_operand.vmem [shape: bf16[200,9], index: 0, kind: input, shape index: {}]   ;;  %s1046_s1 = inlined_call_operand.vmem [shape: bf16[9,128], index: 1, kind: input, shape index: {}]   ;;  %s1047_s2 = inlined_call_operand.hbm [shape: f32[1,128], index: 2, kind: input, shape index: {}]   ;;  %s1048_s3 = inlined_call_operand.vmem [shape: bf16[200,128], index: 3, kind: output, shape index: {}]  }
   0x1   :  { %s19_s13 = sshll.u32 %s884_s12, 4  ;;  %s20_s13 = int_to_ptr.vmem [resolvable:$true] %s19_s13 }
   0x2   :  { %s870_s14 = scalar_lea.vmem %s20_s13, 16  ;;  %s874_s15 = scalar_lea.vmem %s20_s13, 32 }
   0x3   :  { %p871_p0 = scmp.ne.s32.totalorder %s20_s13, %s870_s14  ;;  %p875_p1 = scmp.lt.s32.totalorder %s20_s13, %s20_s13 }
   0x4   :  { %p876_p2 = scmp.lt.s32.totalorder %s874_s15, %s870_s14 }
   0x6   :  { %p877_p3 = por %p876_p2, %p875_p1 }
   0x8   :  { %p878_p4 = pnand %p877_p3, %p871_p0 }
   0xa   :  { %881 = shalt.err (!%p878_p4)
}
   0xb   :  { %22 = dma.hbm_to_vmem [thread:$0]  %s1047_s2, 16, %s20_s13, [#allocation4]  }
   0xc   :  { %882 = dma.done.wait [#allocation4], 16  }
   0xd   :  { %883 = vsyncadd [#allocation4], 4294967280  ;;  %vm216_vm0 = vcmask 1043456   ;;  %v885_v0 = vmov 0.0   ;;  %vm886_vm1 = vmmov 0   ;;  %vm217_vm2 = vcmask 1044480  }
   0xe   :  { %788 = vmatprep.subr.bf16.mxu0 %v885_v0  ;;  %842 = vmatprep.subr.bf16.mxu1 %v885_v0  ;;  %v887_v1 = vmov 65535   ;;  %v848_v4 = vld [vmem:[%s1046_s1] sm:$0x1f]   ;;  %v850_v7 = vld [vmem:[%s1045_s0 + $0x38] sm:$0xff]   ;;  %vm176_vm3 = vcmask 72704   ;;  %v851_v8 = vld [vmem:[%s1045_s0 + $0x8] sm:$0xff]  }
   0xf   :  { %790 = vmatprep.mubr.msk.bf16.mxu0 %vm886_vm1, %v885_v0  ;;  %818 = vmatprep.mubr.msk.bf16.mxu1 %vm886_vm1, %v885_v0  ;;  %v218_v2 = vsel %vm216_vm0, 4294967295, %v887_v1  ;;  %v849_v6 = vld [vmem:[%s1045_s0] sm:$0xff]   ;;  %v853_v10 = vld [vmem:[%s1045_s0 + $0x10] sm:$0xff]   ;;  %v854_v11 = vld [vmem:[%s1045_s0 + $0x48] sm:$0xff]  }
  0x10   :  { %v219_v3 = vsel %vm217_vm2, %v218_v2, 0  ;;  %v852_v9 = vld [vmem:[%s1045_s0 + $0x40] sm:$0xff]   ;;  %v855_v12 = vld [vmem:[%s1045_s0 + $0x18] sm:$0xff]   ;;  %v856_v13 = vld [vmem:[%s1045_s0 + $0x50] sm:$0xff]  }
  0x11   :  { %v221_v5 = vand.u32 %v848_v4, %v219_v3  ;;  %v857_v14 = vld [vmem:[%s1045_s0 + $0x20] sm:$0xff]   ;;  %v858_v15 = vld [vmem:[%s1045_s0 + $0x58] sm:$0xff]   ;;  %v859_v16 = vld [vmem:[%s1045_s0 + $0x28] sm:$0xff]  }
  0x12   :  { %v860_v17 = vld [vmem:[%s1045_s0 + $0x60] ss:$0 sps:$4 sm:$0xff]   ;;  %v861_v18 = vld [vmem:[%s1045_s0 + $0x30] sm:$0xff]  }
  0x13   :  { %789 = vmatpush3.bf16.msra.mxu0 %v221_v5  ;;  %843 = vmatpush3.bf16.msra.mxu1 %v221_v5  ;;  %v979_v20 = vld [vmem:[#allocation3] ss:$0 sm:$0xff] }
  0x16   :  { %791 = vmatmul.mubr.msk.bf16.vlgmr.msra.gmra.mxu0 %vm176_vm3, %v849_v6  ;;  %819 = vmatmul.mubr.msk.bf16.vlgmr.msra.gmra.mxu1 %vm176_vm3, %v850_v7 }
  0x17   :  { %794 = vmatprep.mubr.msk.bf16.mxu0 %vm886_vm1, %v885_v0  ;;  %822 = vmatprep.mubr.msk.bf16.mxu1 %vm886_vm1, %v885_v0 }
  0x1e   :  { %795 = vmatmul.mubr.msk.bf16.gmra.mxu0 %vm176_vm3, %v851_v8  ;;  %823 = vmatmul.mubr.msk.bf16.gmra.mxu1 %vm176_vm3, %v852_v9 }
  0x1f   :  { %798 = vmatprep.mubr.msk.bf16.mxu0 %vm886_vm1, %v885_v0  ;;  %826 = vmatprep.mubr.msk.bf16.mxu1 %vm886_vm1, %v885_v0 }
  0x26   :  { %799 = vmatmul.mubr.msk.bf16.gmra.mxu0 %vm176_vm3, %v853_v10  ;;  %827 = vmatmul.mubr.msk.bf16.gmra.mxu1 %vm176_vm3, %v854_v11 }
  0x27   :  { %802 = vmatprep.mubr.msk.bf16.mxu0 %vm886_vm1, %v885_v0  ;;  %830 = vmatprep.mubr.msk.bf16.mxu1 %vm886_vm1, %v885_v0 }
  0x2e   :  { %803 = vmatmul.mubr.msk.bf16.gmra.mxu0 %vm176_vm3, %v855_v12  ;;  %831 = vmatmul.mubr.msk.bf16.gmra.mxu1 %vm176_vm3, %v856_v13 }
  0x2f   :  { %806 = vmatprep.mubr.msk.bf16.mxu0 %vm886_vm1, %v885_v0  ;;  %834 = vmatprep.mubr.msk.bf16.mxu1 %vm886_vm1, %v885_v0 }
  0x36   :  { %807 = vmatmul.mubr.msk.bf16.gmra.mxu0 %vm176_vm3, %v857_v14  ;;  %835 = vmatmul.mubr.msk.bf16.gmra.mxu1 %vm176_vm3, %v858_v15 }
  0x37   :  { %810 = vmatprep.mubr.msk.bf16.mxu0 %vm886_vm1, %v885_v0  ;;  %838 = vmatprep.mubr.msk.bf16.mxu1 %vm886_vm1, %v885_v0 }
  0x3e   :  { %811 = vmatmul.mubr.msk.bf16.gmra.mxu0 %vm176_vm3, %v859_v16  ;;  %839 = vmatmul.mubr.msk.bf16.gmra.mxu1 %vm176_vm3, %v860_v17 }
  0x3f   :  { %814 = vmatprep.mubr.msk.bf16.mxu0 %vm886_vm1, %v885_v0 }
  0x46   :  { %815 = vmatmul.mubr.msk.bf16.gmra.mxu0 %vm176_vm3, %v861_v18 }
  0xd6   :  { %v257_v19 = vpop.f32.mrf.mxu0  ;;  %v313_v21 = vpop.f32.mrf.mxu1 }
  0xd7   :  { %v458_v22 = vadd.f32 %v979_v20, %v313_v21  ;;  %v444_v25 = vadd.f32 %v979_v20, %v257_v19 }
  0xd8   :  { %v792_v23 = vpop.f32.mrf.mxu0  ;;  %v820_v24 = vpop.f32.mrf.mxu1 }
  0xd9   :  { %v483_v29 = vmax.f32 %v458_v22, 0.0  ;;  %v469_v33 = vmax.f32 %v444_v25, 0.0 }
  0xda   :  { %v260_v26 = vpop.f32.mrf.mxu0  ;;  %v316_v27 = vpop.f32.mrf.mxu1 }
  0xdb   :  { %v445_v28 = vadd.f32 %v979_v20, %v260_v26  ;;  %v459_v30 = vadd.f32 %v979_v20, %v316_v27 }
  0xdc   :  { %v793_v31 = vpop.f32.mrf.mxu0  ;;  %v821_v32 = vpop.f32.mrf.mxu1 }
  0xdd   :  { %v470_v34 = vmax.f32 %v445_v28, 0.0  ;;  %v484_v35 = vmax.f32 %v459_v30, 0.0 }
  0xde   :  { %v265_v36 = vpop.f32.mrf.mxu0  ;;  %v321_v37 = vpop.f32.mrf.mxu1 }
  0xdf   :  { %v706_v38 = vpack.c.bf16 %v470_v34, %v469_v33  ;;  %v741_v39 = vpack.c.bf16 %v484_v35, %v483_v29  ;;  %v460_v40 = vadd.f32 %v979_v20, %v321_v37  ;;  %v446_v43 = vadd.f32 %v979_v20, %v265_v36 }
  0xe0   :  { %v796_v41 = vpop.f32.mrf.mxu0  ;;  %v824_v42 = vpop.f32.mrf.mxu1 }
  0xe1   :  { %707 = vst [vmem:[%s1048_s3] sm:$0xff] %v706_v38   ;;  %769 = vst [vmem:[%s1048_s3 + $0x38] sm:$0xff] %v741_v39   ;;  %v485_v47 = vmax.f32 %v460_v40, 0.0  ;;  %v471_v51 = vmax.f32 %v446_v43, 0.0 }
  0xe2   :  { %v268_v44 = vpop.f32.mrf.mxu0  ;;  %v324_v45 = vpop.f32.mrf.mxu1 }
  0xe3   :  { %v447_v46 = vadd.f32 %v979_v20, %v268_v44  ;;  %v461_v48 = vadd.f32 %v979_v20, %v324_v45 }
  0xe4   :  { %v797_v49 = vpop.f32.mrf.mxu0  ;;  %v825_v50 = vpop.f32.mrf.mxu1 }
  0xe5   :  { %v472_v52 = vmax.f32 %v447_v46, 0.0  ;;  %v486_v53 = vmax.f32 %v461_v48, 0.0 }
  0xe6   :  { %v273_v54 = vpop.f32.mrf.mxu0  ;;  %v329_v55 = vpop.f32.mrf.mxu1 }
  0xe7   :  { %v711_v56 = vpack.c.bf16 %v472_v52, %v471_v51  ;;  %v746_v57 = vpack.c.bf16 %v486_v53, %v485_v47  ;;  %v462_v58 = vadd.f32 %v979_v20, %v329_v55  ;;  %v448_v61 = vadd.f32 %v979_v20, %v273_v54 }
  0xe8   :  { %v800_v59 = vpop.f32.mrf.mxu0  ;;  %v828_v60 = vpop.f32.mrf.mxu1 }
  0xe9   :  { %763 = vst [vmem:[%s1048_s3 + $0x8] sm:$0xff] %v711_v56   ;;  %770 = vst [vmem:[%s1048_s3 + $0x40] sm:$0xff] %v746_v57   ;;  %v487_v1 = vmax.f32 %v462_v58, 0.0  ;;  %v473_v5 = vmax.f32 %v448_v61, 0.0 }
  0xea   :  { %v276_v62 = vpop.f32.mrf.mxu0  ;;  %v332_v63 = vpop.f32.mrf.mxu1 }
  0xeb   :  { %v449_v0 = vadd.f32 %v979_v20, %v276_v62  ;;  %v463_v2 = vadd.f32 %v979_v20, %v332_v63 }
  0xec   :  { %v801_v3 = vpop.f32.mrf.mxu0  ;;  %v829_v4 = vpop.f32.mrf.mxu1 }
  0xed   :  { %v474_v6 = vmax.f32 %v449_v0, 0.0  ;;  %v488_v7 = vmax.f32 %v463_v2, 0.0 }
  0xee   :  { %v281_v8 = vpop.f32.mrf.mxu0  ;;  %v337_v9 = vpop.f32.mrf.mxu1 }
  0xef   :  { %v716_v10 = vpack.c.bf16 %v474_v6, %v473_v5  ;;  %v751_v11 = vpack.c.bf16 %v488_v7, %v487_v1  ;;  %v464_v12 = vadd.f32 %v979_v20, %v337_v9  ;;  %v450_v15 = vadd.f32 %v979_v20, %v281_v8 }
  0xf0   :  { %v804_v13 = vpop.f32.mrf.mxu0  ;;  %v832_v14 = vpop.f32.mrf.mxu1 }
  0xf1   :  { %764 = vst [vmem:[%s1048_s3 + $0x10] sm:$0xff] %v716_v10   ;;  %771 = vst [vmem:[%s1048_s3 + $0x48] sm:$0xff] %v751_v11   ;;  %v489_v19 = vmax.f32 %v464_v12, 0.0  ;;  %v475_v24 = vmax.f32 %v450_v15, 0.0 }
  0xf2   :  { %v284_v16 = vpop.f32.mrf.mxu0  ;;  %v340_v17 = vpop.f32.mrf.mxu1 }
  0xf3   :  { %v451_v18 = vadd.f32 %v979_v20, %v284_v16  ;;  %v465_v21 = vadd.f32 %v979_v20, %v340_v17 }
  0xf4   :  { %v805_v22 = vpop.f32.mrf.mxu0  ;;  %v833_v23 = vpop.f32.mrf.mxu1 }
  0xf5   :  { %v476_v25 = vmax.f32 %v451_v18, 0.0  ;;  %v490_v26 = vmax.f32 %v465_v21, 0.0 }
  0xf6   :  { %v289_v27 = vpop.f32.mrf.mxu0  ;;  %v345_v28 = vpop.f32.mrf.mxu1 }
  0xf7   :  { %v721_v29 = vpack.c.bf16 %v476_v25, %v475_v24  ;;  %v756_v30 = vpack.c.bf16 %v490_v26, %v489_v19  ;;  %v466_v31 = vadd.f32 %v979_v20, %v345_v28  ;;  %v452_v34 = vadd.f32 %v979_v20, %v289_v27 }
  0xf8   :  { %v808_v32 = vpop.f32.mrf.mxu0  ;;  %v836_v33 = vpop.f32.mrf.mxu1 }
  0xf9   :  { %765 = vst [vmem:[%s1048_s3 + $0x18] sm:$0xff] %v721_v29   ;;  %772 = vst [vmem:[%s1048_s3 + $0x50] sm:$0xff] %v756_v30   ;;  %v491_v38 = vmax.f32 %v466_v31, 0.0  ;;  %v477_v42 = vmax.f32 %v452_v34, 0.0 }
  0xfa   :  { %v292_v35 = vpop.f32.mrf.mxu0  ;;  %v348_v36 = vpop.f32.mrf.mxu1 }
  0xfb   :  { %v453_v37 = vadd.f32 %v979_v20, %v292_v35  ;;  %v467_v39 = vadd.f32 %v979_v20, %v348_v36 }
  0xfc   :  { %v809_v40 = vpop.f32.mrf.mxu0  ;;  %v837_v41 = vpop.f32.mrf.mxu1 }
  0xfd   :  { %v478_v43 = vmax.f32 %v453_v37, 0.0  ;;  %v492_v44 = vmax.f32 %v467_v39, 0.0 }
  0xfe   :  { %v297_v45 = vpop.f32.mrf.mxu0  ;;  %v353_v46 = vpop.f32.mrf.mxu1 }
  0xff   :  { %v726_v47 = vpack.c.bf16 %v478_v43, %v477_v42  ;;  %v761_v48 = vpack.c.bf16 %v492_v44, %v491_v38  ;;  %v468_v49 = vadd.f32 %v979_v20, %v353_v46  ;;  %v454_v52 = vadd.f32 %v979_v20, %v297_v45 }
 0x100   :  { %v812_v50 = vpop.f32.mrf.mxu0  ;;  %v840_v51 = vpop.f32.mrf.mxu1 }
 0x101   :  { %766 = vst [vmem:[%s1048_s3 + $0x20] sm:$0xff] %v726_v47   ;;  %773 = vst [vmem:[%s1048_s3 + $0x58] sm:$0xff] %v761_v48   ;;  %v493_v53 = vmax.f32 %v468_v49, 0.0  ;;  %v479_v60 = vmax.f32 %v454_v52, 0.0 }
 0x102   :  { %v300_v54 = vpop.f32.mrf.mxu0  ;;  %v356_v55 = vpop.f32.mrf.mxu1 }
 0x103   :  { %v455_v56 = vadd.f32 %v979_v20, %v300_v54  ;;  %v702_v57 = vpack.c.bf16 %v493_v53, %v493_v53 }
 0x104   :  { %v813_v58 = vpop.f32.mrf.mxu0  ;;  %v841_v59 = vpop.f32.mrf.mxu1 }
 0x105   :  { %v480_v61 = vmax.f32 %v455_v56, 0.0  ;;  %619 = vst [vmem:[%s1048_s3 + $0x60] sm:$0xf] %v702_v57 }
 0x106   :  { %v305_v62 = vpop.f32.mrf.mxu0 }
 0x107   :  { %v731_v63 = vpack.c.bf16 %v480_v61, %v479_v60  ;;  %v456_v1 = vadd.f32 %v979_v20, %v305_v62 }
 0x108   :  { %v816_v0 = vpop.f32.mrf.mxu0 }
 0x109   :  { %767 = vst [vmem:[%s1048_s3 + $0x28] sm:$0xff] %v731_v63   ;;  %v481_v5 = vmax.f32 %v456_v1, 0.0 }
 0x10a   :  { %v308_v2 = vpop.f32.mrf.mxu0 }
 0x10b   :  { %v457_v3 = vadd.f32 %v979_v20, %v308_v2 }
 0x10c   :  { %v817_v4 = vpop.f32.mrf.mxu0 }
 0x10d   :  { %v482_v6 = vmax.f32 %v457_v3, 0.0 }
 0x10f   :  { %v736_v7 = vpack.c.bf16 %v482_v6, %v481_v5 }
 0x111   :  { %768 = vst [vmem:[%s1048_s3 + $0x30] sm:$0xff] %v736_v7  }
 0x112   :  { %624 = vsyncpa [#allocation4], 1 }

// kernel: resnet_forward.26
= control target key start
LH: loop header
LB: loop body
LE: loop exit
PB: predicated region body
PF: predicated region fallthrough
CT: control target
= control target key end

     0   :  { %s447_s1 = inlined_call_operand.vmem [shape: bf16[128,128], index: 1, kind: input, shape index: {}]   ;;  %s448_s0 = inlined_call_operand.vmem [shape: bf16[56,128], index: 0, kind: input, shape index: {}]   ;;  %s449_s2 = inlined_call_operand.vmem [shape: f32[1,128], index: 2, kind: input, shape index: {}]   ;;  %s450_s3 = inlined_call_operand.vmem [shape: bf16[56,128], index: 3, kind: output, shape index: {}]  }
   0x1   :  { %v364_v0 = vld [vmem:[%s447_s1 + $0x38] sm:$0xff]   ;;  %v365_v1 = vld [vmem:[%s447_s1 + $0x30] sm:$0xff]   ;;  %v366_v2 = vld [vmem:[%s447_s1 + $0x28] sm:$0xff]  }
   0x2   :  { %324 = vmatprep.subr.bf16.mxu0 %v364_v0  ;;  %348 = vmatprep.subr.bf16.mxu1 %v364_v0  ;;  %v367_v3 = vld [vmem:[%s447_s1 + $0x20] sm:$0xff]   ;;  %v373_v5 = vld [vmem:[%s448_s0 + $0x10] sm:$0xff]   ;;  %v368_v6 = vld [vmem:[%s447_s1 + $0x18] sm:$0xff]  }
   0x3   :  { %325 = vmatpush3.bf16.msra.mxu0 %v364_v0  ;;  %356 = vmatpush3.bf16.msra.mxu1 %v364_v0  ;;  %v372_v4 = vld [vmem:[%s448_s0] sm:$0xff]   ;;  %v369_v7 = vld [vmem:[%s447_s1 + $0x10] sm:$0xff]   ;;  %v370_v8 = vld [vmem:[%s447_s1 + $0x8] sm:$0xff]  }
   0x4   :  { %326 = vmatprep.subr.bf16.mxu0 %v365_v1  ;;  %349 = vmatprep.subr.bf16.mxu1 %v365_v1  ;;  %v371_v9 = vld [vmem:[%s447_s1] sm:$0xff]   ;;  %v374_v10 = vld [vmem:[%s448_s0 + $0x8] sm:$0xff]   ;;  %v375_v11 = vld [vmem:[%s448_s0 + $0x18] ss:$0 sps:$4 sm:$0xff]  }
   0x5   :  { %340 = vmatprep.mubr.bf16.mxu0 %v372_v4  ;;  %344 = vmatprep.mubr.bf16.mxu1 %v373_v5  ;;  %v280_v12 = vld [vmem:[%s449_s2] ss:$0 sm:$0xff] }
   0x7   :  { %327 = vmatpush3.bf16.msra.mxu0 %v365_v1  ;;  %357 = vmatpush3.bf16.msra.mxu1 %v365_v1 }
   0x8   :  { %328 = vmatprep.subr.bf16.mxu0 %v366_v2  ;;  %350 = vmatprep.subr.bf16.mxu1 %v366_v2 }
   0xb   :  { %329 = vmatpush3.bf16.msra.mxu0 %v366_v2  ;;  %358 = vmatpush3.bf16.msra.mxu1 %v366_v2 }
   0xc   :  { %330 = vmatprep.subr.bf16.mxu0 %v367_v3  ;;  %351 = vmatprep.subr.bf16.mxu1 %v367_v3 }
   0xf   :  { %331 = vmatpush3.bf16.msra.mxu0 %v367_v3  ;;  %359 = vmatpush3.bf16.msra.mxu1 %v367_v3 }
  0x10   :  { %332 = vmatprep.subr.bf16.mxu0 %v368_v6  ;;  %352 = vmatprep.subr.bf16.mxu1 %v368_v6 }
  0x13   :  { %333 = vmatpush3.bf16.msra.mxu0 %v368_v6  ;;  %360 = vmatpush3.bf16.msra.mxu1 %v368_v6 }
  0x14   :  { %334 = vmatprep.subr.bf16.mxu0 %v369_v7  ;;  %353 = vmatprep.subr.bf16.mxu1 %v369_v7 }
  0x17   :  { %335 = vmatpush3.bf16.msra.mxu0 %v369_v7  ;;  %361 = vmatpush3.bf16.msra.mxu1 %v369_v7 }
  0x18   :  { %336 = vmatprep.subr.bf16.mxu0 %v370_v8  ;;  %354 = vmatprep.subr.bf16.mxu1 %v370_v8 }
  0x1b   :  { %337 = vmatpush3.bf16.msra.mxu0 %v370_v8  ;;  %362 = vmatpush3.bf16.msra.mxu1 %v370_v8 }
  0x1c   :  { %338 = vmatprep.subr.bf16.mxu0 %v371_v9  ;;  %355 = vmatprep.subr.bf16.mxu1 %v371_v9 }
  0x1f   :  { %339 = vmatpush3.bf16.msra.mxu0 %v371_v9  ;;  %363 = vmatpush3.bf16.msra.mxu1 %v371_v9 }
  0x22   :  { %341 = vmatmul.mubr.bf16.vlgmr.msra.gmra.mxu0 %v374_v10  ;;  %345 = vmatmul.mubr.bf16.vlgmr.msra.gmra.mxu1 %v375_v11 }
  0xe2   :  { %v342_v13 = vpop.f32.mrf.mxu0  ;;  %v346_v14 = vpop.f32.mrf.mxu1 }
  0xe3   :  { %v227_v15 = vadd.f32 %v346_v14, %v280_v12  ;;  %v223_v21 = vadd.f32 %v342_v13, %v280_v12 }
  0xe4   :  { %v160_v16 = vpop.f32.mrf.mxu0  ;;  %v176_v17 = vpop.f32.mrf.mxu1 }
  0xe5   :  { %v294_v18 = vpack.c.bf16 %v227_v15, %v227_v15  ;;  %v221_v23 = vadd.f32 %v280_v12, %v160_v16  ;;  %v225_v26 = vadd.f32 %v280_v12, %v176_v17 }
  0xe6   :  { %v343_v19 = vpop.f32.mrf.mxu0  ;;  %v347_v20 = vpop.f32.mrf.mxu1 }
  0xe7   :  { %263 = vst [vmem:[%s450_s3 + $0x18] sm:$0xf] %v294_v18  ;;  %v224_v22 = vadd.f32 %v343_v19, %v280_v12 }
  0xe8   :  { %v163_v24 = vpop.f32.mrf.mxu0  ;;  %v179_v25 = vpop.f32.mrf.mxu1 }
  0xe9   :  { %v303_v27 = vpack.c.bf16 %v224_v22, %v223_v21  ;;  %v222_v28 = vadd.f32 %v280_v12, %v163_v24  ;;  %v226_v29 = vadd.f32 %v280_v12, %v179_v25 }
  0xeb   :  { %310 = vst [vmem:[%s450_s3 + $0x8] sm:$0xff] %v303_v27   ;;  %v298_v30 = vpack.c.bf16 %v222_v28, %v221_v23  ;;  %v308_v31 = vpack.c.bf16 %v226_v29, %v225_v26 }
  0xed   :  { %299 = vst [vmem:[%s450_s3] sm:$0xff] %v298_v30   ;;  %311 = vst [vmem:[%s450_s3 + $0x10] sm:$0xff] %v308_v31  }

// kernel: resnet_forward.27
= control target key start
LH: loop header
LB: loop body
LE: loop exit
PB: predicated region body
PF: predicated region fallthrough
CT: control target
= control target key end

     0   :  { %s1352_s15 = smov 0   ;;  %s1354_s16 = smov 0   ;;  %s1485_s0 = inlined_call_operand.vmem [shape: bf16[56,1152], index: 0, kind: input, shape index: {}]   ;;  %s1486_s1 = inlined_call_operand.vmem [shape: bf16[1152,128], index: 1, kind: input, shape index: {}]   ;;  %s1487_s2 = inlined_call_operand.vmem [shape: f32[1,128], index: 2, kind: input, shape index: {}]   ;;  %s1488_s3 = inlined_call_operand.vmem [shape: bf16[56,128], index: 3, kind: input, shape index: {}]   ;;  %s1489_s4 = inlined_call_operand.vmem [shape: bf16[56,128], index: 4, kind: output, shape index: {}]  }
   0x1   :  { %s1356_s17 = smov 0   ;;  %s1358_s18 = smov 0  }
   0x2   :  { %s1360_s19 = smov 0  }
   0x3 LB: > { %s26_s20 = sadd.s32 1, %s1320_s18  ;;  %p49_p1 = scmp.ne.s32.totalorder %s1312_s16, %s1308_s15  ;;  %s1324_s19 = sphi %s1360_s19, %s14_s19   ;;  %s1320_s18 = sphi %s1358_s18, %s1493_s18   ;;  %s1316_s17 = sphi %s1356_s17, %s1492_s17   ;;  %s1312_s16 = sphi %s1354_s16, %s1491_s16   ;;  %s1308_s15 = sphi %s1352_s15, %s1490_s15  }
   0x4   : > { %p27_p0 = scmp.ge.s32.totalorder %s26_s20, 3  ;;  %p50_p2 = scmp.eq.s32.totalorder %s1324_s19, 0 }
   0x5   : > { %s42_s22 = sadd.s32 1, %s1312_s16  ;;  %p1021_p5 = scmp.ge.s32.totalorder %s1324_s19, 3 }
   0x6   : > { %s1495_s20 = smov (%p27_p0, %s26_s20), 0  ;;  %p51_p3 = por %p50_p2, %p49_p1 }
   0x7   : > { %s38_s21 = ssub.s32 %s1320_s18, %s1495_s20  ;;  %203 = sbr.rel (%p1021_p5) target bundleno = 25 (0x19), region = 24 }
   0x8   : > { %p40_p4 = scmp.eq.s32.totalorder %s38_s21, 0 }
   0xa   : > { %s1387_s23 = scalar_select %p40_p4, %s1312_s16, %s42_s22  }
   0xc   : > { %206 = sbr.rel (!%p51_p3) target bundleno = 25 (0x19), region = 28  ;;  %s208_s24 = sand.u32 (%p51_p3), 1, %s1312_s16  }
   0xd   : > { %s1089_s25 = smul.u32 (%p51_p3), 12, %s1320_s18 }
   0xe   : > { %s1204_s26 = smul.u32 (%p51_p3), 84, %s208_s24 }
   0xf   : > { %s216_s29 = scalar_lea.vmem (%p51_p3), %s1485_s0, %s1089_s25 }
  0x10   : > { %v231_v0 = vld [vmem:[%s216_s29] sm:$0xff] (%p51_p3)  ;;  %v235_v2 = vld [vmem:[%s216_s29 + $0x48] sm:$0xff] (%p51_p3)  ;;  %s210_s30 = scalar_lea.vmem (%p51_p3), [#allocation3], %s1204_s26  ;;  %v239_v4 = vld [vmem:[%s216_s29 + $0x90] sm:$0xff] (%p51_p3) }
  0x11   : > { %v233_v1 = vld [vmem:[%s216_s29 + $0x24] sm:$0xff]  ;;  %232 = vst [vmem:[%s210_s30] sm:$0xff] %v231_v0  ;;  %236 = vst [vmem:[%s210_s30 + $0x18] sm:$0xff] %v235_v2  ;;  %v237_v3 = vld [vmem:[%s216_s29 + $0x6c] sm:$0xff] }
  0x12   : > { %234 = vst [vmem:[%s210_s30 + $0xc] sm:$0xff] %v233_v1  ;;  %v241_v5 = vld [vmem:[%s216_s29 + $0xb4] sm:$0xff]  ;;  %238 = vst [vmem:[%s210_s30 + $0x24] sm:$0xff] %v237_v3  ;;  %v1023_v7 = vld [vmem:[%s216_s29 + $0x8] sm:$0xf] }
  0x13   : > { %240 = vst [vmem:[%s210_s30 + $0x30] sm:$0xff] %v239_v4  ;;  %242 = vst [vmem:[%s210_s30 + $0x3c] sm:$0xff] %v241_v5  ;;  %v243_v6 = vld [vmem:[%s216_s29 + $0xd8] sm:$0xff]  ;;  %v1025_v8 = vld [vmem:[%s216_s29 + $0x2c] sm:$0xf] }
  0x14   : > { %244 = vst [vmem:[%s210_s30 + $0x48] sm:$0xff] %v243_v6  ;;  %1024 = vst [vmem:[%s210_s30 + $0x8] sm:$0xf] %v1023_v7  ;;  %v1027_v9 = vld [vmem:[%s216_s29 + $0x50] sm:$0xf] }
  0x15   : > { %1026 = vst [vmem:[%s210_s30 + $0x14] sm:$0xf] %v1025_v8  ;;  %v1029_v10 = vld [vmem:[%s216_s29 + $0x74] sm:$0xf]  ;;  %v1031_v11 = vld [vmem:[%s216_s29 + $0x98] sm:$0xf] }
  0x16   : > { %1028 = vst [vmem:[%s210_s30 + $0x20] sm:$0xf] %v1027_v9  ;;  %1030 = vst [vmem:[%s210_s30 + $0x2c] sm:$0xf] %v1029_v10  ;;  %v1033_v12 = vld [vmem:[%s216_s29 + $0xbc] sm:$0xf] }
  0x17   : > { %1032 = vst [vmem:[%s210_s30 + $0x38] sm:$0xf] %v1031_v11  ;;  %v1035_v13 = vld [vmem:[%s216_s29 + $0xe0] sm:$0xf]  ;;  %1034 = vst [vmem:[%s210_s30 + $0x44] sm:$0xf] %v1033_v12 }
  0x18   : > { %1036 = vst [vmem:[%s210_s30 + $0x50] sm:$0xf] %v1035_v13 }
  0x19 PF: > { %p1037_p6 = scmp.ge.s32.totalorder %s1324_s19, 1  ;;  %p283_p7 = scmp.lt.s32.totalorder %s1324_s19, 4 }
  0x1b   : > { %p284_p8 = pnand %p1037_p6, %p283_p7 }
  0x1c   : > { %s290_s5 = sand.u32 (!%p284_p8), 1, %s1308_s15   ;;  %s339_s6 = smul.u32 (!%p284_p8), 48, %s1316_s17 }
  0x1d   : > { %287 = sbr.rel (%p284_p8) target bundleno = 319 (0x13f), region = 58  ;;  %p1039_p10 = scmp.ne.s32.totalorder (!%p284_p8), %s1316_s17, 0 }
  0x1e   : > { %s1205_s7 = smul.u32 (!%p284_p8), 84, %s290_s5  ;;  %p340_p9 = scmp.lt.s32.totalorder (!%p284_p8), %s339_s6, 143 }
  0x20   : > { %s1404_s12 = scalar_lea.vmem (!%p284_p8), [#allocation3], %s1205_s7 }
  0x22   : > { %s1497_s6 = smov (!%p340_p9, %s339_s6), 143  ;;  %373 = sbr.rel (%p1039_p10) target bundleno = 44 (0x2c), region = 66 }
  0x23   : > { %s1038_s8 = sshll.u32 %s1497_s6, 2 }
  0x24   : > { %s1402_s11 = scalar_lea.vmem %s1486_s1, %s1038_s8 }
  0x27   : > { %v1326_v14 = vmov 0.0  }
  0x28   : > { %374 = vst [vmem:[#allocation2 + $0x30] sm:$0xff] %v1326_v14  ;;  %375 = vst [vmem:[#allocation2] sm:$0xff] %v1326_v14 }
  0x29   : > { %376 = vst [vmem:[#allocation2 + $0x18] sm:$0xff] %v1326_v14  ;;  %377 = vst [vmem:[#allocation2 + $0x10] sm:$0xff] %v1326_v14 }
  0x2a   : > { %378 = vst [vmem:[#allocation2 + $0x8] sm:$0xff] %v1326_v14  ;;  %379 = vst [vmem:[#allocation2 + $0x20] sm:$0xff] %v1326_v14 }
  0x2b   : > { %380 = vst [vmem:[#allocation2 + $0x28] sm:$0xff] %v1326_v14 }
  0x2c PF: > { %v1247_v15 = vld [vmem:[%s1402_s11 + $0x78] sm:$0xff]   ;;  %v1250_v18 = vld [vmem:[%s1402_s11 + $0x70] sm:$0xff]   ;;  %v1253_v21 = vld [vmem:[%s1402_s11 + $0x68] sm:$0xff]   ;;  %p1076_p11 = scmp.ne.s32.totalorder %s1316_s17, 2 }
  0x2d   : > { %v1248_v16 = vld [vmem:[%s1402_s11 + $0x38] sm:$0xff]   ;;  %1128 = vmatprep.subr.bf16.mxu0 %v1247_v15  ;;  %v1251_v19 = vld [vmem:[%s1402_s11 + $0x30] sm:$0xff]   ;;  %v1254_v22 = vld [vmem:[%s1402_s11 + $0x28] sm:$0xff]  }
  0x2e   : > { %v1249_v17 = vld [vmem:[%s1402_s11 + $0xb8] sm:$0xff]   ;;  %1129 = vmatpush3.bf16.msra.mxu0 %v1248_v16  ;;  %v1252_v20 = vld [vmem:[%s1402_s11 + $0xb0] sm:$0xff]   ;;  %v1255_v23 = vld [vmem:[%s1402_s11 + $0xa8] sm:$0xff]  }
  0x2f   : > { %1180 = vmatprep.subr.bf16.mxu1 %v1249_v17  ;;  %1130 = vmatprep.subr.bf16.mxu0 %v1250_v18  ;;  %v1256_v24 = vld [vmem:[%s1402_s11 + $0x60] sm:$0xff]   ;;  %v1259_v27 = vld [vmem:[%s1402_s11 + $0x58] sm:$0xff]   ;;  %v1262_v30 = vld [vmem:[%s1402_s11 + $0x50] sm:$0xff]  }
  0x30   : > { %1181 = vmatpush3.bf16.msra.mxu1 %v1249_v17  ;;  %v1257_v25 = vld [vmem:[%s1402_s11 + $0x20] sm:$0xff]   ;;  %v1261_v28 = vld [vmem:[%s1402_s11 + $0x98] sm:$0xff]   ;;  %v1264_v31 = vld [vmem:[%s1402_s11 + $0x90] sm:$0xff]  }
  0x31   : > { %1182 = vmatprep.subr.bf16.mxu1 %v1252_v20  ;;  %v1258_v26 = vld [vmem:[%s1402_s11 + $0xa0] sm:$0xff]   ;;  %v1260_v29 = vld [vmem:[%s1402_s11 + $0x18] sm:$0xff]   ;;  %v1263_v32 = vld [vmem:[%s1402_s11 + $0x10] sm:$0xff]  }
  0x32   : > { %1131 = vmatpush3.bf16.msra.mxu0 %v1251_v19  ;;  %v1265_v33 = vld [vmem:[%s1402_s11 + $0x48] sm:$0xff]   ;;  %v1268_v36 = vld [vmem:[%s1402_s11 + $0x40] sm:$0xff]   ;;  %v381_v57 = vld [vmem:[#allocation2 + $0x30] sm:$0xff] }
  0x33   : > { %1132 = vmatprep.subr.bf16.mxu0 %v1253_v21  ;;  %v1266_v34 = vld [vmem:[%s1402_s11 + $0x8] sm:$0xff]   ;;  %v1270_v37 = vld [vmem:[%s1402_s11 + $0x80] sm:$0xff]   ;;  %v383_v8 = vld [vmem:[#allocation2 + $0x18] sm:$0xff] }
  0x34   : > { %1183 = vmatpush3.bf16.msra.mxu1 %v1252_v20  ;;  %v1267_v35 = vld [vmem:[%s1402_s11 + $0x88] sm:$0xff]   ;;  %v1269_v40 = vld [vmem:[%s1402_s11] sm:$0xff]   ;;  %v384_v16 = vld [vmem:[#allocation2 + $0x10] sm:$0xff] }
  0x35   : > { %1184 = vmatprep.subr.bf16.mxu1 %v1255_v23  ;;  %v1273_v38 = vld [vmem:[%s1404_s12 + $0x4] ss:$12 sps:$4 sm:$0xff]   ;;  %v1274_v39 = vld [vmem:[%s1404_s12 + $0x8] ss:$12 sps:$4 sm:$0xff]   ;;  %v1271_v41 = vld [vmem:[%s1404_s12] ss:$12 sps:$4 sm:$0xff]  }
  0x36   : > { %1133 = vmatpush3.bf16.msra.mxu0 %v1254_v22  ;;  %685 = vmatprep.mubr.bf16.mxu0 %v1273_v38  ;;  %v1276_v42 = vld [vmem:[%s1404_s12 + $0x1c] ss:$12 sps:$4 sm:$0xff]   ;;  %v1275_v43 = vld [vmem:[%s1404_s12 + $0x20] ss:$12 sps:$4 sm:$0xff]   ;;  %v1281_v44 = vld [vmem:[%s1404_s12 + $0x38] ss:$12 sps:$4 sm:$0xff]  }
  0x37   : > { %1134 = vmatprep.subr.bf16.mxu0 %v1256_v24  ;;  %1196 = vmatprep.mubr.bf16.mxu1 %v1274_v39  ;;  %v1278_v45 = vld [vmem:[%s1404_s12 + $0x18] ss:$12 sps:$4 sm:$0xff]   ;;  %v1279_v46 = vld [vmem:[%s1404_s12 + $0x34] ss:$12 sps:$4 sm:$0xff]   ;;  %v1283_v47 = vld [vmem:[%s1404_s12 + $0x50] ss:$0 sps:$4 sm:$0xff]  }
  0x38   : > { %1185 = vmatpush3.bf16.msra.mxu1 %v1255_v23  ;;  %v400_v48 = vld [vmem:[%s1404_s12 + $0x48] sm:$0xff]  ;;  %v1282_v49 = vld [vmem:[%s1404_s12 + $0x30] ss:$12 sps:$4 sm:$0xff]  }
  0x39   : > { %1186 = vmatprep.subr.bf16.mxu1 %v1258_v26  ;;  %v1050_v50 = vcombine.high %v400_v48, %v400_v48  ;;  %v1049_v51 = vcombine.low %v400_v48, %v400_v48  ;;  %v382_v1 = vld [vmem:[#allocation2] sm:$0xff]  ;;  %v385_v22 = vld [vmem:[#allocation2 + $0x8] sm:$0xff] }
  0x3a   : > { %1135 = vmatpush3.bf16.msra.mxu0 %v1257_v25 }
  0x3b   : > { %1136 = vmatprep.subr.bf16.mxu0 %v1259_v27 }
  0x3c   : > { %1187 = vmatpush3.bf16.msra.mxu1 %v1258_v26 }
  0x3d   : > { %1188 = vmatprep.subr.bf16.mxu1 %v1261_v28 }
  0x3e   : > { %1137 = vmatpush3.bf16.msra.mxu0 %v1260_v29 }
  0x3f   : > { %1138 = vmatprep.subr.bf16.mxu0 %v1262_v30 }
  0x40   : > { %1189 = vmatpush3.bf16.msra.mxu1 %v1261_v28  ;;  %v386_v28 = vld [vmem:[#allocation2 + $0x20] sm:$0xff] }
  0x41   : > { %1190 = vmatprep.subr.bf16.mxu1 %v1264_v31 }
  0x42   : > { %1139 = vmatpush3.bf16.msra.mxu0 %v1263_v32 }
  0x43   : > { %1140 = vmatprep.subr.bf16.mxu0 %v1265_v33 }
  0x44   : > { %1191 = vmatpush3.bf16.msra.mxu1 %v1264_v31 }
  0x45   : > { %1192 = vmatprep.subr.bf16.mxu1 %v1267_v35 }
  0x46   : > { %1141 = vmatpush3.bf16.msra.mxu0 %v1266_v34 }
  0x47   : > { %1142 = vmatprep.subr.bf16.mxu0 %v1268_v36 }
  0x48   : > { %1193 = vmatpush3.bf16.msra.mxu1 %v1267_v35  ;;  %v387_v35 = vld [vmem:[#allocation2 + $0x28] sm:$0xff] }
  0x49   : > { %1194 = vmatprep.subr.bf16.mxu1 %v1270_v37 }
  0x4a   : > { %1143 = vmatpush3.bf16.msra.mxu0 %v1269_v40 }
  0x4c   : > { %1195 = vmatpush3.bf16.msra.mxu1 %v1270_v37 }
  0x4d   : > { %686 = vmatmul.mubr.bf16.vlgmr.msra.gmra.mxu0 %v1271_v41 }
  0x4e   : > { %693 = vmatprep.mubr.bf16.mxu0 %v1276_v42 }
  0x4f   : > { %1197 = vmatmul.mubr.bf16.vlgmr.msra.gmra.mxu1 %v1275_v43 }
  0x50   : > { %1200 = vmatprep.mubr.bf16.mxu1 %v1281_v44 }
  0x55   : > { %694 = vmatmul.mubr.bf16.gmra.mxu0 %v1278_v45 }
  0x56   : > { %701 = vmatprep.mubr.bf16.mxu0 %v1279_v46 }
  0x57   : > { %1201 = vmatmul.mubr.bf16.gmra.mxu1 %v1283_v47 }
  0x5d   : > { %702 = vmatmul.mubr.bf16.gmra.mxu0 %v1282_v49 }
  0x5e   : > { %709 = vmatprep.mubr.bf16.mxu0 %v1050_v50 }
  0x65   : > { %710 = vmatmul.mubr.bf16.gmra.mxu0 %v1049_v51 }
 0x10d   : > { %v1144_v52 = vpop.f32.mrf.mxu0 }
 0x10f   : > { %v1145_v53 = vpop.f32.mrf.mxu0  ;;  %v1198_v54 = vpop.f32.mrf.mxu1 }
 0x110   : > { %v1146_v55 = vadd.f32 %v1145_v53, %v1144_v52 }
 0x111   : > { %v1147_v56 = vpop.f32.mrf.mxu0  ;;  %v751_v58 = vpop.f32.mrf.mxu1 }
 0x112   : > { %v752_v59 = vadd.f32 %v1146_v55, %v751_v58 }
 0x113   : > { %v1148_v60 = vpop.f32.mrf.mxu0  ;;  %v1199_v61 = vpop.f32.mrf.mxu1 }
 0x114   : > { %v781_v62 = vadd.f32 %v752_v59, %v381_v57  ;;  %v1149_v63 = vadd.f32 %v1148_v60, %v1147_v56 }
 0x115   : > { %v1150_v0 = vpop.f32.mrf.mxu0  ;;  %v754_v2 = vpop.f32.mrf.mxu1 }
 0x116   : > { %788 = vst [vmem:[#allocation2 + $0x30] sm:$0xff] %v781_v62  ;;  %v755_v3 = vadd.f32 %v1149_v63, %v754_v2 }
 0x117   : > { %v1151_v4 = vpop.f32.mrf.mxu0  ;;  %v1202_v5 = vpop.f32.mrf.mxu1 }
 0x118   : > { %v782_v6 = vadd.f32 %v755_v3, %v382_v1  ;;  %v1152_v7 = vadd.f32 %v1151_v4, %v1150_v0 }
 0x119   : > { %v1153_v9 = vpop.f32.mrf.mxu0  ;;  %v767_v10 = vpop.f32.mrf.mxu1 }
 0x11a   : > { %789 = vst [vmem:[#allocation2] sm:$0xff] %v782_v6  ;;  %v760_v11 = vadd.f32 %v1198_v54, %v1152_v7 }
 0x11b   : > { %v1154_v12 = vpop.f32.mrf.mxu0  ;;  %v1203_v13 = vpop.f32.mrf.mxu1 }
 0x11c   : > { %v783_v14 = vadd.f32 %v760_v11, %v383_v8  ;;  %v1155_v15 = vadd.f32 %v1154_v12, %v1153_v9 }
 0x11d   : > { %v1156_v17 = vpop.f32.mrf.mxu0  ;;  %v770_v29 = vpop.f32.mrf.mxu1 }
 0x11e   : > { %790 = vst [vmem:[#allocation2 + $0x18] sm:$0xff] %v783_v14  ;;  %v763_v18 = vadd.f32 %v1199_v61, %v1155_v15 }
 0x11f   : > { %v1157_v19 = vpop.f32.mrf.mxu0 }
 0x120   : > { %v784_v20 = vadd.f32 %v763_v18, %v384_v16  ;;  %v1158_v21 = vadd.f32 %v1157_v19, %v1156_v17 }
 0x121   : > { %v1159_v23 = vpop.f32.mrf.mxu0 }
 0x122   : > { %791 = vst [vmem:[#allocation2 + $0x10] sm:$0xff] %v784_v20  ;;  %v768_v24 = vadd.f32 %v1158_v21, %v767_v10 }
 0x123   : > { %v1160_v25 = vpop.f32.mrf.mxu0 }
 0x124   : > { %v785_v26 = vadd.f32 %v768_v24, %v385_v22  ;;  %v1161_v27 = vadd.f32 %v1160_v25, %v1159_v23 }
 0x125   : > { %v1162_v30 = vpop.f32.mrf.mxu0 }
 0x126   : > { %792 = vst [vmem:[#allocation2 + $0x8] sm:$0xff] %v785_v26  ;;  %v771_v31 = vadd.f32 %v1161_v27, %v770_v29 }
 0x127   : > { %v1163_v32 = vpop.f32.mrf.mxu0 }
 0x128   : > { %v786_v33 = vadd.f32 %v771_v31, %v386_v28  ;;  %v1164_v34 = vadd.f32 %v1163_v32, %v1162_v30 }
 0x129   : > { %v1165_v36 = vpop.f32.mrf.mxu0 }
 0x12a   : > { %793 = vst [vmem:[#allocation2 + $0x20] sm:$0xff] %v786_v33  ;;  %v776_v37 = vadd.f32 %v1202_v5, %v1164_v34  ;;  %798 = sbr.rel (%p1076_p11) target bundleno = 319 (0x13f), region = 70 }
 0x12b   : > { %v1166_v38 = vpop.f32.mrf.mxu0 }
 0x12c   : > { %v787_v39 = vadd.f32 %v776_v37, %v387_v35 }
 0x12e   : > { %794 = vst [vmem:[#allocation2 + $0x28] sm:$0xff] %v787_v39 }
 0x12f   : > { %v799_v40 = vld [vmem:[#allocation2 + $0x30] sm:$0xff]  ;;  %v800_v41 = vld [vmem:[#allocation2] sm:$0xff]  ;;  %v801_v46 = vld [vmem:[#allocation2 + $0x18] sm:$0xff] }
 0x130   : > { %v1077_v42 = vld [vmem:[%s1487_s2] ss:$0 sm:$0xff]  ;;  %v802_v47 = vld [vmem:[#allocation2 + $0x10] sm:$0xff]  ;;  %v1124_v52 = vld [vmem:[%s1488_s3 + $0x8] sm:$0xff]  }
 0x131   : > { %v813_v43 = vadd.f32 %v1077_v42, %v799_v40  ;;  %v814_v44 = vadd.f32 %v1077_v42, %v800_v41  ;;  %v1098_v45 = vld [vmem:[%s1488_s3] sm:$0xff]   ;;  %v815_v50 = vadd.f32 %v1077_v42, %v801_v46  ;;  %v816_v51 = vadd.f32 %v1077_v42, %v802_v47  ;;  %v803_v53 = vld [vmem:[#allocation2 + $0x8] sm:$0xff]  ;;  %v1125_v59 = vld [vmem:[%s1488_s3 + $0x10] sm:$0xff]  }
 0x132   : > { %v1099_v48 = vunpack.c.l.bf16 %v1098_v45  ;;  %v1100_v49 = vunpack.c.h.bf16 %v1098_v45  ;;  %v804_v54 = vld [vmem:[#allocation2 + $0x20] sm:$0xff]  ;;  %v1103_v55 = vunpack.c.l.bf16 %v1124_v52  ;;  %v1104_v56 = vunpack.c.h.bf16 %v1124_v52  ;;  %v826_v61 = vld [vmem:[%s1488_s3 + $0x18] sm:$0xf] }
 0x133   : > { %v817_v57 = vadd.f32 %v1077_v42, %v803_v53  ;;  %v818_v58 = vadd.f32 %v1077_v42, %v804_v54  ;;  %v1107_v0 = vunpack.c.l.bf16 %v1125_v59  ;;  %v1108_v1 = vunpack.c.h.bf16 %v1125_v59 }
 0x134   : > { %v834_v62 = vadd.f32 %v1099_v48, %v813_v43  ;;  %v835_v63 = vadd.f32 %v1100_v49, %v814_v44  ;;  %v836_v2 = vadd.f32 %v1103_v55, %v815_v50  ;;  %v837_v3 = vadd.f32 %v1104_v56, %v816_v51 }
 0x135   : > { %v805_v60 = vld [vmem:[#allocation2 + $0x28] sm:$0xff]  ;;  %v833_v5 = vunpack.c.l.bf16 %v826_v61  ;;  %v838_v8 = vadd.f32 %v1107_v0, %v817_v57  ;;  %v839_v9 = vadd.f32 %v1108_v1, %v818_v58 }
 0x136   : > { %v819_v4 = vadd.f32 %v1077_v42, %v805_v60  ;;  %v841_v6 = vmax.f32 %v834_v62, 0.0  ;;  %v842_v7 = vmax.f32 %v835_v63, 0.0  ;;  %v843_v10 = vmax.f32 %v836_v2, 0.0 }
 0x137   : > { %v844_v11 = vmax.f32 %v837_v3, 0.0  ;;  %v845_v14 = vmax.f32 %v838_v8, 0.0  ;;  %v846_v15 = vmax.f32 %v839_v9, 0.0 }
 0x138   : > { %v840_v12 = vadd.f32 %v833_v5, %v819_v4  ;;  %v1112_v13 = vpack.c.bf16 %v842_v7, %v841_v6 }
 0x139   : > { %v1117_v16 = vpack.c.bf16 %v844_v11, %v843_v10  ;;  %v1122_v18 = vpack.c.bf16 %v846_v15, %v845_v14 }
 0x13a   : > { %v847_v17 = vmax.f32 %v840_v12, 0.0  ;;  %1113 = vst [vmem:[%s1489_s4] sm:$0xff] %v1112_v13  }
 0x13b   : > { %1126 = vst [vmem:[%s1489_s4 + $0x8] sm:$0xff] %v1117_v16   ;;  %1127 = vst [vmem:[%s1489_s4 + $0x10] sm:$0xff] %v1122_v18  }
 0x13c   : > { %v1096_v19 = vpack.c.bf16 %v847_v17, %v847_v17 }
 0x13e   : > { %883 = vst [vmem:[%s1489_s4 + $0x18] sm:$0xf] %v1096_v19 }
 0x13f PF: > { %s14_s19 = sadd.s32 1, %s1324_s19   ;;  %s1490_s15 = smov %s1312_s16 }
 0x140   : > { %p11_p12 = scmp.ge.s32.totalorder %s14_s19, 5   ;;  %s1491_s16 = smov %s1387_s23 }
 0x141   : > { %s1492_s17 = smov %s1320_s18  ;;  %s1493_s18 = smov %s1495_s20 }
 0x142   :  { %13 = sbr.rel (!%p11_p12) target bundleno = 3 (0x3), region = 120 }

// kernel: resnet_forward.25
= control target key start
LH: loop header
LB: loop body
LE: loop exit
PB: predicated region body
PF: predicated region fallthrough
CT: control target
= control target key end

     0   :  { %s1233_s12 = smov 0   ;;  %s1235_s13 = smov 0   ;;  %s1354_s0 = inlined_call_operand.vmem [shape: bf16[56,1152], index: 0, kind: input, shape index: {}]   ;;  %s1355_s1 = inlined_call_operand.vmem [shape: bf16[1152,128], index: 1, kind: input, shape index: {}]   ;;  %s1356_s2 = inlined_call_operand.vmem [shape: f32[1,128], index: 2, kind: input, shape index: {}]   ;;  %s1357_s3 = inlined_call_operand.vmem [shape: bf16[56,128], index: 3, kind: output, shape index: {}]  }
   0x1   :  { %s1237_s14 = smov 0   ;;  %s1239_s15 = smov 0  }
   0x2   :  { %s1241_s16 = smov 0  }
   0x3 LB: > { %s25_s17 = sadd.s32 1, %s1206_s15  ;;  %p48_p1 = scmp.ne.s32.totalorder %s1198_s13, %s1194_s12  ;;  %s1210_s16 = sphi %s1241_s16, %s13_s16   ;;  %s1206_s15 = sphi %s1239_s15, %s1361_s15   ;;  %s1202_s14 = sphi %s1237_s14, %s1360_s14   ;;  %s1198_s13 = sphi %s1235_s13, %s1359_s13   ;;  %s1194_s12 = sphi %s1233_s12, %s1358_s12  }
   0x4   : > { %p26_p0 = scmp.ge.s32.totalorder %s25_s17, 3  ;;  %p49_p2 = scmp.eq.s32.totalorder %s1210_s16, 0 }
   0x5   : > { %s41_s19 = sadd.s32 1, %s1198_s13  ;;  %p921_p5 = scmp.ge.s32.totalorder %s1210_s16, 3 }
   0x6   : > { %s1363_s17 = smov (%p26_p0, %s25_s17), 0  ;;  %p50_p3 = por %p49_p2, %p48_p1 }
   0x7   : > { %s37_s18 = ssub.s32 %s1206_s15, %s1363_s17  ;;  %162 = sbr.rel (%p921_p5) target bundleno = 25 (0x19), region = 20 }
   0x8   : > { %p39_p4 = scmp.eq.s32.totalorder %s37_s18, 0 }
   0xa   : > { %s1268_s20 = scalar_select %p39_p4, %s1198_s13, %s41_s19  }
   0xc   : > { %165 = sbr.rel (!%p50_p3) target bundleno = 25 (0x19), region = 24  ;;  %s167_s21 = sand.u32 (%p50_p3), 1, %s1198_s13  }
   0xd   : > { %s989_s22 = smul.u32 (%p50_p3), 12, %s1206_s15 }
   0xe   : > { %s1090_s23 = smul.u32 (%p50_p3), 84, %s167_s21 }
   0xf   : > { %s175_s26 = scalar_lea.vmem (%p50_p3), %s1354_s0, %s989_s22 }
  0x10   : > { %v190_v0 = vld [vmem:[%s175_s26] sm:$0xff] (%p50_p3)  ;;  %v194_v2 = vld [vmem:[%s175_s26 + $0x48] sm:$0xff] (%p50_p3)  ;;  %s169_s27 = scalar_lea.vmem (%p50_p3), [#allocation3], %s1090_s23  ;;  %v198_v4 = vld [vmem:[%s175_s26 + $0x90] sm:$0xff] (%p50_p3) }
  0x11   : > { %v192_v1 = vld [vmem:[%s175_s26 + $0x24] sm:$0xff]  ;;  %191 = vst [vmem:[%s169_s27] sm:$0xff] %v190_v0  ;;  %195 = vst [vmem:[%s169_s27 + $0x18] sm:$0xff] %v194_v2  ;;  %v196_v3 = vld [vmem:[%s175_s26 + $0x6c] sm:$0xff] }
  0x12   : > { %193 = vst [vmem:[%s169_s27 + $0xc] sm:$0xff] %v192_v1  ;;  %v200_v5 = vld [vmem:[%s175_s26 + $0xb4] sm:$0xff]  ;;  %197 = vst [vmem:[%s169_s27 + $0x24] sm:$0xff] %v196_v3  ;;  %v923_v7 = vld [vmem:[%s175_s26 + $0x8] sm:$0xf] }
  0x13   : > { %199 = vst [vmem:[%s169_s27 + $0x30] sm:$0xff] %v198_v4  ;;  %201 = vst [vmem:[%s169_s27 + $0x3c] sm:$0xff] %v200_v5  ;;  %v202_v6 = vld [vmem:[%s175_s26 + $0xd8] sm:$0xff]  ;;  %v925_v8 = vld [vmem:[%s175_s26 + $0x2c] sm:$0xf] }
  0x14   : > { %203 = vst [vmem:[%s169_s27 + $0x48] sm:$0xff] %v202_v6  ;;  %924 = vst [vmem:[%s169_s27 + $0x8] sm:$0xf] %v923_v7  ;;  %v927_v9 = vld [vmem:[%s175_s26 + $0x50] sm:$0xf] }
  0x15   : > { %926 = vst [vmem:[%s169_s27 + $0x14] sm:$0xf] %v925_v8  ;;  %v929_v10 = vld [vmem:[%s175_s26 + $0x74] sm:$0xf]  ;;  %v931_v11 = vld [vmem:[%s175_s26 + $0x98] sm:$0xf] }
  0x16   : > { %928 = vst [vmem:[%s169_s27 + $0x20] sm:$0xf] %v927_v9  ;;  %930 = vst [vmem:[%s169_s27 + $0x2c] sm:$0xf] %v929_v10  ;;  %v933_v12 = vld [vmem:[%s175_s26 + $0xbc] sm:$0xf] }
  0x17   : > { %932 = vst [vmem:[%s169_s27 + $0x38] sm:$0xf] %v931_v11  ;;  %v935_v13 = vld [vmem:[%s175_s26 + $0xe0] sm:$0xf]  ;;  %934 = vst [vmem:[%s169_s27 + $0x44] sm:$0xf] %v933_v12 }
  0x18   : > { %936 = vst [vmem:[%s169_s27 + $0x50] sm:$0xf] %v935_v13 }
  0x19 PF: > { %p937_p6 = scmp.ge.s32.totalorder %s1210_s16, 1  ;;  %p242_p7 = scmp.lt.s32.totalorder %s1210_s16, 4 }
  0x1b   : > { %p243_p8 = pnand %p937_p6, %p242_p7 }
  0x1c   : > { %s249_s28 = sand.u32 (!%p243_p8), 1, %s1194_s12   ;;  %s288_s29 = smul.u32 (!%p243_p8), 48, %s1202_s14 }
  0x1d   : > { %246 = sbr.rel (%p243_p8) target bundleno = 317 (0x13d), region = 54  ;;  %p939_p10 = scmp.ne.s32.totalorder (!%p243_p8), %s1202_s14, 0 }
  0x1e   : > { %s1091_s30 = smul.u32 (!%p243_p8), 84, %s249_s28  ;;  %p289_p9 = scmp.lt.s32.totalorder (!%p243_p8), %s288_s29, 143 }
  0x20   : > { %s1285_s8 = scalar_lea.vmem (!%p243_p8), [#allocation3], %s1091_s30 }
  0x22   : > { %s1365_s29 = smov (!%p289_p9, %s288_s29), 143  ;;  %313 = sbr.rel (%p939_p10) target bundleno = 44 (0x2c), region = 62 }
  0x23   : > { %s938_s4 = sshll.u32 %s1365_s29, 2 }
  0x24   : > { %s1283_s7 = scalar_lea.vmem %s1355_s1, %s938_s4 }
  0x27   : > { %v1212_v14 = vmov 0.0  }
  0x28   : > { %314 = vst [vmem:[#allocation2 + $0x30] sm:$0xff] %v1212_v14  ;;  %315 = vst [vmem:[#allocation2] sm:$0xff] %v1212_v14 }
  0x29   : > { %316 = vst [vmem:[#allocation2 + $0x18] sm:$0xff] %v1212_v14  ;;  %317 = vst [vmem:[#allocation2 + $0x10] sm:$0xff] %v1212_v14 }
  0x2a   : > { %318 = vst [vmem:[#allocation2 + $0x8] sm:$0xff] %v1212_v14  ;;  %319 = vst [vmem:[#allocation2 + $0x20] sm:$0xff] %v1212_v14 }
  0x2b   : > { %320 = vst [vmem:[#allocation2 + $0x28] sm:$0xff] %v1212_v14 }
  0x2c PF: > { %v1133_v15 = vld [vmem:[%s1283_s7 + $0x78] sm:$0xff]   ;;  %v1136_v18 = vld [vmem:[%s1283_s7 + $0x70] sm:$0xff]   ;;  %v1139_v21 = vld [vmem:[%s1283_s7 + $0x68] sm:$0xff]   ;;  %p976_p11 = scmp.ne.s32.totalorder %s1202_s14, 2 }
  0x2d   : > { %v1134_v16 = vld [vmem:[%s1283_s7 + $0x38] sm:$0xff]   ;;  %1014 = vmatprep.subr.bf16.mxu0 %v1133_v15  ;;  %v1137_v19 = vld [vmem:[%s1283_s7 + $0x30] sm:$0xff]   ;;  %v1140_v22 = vld [vmem:[%s1283_s7 + $0x28] sm:$0xff]  }
  0x2e   : > { %v1135_v17 = vld [vmem:[%s1283_s7 + $0xb8] sm:$0xff]   ;;  %1015 = vmatpush3.bf16.msra.mxu0 %v1134_v16  ;;  %v1138_v20 = vld [vmem:[%s1283_s7 + $0xb0] sm:$0xff]   ;;  %v1141_v23 = vld [vmem:[%s1283_s7 + $0xa8] sm:$0xff]  }
  0x2f   : > { %1066 = vmatprep.subr.bf16.mxu1 %v1135_v17  ;;  %1016 = vmatprep.subr.bf16.mxu0 %v1136_v18  ;;  %v1142_v24 = vld [vmem:[%s1283_s7 + $0x60] sm:$0xff]   ;;  %v1145_v27 = vld [vmem:[%s1283_s7 + $0x58] sm:$0xff]   ;;  %v1148_v30 = vld [vmem:[%s1283_s7 + $0x50] sm:$0xff]  }
  0x30   : > { %1067 = vmatpush3.bf16.msra.mxu1 %v1135_v17  ;;  %v1143_v25 = vld [vmem:[%s1283_s7 + $0x20] sm:$0xff]   ;;  %v1147_v28 = vld [vmem:[%s1283_s7 + $0x98] sm:$0xff]   ;;  %v1150_v31 = vld [vmem:[%s1283_s7 + $0x90] sm:$0xff]  }
  0x31   : > { %1068 = vmatprep.subr.bf16.mxu1 %v1138_v20  ;;  %v1144_v26 = vld [vmem:[%s1283_s7 + $0xa0] sm:$0xff]   ;;  %v1146_v29 = vld [vmem:[%s1283_s7 + $0x18] sm:$0xff]   ;;  %v1149_v32 = vld [vmem:[%s1283_s7 + $0x10] sm:$0xff]  }
  0x32   : > { %1017 = vmatpush3.bf16.msra.mxu0 %v1137_v19  ;;  %v1151_v33 = vld [vmem:[%s1283_s7 + $0x48] sm:$0xff]   ;;  %v1154_v36 = vld [vmem:[%s1283_s7 + $0x40] sm:$0xff]   ;;  %v321_v57 = vld [vmem:[#allocation2 + $0x30] sm:$0xff] }
  0x33   : > { %1018 = vmatprep.subr.bf16.mxu0 %v1139_v21  ;;  %v1152_v34 = vld [vmem:[%s1283_s7 + $0x8] sm:$0xff]   ;;  %v1156_v37 = vld [vmem:[%s1283_s7 + $0x80] sm:$0xff]   ;;  %v323_v8 = vld [vmem:[#allocation2 + $0x18] sm:$0xff] }
  0x34   : > { %1069 = vmatpush3.bf16.msra.mxu1 %v1138_v20  ;;  %v1153_v35 = vld [vmem:[%s1283_s7 + $0x88] sm:$0xff]   ;;  %v1155_v40 = vld [vmem:[%s1283_s7] sm:$0xff]   ;;  %v324_v16 = vld [vmem:[#allocation2 + $0x10] sm:$0xff] }
  0x35   : > { %1070 = vmatprep.subr.bf16.mxu1 %v1141_v23  ;;  %v1159_v38 = vld [vmem:[%s1285_s8 + $0x4] ss:$12 sps:$4 sm:$0xff]   ;;  %v1160_v39 = vld [vmem:[%s1285_s8 + $0x8] ss:$12 sps:$4 sm:$0xff]   ;;  %v1157_v41 = vld [vmem:[%s1285_s8] ss:$12 sps:$4 sm:$0xff]  }
  0x36   : > { %1019 = vmatpush3.bf16.msra.mxu0 %v1140_v22  ;;  %625 = vmatprep.mubr.bf16.mxu0 %v1159_v38  ;;  %v1162_v42 = vld [vmem:[%s1285_s8 + $0x1c] ss:$12 sps:$4 sm:$0xff]   ;;  %v1161_v43 = vld [vmem:[%s1285_s8 + $0x20] ss:$12 sps:$4 sm:$0xff]   ;;  %v1167_v44 = vld [vmem:[%s1285_s8 + $0x38] ss:$12 sps:$4 sm:$0xff]  }
  0x37   : > { %1020 = vmatprep.subr.bf16.mxu0 %v1142_v24  ;;  %1082 = vmatprep.mubr.bf16.mxu1 %v1160_v39  ;;  %v1164_v45 = vld [vmem:[%s1285_s8 + $0x18] ss:$12 sps:$4 sm:$0xff]   ;;  %v1165_v46 = vld [vmem:[%s1285_s8 + $0x34] ss:$12 sps:$4 sm:$0xff]   ;;  %v1169_v47 = vld [vmem:[%s1285_s8 + $0x50] ss:$0 sps:$4 sm:$0xff]  }
  0x38   : > { %1071 = vmatpush3.bf16.msra.mxu1 %v1141_v23  ;;  %v340_v48 = vld [vmem:[%s1285_s8 + $0x48] sm:$0xff]  ;;  %v1168_v49 = vld [vmem:[%s1285_s8 + $0x30] ss:$12 sps:$4 sm:$0xff]  }
  0x39   : > { %1072 = vmatprep.subr.bf16.mxu1 %v1144_v26  ;;  %v950_v50 = vcombine.high %v340_v48, %v340_v48  ;;  %v949_v51 = vcombine.low %v340_v48, %v340_v48  ;;  %v322_v1 = vld [vmem:[#allocation2] sm:$0xff]  ;;  %v325_v22 = vld [vmem:[#allocation2 + $0x8] sm:$0xff] }
  0x3a   : > { %1021 = vmatpush3.bf16.msra.mxu0 %v1143_v25 }
  0x3b   : > { %1022 = vmatprep.subr.bf16.mxu0 %v1145_v27 }
  0x3c   : > { %1073 = vmatpush3.bf16.msra.mxu1 %v1144_v26 }
  0x3d   : > { %1074 = vmatprep.subr.bf16.mxu1 %v1147_v28 }
  0x3e   : > { %1023 = vmatpush3.bf16.msra.mxu0 %v1146_v29 }
  0x3f   : > { %1024 = vmatprep.subr.bf16.mxu0 %v1148_v30 }
  0x40   : > { %1075 = vmatpush3.bf16.msra.mxu1 %v1147_v28  ;;  %v326_v28 = vld [vmem:[#allocation2 + $0x20] sm:$0xff] }
  0x41   : > { %1076 = vmatprep.subr.bf16.mxu1 %v1150_v31 }
  0x42   : > { %1025 = vmatpush3.bf16.msra.mxu0 %v1149_v32 }
  0x43   : > { %1026 = vmatprep.subr.bf16.mxu0 %v1151_v33 }
  0x44   : > { %1077 = vmatpush3.bf16.msra.mxu1 %v1150_v31 }
  0x45   : > { %1078 = vmatprep.subr.bf16.mxu1 %v1153_v35 }
  0x46   : > { %1027 = vmatpush3.bf16.msra.mxu0 %v1152_v34 }
  0x47   : > { %1028 = vmatprep.subr.bf16.mxu0 %v1154_v36 }
  0x48   : > { %1079 = vmatpush3.bf16.msra.mxu1 %v1153_v35  ;;  %v327_v35 = vld [vmem:[#allocation2 + $0x28] sm:$0xff] }
  0x49   : > { %1080 = vmatprep.subr.bf16.mxu1 %v1156_v37 }
  0x4a   : > { %1029 = vmatpush3.bf16.msra.mxu0 %v1155_v40 }
  0x4c   : > { %1081 = vmatpush3.bf16.msra.mxu1 %v1156_v37 }
  0x4d   : > { %626 = vmatmul.mubr.bf16.vlgmr.msra.gmra.mxu0 %v1157_v41 }
  0x4e   : > { %633 = vmatprep.mubr.bf16.mxu0 %v1162_v42 }
  0x4f   : > { %1083 = vmatmul.mubr.bf16.vlgmr.msra.gmra.mxu1 %v1161_v43 }
  0x50   : > { %1086 = vmatprep.mubr.bf16.mxu1 %v1167_v44 }
  0x55   : > { %634 = vmatmul.mubr.bf16.gmra.mxu0 %v1164_v45 }
  0x56   : > { %641 = vmatprep.mubr.bf16.mxu0 %v1165_v46 }
  0x57   : > { %1087 = vmatmul.mubr.bf16.gmra.mxu1 %v1169_v47 }
  0x5d   : > { %642 = vmatmul.mubr.bf16.gmra.mxu0 %v1168_v49 }
  0x5e   : > { %649 = vmatprep.mubr.bf16.mxu0 %v950_v50 }
  0x65   : > { %650 = vmatmul.mubr.bf16.gmra.mxu0 %v949_v51 }
 0x10d   : > { %v1030_v52 = vpop.f32.mrf.mxu0 }
 0x10f   : > { %v1031_v53 = vpop.f32.mrf.mxu0  ;;  %v1084_v54 = vpop.f32.mrf.mxu1 }
 0x110   : > { %v1032_v55 = vadd.f32 %v1031_v53, %v1030_v52 }
 0x111   : > { %v1033_v56 = vpop.f32.mrf.mxu0  ;;  %v691_v58 = vpop.f32.mrf.mxu1 }
 0x112   : > { %v692_v59 = vadd.f32 %v1032_v55, %v691_v58 }
 0x113   : > { %v1034_v60 = vpop.f32.mrf.mxu0  ;;  %v1085_v61 = vpop.f32.mrf.mxu1 }
 0x114   : > { %v721_v62 = vadd.f32 %v692_v59, %v321_v57  ;;  %v1035_v63 = vadd.f32 %v1034_v60, %v1033_v56 }
 0x115   : > { %v1036_v0 = vpop.f32.mrf.mxu0  ;;  %v694_v2 = vpop.f32.mrf.mxu1 }
 0x116   : > { %728 = vst [vmem:[#allocation2 + $0x30] sm:$0xff] %v721_v62  ;;  %v695_v3 = vadd.f32 %v1035_v63, %v694_v2 }
 0x117   : > { %v1037_v4 = vpop.f32.mrf.mxu0  ;;  %v1088_v5 = vpop.f32.mrf.mxu1 }
 0x118   : > { %v722_v6 = vadd.f32 %v695_v3, %v322_v1  ;;  %v1038_v7 = vadd.f32 %v1037_v4, %v1036_v0 }
 0x119   : > { %v1039_v9 = vpop.f32.mrf.mxu0  ;;  %v707_v10 = vpop.f32.mrf.mxu1 }
 0x11a   : > { %729 = vst [vmem:[#allocation2] sm:$0xff] %v722_v6  ;;  %v700_v11 = vadd.f32 %v1084_v54, %v1038_v7 }
 0x11b   : > { %v1040_v12 = vpop.f32.mrf.mxu0  ;;  %v1089_v13 = vpop.f32.mrf.mxu1 }
 0x11c   : > { %v723_v14 = vadd.f32 %v700_v11, %v323_v8  ;;  %v1041_v15 = vadd.f32 %v1040_v12, %v1039_v9 }
 0x11d   : > { %v1042_v17 = vpop.f32.mrf.mxu0  ;;  %v710_v29 = vpop.f32.mrf.mxu1 }
 0x11e   : > { %730 = vst [vmem:[#allocation2 + $0x18] sm:$0xff] %v723_v14  ;;  %v703_v18 = vadd.f32 %v1085_v61, %v1041_v15 }
 0x11f   : > { %v1043_v19 = vpop.f32.mrf.mxu0 }
 0x120   : > { %v724_v20 = vadd.f32 %v703_v18, %v324_v16  ;;  %v1044_v21 = vadd.f32 %v1043_v19, %v1042_v17 }
 0x121   : > { %v1045_v23 = vpop.f32.mrf.mxu0 }
 0x122   : > { %731 = vst [vmem:[#allocation2 + $0x10] sm:$0xff] %v724_v20  ;;  %v708_v24 = vadd.f32 %v1044_v21, %v707_v10 }
 0x123   : > { %v1046_v25 = vpop.f32.mrf.mxu0 }
 0x124   : > { %v725_v26 = vadd.f32 %v708_v24, %v325_v22  ;;  %v1047_v27 = vadd.f32 %v1046_v25, %v1045_v23 }
 0x125   : > { %v1048_v30 = vpop.f32.mrf.mxu0 }
 0x126   : > { %732 = vst [vmem:[#allocation2 + $0x8] sm:$0xff] %v725_v26  ;;  %v711_v31 = vadd.f32 %v1047_v27, %v710_v29 }
 0x127   : > { %v1049_v32 = vpop.f32.mrf.mxu0 }
 0x128   : > { %v726_v33 = vadd.f32 %v711_v31, %v326_v28  ;;  %v1050_v34 = vadd.f32 %v1049_v32, %v1048_v30 }
 0x129   : > { %v1051_v36 = vpop.f32.mrf.mxu0 }
 0x12a   : > { %733 = vst [vmem:[#allocation2 + $0x20] sm:$0xff] %v726_v33  ;;  %v716_v37 = vadd.f32 %v1088_v5, %v1050_v34  ;;  %738 = sbr.rel (%p976_p11) target bundleno = 317 (0x13d), region = 66 }
 0x12b   : > { %v1052_v38 = vpop.f32.mrf.mxu0 }
 0x12c   : > { %v727_v39 = vadd.f32 %v716_v37, %v327_v35 }
 0x12e   : > { %734 = vst [vmem:[#allocation2 + $0x28] sm:$0xff] %v727_v39 }
 0x12f   : > { %v739_v40 = vld [vmem:[#allocation2 + $0x30] sm:$0xff]  ;;  %v740_v41 = vld [vmem:[#allocation2] sm:$0xff]  ;;  %v741_v45 = vld [vmem:[#allocation2 + $0x18] sm:$0xff] }
 0x130   : > { %v977_v42 = vld [vmem:[%s1356_s2] ss:$0 sm:$0xff]  ;;  %v742_v46 = vld [vmem:[#allocation2 + $0x10] sm:$0xff]  ;;  %v743_v47 = vld [vmem:[#allocation2 + $0x8] sm:$0xff] }
 0x131   : > { %v753_v43 = vadd.f32 %v977_v42, %v739_v40  ;;  %v754_v44 = vadd.f32 %v977_v42, %v740_v41  ;;  %v755_v48 = vadd.f32 %v977_v42, %v741_v45  ;;  %v756_v49 = vadd.f32 %v977_v42, %v742_v46  ;;  %v744_v50 = vld [vmem:[#allocation2 + $0x20] sm:$0xff] }
 0x132   : > { %v757_v51 = vadd.f32 %v977_v42, %v743_v47  ;;  %v758_v55 = vadd.f32 %v977_v42, %v744_v50 }
 0x133   : > { %v760_v53 = vmax.f32 %v753_v43, 0.0  ;;  %v761_v54 = vmax.f32 %v754_v44, 0.0  ;;  %v762_v57 = vmax.f32 %v755_v48, 0.0  ;;  %v763_v58 = vmax.f32 %v756_v49, 0.0 }
 0x134   : > { %v764_v59 = vmax.f32 %v757_v51, 0.0  ;;  %v765_v61 = vmax.f32 %v758_v55, 0.0 }
 0x135   : > { %v745_v52 = vld [vmem:[#allocation2 + $0x28] sm:$0xff]  ;;  %v1000_v60 = vpack.c.bf16 %v761_v54, %v760_v53  ;;  %v1005_v63 = vpack.c.bf16 %v763_v58, %v762_v57 }
 0x136   : > { %v759_v56 = vadd.f32 %v977_v42, %v745_v52  ;;  %v1010_v0 = vpack.c.bf16 %v765_v61, %v764_v59 }
 0x137   : > { %1001 = vst [vmem:[%s1357_s3] sm:$0xff] %v1000_v60   ;;  %1012 = vst [vmem:[%s1357_s3 + $0x8] sm:$0xff] %v1005_v63  }
 0x138   : > { %v766_v62 = vmax.f32 %v759_v56, 0.0  ;;  %1013 = vst [vmem:[%s1357_s3 + $0x10] sm:$0xff] %v1010_v0  }
 0x13a   : > { %v996_v1 = vpack.c.bf16 %v766_v62, %v766_v62 }
 0x13c   : > { %802 = vst [vmem:[%s1357_s3 + $0x18] sm:$0xf] %v996_v1 }
 0x13d PF: > { %s13_s16 = sadd.s32 1, %s1210_s16   ;;  %s1358_s12 = smov %s1198_s13 }
 0x13e   : > { %p10_p12 = scmp.ge.s32.totalorder %s13_s16, 5   ;;  %s1359_s13 = smov %s1268_s20 }
 0x13f   : > { %s1360_s14 = smov %s1206_s15  ;;  %s1361_s15 = smov %s1363_s17 }
 0x140   :  { %12 = sbr.rel (!%p10_p12) target bundleno = 3 (0x3), region = 113 }

// kernel: resnet_forward.30
= control target key start
LH: loop header
LB: loop body
LE: loop exit
PB: predicated region body
PF: predicated region fallthrough
CT: control target
= control target key end

     0   :  { %s1037_s12 = smov 0   ;;  %s1039_s13 = smov 0   ;;  %s1146_s0 = inlined_call_operand.vmem [shape: bf16[24,1152], index: 0, kind: input, shape index: {}]   ;;  %s1147_s1 = inlined_call_operand.vmem [shape: bf16[1152,128], index: 1, kind: input, shape index: {}]   ;;  %s1148_s2 = inlined_call_operand.vmem [shape: f32[1,128], index: 2, kind: input, shape index: {}]   ;;  %s1149_s3 = inlined_call_operand.vmem [shape: bf16[24,128], index: 3, kind: output, shape index: {}]  }
   0x1   :  { %s1041_s14 = smov 0   ;;  %s1043_s15 = smov 0  }
   0x2   :  { %s1045_s16 = smov 0  }
   0x3 LB: > { %s25_s17 = sadd.s32 1, %s1010_s15  ;;  %p48_p1 = scmp.ne.s32.totalorder %s1002_s13, %s998_s12  ;;  %s1014_s16 = sphi %s1045_s16, %s13_s16   ;;  %s1010_s15 = sphi %s1043_s15, %s1153_s15   ;;  %s1006_s14 = sphi %s1041_s14, %s1152_s14   ;;  %s1002_s13 = sphi %s1039_s13, %s1151_s13   ;;  %s998_s12 = sphi %s1037_s12, %s1150_s12  }
   0x4   : > { %p26_p0 = scmp.ge.s32.totalorder %s25_s17, 3  ;;  %p49_p2 = scmp.eq.s32.totalorder %s1014_s16, 0 }
   0x5   : > { %s41_s19 = sadd.s32 1, %s1002_s13  ;;  %p785_p5 = scmp.ge.s32.totalorder %s1014_s16, 3 }
   0x6   : > { %s1155_s17 = smov (%p26_p0, %s25_s17), 0  ;;  %p50_p3 = por %p49_p2, %p48_p1 }
   0x7   : > { %s37_s18 = ssub.s32 %s1010_s15, %s1155_s17  ;;  %162 = sbr.rel (%p785_p5) target bundleno = 20 (0x14), region = 20 }
   0x8   : > { %p39_p4 = scmp.eq.s32.totalorder %s37_s18, 0 }
   0xa   : > { %s1072_s20 = scalar_select %p39_p4, %s1002_s13, %s41_s19  }
   0xc   : > { %165 = sbr.rel (!%p50_p3) target bundleno = 20 (0x14), region = 24  ;;  %s167_s21 = sand.u32 (%p50_p3), 1, %s1002_s13  }
   0xd   : > { %s835_s22 = smul.u32 (%p50_p3), 12, %s1010_s15 }
   0xe   : > { %s902_s23 = smul.u32 (%p50_p3), 36, %s167_s21 }
   0xf   : > { %s175_s26 = scalar_lea.vmem (%p50_p3), %s1146_s0, %s835_s22 }
  0x10   : > { %v190_v0 = vld [vmem:[%s175_s26] sm:$0xff] (%p50_p3)  ;;  %v194_v2 = vld [vmem:[%s175_s26 + $0x48] sm:$0xff] (%p50_p3)  ;;  %s169_s27 = scalar_lea.vmem (%p50_p3), [#allocation3], %s902_s23  ;;  %v791_v5 = vld [vmem:[%s175_s26 + $0x50] sm:$0xf] (%p50_p3) }
  0x11   : > { %v192_v1 = vld [vmem:[%s175_s26 + $0x24] sm:$0xff]  ;;  %191 = vst [vmem:[%s169_s27] sm:$0xff] %v190_v0  ;;  %195 = vst [vmem:[%s169_s27 + $0x18] sm:$0xff] %v194_v2  ;;  %v789_v4 = vld [vmem:[%s175_s26 + $0x2c] sm:$0xf] }
  0x12   : > { %193 = vst [vmem:[%s169_s27 + $0xc] sm:$0xff] %v192_v1  ;;  %v787_v3 = vld [vmem:[%s175_s26 + $0x8] sm:$0xf]  ;;  %790 = vst [vmem:[%s169_s27 + $0x14] sm:$0xf] %v789_v4 }
  0x13   : > { %788 = vst [vmem:[%s169_s27 + $0x8] sm:$0xf] %v787_v3  ;;  %792 = vst [vmem:[%s169_s27 + $0x20] sm:$0xf] %v791_v5 }
  0x14 PF: > { %p793_p6 = scmp.ge.s32.totalorder %s1014_s16, 1  ;;  %p226_p7 = scmp.lt.s32.totalorder %s1014_s16, 4 }
  0x16   : > { %p227_p8 = pnand %p793_p6, %p226_p7 }
  0x17   : > { %s233_s28 = sand.u32 (!%p227_p8), 1, %s998_s12   ;;  %s272_s29 = smul.u32 (!%p227_p8), 48, %s1006_s14 }
  0x18   : > { %230 = sbr.rel (%p227_p8) target bundleno = 295 (0x127), region = 54  ;;  %p795_p10 = scmp.ne.s32.totalorder (!%p227_p8), %s1006_s14, 0 }
  0x19   : > { %s903_s30 = smul.u32 (!%p227_p8), 36, %s233_s28  ;;  %p273_p9 = scmp.lt.s32.totalorder (!%p227_p8), %s272_s29, 143 }
  0x1b   : > { %s1089_s8 = scalar_lea.vmem (!%p227_p8), [#allocation3], %s903_s30 }
  0x1d   : > { %s1157_s29 = smov (!%p273_p9, %s272_s29), 143  ;;  %297 = sbr.rel (%p795_p10) target bundleno = 37 (0x25), region = 62 }
  0x1e   : > { %s794_s4 = sshll.u32 %s1157_s29, 2 }
  0x1f   : > { %s1087_s7 = scalar_lea.vmem %s1147_s1, %s794_s4 }
  0x22   : > { %v1016_v6 = vmov 0.0  }
  0x23   : > { %298 = vst [vmem:[#allocation2 + $0x10] sm:$0xff] %v1016_v6  ;;  %299 = vst [vmem:[#allocation2] sm:$0xff] %v1016_v6 }
  0x24   : > { %300 = vst [vmem:[#allocation2 + $0x8] sm:$0xff] %v1016_v6 }
  0x25 PF: > { %v945_v7 = vld [vmem:[%s1087_s7 + $0x78] sm:$0xff]   ;;  %v948_v10 = vld [vmem:[%s1087_s7 + $0x70] sm:$0xff]   ;;  %v951_v13 = vld [vmem:[%s1087_s7 + $0x68] sm:$0xff]   ;;  %p826_p11 = scmp.ne.s32.totalorder %s1006_s14, 2 }
  0x26   : > { %v946_v8 = vld [vmem:[%s1087_s7 + $0xb8] sm:$0xff]   ;;  %844 = vmatprep.subr.bf16.mxu0 %v945_v7  ;;  %v949_v11 = vld [vmem:[%s1087_s7 + $0xb0] sm:$0xff]   ;;  %v952_v14 = vld [vmem:[%s1087_s7 + $0xa8] sm:$0xff]  }
  0x27   : > { %v947_v9 = vld [vmem:[%s1087_s7 + $0x38] sm:$0xff]   ;;  %882 = vmatprep.subr.bf16.mxu1 %v946_v8  ;;  %v950_v12 = vld [vmem:[%s1087_s7 + $0x30] sm:$0xff]   ;;  %v953_v15 = vld [vmem:[%s1087_s7 + $0x28] sm:$0xff]  }
  0x28   : > { %845 = vmatpush3.bf16.msra.mxu0 %v947_v9  ;;  %883 = vmatpush3.bf16.msra.mxu1 %v946_v8  ;;  %v954_v16 = vld [vmem:[%s1087_s7 + $0x60] sm:$0xff]   ;;  %v957_v19 = vld [vmem:[%s1087_s7 + $0x58] sm:$0xff]   ;;  %v960_v22 = vld [vmem:[%s1087_s7 + $0x50] sm:$0xff]  }
  0x29   : > { %846 = vmatprep.subr.bf16.mxu0 %v948_v10  ;;  %884 = vmatprep.subr.bf16.mxu1 %v949_v11  ;;  %v955_v17 = vld [vmem:[%s1087_s7 + $0xa0] sm:$0xff]   ;;  %v958_v20 = vld [vmem:[%s1087_s7 + $0x98] sm:$0xff]   ;;  %v961_v23 = vld [vmem:[%s1087_s7 + $0x90] sm:$0xff]  }
  0x2a   : > { %v956_v18 = vld [vmem:[%s1087_s7 + $0x20] sm:$0xff]   ;;  %v959_v21 = vld [vmem:[%s1087_s7 + $0x18] sm:$0xff]   ;;  %v962_v24 = vld [vmem:[%s1087_s7 + $0x10] sm:$0xff]  }
  0x2b   : > { %v963_v25 = vld [vmem:[%s1087_s7 + $0x48] sm:$0xff]   ;;  %v966_v28 = vld [vmem:[%s1087_s7 + $0x40] sm:$0xff]   ;;  %v308_v33 = vld [vmem:[%s1089_s8 + $0x18] sm:$0xff] }
  0x2c   : > { %847 = vmatpush3.bf16.msra.mxu0 %v950_v12  ;;  %885 = vmatpush3.bf16.msra.mxu1 %v949_v11  ;;  %v964_v26 = vld [vmem:[%s1087_s7 + $0x88] sm:$0xff]   ;;  %v967_v29 = vld [vmem:[%s1087_s7 + $0x80] sm:$0xff]   ;;  %v973_v35 = vld [vmem:[%s1089_s8 + $0x20] ss:$0 sps:$4 sm:$0xff]   ;;  %v800_v36 = vcombine.high %v308_v33, %v308_v33  ;;  %v799_v37 = vcombine.low %v308_v33, %v308_v33 }
  0x2d   : > { %848 = vmatprep.subr.bf16.mxu0 %v951_v13  ;;  %886 = vmatprep.subr.bf16.mxu1 %v952_v14  ;;  %v965_v27 = vld [vmem:[%s1087_s7 + $0x8] sm:$0xff]   ;;  %v968_v32 = vld [vmem:[%s1087_s7] sm:$0xff]   ;;  %v301_v43 = vld [vmem:[#allocation2 + $0x10] sm:$0xff] }
  0x2e   : > { %v971_v30 = vld [vmem:[%s1089_s8 + $0x4] ss:$12 sps:$4 sm:$0xff]   ;;  %v972_v31 = vld [vmem:[%s1089_s8 + $0x8] ss:$12 sps:$4 sm:$0xff]   ;;  %v969_v34 = vld [vmem:[%s1089_s8] ss:$12 sps:$4 sm:$0xff]  }
  0x2f   : > { %561 = vmatprep.mubr.bf16.mxu0 %v971_v30  ;;  %898 = vmatprep.mubr.bf16.mxu1 %v972_v31  ;;  %v302_v50 = vld [vmem:[#allocation2] sm:$0xff]  ;;  %v303_v57 = vld [vmem:[#allocation2 + $0x8] sm:$0xff] }
  0x30   : > { %849 = vmatpush3.bf16.msra.mxu0 %v953_v15  ;;  %887 = vmatpush3.bf16.msra.mxu1 %v952_v14 }
  0x31   : > { %850 = vmatprep.subr.bf16.mxu0 %v954_v16  ;;  %888 = vmatprep.subr.bf16.mxu1 %v955_v17 }
  0x34   : > { %851 = vmatpush3.bf16.msra.mxu0 %v956_v18  ;;  %889 = vmatpush3.bf16.msra.mxu1 %v955_v17 }
  0x35   : > { %852 = vmatprep.subr.bf16.mxu0 %v957_v19  ;;  %890 = vmatprep.subr.bf16.mxu1 %v958_v20 }
  0x38   : > { %853 = vmatpush3.bf16.msra.mxu0 %v959_v21  ;;  %891 = vmatpush3.bf16.msra.mxu1 %v958_v20 }
  0x39   : > { %854 = vmatprep.subr.bf16.mxu0 %v960_v22  ;;  %892 = vmatprep.subr.bf16.mxu1 %v961_v23 }
  0x3c   : > { %855 = vmatpush3.bf16.msra.mxu0 %v962_v24  ;;  %893 = vmatpush3.bf16.msra.mxu1 %v961_v23 }
  0x3d   : > { %856 = vmatprep.subr.bf16.mxu0 %v963_v25  ;;  %894 = vmatprep.subr.bf16.mxu1 %v964_v26 }
  0x40   : > { %857 = vmatpush3.bf16.msra.mxu0 %v965_v27  ;;  %895 = vmatpush3.bf16.msra.mxu1 %v964_v26 }
  0x41   : > { %858 = vmatprep.subr.bf16.mxu0 %v966_v28  ;;  %896 = vmatprep.subr.bf16.mxu1 %v967_v29 }
  0x44   : > { %859 = vmatpush3.bf16.msra.mxu0 %v968_v32  ;;  %897 = vmatpush3.bf16.msra.mxu1 %v967_v29 }
  0x47   : > { %562 = vmatmul.mubr.bf16.vlgmr.msra.gmra.mxu0 %v969_v34  ;;  %899 = vmatmul.mubr.bf16.vlgmr.msra.gmra.mxu1 %v973_v35 }
  0x48   : > { %569 = vmatprep.mubr.bf16.mxu0 %v800_v36 }
  0x4f   : > { %570 = vmatmul.mubr.bf16.gmra.mxu0 %v799_v37 }
 0x107   : > { %v860_v38 = vpop.f32.mrf.mxu0  ;;  %v900_v39 = vpop.f32.mrf.mxu1 }
 0x109   : > { %v861_v40 = vpop.f32.mrf.mxu0  ;;  %v611_v41 = vpop.f32.mrf.mxu1 }
 0x10a   : > { %v862_v42 = vadd.f32 %v861_v40, %v860_v38 }
 0x10b   : > { %v863_v44 = vpop.f32.mrf.mxu0  ;;  %v901_v45 = vpop.f32.mrf.mxu1 }
 0x10c   : > { %v612_v46 = vadd.f32 %v862_v42, %v611_v41 }
 0x10d   : > { %v864_v47 = vpop.f32.mrf.mxu0  ;;  %v614_v51 = vpop.f32.mrf.mxu1 }
 0x10e   : > { %v625_v48 = vadd.f32 %v612_v46, %v301_v43  ;;  %v865_v49 = vadd.f32 %v864_v47, %v863_v44 }
 0x10f   : > { %v866_v52 = vpop.f32.mrf.mxu0 }
 0x110   : > { %628 = vst [vmem:[#allocation2 + $0x10] sm:$0xff] %v625_v48  ;;  %v615_v53 = vadd.f32 %v865_v49, %v614_v51 }
 0x111   : > { %v867_v54 = vpop.f32.mrf.mxu0 }
 0x112   : > { %v626_v55 = vadd.f32 %v615_v53, %v302_v50  ;;  %v868_v56 = vadd.f32 %v867_v54, %v866_v52 }
 0x113   : > { %v869_v58 = vpop.f32.mrf.mxu0 }
 0x114   : > { %629 = vst [vmem:[#allocation2] sm:$0xff] %v626_v55  ;;  %v620_v59 = vadd.f32 %v900_v39, %v868_v56  ;;  %634 = sbr.rel (%p826_p11) target bundleno = 295 (0x127), region = 66 }
 0x115   : > { %v870_v60 = vpop.f32.mrf.mxu0 }
 0x116   : > { %v627_v61 = vadd.f32 %v620_v59, %v303_v57 }
 0x118   : > { %630 = vst [vmem:[#allocation2 + $0x8] sm:$0xff] %v627_v61 }
 0x119   : > { %v635_v62 = vld [vmem:[#allocation2 + $0x10] sm:$0xff]  ;;  %v827_v0 = vld [vmem:[%s1148_s2] ss:$0 sm:$0xff] }
 0x11a   : > { %v645_v1 = vadd.f32 %v827_v0, %v635_v62 }
 0x11b   : > { %v636_v63 = vld [vmem:[#allocation2] sm:$0xff] }
 0x11c   : > { %v646_v2 = vadd.f32 %v827_v0, %v636_v63  ;;  %v648_v5 = vmax.f32 %v645_v1, 0.0 }
 0x11e   : > { %v649_v6 = vmax.f32 %v646_v2, 0.0 }
 0x11f   : > { %v637_v3 = vld [vmem:[#allocation2 + $0x8] sm:$0xff] }
 0x120   : > { %v647_v4 = vadd.f32 %v827_v0, %v637_v3  ;;  %v842_v8 = vpack.c.bf16 %v649_v6, %v648_v5 }
 0x122   : > { %v650_v7 = vmax.f32 %v647_v4, 0.0  ;;  %843 = vst [vmem:[%s1149_s3] sm:$0xff] %v842_v8  }
 0x124   : > { %v838_v9 = vpack.c.bf16 %v650_v7, %v650_v7 }
 0x126   : > { %666 = vst [vmem:[%s1149_s3 + $0x8] sm:$0xf] %v838_v9 }
 0x127 PF: > { %s13_s16 = sadd.s32 1, %s1014_s16   ;;  %s1150_s12 = smov %s1002_s13 }
 0x128   : > { %p10_p12 = scmp.ge.s32.totalorder %s13_s16, 5   ;;  %s1151_s13 = smov %s1072_s20 }
 0x129   : > { %s1152_s14 = smov %s1010_s15  ;;  %s1153_s15 = smov %s1155_s17 }
 0x12a   :  { %12 = sbr.rel (!%p10_p12) target bundleno = 3 (0x3), region = 113 }

// kernel: resnet_forward.31
= control target key start
LH: loop header
LB: loop body
LE: loop exit
PB: predicated region body
PF: predicated region fallthrough
CT: control target
= control target key end

     0   :  { %s313_s1 = inlined_call_operand.vmem [shape: bf16[128,128], index: 1, kind: input, shape index: {}]   ;;  %s314_s0 = inlined_call_operand.vmem [shape: bf16[24,128], index: 0, kind: input, shape index: {}]   ;;  %s315_s2 = inlined_call_operand.vmem [shape: f32[1,128], index: 2, kind: input, shape index: {}]   ;;  %s316_s3 = inlined_call_operand.vmem [shape: bf16[24,128], index: 3, kind: output, shape index: {}]  }
   0x1   :  { %v244_v0 = vld [vmem:[%s313_s1 + $0x38] sm:$0xff]   ;;  %v245_v1 = vld [vmem:[%s313_s1 + $0x30] sm:$0xff]   ;;  %v246_v2 = vld [vmem:[%s313_s1 + $0x28] sm:$0xff]  }
   0x2   :  { %224 = vmatprep.subr.bf16.mxu0 %v244_v0  ;;  %v247_v3 = vld [vmem:[%s313_s1 + $0x20] sm:$0xff]   ;;  %v248_v5 = vld [vmem:[%s313_s1 + $0x18] sm:$0xff]   ;;  %v249_v6 = vld [vmem:[%s313_s1 + $0x10] sm:$0xff]  }
   0x3   :  { %225 = vmatpush3.bf16.msra.mxu0 %v244_v0  ;;  %v252_v4 = vld [vmem:[%s314_s0] sm:$0xff]   ;;  %v250_v7 = vld [vmem:[%s313_s1 + $0x8] sm:$0xff]  }
   0x4   :  { %226 = vmatprep.subr.bf16.mxu0 %v245_v1  ;;  %240 = vmatprep.mubr.bf16.mxu0 %v252_v4  ;;  %v251_v8 = vld [vmem:[%s313_s1] sm:$0xff]   ;;  %v253_v9 = vld [vmem:[%s314_s0 + $0x8] ss:$0 sps:$4 sm:$0xff]  }
   0x5   :  { %v202_v10 = vld [vmem:[%s315_s2] ss:$0 sm:$0xff] }
   0x7   :  { %227 = vmatpush3.bf16.msra.mxu0 %v245_v1 }
   0x8   :  { %228 = vmatprep.subr.bf16.mxu0 %v246_v2 }
   0xb   :  { %229 = vmatpush3.bf16.msra.mxu0 %v246_v2 }
   0xc   :  { %230 = vmatprep.subr.bf16.mxu0 %v247_v3 }
   0xf   :  { %231 = vmatpush3.bf16.msra.mxu0 %v247_v3 }
  0x10   :  { %232 = vmatprep.subr.bf16.mxu0 %v248_v5 }
  0x13   :  { %233 = vmatpush3.bf16.msra.mxu0 %v248_v5 }
  0x14   :  { %234 = vmatprep.subr.bf16.mxu0 %v249_v6 }
  0x17   :  { %235 = vmatpush3.bf16.msra.mxu0 %v249_v6 }
  0x18   :  { %236 = vmatprep.subr.bf16.mxu0 %v250_v7 }
  0x1b   :  { %237 = vmatpush3.bf16.msra.mxu0 %v250_v7 }
  0x1c   :  { %238 = vmatprep.subr.bf16.mxu0 %v251_v8 }
  0x1f   :  { %239 = vmatpush3.bf16.msra.mxu0 %v251_v8 }
  0x22   :  { %241 = vmatmul.mubr.bf16.vlgmr.msra.gmra.mxu0 %v253_v9 }
  0xe2   :  { %v242_v11 = vpop.f32.mrf.mxu0 }
  0xe3   :  { %v171_v12 = vadd.f32 %v242_v11, %v202_v10 }
  0xe4   :  { %v136_v13 = vpop.f32.mrf.mxu0 }
  0xe5   :  { %v208_v14 = vpack.c.bf16 %v171_v12, %v171_v12  ;;  %v169_v17 = vadd.f32 %v202_v10, %v136_v13 }
  0xe6   :  { %v243_v15 = vpop.f32.mrf.mxu0 }
  0xe7   :  { %187 = vst [vmem:[%s316_s3 + $0x8] sm:$0xf] %v208_v14 }
  0xe8   :  { %v139_v16 = vpop.f32.mrf.mxu0 }
  0xe9   :  { %v170_v18 = vadd.f32 %v202_v10, %v139_v16 }
  0xeb   :  { %v212_v19 = vpack.c.bf16 %v170_v18, %v169_v17 }
  0xed   :  { %213 = vst [vmem:[%s316_s3] sm:$0xff] %v212_v19  }

// kernel: resnet_forward.32
= control target key start
LH: loop header
LB: loop body
LE: loop exit
PB: predicated region body
PF: predicated region fallthrough
CT: control target
= control target key end

     0   :  { %s1134_s15 = smov 0   ;;  %s1136_s16 = smov 0   ;;  %s1249_s0 = inlined_call_operand.vmem [shape: bf16[24,1152], index: 0, kind: input, shape index: {}]   ;;  %s1250_s1 = inlined_call_operand.vmem [shape: bf16[1152,128], index: 1, kind: input, shape index: {}]   ;;  %s1251_s2 = inlined_call_operand.vmem [shape: f32[1,128], index: 2, kind: input, shape index: {}]   ;;  %s1252_s3 = inlined_call_operand.vmem [shape: bf16[24,128], index: 3, kind: input, shape index: {}]   ;;  %s1253_s4 = inlined_call_operand.vmem [shape: bf16[24,128], index: 4, kind: output, shape index: {}]  }
   0x1   :  { %s1138_s17 = smov 0   ;;  %s1140_s18 = smov 0  }
   0x2   :  { %s1142_s19 = smov 0  }
   0x3 LB: > { %s26_s20 = sadd.s32 1, %s1102_s18  ;;  %p49_p1 = scmp.ne.s32.totalorder %s1094_s16, %s1090_s15  ;;  %s1106_s19 = sphi %s1142_s19, %s14_s19   ;;  %s1102_s18 = sphi %s1140_s18, %s1257_s18   ;;  %s1098_s17 = sphi %s1138_s17, %s1256_s17   ;;  %s1094_s16 = sphi %s1136_s16, %s1255_s16   ;;  %s1090_s15 = sphi %s1134_s15, %s1254_s15  }
   0x4   : > { %p27_p0 = scmp.ge.s32.totalorder %s26_s20, 3  ;;  %p50_p2 = scmp.eq.s32.totalorder %s1106_s19, 0 }
   0x5   : > { %s42_s22 = sadd.s32 1, %s1094_s16  ;;  %p873_p5 = scmp.ge.s32.totalorder %s1106_s19, 3 }
   0x6   : > { %s1259_s20 = smov (%p27_p0, %s26_s20), 0  ;;  %p51_p3 = por %p50_p2, %p49_p1 }
   0x7   : > { %s38_s21 = ssub.s32 %s1102_s18, %s1259_s20  ;;  %203 = sbr.rel (%p873_p5) target bundleno = 20 (0x14), region = 24 }
   0x8   : > { %p40_p4 = scmp.eq.s32.totalorder %s38_s21, 0 }
   0xa   : > { %s1169_s23 = scalar_select %p40_p4, %s1094_s16, %s42_s22  }
   0xc   : > { %206 = sbr.rel (!%p51_p3) target bundleno = 20 (0x14), region = 28  ;;  %s208_s24 = sand.u32 (%p51_p3), 1, %s1094_s16  }
   0xd   : > { %s923_s25 = smul.u32 (%p51_p3), 12, %s1102_s18 }
   0xe   : > { %s994_s26 = smul.u32 (%p51_p3), 36, %s208_s24 }
   0xf   : > { %s216_s29 = scalar_lea.vmem (%p51_p3), %s1249_s0, %s923_s25 }
  0x10   : > { %v231_v0 = vld [vmem:[%s216_s29] sm:$0xff] (%p51_p3)  ;;  %v235_v2 = vld [vmem:[%s216_s29 + $0x48] sm:$0xff] (%p51_p3)  ;;  %s210_s30 = scalar_lea.vmem (%p51_p3), [#allocation3], %s994_s26  ;;  %v879_v5 = vld [vmem:[%s216_s29 + $0x50] sm:$0xf] (%p51_p3) }
  0x11   : > { %v233_v1 = vld [vmem:[%s216_s29 + $0x24] sm:$0xff]  ;;  %232 = vst [vmem:[%s210_s30] sm:$0xff] %v231_v0  ;;  %236 = vst [vmem:[%s210_s30 + $0x18] sm:$0xff] %v235_v2  ;;  %v877_v4 = vld [vmem:[%s216_s29 + $0x2c] sm:$0xf] }
  0x12   : > { %234 = vst [vmem:[%s210_s30 + $0xc] sm:$0xff] %v233_v1  ;;  %v875_v3 = vld [vmem:[%s216_s29 + $0x8] sm:$0xf]  ;;  %878 = vst [vmem:[%s210_s30 + $0x14] sm:$0xf] %v877_v4 }
  0x13   : > { %876 = vst [vmem:[%s210_s30 + $0x8] sm:$0xf] %v875_v3  ;;  %880 = vst [vmem:[%s210_s30 + $0x20] sm:$0xf] %v879_v5 }
  0x14 PF: > { %p881_p6 = scmp.ge.s32.totalorder %s1106_s19, 1  ;;  %p267_p7 = scmp.lt.s32.totalorder %s1106_s19, 4 }
  0x16   : > { %p268_p8 = pnand %p881_p6, %p267_p7 }
  0x17   : > { %s274_s5 = sand.u32 (!%p268_p8), 1, %s1090_s15   ;;  %s323_s6 = smul.u32 (!%p268_p8), 48, %s1098_s17 }
  0x18   : > { %271 = sbr.rel (%p268_p8) target bundleno = 297 (0x129), region = 58  ;;  %p883_p10 = scmp.ne.s32.totalorder (!%p268_p8), %s1098_s17, 0 }
  0x19   : > { %s995_s7 = smul.u32 (!%p268_p8), 36, %s274_s5  ;;  %p324_p9 = scmp.lt.s32.totalorder (!%p268_p8), %s323_s6, 143 }
  0x1b   : > { %s1186_s12 = scalar_lea.vmem (!%p268_p8), [#allocation3], %s995_s7 }
  0x1d   : > { %s1261_s6 = smov (!%p324_p9, %s323_s6), 143  ;;  %357 = sbr.rel (%p883_p10) target bundleno = 37 (0x25), region = 66 }
  0x1e   : > { %s882_s8 = sshll.u32 %s1261_s6, 2 }
  0x1f   : > { %s1184_s11 = scalar_lea.vmem %s1250_s1, %s882_s8 }
  0x22   : > { %v1108_v6 = vmov 0.0  }
  0x23   : > { %358 = vst [vmem:[#allocation2 + $0x10] sm:$0xff] %v1108_v6  ;;  %359 = vst [vmem:[#allocation2] sm:$0xff] %v1108_v6 }
  0x24   : > { %360 = vst [vmem:[#allocation2 + $0x8] sm:$0xff] %v1108_v6 }
  0x25 PF: > { %v1037_v7 = vld [vmem:[%s1184_s11 + $0x78] sm:$0xff]   ;;  %v1040_v10 = vld [vmem:[%s1184_s11 + $0x70] sm:$0xff]   ;;  %v1043_v13 = vld [vmem:[%s1184_s11 + $0x68] sm:$0xff]   ;;  %p914_p11 = scmp.ne.s32.totalorder %s1098_s17, 2 }
  0x26   : > { %v1038_v8 = vld [vmem:[%s1184_s11 + $0xb8] sm:$0xff]   ;;  %936 = vmatprep.subr.bf16.mxu0 %v1037_v7  ;;  %v1041_v11 = vld [vmem:[%s1184_s11 + $0xb0] sm:$0xff]   ;;  %v1044_v14 = vld [vmem:[%s1184_s11 + $0xa8] sm:$0xff]  }
  0x27   : > { %v1039_v9 = vld [vmem:[%s1184_s11 + $0x38] sm:$0xff]   ;;  %974 = vmatprep.subr.bf16.mxu1 %v1038_v8  ;;  %v1042_v12 = vld [vmem:[%s1184_s11 + $0x30] sm:$0xff]   ;;  %v1045_v15 = vld [vmem:[%s1184_s11 + $0x28] sm:$0xff]  }
  0x28   : > { %937 = vmatpush3.bf16.msra.mxu0 %v1039_v9  ;;  %975 = vmatpush3.bf16.msra.mxu1 %v1038_v8  ;;  %v1046_v16 = vld [vmem:[%s1184_s11 + $0x60] sm:$0xff]   ;;  %v1049_v19 = vld [vmem:[%s1184_s11 + $0x58] sm:$0xff]   ;;  %v1052_v22 = vld [vmem:[%s1184_s11 + $0x50] sm:$0xff]  }
  0x29   : > { %938 = vmatprep.subr.bf16.mxu0 %v1040_v10  ;;  %976 = vmatprep.subr.bf16.mxu1 %v1041_v11  ;;  %v1047_v17 = vld [vmem:[%s1184_s11 + $0xa0] sm:$0xff]   ;;  %v1050_v20 = vld [vmem:[%s1184_s11 + $0x98] sm:$0xff]   ;;  %v1053_v23 = vld [vmem:[%s1184_s11 + $0x90] sm:$0xff]  }
  0x2a   : > { %v1048_v18 = vld [vmem:[%s1184_s11 + $0x20] sm:$0xff]   ;;  %v1051_v21 = vld [vmem:[%s1184_s11 + $0x18] sm:$0xff]   ;;  %v1054_v24 = vld [vmem:[%s1184_s11 + $0x10] sm:$0xff]  }
  0x2b   : > { %v1055_v25 = vld [vmem:[%s1184_s11 + $0x48] sm:$0xff]   ;;  %v1058_v28 = vld [vmem:[%s1184_s11 + $0x40] sm:$0xff]   ;;  %v368_v33 = vld [vmem:[%s1186_s12 + $0x18] sm:$0xff] }
  0x2c   : > { %939 = vmatpush3.bf16.msra.mxu0 %v1042_v12  ;;  %977 = vmatpush3.bf16.msra.mxu1 %v1041_v11  ;;  %v1056_v26 = vld [vmem:[%s1184_s11 + $0x88] sm:$0xff]   ;;  %v1059_v29 = vld [vmem:[%s1184_s11 + $0x80] sm:$0xff]   ;;  %v1065_v35 = vld [vmem:[%s1186_s12 + $0x20] ss:$0 sps:$4 sm:$0xff]   ;;  %v888_v36 = vcombine.high %v368_v33, %v368_v33  ;;  %v887_v37 = vcombine.low %v368_v33, %v368_v33 }
  0x2d   : > { %940 = vmatprep.subr.bf16.mxu0 %v1043_v13  ;;  %978 = vmatprep.subr.bf16.mxu1 %v1044_v14  ;;  %v1057_v27 = vld [vmem:[%s1184_s11 + $0x8] sm:$0xff]   ;;  %v1060_v32 = vld [vmem:[%s1184_s11] sm:$0xff]   ;;  %v361_v43 = vld [vmem:[#allocation2 + $0x10] sm:$0xff] }
  0x2e   : > { %v1063_v30 = vld [vmem:[%s1186_s12 + $0x4] ss:$12 sps:$4 sm:$0xff]   ;;  %v1064_v31 = vld [vmem:[%s1186_s12 + $0x8] ss:$12 sps:$4 sm:$0xff]   ;;  %v1061_v34 = vld [vmem:[%s1186_s12] ss:$12 sps:$4 sm:$0xff]  }
  0x2f   : > { %621 = vmatprep.mubr.bf16.mxu0 %v1063_v30  ;;  %990 = vmatprep.mubr.bf16.mxu1 %v1064_v31  ;;  %v362_v50 = vld [vmem:[#allocation2] sm:$0xff]  ;;  %v363_v57 = vld [vmem:[#allocation2 + $0x8] sm:$0xff] }
  0x30   : > { %941 = vmatpush3.bf16.msra.mxu0 %v1045_v15  ;;  %979 = vmatpush3.bf16.msra.mxu1 %v1044_v14 }
  0x31   : > { %942 = vmatprep.subr.bf16.mxu0 %v1046_v16  ;;  %980 = vmatprep.subr.bf16.mxu1 %v1047_v17 }
  0x34   : > { %943 = vmatpush3.bf16.msra.mxu0 %v1048_v18  ;;  %981 = vmatpush3.bf16.msra.mxu1 %v1047_v17 }
  0x35   : > { %944 = vmatprep.subr.bf16.mxu0 %v1049_v19  ;;  %982 = vmatprep.subr.bf16.mxu1 %v1050_v20 }
  0x38   : > { %945 = vmatpush3.bf16.msra.mxu0 %v1051_v21  ;;  %983 = vmatpush3.bf16.msra.mxu1 %v1050_v20 }
  0x39   : > { %946 = vmatprep.subr.bf16.mxu0 %v1052_v22  ;;  %984 = vmatprep.subr.bf16.mxu1 %v1053_v23 }
  0x3c   : > { %947 = vmatpush3.bf16.msra.mxu0 %v1054_v24  ;;  %985 = vmatpush3.bf16.msra.mxu1 %v1053_v23 }
  0x3d   : > { %948 = vmatprep.subr.bf16.mxu0 %v1055_v25  ;;  %986 = vmatprep.subr.bf16.mxu1 %v1056_v26 }
  0x40   : > { %949 = vmatpush3.bf16.msra.mxu0 %v1057_v27  ;;  %987 = vmatpush3.bf16.msra.mxu1 %v1056_v26 }
  0x41   : > { %950 = vmatprep.subr.bf16.mxu0 %v1058_v28  ;;  %988 = vmatprep.subr.bf16.mxu1 %v1059_v29 }
  0x44   : > { %951 = vmatpush3.bf16.msra.mxu0 %v1060_v32  ;;  %989 = vmatpush3.bf16.msra.mxu1 %v1059_v29 }
  0x47   : > { %622 = vmatmul.mubr.bf16.vlgmr.msra.gmra.mxu0 %v1061_v34  ;;  %991 = vmatmul.mubr.bf16.vlgmr.msra.gmra.mxu1 %v1065_v35 }
  0x48   : > { %629 = vmatprep.mubr.bf16.mxu0 %v888_v36 }
  0x4f   : > { %630 = vmatmul.mubr.bf16.gmra.mxu0 %v887_v37 }
 0x107   : > { %v952_v38 = vpop.f32.mrf.mxu0  ;;  %v992_v39 = vpop.f32.mrf.mxu1 }
 0x109   : > { %v953_v40 = vpop.f32.mrf.mxu0  ;;  %v671_v41 = vpop.f32.mrf.mxu1 }
 0x10a   : > { %v954_v42 = vadd.f32 %v953_v40, %v952_v38 }
 0x10b   : > { %v955_v44 = vpop.f32.mrf.mxu0  ;;  %v993_v45 = vpop.f32.mrf.mxu1 }
 0x10c   : > { %v672_v46 = vadd.f32 %v954_v42, %v671_v41 }
 0x10d   : > { %v956_v47 = vpop.f32.mrf.mxu0  ;;  %v674_v51 = vpop.f32.mrf.mxu1 }
 0x10e   : > { %v685_v48 = vadd.f32 %v672_v46, %v361_v43  ;;  %v957_v49 = vadd.f32 %v956_v47, %v955_v44 }
 0x10f   : > { %v958_v52 = vpop.f32.mrf.mxu0 }
 0x110   : > { %688 = vst [vmem:[#allocation2 + $0x10] sm:$0xff] %v685_v48  ;;  %v675_v53 = vadd.f32 %v957_v49, %v674_v51 }
 0x111   : > { %v959_v54 = vpop.f32.mrf.mxu0 }
 0x112   : > { %v686_v55 = vadd.f32 %v675_v53, %v362_v50  ;;  %v960_v56 = vadd.f32 %v959_v54, %v958_v52 }
 0x113   : > { %v961_v58 = vpop.f32.mrf.mxu0 }
 0x114   : > { %689 = vst [vmem:[#allocation2] sm:$0xff] %v686_v55  ;;  %v680_v59 = vadd.f32 %v992_v39, %v960_v56  ;;  %694 = sbr.rel (%p914_p11) target bundleno = 297 (0x129), region = 70 }
 0x115   : > { %v962_v60 = vpop.f32.mrf.mxu0 }
 0x116   : > { %v687_v61 = vadd.f32 %v680_v59, %v363_v57 }
 0x118   : > { %690 = vst [vmem:[#allocation2 + $0x8] sm:$0xff] %v687_v61 }
 0x119   : > { %v695_v62 = vld [vmem:[#allocation2 + $0x10] sm:$0xff]  ;;  %v915_v0 = vld [vmem:[%s1251_s2] ss:$0 sm:$0xff]  ;;  %v710_v5 = vld [vmem:[%s1252_s3 + $0x8] sm:$0xf] }
 0x11a   : > { %v705_v1 = vadd.f32 %v915_v0, %v695_v62  ;;  %v928_v3 = vld [vmem:[%s1252_s3] sm:$0xff]   ;;  %v713_v9 = vunpack.c.l.bf16 %v710_v5 }
 0x11b   : > { %v696_v63 = vld [vmem:[#allocation2] sm:$0xff]  ;;  %v929_v6 = vunpack.c.l.bf16 %v928_v3  ;;  %v930_v7 = vunpack.c.h.bf16 %v928_v3 }
 0x11c   : > { %v706_v2 = vadd.f32 %v915_v0, %v696_v63 }
 0x11d   : > { %v714_v10 = vadd.f32 %v929_v6, %v705_v1 }
 0x11e   : > { %v715_v11 = vadd.f32 %v930_v7, %v706_v2 }
 0x11f   : > { %v697_v4 = vld [vmem:[#allocation2 + $0x8] sm:$0xff]  ;;  %v717_v13 = vmax.f32 %v714_v10, 0.0 }
 0x120   : > { %v707_v8 = vadd.f32 %v915_v0, %v697_v4  ;;  %v718_v14 = vmax.f32 %v715_v11, 0.0 }
 0x122   : > { %v716_v12 = vadd.f32 %v713_v9, %v707_v8  ;;  %v934_v16 = vpack.c.bf16 %v718_v14, %v717_v13 }
 0x124   : > { %v719_v15 = vmax.f32 %v716_v12, 0.0  ;;  %935 = vst [vmem:[%s1253_s4] sm:$0xff] %v934_v16  }
 0x126   : > { %v926_v17 = vpack.c.bf16 %v719_v15, %v719_v15 }
 0x128   : > { %735 = vst [vmem:[%s1253_s4 + $0x8] sm:$0xf] %v926_v17 }
 0x129 PF: > { %s14_s19 = sadd.s32 1, %s1106_s19   ;;  %s1254_s15 = smov %s1094_s16 }
 0x12a   : > { %p11_p12 = scmp.ge.s32.totalorder %s14_s19, 5   ;;  %s1255_s16 = smov %s1169_s23 }
 0x12b   : > { %s1256_s17 = smov %s1102_s18  ;;  %s1257_s18 = smov %s1259_s20 }
 0x12c   :  { %13 = sbr.rel (!%p11_p12) target bundleno = 3 (0x3), region = 120 }

// kernel: resnet_forward.35
= control target key start
LH: loop header
LB: loop body
LE: loop exit
PB: predicated region body
PF: predicated region fallthrough
CT: control target
= control target key end

     0   :  { %s1036_s12 = smov 0   ;;  %s1038_s13 = smov 0   ;;  %s1135_s0 = inlined_call_operand.vmem [shape: bf16[8,1152], index: 0, kind: input, shape index: {}]   ;;  %s1136_s1 = inlined_call_operand.vmem [shape: bf16[1152,256], index: 1, kind: input, shape index: {}]   ;;  %s1137_s2 = inlined_call_operand.vmem [shape: f32[1,256], index: 2, kind: input, shape index: {}]   ;;  %s1138_s3 = inlined_call_operand.vmem [shape: bf16[8,256], index: 3, kind: output, shape index: {}]  }
   0x1   :  { %s1040_s14 = smov 0  }
   0x2 LB: > { %s25_s15 = sadd.s32 1, %s1008_s13  ;;  %p825_p0 = scmp.ge.s32.totalorder %s1012_s14, 1  ;;  %s1012_s14 = sphi %s1040_s14, %s13_s14   ;;  %s1008_s13 = sphi %s1038_s13, %s1140_s13   ;;  %s1004_s12 = sphi %s1036_s12, %s1139_s12  }
   0x3   : > { %p26_p1 = scmp.ge.s32.totalorder %s25_s15, 3  ;;  %p194_p2 = scmp.lt.s32.totalorder %s1012_s14, 4 }
   0x5   : > { %s1142_s15 = smov (%p26_p1, %s25_s15), 0  ;;  %p195_p3 = pnand %p825_p0, %p194_p2 }
   0x6   : > { %s240_s16 = smul.u32 (!%p195_p3), 3, %s1004_s12  ;;  %p829_p6 = scmp.ne.s32.totalorder (!%p195_p3), %s1004_s12, 0 }
   0x7   : > { %198 = sbr.rel (%p195_p3) target bundleno = 302 (0x12e), region = 32 }
   0x8   : > { %s250_s17 = smul.u32 (!%p195_p3), 48, %s1004_s12  ;;  %p243_p4 = scmp.lt.s32.totalorder (!%p195_p3), %s240_s16, 8 }
   0xa   : > { %p252_p5 = scmp.lt.s32.totalorder (!%p195_p3), %s250_s17, 143 }
   0xc   : > { %s1144_s16 = smov (!%p243_p4, %s240_s16), 8  ;;  %s1146_s17 = smov (!%p252_p5, %s250_s17), 143 }
   0xd   : > { %s826_s18 = sshll.u32 %s1144_s16, 2  ;;  %s887_s22 = sshll.u32 %s1146_s17, 3 }
   0xe   : > { %s1061_s21 = scalar_lea.vmem %s1135_s0, %s826_s18  ;;  %s1066_s25 = scalar_lea.vmem %s1136_s1, %s887_s22 }
   0xf   : > { %281 = sbr.rel (%p829_p6) target bundleno = 22 (0x16), region = 36 }
  0x14   : > { %v1014_v0 = vmov 0.0  }
  0x15   : > { %282 = vst [vmem:[#allocation2] sm:$0xff] %v1014_v0  ;;  %283 = vst [vmem:[#allocation2 + $0x8] sm:$0xff] %v1014_v0 }
  0x16 PF: > { %v915_v1 = vld [vmem:[%s1066_s25 + $0x74] ss:$8 sps:$4 sm:$0xff]   ;;  %v917_v2 = vld [vmem:[%s1066_s25 + $0x70] ss:$8 sps:$4 sm:$0xff]   ;;  %v1015_v3 = vmov 0   ;;  %v286_v34 = vld [vmem:[%s1061_s21] sm:$0xff] }
  0x17   : > { %660 = vmatprep.mubr.bf16.mxu1 %v1015_v3  ;;  %587 = vmatprep.subr.bf16.mxu0 %v915_v1  ;;  %v918_v4 = vld [vmem:[%s1066_s25 + $0x64] ss:$8 sps:$4 sm:$0xff]   ;;  %v920_v5 = vld [vmem:[%s1066_s25 + $0x60] ss:$8 sps:$4 sm:$0xff]   ;;  %v921_v6 = vld [vmem:[%s1066_s25 + $0x54] ss:$8 sps:$4 sm:$0xff]   ;;  %v831_v36 = vcombine.high %v286_v34, %v286_v34  ;;  %v830_v53 = vcombine.low %v286_v34, %v286_v34 }
  0x18   : > { %588 = vmatpush1.bf16.msra.mxu0 %v917_v2  ;;  %v923_v7 = vld [vmem:[%s1066_s25 + $0x50] ss:$8 sps:$4 sm:$0xff]   ;;  %v924_v8 = vld [vmem:[%s1066_s25 + $0x44] ss:$8 sps:$4 sm:$0xff]   ;;  %v936_v9 = vld [vmem:[%s1066_s25 + $0x174] ss:$8 sps:$4 sm:$0xff]  }
  0x19   : > { %589 = vmatprep.subr.bf16.mxu0 %v918_v4  ;;  %v938_v10 = vld [vmem:[%s1066_s25 + $0x170] ss:$8 sps:$4 sm:$0xff]   ;;  %v926_v11 = vld [vmem:[%s1066_s25 + $0x40] ss:$8 sps:$4 sm:$0xff]   ;;  %v927_v12 = vld [vmem:[%s1066_s25 + $0x34] ss:$8 sps:$4 sm:$0xff]   ;;  %628 = vmatprep.subr.bf16.mxu1 %v936_v9 }
  0x1a   : > { %v942_v13 = vld [vmem:[%s1066_s25 + $0x164] ss:$8 sps:$4 sm:$0xff]   ;;  %629 = vmatpush1.bf16.msra.mxu1 %v938_v10  ;;  %v944_v14 = vld [vmem:[%s1066_s25 + $0x160] ss:$8 sps:$4 sm:$0xff]   ;;  %v929_v15 = vld [vmem:[%s1066_s25 + $0x30] ss:$8 sps:$4 sm:$0xff]   ;;  %619 = vmatprep.mubr.bf16.mxu0 %v831_v36 }
  0x1b   : > { %630 = vmatprep.subr.bf16.mxu1 %v942_v13  ;;  %v948_v16 = vld [vmem:[%s1066_s25 + $0x154] ss:$8 sps:$4 sm:$0xff]   ;;  %v930_v17 = vld [vmem:[%s1066_s25 + $0x24] ss:$8 sps:$4 sm:$0xff]   ;;  %v950_v18 = vld [vmem:[%s1066_s25 + $0x150] ss:$8 sps:$4 sm:$0xff]  }
  0x1c   : > { %590 = vmatpush1.bf16.msra.mxu0 %v920_v5  ;;  %v954_v19 = vld [vmem:[%s1066_s25 + $0x144] ss:$8 sps:$4 sm:$0xff]   ;;  %v932_v20 = vld [vmem:[%s1066_s25 + $0x20] ss:$8 sps:$4 sm:$0xff]   ;;  %v933_v21 = vld [vmem:[%s1066_s25 + $0x14] ss:$8 sps:$4 sm:$0xff]  }
  0x1d   : > { %591 = vmatprep.subr.bf16.mxu0 %v921_v6  ;;  %v956_v22 = vld [vmem:[%s1066_s25 + $0x140] ss:$8 sps:$4 sm:$0xff]   ;;  %v960_v23 = vld [vmem:[%s1066_s25 + $0x134] ss:$8 sps:$4 sm:$0xff]   ;;  %v935_v24 = vld [vmem:[%s1066_s25 + $0x10] ss:$8 sps:$4 sm:$0xff]  }
  0x1e   : > { %631 = vmatpush1.bf16.msra.mxu1 %v944_v14  ;;  %v939_v25 = vld [vmem:[%s1066_s25 + $0x4] ss:$8 sps:$4 sm:$0xff]   ;;  %v962_v26 = vld [vmem:[%s1066_s25 + $0x130] ss:$8 sps:$4 sm:$0xff]   ;;  %v941_v28 = vld [vmem:[%s1066_s25] ss:$8 sps:$4 sm:$0xff]  }
  0x1f   : > { %632 = vmatprep.subr.bf16.mxu1 %v948_v16  ;;  %v966_v27 = vld [vmem:[%s1066_s25 + $0x124] ss:$8 sps:$4 sm:$0xff]   ;;  %v945_v29 = vld [vmem:[%s1066_s25 + $0xf4] ss:$8 sps:$4 sm:$0xff]   ;;  %v968_v30 = vld [vmem:[%s1066_s25 + $0x120] ss:$8 sps:$4 sm:$0xff]  }
  0x20   : > { %592 = vmatpush1.bf16.msra.mxu0 %v923_v7  ;;  %v972_v31 = vld [vmem:[%s1066_s25 + $0x114] ss:$8 sps:$4 sm:$0xff]   ;;  %v947_v32 = vld [vmem:[%s1066_s25 + $0xf0] ss:$8 sps:$4 sm:$0xff]   ;;  %v951_v33 = vld [vmem:[%s1066_s25 + $0xe4] ss:$8 sps:$4 sm:$0xff]  }
  0x21   : > { %593 = vmatprep.subr.bf16.mxu0 %v924_v8  ;;  %v974_v35 = vld [vmem:[%s1066_s25 + $0x110] ss:$8 sps:$4 sm:$0xff]   ;;  %v978_v37 = vld [vmem:[%s1066_s25 + $0x104] ss:$8 sps:$4 sm:$0xff]   ;;  %v953_v38 = vld [vmem:[%s1066_s25 + $0xe0] ss:$8 sps:$4 sm:$0xff]  }
  0x22   : > { %633 = vmatpush1.bf16.msra.mxu1 %v950_v18  ;;  %v957_v39 = vld [vmem:[%s1066_s25 + $0xd4] ss:$8 sps:$4 sm:$0xff]   ;;  %v980_v40 = vld [vmem:[%s1066_s25 + $0x100] ss:$8 sps:$4 sm:$0xff]   ;;  %v959_v41 = vld [vmem:[%s1066_s25 + $0xd0] ss:$8 sps:$4 sm:$0xff]  }
  0x23   : > { %634 = vmatprep.subr.bf16.mxu1 %v954_v19  ;;  %v963_v42 = vld [vmem:[%s1066_s25 + $0xc4] ss:$8 sps:$4 sm:$0xff]   ;;  %v984_v43 = vld [vmem:[%s1061_s21 + $0x8] ss:$0 sps:$4 sm:$0xff]   ;;  %v969_v45 = vld [vmem:[%s1066_s25 + $0xb4] ss:$8 sps:$4 sm:$0xff]  }
  0x24   : > { %594 = vmatpush1.bf16.msra.mxu0 %v926_v11  ;;  %v965_v44 = vld [vmem:[%s1066_s25 + $0xc0] ss:$8 sps:$4 sm:$0xff]   ;;  %v971_v46 = vld [vmem:[%s1066_s25 + $0xb0] ss:$8 sps:$4 sm:$0xff]   ;;  %v975_v47 = vld [vmem:[%s1066_s25 + $0xa4] ss:$8 sps:$4 sm:$0xff]  }
  0x25   : > { %595 = vmatprep.subr.bf16.mxu0 %v927_v12  ;;  %v977_v48 = vld [vmem:[%s1066_s25 + $0xa0] ss:$8 sps:$4 sm:$0xff]   ;;  %v981_v49 = vld [vmem:[%s1066_s25 + $0x94] ss:$8 sps:$4 sm:$0xff]   ;;  %v983_v50 = vld [vmem:[%s1066_s25 + $0x90] ss:$8 sps:$4 sm:$0xff]  }
  0x26   : > { %635 = vmatpush1.bf16.msra.mxu1 %v956_v22  ;;  %v985_v51 = vld [vmem:[%s1066_s25 + $0x84] ss:$8 sps:$4 sm:$0xff]   ;;  %v987_v52 = vld [vmem:[%s1066_s25 + $0x80] ss:$8 sps:$4 sm:$0xff]   ;;  %p881_p7 = scmp.ne.s32.totalorder %s1004_s12, 2 }
  0x27   : > { %636 = vmatprep.subr.bf16.mxu1 %v960_v23  ;;  %v284_v58 = vld [vmem:[#allocation2] sm:$0xff]  ;;  %v285_v61 = vld [vmem:[#allocation2 + $0x8] sm:$0xff] }
  0x28   : > { %596 = vmatpush1.bf16.msra.mxu0 %v929_v15 }
  0x29   : > { %597 = vmatprep.subr.bf16.mxu0 %v930_v17 }
  0x2a   : > { %637 = vmatpush1.bf16.msra.mxu1 %v962_v26 }
  0x2b   : > { %638 = vmatprep.subr.bf16.mxu1 %v966_v27 }
  0x2c   : > { %598 = vmatpush1.bf16.msra.mxu0 %v932_v20 }
  0x2d   : > { %599 = vmatprep.subr.bf16.mxu0 %v933_v21 }
  0x2e   : > { %639 = vmatpush1.bf16.msra.mxu1 %v968_v30 }
  0x2f   : > { %640 = vmatprep.subr.bf16.mxu1 %v972_v31 }
  0x30   : > { %600 = vmatpush1.bf16.msra.mxu0 %v935_v24 }
  0x31   : > { %601 = vmatprep.subr.bf16.mxu0 %v939_v25 }
  0x32   : > { %641 = vmatpush1.bf16.msra.mxu1 %v974_v35 }
  0x33   : > { %642 = vmatprep.subr.bf16.mxu1 %v978_v37 }
  0x34   : > { %602 = vmatpush1.bf16.msra.mxu0 %v941_v28 }
  0x35   : > { %603 = vmatprep.subr.bf16.mxu0 %v945_v29 }
  0x36   : > { %643 = vmatpush1.bf16.msra.mxu1 %v980_v40 }
  0x38   : > { %604 = vmatpush2.bf16.msra.mxu0 %v947_v32 }
  0x39   : > { %605 = vmatprep.subr.bf16.mxu0 %v951_v33  ;;  %661 = vmatmul.mubr.bf16.vlgmr.msra.gmra.mxu1 %v984_v43 }
  0x3c   : > { %606 = vmatpush2.bf16.msra.mxu0 %v953_v38 }
  0x3d   : > { %607 = vmatprep.subr.bf16.mxu0 %v957_v39 }
  0x40   : > { %608 = vmatpush2.bf16.msra.mxu0 %v959_v41 }
  0x41   : > { %609 = vmatprep.subr.bf16.mxu0 %v963_v42 }
  0x44   : > { %610 = vmatpush2.bf16.msra.mxu0 %v965_v44 }
  0x45   : > { %611 = vmatprep.subr.bf16.mxu0 %v969_v45 }
  0x48   : > { %612 = vmatpush2.bf16.msra.mxu0 %v971_v46 }
  0x49   : > { %613 = vmatprep.subr.bf16.mxu0 %v975_v47 }
  0x4c   : > { %614 = vmatpush2.bf16.msra.mxu0 %v977_v48 }
  0x4d   : > { %615 = vmatprep.subr.bf16.mxu0 %v981_v49 }
  0x50   : > { %616 = vmatpush2.bf16.msra.mxu0 %v983_v50 }
  0x51   : > { %617 = vmatprep.subr.bf16.mxu0 %v985_v51 }
  0x54   : > { %618 = vmatpush2.bf16.msra.mxu0 %v987_v52 }
  0x57   : > { %620 = vmatmul.mubr.bf16.vlgmr.msra.gmra.mxu0 %v830_v53 }
  0xf9   : > { %v662_v54 = vpop.f32.mrf.mxu1 }
  0xfb   : > { %v664_v55 = vpop.f32.mrf.mxu1 }
  0xfd   : > { %v666_v56 = vpop.f32.mrf.mxu1 }
  0xff   : > { %v667_v57 = vpop.f32.mrf.mxu1 }
 0x117   : > { %v621_v59 = vpop.f32.mrf.mxu0 }
 0x118   : > { %v663_v60 = vadd.f32 %v662_v54, %v621_v59 }
 0x119   : > { %v623_v62 = vpop.f32.mrf.mxu0 }
 0x11a   : > { %v669_v63 = vadd.f32 %v663_v60, %v284_v58  ;;  %v665_v0 = vadd.f32 %v664_v55, %v623_v62  ;;  %676 = sbr.rel (%p881_p7) target bundleno = 302 (0x12e), region = 40 }
 0x11b   : > { %v625_v1 = vpop.f32.mrf.mxu0 }
 0x11c   : > { %671 = vst [vmem:[#allocation2] sm:$0xff] %v669_v63  ;;  %v670_v2 = vadd.f32 %v665_v0, %v285_v61 }
 0x11d   : > { %v626_v3 = vpop.f32.mrf.mxu0 }
 0x11e   : > { %672 = vst [vmem:[#allocation2 + $0x8] sm:$0xff] %v670_v2 }
 0x11f   : > { %v681_v4 = vlaneseq  ;;  %v679_v6 = vld [vmem:[%s1137_s2] sm:$0x3] }
 0x121   : > { %v682_v5 = vshrl.u32 %v681_v4, 7 }
 0x123   : > { %v683_v7 = vsub.s32 0, %v682_v5  ;;  %v687_v8 = vsub.s32 1, %v682_v5  ;;  %v677_v9 = vld [vmem:[#allocation2] sm:$0xff] }
 0x125   : > { %v678_v10 = vld [vmem:[#allocation2 + $0x8] sm:$0xff]  ;;  %v684_v11 = vrot.slane %v679_v6, %v683_v7  ;;  %v688_v12 = vrot.slane %v679_v6, %v687_v8 }
 0x127   : > { %v691_v13 = vadd.f32 %v684_v11, %v677_v9  ;;  %v692_v14 = vadd.f32 %v688_v12, %v678_v10 }
 0x129   : > { %v693_v15 = vmax.f32 %v691_v13, 0.0  ;;  %v694_v16 = vmax.f32 %v692_v14, 0.0 }
 0x12b   : > { %v888_v17 = vpack.c.bf16 %v694_v16, %v693_v15 }
 0x12d   : > { %703 = vst [vmem:[%s1138_s3] sm:$0xff] %v888_v17 }
 0x12e PF: > { %s13_s14 = sadd.s32 1, %s1012_s14   ;;  %s1139_s12 = smov %s1008_s13 }
 0x12f   : > { %p10_p8 = scmp.ge.s32.totalorder %s13_s14, 5   ;;  %s1140_s13 = smov %s1142_s15 }
 0x131   :  { %12 = sbr.rel (!%p10_p8) target bundleno = 2 (0x2), region = 76 }

// kernel: resnet_forward.36
= control target key start
LH: loop header
LB: loop body
LE: loop exit
PB: predicated region body
PF: predicated region fallthrough
CT: control target
= control target key end

     0   :  { %v240_v1 = vmov 0   ;;  %v172_v18 = vlaneseq  ;;  %s318_s1 = inlined_call_operand.vmem [shape: bf16[128,256], index: 1, kind: input, shape index: {}]   ;;  %s319_s0 = inlined_call_operand.vmem [shape: bf16[8,128], index: 0, kind: input, shape index: {}]   ;;  %s320_s2 = inlined_call_operand.vmem [shape: f32[1,256], index: 2, kind: input, shape index: {}]   ;;  %s321_s3 = inlined_call_operand.vmem [shape: bf16[8,256], index: 3, kind: output, shape index: {}]  }
   0x1   :  { %v216_v0 = vld [vmem:[%s318_s1 + $0x74] ss:$8 sps:$4 sm:$0xff]   ;;  %152 = vmatprep.mubr.bf16.mxu0 %v240_v1  ;;  %v218_v2 = vld [vmem:[%s318_s1 + $0x70] ss:$8 sps:$4 sm:$0xff]   ;;  %v219_v3 = vld [vmem:[%s318_s1 + $0x64] ss:$8 sps:$4 sm:$0xff]  }
   0x2   :  { %120 = vmatprep.subr.bf16.mxu0 %v216_v0  ;;  %v221_v4 = vld [vmem:[%s318_s1 + $0x60] ss:$8 sps:$4 sm:$0xff]   ;;  %v222_v5 = vld [vmem:[%s318_s1 + $0x54] ss:$8 sps:$4 sm:$0xff]   ;;  %v224_v6 = vld [vmem:[%s318_s1 + $0x50] ss:$8 sps:$4 sm:$0xff]  }
   0x3   :  { %121 = vmatpush1.bf16.msra.mxu0 %v218_v2  ;;  %v225_v7 = vld [vmem:[%s318_s1 + $0x44] ss:$8 sps:$4 sm:$0xff]   ;;  %v227_v8 = vld [vmem:[%s318_s1 + $0x40] ss:$8 sps:$4 sm:$0xff]   ;;  %v228_v9 = vld [vmem:[%s318_s1 + $0x34] ss:$8 sps:$4 sm:$0xff]  }
   0x4   :  { %122 = vmatprep.subr.bf16.mxu0 %v219_v3  ;;  %v230_v10 = vld [vmem:[%s318_s1 + $0x30] ss:$8 sps:$4 sm:$0xff]   ;;  %v231_v11 = vld [vmem:[%s318_s1 + $0x24] ss:$8 sps:$4 sm:$0xff]   ;;  %v233_v12 = vld [vmem:[%s318_s1 + $0x20] ss:$8 sps:$4 sm:$0xff]  }
   0x5   :  { %v234_v13 = vld [vmem:[%s318_s1 + $0x14] ss:$8 sps:$4 sm:$0xff]   ;;  %v236_v14 = vld [vmem:[%s318_s1 + $0x10] ss:$8 sps:$4 sm:$0xff]   ;;  %v237_v15 = vld [vmem:[%s318_s1 + $0x4] ss:$8 sps:$4 sm:$0xff]  }
   0x6   :  { %v239_v16 = vld [vmem:[%s318_s1] ss:$8 sps:$4 sm:$0xff]   ;;  %v173_v19 = vshrl.u32 %v172_v18, 7 }
   0x7   :  { %123 = vmatpush1.bf16.msra.mxu0 %v221_v4  ;;  %v23_v17 = vld [vmem:[%s319_s0] sm:$0xf] }
   0x8   :  { %124 = vmatprep.subr.bf16.mxu0 %v222_v5  ;;  %v174_v20 = vsub.s32 0, %v173_v19  ;;  %v178_v21 = vsub.s32 1, %v173_v19  ;;  %v170_v22 = vld [vmem:[%s320_s2] sm:$0x3] }
   0xa   :  { %v175_v23 = vrot.slane %v170_v22, %v174_v20  ;;  %v179_v24 = vrot.slane %v170_v22, %v178_v21 }
   0xb   :  { %125 = vmatpush1.bf16.msra.mxu0 %v224_v6 }
   0xc   :  { %126 = vmatprep.subr.bf16.mxu0 %v225_v7 }
   0xf   :  { %127 = vmatpush1.bf16.msra.mxu0 %v227_v8 }
  0x10   :  { %128 = vmatprep.subr.bf16.mxu0 %v228_v9 }
  0x13   :  { %129 = vmatpush1.bf16.msra.mxu0 %v230_v10 }
  0x14   :  { %130 = vmatprep.subr.bf16.mxu0 %v231_v11 }
  0x17   :  { %131 = vmatpush1.bf16.msra.mxu0 %v233_v12 }
  0x18   :  { %132 = vmatprep.subr.bf16.mxu0 %v234_v13 }
  0x1b   :  { %133 = vmatpush1.bf16.msra.mxu0 %v236_v14 }
  0x1c   :  { %134 = vmatprep.subr.bf16.mxu0 %v237_v15 }
  0x1f   :  { %135 = vmatpush1.bf16.msra.mxu0 %v239_v16 }
  0x22   :  { %153 = vmatmul.mubr.bf16.vlgmr.msra.gmra.mxu0 %v23_v17 }
  0xe2   :  { %v154_v25 = vpop.f32.mrf.mxu0 }
  0xe3   :  { %v182_v27 = vadd.f32 %v175_v23, %v154_v25 }
  0xe4   :  { %v156_v26 = vpop.f32.mrf.mxu0 }
  0xe5   :  { %v183_v28 = vadd.f32 %v179_v24, %v156_v26 }
  0xe6   :  { %v158_v29 = vpop.f32.mrf.mxu0 }
  0xe7   :  { %v214_v30 = vpack.c.bf16 %v183_v28, %v182_v27 }
  0xe8   :  { %v159_v31 = vpop.f32.mrf.mxu0 }
  0xe9   :  { %192 = vst [vmem:[%s321_s3] sm:$0xff] %v214_v30 }

// kernel: resnet_forward.37
= control target key start
LH: loop header
LB: loop body
LE: loop exit
PB: predicated region body
PF: predicated region fallthrough
CT: control target
= control target key end

     0   :  { %s1131_s15 = smov 0   ;;  %s1133_s16 = smov 0   ;;  %s1233_s0 = inlined_call_operand.vmem [shape: bf16[8,2304], index: 0, kind: input, shape index: {}]   ;;  %s1234_s1 = inlined_call_operand.vmem [shape: bf16[2304,256], index: 1, kind: input, shape index: {}]   ;;  %s1235_s2 = inlined_call_operand.vmem [shape: f32[1,256], index: 2, kind: input, shape index: {}]   ;;  %s1236_s3 = inlined_call_operand.vmem [shape: bf16[8,256], index: 3, kind: input, shape index: {}]   ;;  %s1237_s4 = inlined_call_operand.vmem [shape: bf16[8,256], index: 4, kind: output, shape index: {}]  }
   0x1   :  { %s1135_s17 = smov 0  }
   0x2 LB: > { %s26_s18 = sadd.s32 1, %s1098_s16  ;;  %p915_p0 = scmp.ge.s32.totalorder %s1102_s17, 1  ;;  %s1102_s17 = sphi %s1135_s17, %s14_s17   ;;  %s1098_s16 = sphi %s1133_s16, %s1239_s16   ;;  %s1094_s15 = sphi %s1131_s15, %s1238_s15  }
   0x3   : > { %p27_p1 = scmp.ge.s32.totalorder %s26_s18, 6  ;;  %p236_p2 = scmp.lt.s32.totalorder %s1102_s17, 7 }
   0x5   : > { %s1241_s18 = smov (%p27_p1, %s26_s18), 0  ;;  %p237_p3 = pnand %p915_p0, %p236_p2 }
   0x6   : > { %s293_s19 = smul.u32 (!%p237_p3), 3, %s1094_s15  ;;  %p919_p6 = scmp.ne.s32.totalorder (!%p237_p3), %s1094_s15, 0 }
   0x7   : > { %240 = sbr.rel (%p237_p3) target bundleno = 304 (0x130), region = 36 }
   0x8   : > { %s303_s20 = smul.u32 (!%p237_p3), 48, %s1094_s15  ;;  %p296_p4 = scmp.lt.s32.totalorder (!%p237_p3), %s293_s19, 17 }
   0xa   : > { %p305_p5 = scmp.lt.s32.totalorder (!%p237_p3), %s303_s20, 287 }
   0xc   : > { %s1243_s19 = smov (!%p296_p4, %s293_s19), 17  ;;  %s1245_s20 = smov (!%p305_p5, %s303_s20), 287 }
   0xd   : > { %s916_s21 = sshll.u32 %s1243_s19, 2  ;;  %s977_s25 = sshll.u32 %s1245_s20, 3 }
   0xe   : > { %s1156_s24 = scalar_lea.vmem %s1233_s0, %s916_s21  ;;  %s1161_s28 = scalar_lea.vmem %s1234_s1, %s977_s25 }
   0xf   : > { %344 = sbr.rel (%p919_p6) target bundleno = 22 (0x16), region = 40 }
  0x14   : > { %v1104_v0 = vmov 0.0  }
  0x15   : > { %345 = vst [vmem:[#allocation2] sm:$0xff] %v1104_v0  ;;  %346 = vst [vmem:[#allocation2 + $0x8] sm:$0xff] %v1104_v0 }
  0x16 PF: > { %v1005_v1 = vld [vmem:[%s1161_s28 + $0x74] ss:$8 sps:$4 sm:$0xff]   ;;  %v1007_v2 = vld [vmem:[%s1161_s28 + $0x70] ss:$8 sps:$4 sm:$0xff]   ;;  %v1105_v3 = vmov 0   ;;  %v349_v34 = vld [vmem:[%s1156_s24] sm:$0xff] }
  0x17   : > { %723 = vmatprep.mubr.bf16.mxu1 %v1105_v3  ;;  %650 = vmatprep.subr.bf16.mxu0 %v1005_v1  ;;  %v1008_v4 = vld [vmem:[%s1161_s28 + $0x64] ss:$8 sps:$4 sm:$0xff]   ;;  %v1010_v5 = vld [vmem:[%s1161_s28 + $0x60] ss:$8 sps:$4 sm:$0xff]   ;;  %v1011_v6 = vld [vmem:[%s1161_s28 + $0x54] ss:$8 sps:$4 sm:$0xff]   ;;  %v921_v36 = vcombine.high %v349_v34, %v349_v34  ;;  %v920_v53 = vcombine.low %v349_v34, %v349_v34 }
  0x18   : > { %651 = vmatpush1.bf16.msra.mxu0 %v1007_v2  ;;  %v1013_v7 = vld [vmem:[%s1161_s28 + $0x50] ss:$8 sps:$4 sm:$0xff]   ;;  %v1014_v8 = vld [vmem:[%s1161_s28 + $0x44] ss:$8 sps:$4 sm:$0xff]   ;;  %v1026_v9 = vld [vmem:[%s1161_s28 + $0x174] ss:$8 sps:$4 sm:$0xff]  }
  0x19   : > { %652 = vmatprep.subr.bf16.mxu0 %v1008_v4  ;;  %v1028_v10 = vld [vmem:[%s1161_s28 + $0x170] ss:$8 sps:$4 sm:$0xff]   ;;  %v1016_v11 = vld [vmem:[%s1161_s28 + $0x40] ss:$8 sps:$4 sm:$0xff]   ;;  %v1017_v12 = vld [vmem:[%s1161_s28 + $0x34] ss:$8 sps:$4 sm:$0xff]   ;;  %691 = vmatprep.subr.bf16.mxu1 %v1026_v9 }
  0x1a   : > { %v1032_v13 = vld [vmem:[%s1161_s28 + $0x164] ss:$8 sps:$4 sm:$0xff]   ;;  %692 = vmatpush1.bf16.msra.mxu1 %v1028_v10  ;;  %v1034_v14 = vld [vmem:[%s1161_s28 + $0x160] ss:$8 sps:$4 sm:$0xff]   ;;  %v1019_v15 = vld [vmem:[%s1161_s28 + $0x30] ss:$8 sps:$4 sm:$0xff]   ;;  %682 = vmatprep.mubr.bf16.mxu0 %v921_v36 }
  0x1b   : > { %693 = vmatprep.subr.bf16.mxu1 %v1032_v13  ;;  %v1038_v16 = vld [vmem:[%s1161_s28 + $0x154] ss:$8 sps:$4 sm:$0xff]   ;;  %v1020_v17 = vld [vmem:[%s1161_s28 + $0x24] ss:$8 sps:$4 sm:$0xff]   ;;  %v1040_v18 = vld [vmem:[%s1161_s28 + $0x150] ss:$8 sps:$4 sm:$0xff]  }
  0x1c   : > { %653 = vmatpush1.bf16.msra.mxu0 %v1010_v5  ;;  %v1044_v19 = vld [vmem:[%s1161_s28 + $0x144] ss:$8 sps:$4 sm:$0xff]   ;;  %v1022_v20 = vld [vmem:[%s1161_s28 + $0x20] ss:$8 sps:$4 sm:$0xff]   ;;  %v1023_v21 = vld [vmem:[%s1161_s28 + $0x14] ss:$8 sps:$4 sm:$0xff]  }
  0x1d   : > { %654 = vmatprep.subr.bf16.mxu0 %v1011_v6  ;;  %v1046_v22 = vld [vmem:[%s1161_s28 + $0x140] ss:$8 sps:$4 sm:$0xff]   ;;  %v1050_v23 = vld [vmem:[%s1161_s28 + $0x134] ss:$8 sps:$4 sm:$0xff]   ;;  %v1025_v24 = vld [vmem:[%s1161_s28 + $0x10] ss:$8 sps:$4 sm:$0xff]  }
  0x1e   : > { %694 = vmatpush1.bf16.msra.mxu1 %v1034_v14  ;;  %v1029_v25 = vld [vmem:[%s1161_s28 + $0x4] ss:$8 sps:$4 sm:$0xff]   ;;  %v1052_v26 = vld [vmem:[%s1161_s28 + $0x130] ss:$8 sps:$4 sm:$0xff]   ;;  %v1031_v28 = vld [vmem:[%s1161_s28] ss:$8 sps:$4 sm:$0xff]  }
  0x1f   : > { %695 = vmatprep.subr.bf16.mxu1 %v1038_v16  ;;  %v1056_v27 = vld [vmem:[%s1161_s28 + $0x124] ss:$8 sps:$4 sm:$0xff]   ;;  %v1035_v29 = vld [vmem:[%s1161_s28 + $0xf4] ss:$8 sps:$4 sm:$0xff]   ;;  %v1058_v30 = vld [vmem:[%s1161_s28 + $0x120] ss:$8 sps:$4 sm:$0xff]  }
  0x20   : > { %655 = vmatpush1.bf16.msra.mxu0 %v1013_v7  ;;  %v1062_v31 = vld [vmem:[%s1161_s28 + $0x114] ss:$8 sps:$4 sm:$0xff]   ;;  %v1037_v32 = vld [vmem:[%s1161_s28 + $0xf0] ss:$8 sps:$4 sm:$0xff]   ;;  %v1041_v33 = vld [vmem:[%s1161_s28 + $0xe4] ss:$8 sps:$4 sm:$0xff]  }
  0x21   : > { %656 = vmatprep.subr.bf16.mxu0 %v1014_v8  ;;  %v1064_v35 = vld [vmem:[%s1161_s28 + $0x110] ss:$8 sps:$4 sm:$0xff]   ;;  %v1068_v37 = vld [vmem:[%s1161_s28 + $0x104] ss:$8 sps:$4 sm:$0xff]   ;;  %v1043_v38 = vld [vmem:[%s1161_s28 + $0xe0] ss:$8 sps:$4 sm:$0xff]  }
  0x22   : > { %696 = vmatpush1.bf16.msra.mxu1 %v1040_v18  ;;  %v1047_v39 = vld [vmem:[%s1161_s28 + $0xd4] ss:$8 sps:$4 sm:$0xff]   ;;  %v1070_v40 = vld [vmem:[%s1161_s28 + $0x100] ss:$8 sps:$4 sm:$0xff]   ;;  %v1049_v41 = vld [vmem:[%s1161_s28 + $0xd0] ss:$8 sps:$4 sm:$0xff]  }
  0x23   : > { %697 = vmatprep.subr.bf16.mxu1 %v1044_v19  ;;  %v1053_v42 = vld [vmem:[%s1161_s28 + $0xc4] ss:$8 sps:$4 sm:$0xff]   ;;  %v1074_v43 = vld [vmem:[%s1156_s24 + $0x8] ss:$0 sps:$4 sm:$0xff]   ;;  %v1059_v45 = vld [vmem:[%s1161_s28 + $0xb4] ss:$8 sps:$4 sm:$0xff]  }
  0x24   : > { %657 = vmatpush1.bf16.msra.mxu0 %v1016_v11  ;;  %v1055_v44 = vld [vmem:[%s1161_s28 + $0xc0] ss:$8 sps:$4 sm:$0xff]   ;;  %v1061_v46 = vld [vmem:[%s1161_s28 + $0xb0] ss:$8 sps:$4 sm:$0xff]   ;;  %v1065_v47 = vld [vmem:[%s1161_s28 + $0xa4] ss:$8 sps:$4 sm:$0xff]  }
  0x25   : > { %658 = vmatprep.subr.bf16.mxu0 %v1017_v12  ;;  %v1067_v48 = vld [vmem:[%s1161_s28 + $0xa0] ss:$8 sps:$4 sm:$0xff]   ;;  %v1071_v49 = vld [vmem:[%s1161_s28 + $0x94] ss:$8 sps:$4 sm:$0xff]   ;;  %v1073_v50 = vld [vmem:[%s1161_s28 + $0x90] ss:$8 sps:$4 sm:$0xff]  }
  0x26   : > { %698 = vmatpush1.bf16.msra.mxu1 %v1046_v22  ;;  %v1075_v51 = vld [vmem:[%s1161_s28 + $0x84] ss:$8 sps:$4 sm:$0xff]   ;;  %v1077_v52 = vld [vmem:[%s1161_s28 + $0x80] ss:$8 sps:$4 sm:$0xff]   ;;  %p971_p7 = scmp.ne.s32.totalorder %s1094_s15, 5 }
  0x27   : > { %699 = vmatprep.subr.bf16.mxu1 %v1050_v23  ;;  %v347_v58 = vld [vmem:[#allocation2] sm:$0xff]  ;;  %v348_v61 = vld [vmem:[#allocation2 + $0x8] sm:$0xff] }
  0x28   : > { %659 = vmatpush1.bf16.msra.mxu0 %v1019_v15 }
  0x29   : > { %660 = vmatprep.subr.bf16.mxu0 %v1020_v17 }
  0x2a   : > { %700 = vmatpush1.bf16.msra.mxu1 %v1052_v26 }
  0x2b   : > { %701 = vmatprep.subr.bf16.mxu1 %v1056_v27 }
  0x2c   : > { %661 = vmatpush1.bf16.msra.mxu0 %v1022_v20 }
  0x2d   : > { %662 = vmatprep.subr.bf16.mxu0 %v1023_v21 }
  0x2e   : > { %702 = vmatpush1.bf16.msra.mxu1 %v1058_v30 }
  0x2f   : > { %703 = vmatprep.subr.bf16.mxu1 %v1062_v31 }
  0x30   : > { %663 = vmatpush1.bf16.msra.mxu0 %v1025_v24 }
  0x31   : > { %664 = vmatprep.subr.bf16.mxu0 %v1029_v25 }
  0x32   : > { %704 = vmatpush1.bf16.msra.mxu1 %v1064_v35 }
  0x33   : > { %705 = vmatprep.subr.bf16.mxu1 %v1068_v37 }
  0x34   : > { %665 = vmatpush1.bf16.msra.mxu0 %v1031_v28 }
  0x35   : > { %666 = vmatprep.subr.bf16.mxu0 %v1035_v29 }
  0x36   : > { %706 = vmatpush1.bf16.msra.mxu1 %v1070_v40 }
  0x38   : > { %667 = vmatpush2.bf16.msra.mxu0 %v1037_v32 }
  0x39   : > { %668 = vmatprep.subr.bf16.mxu0 %v1041_v33  ;;  %724 = vmatmul.mubr.bf16.vlgmr.msra.gmra.mxu1 %v1074_v43 }
  0x3c   : > { %669 = vmatpush2.bf16.msra.mxu0 %v1043_v38 }
  0x3d   : > { %670 = vmatprep.subr.bf16.mxu0 %v1047_v39 }
  0x40   : > { %671 = vmatpush2.bf16.msra.mxu0 %v1049_v41 }
  0x41   : > { %672 = vmatprep.subr.bf16.mxu0 %v1053_v42 }
  0x44   : > { %673 = vmatpush2.bf16.msra.mxu0 %v1055_v44 }
  0x45   : > { %674 = vmatprep.subr.bf16.mxu0 %v1059_v45 }
  0x48   : > { %675 = vmatpush2.bf16.msra.mxu0 %v1061_v46 }
  0x49   : > { %676 = vmatprep.subr.bf16.mxu0 %v1065_v47 }
  0x4c   : > { %677 = vmatpush2.bf16.msra.mxu0 %v1067_v48 }
  0x4d   : > { %678 = vmatprep.subr.bf16.mxu0 %v1071_v49 }
  0x50   : > { %679 = vmatpush2.bf16.msra.mxu0 %v1073_v50 }
  0x51   : > { %680 = vmatprep.subr.bf16.mxu0 %v1075_v51 }
  0x54   : > { %681 = vmatpush2.bf16.msra.mxu0 %v1077_v52 }
  0x57   : > { %683 = vmatmul.mubr.bf16.vlgmr.msra.gmra.mxu0 %v920_v53 }
  0xf9   : > { %v725_v54 = vpop.f32.mrf.mxu1 }
  0xfb   : > { %v727_v55 = vpop.f32.mrf.mxu1 }
  0xfd   : > { %v729_v56 = vpop.f32.mrf.mxu1 }
  0xff   : > { %v730_v57 = vpop.f32.mrf.mxu1 }
 0x117   : > { %v684_v59 = vpop.f32.mrf.mxu0 }
 0x118   : > { %v726_v60 = vadd.f32 %v725_v54, %v684_v59 }
 0x119   : > { %v686_v62 = vpop.f32.mrf.mxu0 }
 0x11a   : > { %v732_v63 = vadd.f32 %v726_v60, %v347_v58  ;;  %v728_v0 = vadd.f32 %v727_v55, %v686_v62  ;;  %739 = sbr.rel (%p971_p7) target bundleno = 304 (0x130), region = 44 }
 0x11b   : > { %v688_v1 = vpop.f32.mrf.mxu0 }
 0x11c   : > { %734 = vst [vmem:[#allocation2] sm:$0xff] %v732_v63  ;;  %v733_v2 = vadd.f32 %v728_v0, %v348_v61 }
 0x11d   : > { %v689_v3 = vpop.f32.mrf.mxu0 }
 0x11e   : > { %735 = vst [vmem:[#allocation2 + $0x8] sm:$0xff] %v733_v2 }
 0x11f   : > { %v744_v4 = vlaneseq  ;;  %v742_v6 = vld [vmem:[%s1235_s2] sm:$0x3] }
 0x120   : > { %v756_v7 = vld [vmem:[%s1236_s3] sm:$0xff] }
 0x121   : > { %v745_v5 = vshrl.u32 %v744_v4, 7  ;;  %v757_v14 = vunpack.c.l.bf16 %v756_v7  ;;  %v758_v15 = vunpack.c.h.bf16 %v756_v7 }
 0x123   : > { %v746_v8 = vsub.s32 0, %v745_v5  ;;  %v750_v9 = vsub.s32 1, %v745_v5  ;;  %v740_v10 = vld [vmem:[#allocation2] sm:$0xff] }
 0x125   : > { %v741_v11 = vld [vmem:[#allocation2 + $0x8] sm:$0xff]  ;;  %v747_v12 = vrot.slane %v742_v6, %v746_v8  ;;  %v751_v13 = vrot.slane %v742_v6, %v750_v9 }
 0x127   : > { %v754_v16 = vadd.f32 %v747_v12, %v740_v10  ;;  %v755_v17 = vadd.f32 %v751_v13, %v741_v11 }
 0x129   : > { %v759_v18 = vadd.f32 %v757_v14, %v754_v16  ;;  %v760_v19 = vadd.f32 %v758_v15, %v755_v17 }
 0x12b   : > { %v761_v20 = vmax.f32 %v759_v18, 0.0  ;;  %v762_v21 = vmax.f32 %v760_v19, 0.0 }
 0x12d   : > { %v978_v22 = vpack.c.bf16 %v762_v21, %v761_v20 }
 0x12f   : > { %771 = vst [vmem:[%s1237_s4] sm:$0xff] %v978_v22 }
 0x130 PF: > { %s14_s17 = sadd.s32 1, %s1102_s17   ;;  %s1238_s15 = smov %s1098_s16 }
 0x131   : > { %p11_p8 = scmp.ge.s32.totalorder %s14_s17, 8   ;;  %s1239_s16 = smov %s1241_s18 }
 0x133   :  { %13 = sbr.rel (!%p11_p8) target bundleno = 2 (0x2), region = 83 }

// kernel: resnet_forward.38
= control target key start
LH: loop header
LB: loop body
LE: loop exit
PB: predicated region body
PF: predicated region fallthrough
CT: control target
= control target key end

     0   :  { %s1036_s12 = smov 0   ;;  %s1038_s13 = smov 0   ;;  %s1135_s0 = inlined_call_operand.vmem [shape: bf16[8,2304], index: 0, kind: input, shape index: {}]   ;;  %s1136_s1 = inlined_call_operand.vmem [shape: bf16[2304,256], index: 1, kind: input, shape index: {}]   ;;  %s1137_s2 = inlined_call_operand.vmem [shape: f32[1,256], index: 2, kind: input, shape index: {}]   ;;  %s1138_s3 = inlined_call_operand.vmem [shape: bf16[8,256], index: 3, kind: output, shape index: {}]  }
   0x1   :  { %s1040_s14 = smov 0  }
   0x2 LB: > { %s25_s15 = sadd.s32 1, %s1008_s13  ;;  %p825_p0 = scmp.ge.s32.totalorder %s1012_s14, 1  ;;  %s1012_s14 = sphi %s1040_s14, %s13_s14   ;;  %s1008_s13 = sphi %s1038_s13, %s1140_s13   ;;  %s1004_s12 = sphi %s1036_s12, %s1139_s12  }
   0x3   : > { %p26_p1 = scmp.ge.s32.totalorder %s25_s15, 6  ;;  %p194_p2 = scmp.lt.s32.totalorder %s1012_s14, 7 }
   0x5   : > { %s1142_s15 = smov (%p26_p1, %s25_s15), 0  ;;  %p195_p3 = pnand %p825_p0, %p194_p2 }
   0x6   : > { %s240_s16 = smul.u32 (!%p195_p3), 3, %s1004_s12  ;;  %p829_p6 = scmp.ne.s32.totalorder (!%p195_p3), %s1004_s12, 0 }
   0x7   : > { %198 = sbr.rel (%p195_p3) target bundleno = 302 (0x12e), region = 32 }
   0x8   : > { %s250_s17 = smul.u32 (!%p195_p3), 48, %s1004_s12  ;;  %p243_p4 = scmp.lt.s32.totalorder (!%p195_p3), %s240_s16, 17 }
   0xa   : > { %p252_p5 = scmp.lt.s32.totalorder (!%p195_p3), %s250_s17, 287 }
   0xc   : > { %s1144_s16 = smov (!%p243_p4, %s240_s16), 17  ;;  %s1146_s17 = smov (!%p252_p5, %s250_s17), 287 }
   0xd   : > { %s826_s18 = sshll.u32 %s1144_s16, 2  ;;  %s887_s22 = sshll.u32 %s1146_s17, 3 }
   0xe   : > { %s1061_s21 = scalar_lea.vmem %s1135_s0, %s826_s18  ;;  %s1066_s25 = scalar_lea.vmem %s1136_s1, %s887_s22 }
   0xf   : > { %281 = sbr.rel (%p829_p6) target bundleno = 22 (0x16), region = 36 }
  0x14   : > { %v1014_v0 = vmov 0.0  }
  0x15   : > { %282 = vst [vmem:[#allocation2] sm:$0xff] %v1014_v0  ;;  %283 = vst [vmem:[#allocation2 + $0x8] sm:$0xff] %v1014_v0 }
  0x16 PF: > { %v915_v1 = vld [vmem:[%s1066_s25 + $0x74] ss:$8 sps:$4 sm:$0xff]   ;;  %v917_v2 = vld [vmem:[%s1066_s25 + $0x70] ss:$8 sps:$4 sm:$0xff]   ;;  %v1015_v3 = vmov 0   ;;  %v286_v34 = vld [vmem:[%s1061_s21] sm:$0xff] }
  0x17   : > { %660 = vmatprep.mubr.bf16.mxu1 %v1015_v3  ;;  %587 = vmatprep.subr.bf16.mxu0 %v915_v1  ;;  %v918_v4 = vld [vmem:[%s1066_s25 + $0x64] ss:$8 sps:$4 sm:$0xff]   ;;  %v920_v5 = vld [vmem:[%s1066_s25 + $0x60] ss:$8 sps:$4 sm:$0xff]   ;;  %v921_v6 = vld [vmem:[%s1066_s25 + $0x54] ss:$8 sps:$4 sm:$0xff]   ;;  %v831_v36 = vcombine.high %v286_v34, %v286_v34  ;;  %v830_v53 = vcombine.low %v286_v34, %v286_v34 }
  0x18   : > { %588 = vmatpush1.bf16.msra.mxu0 %v917_v2  ;;  %v923_v7 = vld [vmem:[%s1066_s25 + $0x50] ss:$8 sps:$4 sm:$0xff]   ;;  %v924_v8 = vld [vmem:[%s1066_s25 + $0x44] ss:$8 sps:$4 sm:$0xff]   ;;  %v936_v9 = vld [vmem:[%s1066_s25 + $0x174] ss:$8 sps:$4 sm:$0xff]  }
  0x19   : > { %589 = vmatprep.subr.bf16.mxu0 %v918_v4  ;;  %v938_v10 = vld [vmem:[%s1066_s25 + $0x170] ss:$8 sps:$4 sm:$0xff]   ;;  %v926_v11 = vld [vmem:[%s1066_s25 + $0x40] ss:$8 sps:$4 sm:$0xff]   ;;  %v927_v12 = vld [vmem:[%s1066_s25 + $0x34] ss:$8 sps:$4 sm:$0xff]   ;;  %628 = vmatprep.subr.bf16.mxu1 %v936_v9 }
  0x1a   : > { %v942_v13 = vld [vmem:[%s1066_s25 + $0x164] ss:$8 sps:$4 sm:$0xff]   ;;  %629 = vmatpush1.bf16.msra.mxu1 %v938_v10  ;;  %v944_v14 = vld [vmem:[%s1066_s25 + $0x160] ss:$8 sps:$4 sm:$0xff]   ;;  %v929_v15 = vld [vmem:[%s1066_s25 + $0x30] ss:$8 sps:$4 sm:$0xff]   ;;  %619 = vmatprep.mubr.bf16.mxu0 %v831_v36 }
  0x1b   : > { %630 = vmatprep.subr.bf16.mxu1 %v942_v13  ;;  %v948_v16 = vld [vmem:[%s1066_s25 + $0x154] ss:$8 sps:$4 sm:$0xff]   ;;  %v930_v17 = vld [vmem:[%s1066_s25 + $0x24] ss:$8 sps:$4 sm:$0xff]   ;;  %v950_v18 = vld [vmem:[%s1066_s25 + $0x150] ss:$8 sps:$4 sm:$0xff]  }
  0x1c   : > { %590 = vmatpush1.bf16.msra.mxu0 %v920_v5  ;;  %v954_v19 = vld [vmem:[%s1066_s25 + $0x144] ss:$8 sps:$4 sm:$0xff]   ;;  %v932_v20 = vld [vmem:[%s1066_s25 + $0x20] ss:$8 sps:$4 sm:$0xff]   ;;  %v933_v21 = vld [vmem:[%s1066_s25 + $0x14] ss:$8 sps:$4 sm:$0xff]  }
  0x1d   : > { %591 = vmatprep.subr.bf16.mxu0 %v921_v6  ;;  %v956_v22 = vld [vmem:[%s1066_s25 + $0x140] ss:$8 sps:$4 sm:$0xff]   ;;  %v960_v23 = vld [vmem:[%s1066_s25 + $0x134] ss:$8 sps:$4 sm:$0xff]   ;;  %v935_v24 = vld [vmem:[%s1066_s25 + $0x10] ss:$8 sps:$4 sm:$0xff]  }
  0x1e   : > { %631 = vmatpush1.bf16.msra.mxu1 %v944_v14  ;;  %v939_v25 = vld [vmem:[%s1066_s25 + $0x4] ss:$8 sps:$4 sm:$0xff]   ;;  %v962_v26 = vld [vmem:[%s1066_s25 + $0x130] ss:$8 sps:$4 sm:$0xff]   ;;  %v941_v28 = vld [vmem:[%s1066_s25] ss:$8 sps:$4 sm:$0xff]  }
  0x1f   : > { %632 = vmatprep.subr.bf16.mxu1 %v948_v16  ;;  %v966_v27 = vld [vmem:[%s1066_s25 + $0x124] ss:$8 sps:$4 sm:$0xff]   ;;  %v945_v29 = vld [vmem:[%s1066_s25 + $0xf4] ss:$8 sps:$4 sm:$0xff]   ;;  %v968_v30 = vld [vmem:[%s1066_s25 + $0x120] ss:$8 sps:$4 sm:$0xff]  }
  0x20   : > { %592 = vmatpush1.bf16.msra.mxu0 %v923_v7  ;;  %v972_v31 = vld [vmem:[%s1066_s25 + $0x114] ss:$8 sps:$4 sm:$0xff]   ;;  %v947_v32 = vld [vmem:[%s1066_s25 + $0xf0] ss:$8 sps:$4 sm:$0xff]   ;;  %v951_v33 = vld [vmem:[%s1066_s25 + $0xe4] ss:$8 sps:$4 sm:$0xff]  }
  0x21   : > { %593 = vmatprep.subr.bf16.mxu0 %v924_v8  ;;  %v974_v35 = vld [vmem:[%s1066_s25 + $0x110] ss:$8 sps:$4 sm:$0xff]   ;;  %v978_v37 = vld [vmem:[%s1066_s25 + $0x104] ss:$8 sps:$4 sm:$0xff]   ;;  %v953_v38 = vld [vmem:[%s1066_s25 + $0xe0] ss:$8 sps:$4 sm:$0xff]  }
  0x22   : > { %633 = vmatpush1.bf16.msra.mxu1 %v950_v18  ;;  %v957_v39 = vld [vmem:[%s1066_s25 + $0xd4] ss:$8 sps:$4 sm:$0xff]   ;;  %v980_v40 = vld [vmem:[%s1066_s25 + $0x100] ss:$8 sps:$4 sm:$0xff]   ;;  %v959_v41 = vld [vmem:[%s1066_s25 + $0xd0] ss:$8 sps:$4 sm:$0xff]  }
  0x23   : > { %634 = vmatprep.subr.bf16.mxu1 %v954_v19  ;;  %v963_v42 = vld [vmem:[%s1066_s25 + $0xc4] ss:$8 sps:$4 sm:$0xff]   ;;  %v984_v43 = vld [vmem:[%s1061_s21 + $0x8] ss:$0 sps:$4 sm:$0xff]   ;;  %v969_v45 = vld [vmem:[%s1066_s25 + $0xb4] ss:$8 sps:$4 sm:$0xff]  }
  0x24   : > { %594 = vmatpush1.bf16.msra.mxu0 %v926_v11  ;;  %v965_v44 = vld [vmem:[%s1066_s25 + $0xc0] ss:$8 sps:$4 sm:$0xff]   ;;  %v971_v46 = vld [vmem:[%s1066_s25 + $0xb0] ss:$8 sps:$4 sm:$0xff]   ;;  %v975_v47 = vld [vmem:[%s1066_s25 + $0xa4] ss:$8 sps:$4 sm:$0xff]  }
  0x25   : > { %595 = vmatprep.subr.bf16.mxu0 %v927_v12  ;;  %v977_v48 = vld [vmem:[%s1066_s25 + $0xa0] ss:$8 sps:$4 sm:$0xff]   ;;  %v981_v49 = vld [vmem:[%s1066_s25 + $0x94] ss:$8 sps:$4 sm:$0xff]   ;;  %v983_v50 = vld [vmem:[%s1066_s25 + $0x90] ss:$8 sps:$4 sm:$0xff]  }
  0x26   : > { %635 = vmatpush1.bf16.msra.mxu1 %v956_v22  ;;  %v985_v51 = vld [vmem:[%s1066_s25 + $0x84] ss:$8 sps:$4 sm:$0xff]   ;;  %v987_v52 = vld [vmem:[%s1066_s25 + $0x80] ss:$8 sps:$4 sm:$0xff]   ;;  %p881_p7 = scmp.ne.s32.totalorder %s1004_s12, 5 }
  0x27   : > { %636 = vmatprep.subr.bf16.mxu1 %v960_v23  ;;  %v284_v58 = vld [vmem:[#allocation2] sm:$0xff]  ;;  %v285_v61 = vld [vmem:[#allocation2 + $0x8] sm:$0xff] }
  0x28   : > { %596 = vmatpush1.bf16.msra.mxu0 %v929_v15 }
  0x29   : > { %597 = vmatprep.subr.bf16.mxu0 %v930_v17 }
  0x2a   : > { %637 = vmatpush1.bf16.msra.mxu1 %v962_v26 }
  0x2b   : > { %638 = vmatprep.subr.bf16.mxu1 %v966_v27 }
  0x2c   : > { %598 = vmatpush1.bf16.msra.mxu0 %v932_v20 }
  0x2d   : > { %599 = vmatprep.subr.bf16.mxu0 %v933_v21 }
  0x2e   : > { %639 = vmatpush1.bf16.msra.mxu1 %v968_v30 }
  0x2f   : > { %640 = vmatprep.subr.bf16.mxu1 %v972_v31 }
  0x30   : > { %600 = vmatpush1.bf16.msra.mxu0 %v935_v24 }
  0x31   : > { %601 = vmatprep.subr.bf16.mxu0 %v939_v25 }
  0x32   : > { %641 = vmatpush1.bf16.msra.mxu1 %v974_v35 }
  0x33   : > { %642 = vmatprep.subr.bf16.mxu1 %v978_v37 }
  0x34   : > { %602 = vmatpush1.bf16.msra.mxu0 %v941_v28 }
  0x35   : > { %603 = vmatprep.subr.bf16.mxu0 %v945_v29 }
  0x36   : > { %643 = vmatpush1.bf16.msra.mxu1 %v980_v40 }
  0x38   : > { %604 = vmatpush2.bf16.msra.mxu0 %v947_v32 }
  0x39   : > { %605 = vmatprep.subr.bf16.mxu0 %v951_v33  ;;  %661 = vmatmul.mubr.bf16.vlgmr.msra.gmra.mxu1 %v984_v43 }
  0x3c   : > { %606 = vmatpush2.bf16.msra.mxu0 %v953_v38 }
  0x3d   : > { %607 = vmatprep.subr.bf16.mxu0 %v957_v39 }
  0x40   : > { %608 = vmatpush2.bf16.msra.mxu0 %v959_v41 }
  0x41   : > { %609 = vmatprep.subr.bf16.mxu0 %v963_v42 }
  0x44   : > { %610 = vmatpush2.bf16.msra.mxu0 %v965_v44 }
  0x45   : > { %611 = vmatprep.subr.bf16.mxu0 %v969_v45 }
  0x48   : > { %612 = vmatpush2.bf16.msra.mxu0 %v971_v46 }
  0x49   : > { %613 = vmatprep.subr.bf16.mxu0 %v975_v47 }
  0x4c   : > { %614 = vmatpush2.bf16.msra.mxu0 %v977_v48 }
  0x4d   : > { %615 = vmatprep.subr.bf16.mxu0 %v981_v49 }
  0x50   : > { %616 = vmatpush2.bf16.msra.mxu0 %v983_v50 }
  0x51   : > { %617 = vmatprep.subr.bf16.mxu0 %v985_v51 }
  0x54   : > { %618 = vmatpush2.bf16.msra.mxu0 %v987_v52 }
  0x57   : > { %620 = vmatmul.mubr.bf16.vlgmr.msra.gmra.mxu0 %v830_v53 }
  0xf9   : > { %v662_v54 = vpop.f32.mrf.mxu1 }
  0xfb   : > { %v664_v55 = vpop.f32.mrf.mxu1 }
  0xfd   : > { %v666_v56 = vpop.f32.mrf.mxu1 }
  0xff   : > { %v667_v57 = vpop.f32.mrf.mxu1 }
 0x117   : > { %v621_v59 = vpop.f32.mrf.mxu0 }
 0x118   : > { %v663_v60 = vadd.f32 %v662_v54, %v621_v59 }
 0x119   : > { %v623_v62 = vpop.f32.mrf.mxu0 }
 0x11a   : > { %v669_v63 = vadd.f32 %v663_v60, %v284_v58  ;;  %v665_v0 = vadd.f32 %v664_v55, %v623_v62  ;;  %676 = sbr.rel (%p881_p7) target bundleno = 302 (0x12e), region = 40 }
 0x11b   : > { %v625_v1 = vpop.f32.mrf.mxu0 }
 0x11c   : > { %671 = vst [vmem:[#allocation2] sm:$0xff] %v669_v63  ;;  %v670_v2 = vadd.f32 %v665_v0, %v285_v61 }
 0x11d   : > { %v626_v3 = vpop.f32.mrf.mxu0 }
 0x11e   : > { %672 = vst [vmem:[#allocation2 + $0x8] sm:$0xff] %v670_v2 }
 0x11f   : > { %v681_v4 = vlaneseq  ;;  %v679_v6 = vld [vmem:[%s1137_s2] sm:$0x3] }
 0x121   : > { %v682_v5 = vshrl.u32 %v681_v4, 7 }
 0x123   : > { %v683_v7 = vsub.s32 0, %v682_v5  ;;  %v687_v8 = vsub.s32 1, %v682_v5  ;;  %v677_v9 = vld [vmem:[#allocation2] sm:$0xff] }
 0x125   : > { %v678_v10 = vld [vmem:[#allocation2 + $0x8] sm:$0xff]  ;;  %v684_v11 = vrot.slane %v679_v6, %v683_v7  ;;  %v688_v12 = vrot.slane %v679_v6, %v687_v8 }
 0x127   : > { %v691_v13 = vadd.f32 %v684_v11, %v677_v9  ;;  %v692_v14 = vadd.f32 %v688_v12, %v678_v10 }
 0x129   : > { %v693_v15 = vmax.f32 %v691_v13, 0.0  ;;  %v694_v16 = vmax.f32 %v692_v14, 0.0 }
 0x12b   : > { %v888_v17 = vpack.c.bf16 %v694_v16, %v693_v15 }
 0x12d   : > { %703 = vst [vmem:[%s1138_s3] sm:$0xff] %v888_v17 }
 0x12e PF: > { %s13_s14 = sadd.s32 1, %s1012_s14   ;;  %s1139_s12 = smov %s1008_s13 }
 0x12f   : > { %p10_p8 = scmp.ge.s32.totalorder %s13_s14, 8   ;;  %s1140_s13 = smov %s1142_s15 }
 0x131   :  { %12 = sbr.rel (!%p10_p8) target bundleno = 2 (0x2), region = 76 }

// kernel: resnet_forward.40
= control target key start
LH: loop header
LB: loop body
LE: loop exit
PB: predicated region body
PF: predicated region fallthrough
CT: control target
= control target key end

     0   :  { %s1320_s12 = smov 0   ;;  %s1322_s13 = smov 0   ;;  %s1583_s0 = inlined_call_operand.vmem [shape: bf16[8,2304], index: 0, kind: input, shape index: {}]   ;;  %s1584_s1 = inlined_call_operand.vmem [shape: bf16[2304,512], index: 1, kind: input, shape index: {}]   ;;  %s1585_s2 = inlined_call_operand.vmem [shape: f32[1,512], index: 2, kind: input, shape index: {}]   ;;  %s1586_s3 = inlined_call_operand.vmem [shape: bf16[8,512], index: 3, kind: output, shape index: {}]  }
   0x1   :  { %s1324_s14 = smov 0   ;;  %s1326_s15 = smov 0  }
   0x2   :  { %s1328_s16 = smov 0   ;;  %s1330_s17 = smov 0  }
   0x3   :  { %s1332_s18 = smov 0  }
   0x4 LB: > { %s25_s19 = sadd.s32 1, %s1288_s16  ;;  %s28_s20 = sadd.s32 1, %s1292_s17  ;;  %s1296_s18 = sphi %s1332_s18, %s13_s18   ;;  %s1292_s17 = sphi %s1330_s17, %s1592_s17   ;;  %s1288_s16 = sphi %s1328_s16, %s1591_s16   ;;  %s1284_s15 = sphi %s1326_s15, %s1590_s15   ;;  %s1280_s14 = sphi %s1324_s14, %s1589_s14   ;;  %s1276_s13 = sphi %s1322_s13, %s1588_s13   ;;  %s1272_s12 = sphi %s1320_s12, %s1587_s12  }
   0x5   : > { %p26_p0 = scmp.ge.s32.totalorder %s25_s19, 6  ;;  %p76_p1 = scmp.ne.s32.totalorder %s1276_s13, %s1272_s12 }
   0x6   : > { %p77_p2 = scmp.eq.s32.totalorder %s1296_s18, 0  ;;  %s69_s24 = sadd.s32 1, %s1276_s13 }
   0x7   : > { %s1594_s19 = smov (%p26_p0, %s25_s19), 0  ;;  %s1596_s20 = smov (!%p26_p0, %s28_s20), %s1292_s17 }
   0x8   : > { %p78_p3 = por %p77_p2, %p76_p1  ;;  %p30_p4 = scmp.ge.s32.totalorder %s1596_s20, 2 }
   0x9   : > { %s64_s21 = ssub.s32 %s1288_s16, %s1594_s19  ;;  %p1040_p6 = scmp.ge.s32.totalorder %s1296_s18, 12 }
   0xa   : > { %s1598_s20 = smov (%p30_p4, %s1596_s20), 0 }
   0xb   : > { %s65_s22 = ssub.s32 %s1292_s17, %s1598_s20  ;;  %156 = sbr.rel (%p1040_p6) target bundleno = 48 (0x30), region = 16 }
   0xc   : > { %s66_s23 = sor.u32 %s65_s22, %s64_s21 }
   0xd   : > { %p67_p5 = scmp.eq.s32.totalorder %s66_s23, 0 }
   0xf   : > { %s1371_s25 = scalar_select %p67_p5, %s1276_s13, %s69_s24  }
  0x10   : > { %172 = sbr.rel (!%p78_p3) target bundleno = 48 (0x30), region = 24  ;;  %s174_s26 = sand.u32 (%p78_p3), 1, %s1276_s13  }
  0x11   : > { %s1107_s27 = smul.u32 (%p78_p3), 384, %s174_s26  ;;  %s1041_s28 = sshll.u32 (%p78_p3), %s1292_s17, 1 }
  0x12   : > { %s1105_s29 = smul.u32 (%p78_p3), 192, %s1288_s16 }
  0x13   : > { %s1385_s8 = scalar_lea.vmem (%p78_p3), [#allocation3], %s1107_s27 }
  0x14   : > { %s180_s30 = sadd.s32 (%p78_p3), %s1105_s29, %s1041_s28 }
  0x15   : > { %s1043_s4 = sshll.u32 %s180_s30, 2 }
  0x16   : > { %s1380_s7 = scalar_lea.vmem %s1584_s1, %s1043_s4 }
  0x17   : > { %v305_v0 = vld [vmem:[%s1380_s7] sm:$0xff]  ;;  %v307_v1 = vld [vmem:[%s1380_s7 + $0x10] sm:$0xff] }
  0x18   : > { %v309_v2 = vld [vmem:[%s1380_s7 + $0x20] sm:$0xff]  ;;  %306 = vst [vmem:[%s1385_s8] sm:$0xff] %v305_v0  ;;  %308 = vst [vmem:[%s1385_s8 + $0x8] sm:$0xff] %v307_v1  ;;  %v311_v3 = vld [vmem:[%s1380_s7 + $0x30] sm:$0xff] }
  0x19   : > { %310 = vst [vmem:[%s1385_s8 + $0x10] sm:$0xff] %v309_v2  ;;  %v313_v4 = vld [vmem:[%s1380_s7 + $0x40] sm:$0xff]  ;;  %v315_v5 = vld [vmem:[%s1380_s7 + $0x50] sm:$0xff]  ;;  %312 = vst [vmem:[%s1385_s8 + $0x18] sm:$0xff] %v311_v3 }
  0x1a   : > { %314 = vst [vmem:[%s1385_s8 + $0x20] sm:$0xff] %v313_v4  ;;  %316 = vst [vmem:[%s1385_s8 + $0x28] sm:$0xff] %v315_v5  ;;  %v317_v6 = vld [vmem:[%s1380_s7 + $0x60] sm:$0xff]  ;;  %v319_v7 = vld [vmem:[%s1380_s7 + $0x70] sm:$0xff] }
  0x1b   : > { %v321_v8 = vld [vmem:[%s1380_s7 + $0x80] sm:$0xff]  ;;  %318 = vst [vmem:[%s1385_s8 + $0x30] sm:$0xff] %v317_v6  ;;  %320 = vst [vmem:[%s1385_s8 + $0x38] sm:$0xff] %v319_v7  ;;  %v323_v9 = vld [vmem:[%s1380_s7 + $0x90] sm:$0xff] }
  0x1c   : > { %322 = vst [vmem:[%s1385_s8 + $0x40] sm:$0xff] %v321_v8  ;;  %v325_v10 = vld [vmem:[%s1380_s7 + $0xa0] sm:$0xff]  ;;  %v327_v11 = vld [vmem:[%s1380_s7 + $0xb0] sm:$0xff]  ;;  %324 = vst [vmem:[%s1385_s8 + $0x48] sm:$0xff] %v323_v9 }
  0x1d   : > { %326 = vst [vmem:[%s1385_s8 + $0x50] sm:$0xff] %v325_v10  ;;  %328 = vst [vmem:[%s1385_s8 + $0x58] sm:$0xff] %v327_v11  ;;  %v329_v12 = vld [vmem:[%s1380_s7 + $0xc0] sm:$0xff]  ;;  %v331_v13 = vld [vmem:[%s1380_s7 + $0xd0] sm:$0xff] }
  0x1e   : > { %v333_v14 = vld [vmem:[%s1380_s7 + $0xe0] sm:$0xff]  ;;  %330 = vst [vmem:[%s1385_s8 + $0x60] sm:$0xff] %v329_v12  ;;  %332 = vst [vmem:[%s1385_s8 + $0x68] sm:$0xff] %v331_v13  ;;  %v335_v15 = vld [vmem:[%s1380_s7 + $0xf0] sm:$0xff] }
  0x1f   : > { %334 = vst [vmem:[%s1385_s8 + $0x70] sm:$0xff] %v333_v14  ;;  %v337_v16 = vld [vmem:[%s1380_s7 + $0x100] sm:$0xff]  ;;  %v339_v17 = vld [vmem:[%s1380_s7 + $0x110] sm:$0xff]  ;;  %336 = vst [vmem:[%s1385_s8 + $0x78] sm:$0xff] %v335_v15 }
  0x20   : > { %338 = vst [vmem:[%s1385_s8 + $0x80] sm:$0xff] %v337_v16  ;;  %340 = vst [vmem:[%s1385_s8 + $0x88] sm:$0xff] %v339_v17  ;;  %v341_v18 = vld [vmem:[%s1380_s7 + $0x120] sm:$0xff]  ;;  %v343_v19 = vld [vmem:[%s1380_s7 + $0x130] sm:$0xff] }
  0x21   : > { %v345_v20 = vld [vmem:[%s1380_s7 + $0x140] sm:$0xff]  ;;  %342 = vst [vmem:[%s1385_s8 + $0x90] sm:$0xff] %v341_v18  ;;  %344 = vst [vmem:[%s1385_s8 + $0x98] sm:$0xff] %v343_v19  ;;  %v347_v21 = vld [vmem:[%s1380_s7 + $0x150] sm:$0xff] }
  0x22   : > { %346 = vst [vmem:[%s1385_s8 + $0xa0] sm:$0xff] %v345_v20  ;;  %v349_v22 = vld [vmem:[%s1380_s7 + $0x160] sm:$0xff]  ;;  %v351_v23 = vld [vmem:[%s1380_s7 + $0x170] sm:$0xff]  ;;  %348 = vst [vmem:[%s1385_s8 + $0xa8] sm:$0xff] %v347_v21 }
  0x23   : > { %350 = vst [vmem:[%s1385_s8 + $0xb0] sm:$0xff] %v349_v22  ;;  %352 = vst [vmem:[%s1385_s8 + $0xb8] sm:$0xff] %v351_v23  ;;  %v353_v24 = vld [vmem:[%s1380_s7 + $0x180] sm:$0xff]  ;;  %v355_v25 = vld [vmem:[%s1380_s7 + $0x190] sm:$0xff] }
  0x24   : > { %v357_v26 = vld [vmem:[%s1380_s7 + $0x1a0] sm:$0xff]  ;;  %354 = vst [vmem:[%s1385_s8 + $0xc0] sm:$0xff] %v353_v24  ;;  %356 = vst [vmem:[%s1385_s8 + $0xc8] sm:$0xff] %v355_v25  ;;  %v359_v27 = vld [vmem:[%s1380_s7 + $0x1b0] sm:$0xff] }
  0x25   : > { %358 = vst [vmem:[%s1385_s8 + $0xd0] sm:$0xff] %v357_v26  ;;  %v361_v28 = vld [vmem:[%s1380_s7 + $0x1c0] sm:$0xff]  ;;  %v363_v29 = vld [vmem:[%s1380_s7 + $0x1d0] sm:$0xff]  ;;  %360 = vst [vmem:[%s1385_s8 + $0xd8] sm:$0xff] %v359_v27 }
  0x26   : > { %362 = vst [vmem:[%s1385_s8 + $0xe0] sm:$0xff] %v361_v28  ;;  %364 = vst [vmem:[%s1385_s8 + $0xe8] sm:$0xff] %v363_v29  ;;  %v365_v30 = vld [vmem:[%s1380_s7 + $0x1e0] sm:$0xff]  ;;  %v367_v31 = vld [vmem:[%s1380_s7 + $0x1f0] sm:$0xff] }
  0x27   : > { %v369_v32 = vld [vmem:[%s1380_s7 + $0x200] sm:$0xff]  ;;  %366 = vst [vmem:[%s1385_s8 + $0xf0] sm:$0xff] %v365_v30  ;;  %368 = vst [vmem:[%s1385_s8 + $0xf8] sm:$0xff] %v367_v31  ;;  %v371_v33 = vld [vmem:[%s1380_s7 + $0x210] sm:$0xff] }
  0x28   : > { %370 = vst [vmem:[%s1385_s8 + $0x100] sm:$0xff] %v369_v32  ;;  %v373_v34 = vld [vmem:[%s1380_s7 + $0x220] sm:$0xff]  ;;  %v375_v35 = vld [vmem:[%s1380_s7 + $0x230] sm:$0xff]  ;;  %372 = vst [vmem:[%s1385_s8 + $0x108] sm:$0xff] %v371_v33 }
  0x29   : > { %374 = vst [vmem:[%s1385_s8 + $0x110] sm:$0xff] %v373_v34  ;;  %376 = vst [vmem:[%s1385_s8 + $0x118] sm:$0xff] %v375_v35  ;;  %v377_v36 = vld [vmem:[%s1380_s7 + $0x240] sm:$0xff]  ;;  %v379_v37 = vld [vmem:[%s1380_s7 + $0x250] sm:$0xff] }
  0x2a   : > { %v381_v38 = vld [vmem:[%s1380_s7 + $0x260] sm:$0xff]  ;;  %378 = vst [vmem:[%s1385_s8 + $0x120] sm:$0xff] %v377_v36  ;;  %380 = vst [vmem:[%s1385_s8 + $0x128] sm:$0xff] %v379_v37  ;;  %v383_v39 = vld [vmem:[%s1380_s7 + $0x270] sm:$0xff] }
  0x2b   : > { %382 = vst [vmem:[%s1385_s8 + $0x130] sm:$0xff] %v381_v38  ;;  %v385_v40 = vld [vmem:[%s1380_s7 + $0x280] sm:$0xff]  ;;  %v387_v41 = vld [vmem:[%s1380_s7 + $0x290] sm:$0xff]  ;;  %384 = vst [vmem:[%s1385_s8 + $0x138] sm:$0xff] %v383_v39 }
  0x2c   : > { %386 = vst [vmem:[%s1385_s8 + $0x140] sm:$0xff] %v385_v40  ;;  %388 = vst [vmem:[%s1385_s8 + $0x148] sm:$0xff] %v387_v41  ;;  %v389_v42 = vld [vmem:[%s1380_s7 + $0x2a0] sm:$0xff]  ;;  %v391_v43 = vld [vmem:[%s1380_s7 + $0x2b0] sm:$0xff] }
  0x2d   : > { %v393_v44 = vld [vmem:[%s1380_s7 + $0x2c0] sm:$0xff]  ;;  %390 = vst [vmem:[%s1385_s8 + $0x150] sm:$0xff] %v389_v42  ;;  %392 = vst [vmem:[%s1385_s8 + $0x158] sm:$0xff] %v391_v43  ;;  %v395_v45 = vld [vmem:[%s1380_s7 + $0x2d0] sm:$0xff] }
  0x2e   : > { %394 = vst [vmem:[%s1385_s8 + $0x160] sm:$0xff] %v393_v44  ;;  %v397_v46 = vld [vmem:[%s1380_s7 + $0x2e0] sm:$0xff]  ;;  %v399_v47 = vld [vmem:[%s1380_s7 + $0x2f0] sm:$0xff]  ;;  %396 = vst [vmem:[%s1385_s8 + $0x168] sm:$0xff] %v395_v45 }
  0x2f   : > { %398 = vst [vmem:[%s1385_s8 + $0x170] sm:$0xff] %v397_v46  ;;  %400 = vst [vmem:[%s1385_s8 + $0x178] sm:$0xff] %v399_v47 }
  0x30 PF: > { %p1044_p7 = scmp.ge.s32.totalorder %s1296_s18, 1  ;;  %p413_p8 = scmp.lt.s32.totalorder %s1296_s18, 13 }
  0x32   : > { %p414_p9 = pnand %p1044_p7, %p413_p8 }
  0x33   : > { %s420_s9 = sand.u32 (!%p414_p9), 1, %s1272_s12   ;;  %s460_s10 = smul.u32 (!%p414_p9), 3, %s1280_s14 }
  0x34   : > { %417 = sbr.rel (%p414_p9) target bundleno = 347 (0x15b), region = 66  ;;  %s1046_s21 = sshll.u32 (!%p414_p9), %s1284_s15, 1 }
  0x35   : > { %s1108_s11 = smul.u32 (!%p414_p9), 384, %s420_s9  ;;  %p463_p10 = scmp.lt.s32.totalorder (!%p414_p9), %s460_s10, 17 }
  0x36   : > { %p473_p11 = scmp.lt.s32.totalorder (!%p414_p9), %s1046_s21, 3  ;;  %p1049_p12 = scmp.ne.s32.totalorder (!%p414_p9), %s1280_s14, 0 }
  0x37   : > { %s1502_s5 = scalar_lea.vmem (!%p414_p9), [#allocation3], %s1108_s11 }
  0x39   : > { %s1600_s10 = smov (!%p463_p10, %s460_s10), 17  ;;  %s1602_s21 = smov (!%p473_p11, %s1046_s21), 3 }
  0x3a   : > { %s1045_s22 = sshll.u32 %s1600_s10, 2  ;;  %s475_s12 = scalar_lea.vmem %s1585_s2, %s1602_s21 }
  0x3b   : > { %s1490_s26 = scalar_lea.vmem %s1583_s0, %s1045_s22  ;;  %s1048_s29 = sshll.u32 %s1602_s21, 2 }
  0x3c   : > { %s1500_s4 = scalar_lea.vmem %s1586_s3, %s1048_s29  ;;  %491 = sbr.rel (%p1049_p12) target bundleno = 67 (0x43), region = 74 }
  0x41   : > { %v1298_v48 = vmov 0.0  }
  0x42   : > { %492 = vst [vmem:[#allocation2] sm:$0xff] %v1298_v48  ;;  %493 = vst [vmem:[#allocation2 + $0x8] sm:$0xff] %v1298_v48 }
  0x43 PF: > { %v1167_v49 = vld [vmem:[%s1502_s5 + $0x74] ss:$8 sps:$4 sm:$0xff]   ;;  %v1169_v50 = vld [vmem:[%s1502_s5 + $0x70] ss:$8 sps:$4 sm:$0xff]   ;;  %v1299_v51 = vmov 0   ;;  %p1101_p13 = scmp.ne.s32.totalorder %s1280_s14, 5 }
  0x44   : > { %870 = vmatprep.mubr.bf16.mxu1 %v1299_v51  ;;  %797 = vmatprep.subr.bf16.mxu0 %v1167_v49  ;;  %v1170_v52 = vld [vmem:[%s1502_s5 + $0x64] ss:$8 sps:$4 sm:$0xff]   ;;  %v1172_v53 = vld [vmem:[%s1502_s5 + $0x60] ss:$8 sps:$4 sm:$0xff]   ;;  %v1173_v54 = vld [vmem:[%s1502_s5 + $0x54] ss:$8 sps:$4 sm:$0xff]  }
  0x45   : > { %798 = vmatpush1.bf16.msra.mxu0 %v1169_v50  ;;  %v1175_v55 = vld [vmem:[%s1502_s5 + $0x50] ss:$8 sps:$4 sm:$0xff]   ;;  %v1176_v56 = vld [vmem:[%s1502_s5 + $0x44] ss:$8 sps:$4 sm:$0xff]   ;;  %v1188_v57 = vld [vmem:[%s1502_s5 + $0x174] ss:$8 sps:$4 sm:$0xff]  }
  0x46   : > { %799 = vmatprep.subr.bf16.mxu0 %v1170_v52  ;;  %v1190_v58 = vld [vmem:[%s1502_s5 + $0x170] ss:$8 sps:$4 sm:$0xff]   ;;  %v1178_v59 = vld [vmem:[%s1502_s5 + $0x40] ss:$8 sps:$4 sm:$0xff]   ;;  %v1179_v60 = vld [vmem:[%s1502_s5 + $0x34] ss:$8 sps:$4 sm:$0xff]   ;;  %838 = vmatprep.subr.bf16.mxu1 %v1188_v57 }
  0x47   : > { %v1194_v61 = vld [vmem:[%s1502_s5 + $0x164] ss:$8 sps:$4 sm:$0xff]   ;;  %839 = vmatpush1.bf16.msra.mxu1 %v1190_v58  ;;  %v1196_v62 = vld [vmem:[%s1502_s5 + $0x160] ss:$8 sps:$4 sm:$0xff]   ;;  %v1181_v63 = vld [vmem:[%s1502_s5 + $0x30] ss:$8 sps:$4 sm:$0xff]  }
  0x48   : > { %840 = vmatprep.subr.bf16.mxu1 %v1194_v61  ;;  %v1200_v0 = vld [vmem:[%s1502_s5 + $0x154] ss:$8 sps:$4 sm:$0xff]   ;;  %v1182_v1 = vld [vmem:[%s1502_s5 + $0x24] ss:$8 sps:$4 sm:$0xff]   ;;  %v1202_v2 = vld [vmem:[%s1502_s5 + $0x150] ss:$8 sps:$4 sm:$0xff]  }
  0x49   : > { %800 = vmatpush1.bf16.msra.mxu0 %v1172_v53  ;;  %v1206_v3 = vld [vmem:[%s1502_s5 + $0x144] ss:$8 sps:$4 sm:$0xff]   ;;  %v1184_v4 = vld [vmem:[%s1502_s5 + $0x20] ss:$8 sps:$4 sm:$0xff]   ;;  %v1185_v5 = vld [vmem:[%s1502_s5 + $0x14] ss:$8 sps:$4 sm:$0xff]  }
  0x4a   : > { %801 = vmatprep.subr.bf16.mxu0 %v1173_v54  ;;  %v1208_v6 = vld [vmem:[%s1502_s5 + $0x140] ss:$8 sps:$4 sm:$0xff]   ;;  %v1212_v7 = vld [vmem:[%s1502_s5 + $0x134] ss:$8 sps:$4 sm:$0xff]   ;;  %v1187_v8 = vld [vmem:[%s1502_s5 + $0x10] ss:$8 sps:$4 sm:$0xff]  }
  0x4b   : > { %841 = vmatpush1.bf16.msra.mxu1 %v1196_v62  ;;  %v1191_v9 = vld [vmem:[%s1502_s5 + $0x4] ss:$8 sps:$4 sm:$0xff]   ;;  %v1214_v10 = vld [vmem:[%s1502_s5 + $0x130] ss:$8 sps:$4 sm:$0xff]   ;;  %v1193_v12 = vld [vmem:[%s1502_s5] ss:$8 sps:$4 sm:$0xff]  }
  0x4c   : > { %842 = vmatprep.subr.bf16.mxu1 %v1200_v0  ;;  %v1218_v11 = vld [vmem:[%s1502_s5 + $0x124] ss:$8 sps:$4 sm:$0xff]   ;;  %v1197_v13 = vld [vmem:[%s1502_s5 + $0xf4] ss:$8 sps:$4 sm:$0xff]   ;;  %v1220_v14 = vld [vmem:[%s1502_s5 + $0x120] ss:$8 sps:$4 sm:$0xff]  }
  0x4d   : > { %802 = vmatpush1.bf16.msra.mxu0 %v1175_v55  ;;  %v1224_v15 = vld [vmem:[%s1502_s5 + $0x114] ss:$8 sps:$4 sm:$0xff]   ;;  %v1199_v16 = vld [vmem:[%s1502_s5 + $0xf0] ss:$8 sps:$4 sm:$0xff]   ;;  %v1203_v17 = vld [vmem:[%s1502_s5 + $0xe4] ss:$8 sps:$4 sm:$0xff]  }
  0x4e   : > { %803 = vmatprep.subr.bf16.mxu0 %v1176_v56  ;;  %v496_v18 = vld [vmem:[%s1490_s26] sm:$0xff]  ;;  %v1230_v21 = vld [vmem:[%s1502_s5 + $0x104] ss:$8 sps:$4 sm:$0xff]   ;;  %v1205_v22 = vld [vmem:[%s1502_s5 + $0xe0] ss:$8 sps:$4 sm:$0xff]  }
  0x4f   : > { %843 = vmatpush1.bf16.msra.mxu1 %v1202_v2  ;;  %v1226_v19 = vld [vmem:[%s1502_s5 + $0x110] ss:$8 sps:$4 sm:$0xff]   ;;  %v1051_v20 = vcombine.high %v496_v18, %v496_v18  ;;  %v1209_v23 = vld [vmem:[%s1502_s5 + $0xd4] ss:$8 sps:$4 sm:$0xff]   ;;  %v1232_v24 = vld [vmem:[%s1502_s5 + $0x100] ss:$8 sps:$4 sm:$0xff]   ;;  %v1050_v37 = vcombine.low %v496_v18, %v496_v18 }
  0x50   : > { %844 = vmatprep.subr.bf16.mxu1 %v1206_v3  ;;  %v1211_v25 = vld [vmem:[%s1502_s5 + $0xd0] ss:$8 sps:$4 sm:$0xff]   ;;  %v1215_v26 = vld [vmem:[%s1502_s5 + $0xc4] ss:$8 sps:$4 sm:$0xff]   ;;  %v1217_v28 = vld [vmem:[%s1502_s5 + $0xc0] ss:$8 sps:$4 sm:$0xff]  }
  0x51   : > { %804 = vmatpush1.bf16.msra.mxu0 %v1178_v59  ;;  %829 = vmatprep.mubr.bf16.mxu0 %v1051_v20  ;;  %v1236_v27 = vld [vmem:[%s1490_s26 + $0x8] ss:$0 sps:$4 sm:$0xff]   ;;  %v1221_v29 = vld [vmem:[%s1502_s5 + $0xb4] ss:$8 sps:$4 sm:$0xff]   ;;  %v1227_v31 = vld [vmem:[%s1502_s5 + $0xa4] ss:$8 sps:$4 sm:$0xff]  }
  0x52   : > { %805 = vmatprep.subr.bf16.mxu0 %v1179_v60  ;;  %v1223_v30 = vld [vmem:[%s1502_s5 + $0xb0] ss:$8 sps:$4 sm:$0xff]   ;;  %v1229_v32 = vld [vmem:[%s1502_s5 + $0xa0] ss:$8 sps:$4 sm:$0xff]   ;;  %v1233_v33 = vld [vmem:[%s1502_s5 + $0x94] ss:$8 sps:$4 sm:$0xff]  }
  0x53   : > { %845 = vmatpush1.bf16.msra.mxu1 %v1208_v6  ;;  %v1235_v34 = vld [vmem:[%s1502_s5 + $0x90] ss:$8 sps:$4 sm:$0xff]   ;;  %v1237_v35 = vld [vmem:[%s1502_s5 + $0x84] ss:$8 sps:$4 sm:$0xff]   ;;  %v1239_v36 = vld [vmem:[%s1502_s5 + $0x80] ss:$8 sps:$4 sm:$0xff]  }
  0x54   : > { %846 = vmatprep.subr.bf16.mxu1 %v1212_v7  ;;  %v494_v42 = vld [vmem:[#allocation2] sm:$0xff]  ;;  %v495_v45 = vld [vmem:[#allocation2 + $0x8] sm:$0xff] }
  0x55   : > { %806 = vmatpush1.bf16.msra.mxu0 %v1181_v63 }
  0x56   : > { %807 = vmatprep.subr.bf16.mxu0 %v1182_v1 }
  0x57   : > { %847 = vmatpush1.bf16.msra.mxu1 %v1214_v10 }
  0x58   : > { %848 = vmatprep.subr.bf16.mxu1 %v1218_v11 }
  0x59   : > { %808 = vmatpush1.bf16.msra.mxu0 %v1184_v4 }
  0x5a   : > { %809 = vmatprep.subr.bf16.mxu0 %v1185_v5 }
  0x5b   : > { %849 = vmatpush1.bf16.msra.mxu1 %v1220_v14 }
  0x5c   : > { %850 = vmatprep.subr.bf16.mxu1 %v1224_v15 }
  0x5d   : > { %810 = vmatpush1.bf16.msra.mxu0 %v1187_v8 }
  0x5e   : > { %811 = vmatprep.subr.bf16.mxu0 %v1191_v9 }
  0x5f   : > { %851 = vmatpush1.bf16.msra.mxu1 %v1226_v19 }
  0x60   : > { %852 = vmatprep.subr.bf16.mxu1 %v1230_v21 }
  0x61   : > { %812 = vmatpush1.bf16.msra.mxu0 %v1193_v12 }
  0x62   : > { %813 = vmatprep.subr.bf16.mxu0 %v1197_v13 }
  0x63   : > { %853 = vmatpush1.bf16.msra.mxu1 %v1232_v24 }
  0x65   : > { %814 = vmatpush2.bf16.msra.mxu0 %v1199_v16 }
  0x66   : > { %815 = vmatprep.subr.bf16.mxu0 %v1203_v17  ;;  %871 = vmatmul.mubr.bf16.vlgmr.msra.gmra.mxu1 %v1236_v27 }
  0x69   : > { %816 = vmatpush2.bf16.msra.mxu0 %v1205_v22 }
  0x6a   : > { %817 = vmatprep.subr.bf16.mxu0 %v1209_v23 }
  0x6d   : > { %818 = vmatpush2.bf16.msra.mxu0 %v1211_v25 }
  0x6e   : > { %819 = vmatprep.subr.bf16.mxu0 %v1215_v26 }
  0x71   : > { %820 = vmatpush2.bf16.msra.mxu0 %v1217_v28 }
  0x72   : > { %821 = vmatprep.subr.bf16.mxu0 %v1221_v29 }
  0x75   : > { %822 = vmatpush2.bf16.msra.mxu0 %v1223_v30 }
  0x76   : > { %823 = vmatprep.subr.bf16.mxu0 %v1227_v31 }
  0x79   : > { %824 = vmatpush2.bf16.msra.mxu0 %v1229_v32 }
  0x7a   : > { %825 = vmatprep.subr.bf16.mxu0 %v1233_v33 }
  0x7d   : > { %826 = vmatpush2.bf16.msra.mxu0 %v1235_v34 }
  0x7e   : > { %827 = vmatprep.subr.bf16.mxu0 %v1237_v35 }
  0x81   : > { %828 = vmatpush2.bf16.msra.mxu0 %v1239_v36 }
  0x84   : > { %830 = vmatmul.mubr.bf16.vlgmr.msra.gmra.mxu0 %v1050_v37 }
 0x126   : > { %v872_v38 = vpop.f32.mrf.mxu1 }
 0x128   : > { %v874_v39 = vpop.f32.mrf.mxu1 }
 0x12a   : > { %v876_v40 = vpop.f32.mrf.mxu1 }
 0x12c   : > { %v877_v41 = vpop.f32.mrf.mxu1 }
 0x144   : > { %v831_v43 = vpop.f32.mrf.mxu0 }
 0x145   : > { %v873_v44 = vadd.f32 %v872_v38, %v831_v43 }
 0x146   : > { %v833_v46 = vpop.f32.mrf.mxu0 }
 0x147   : > { %v879_v47 = vadd.f32 %v873_v44, %v494_v42  ;;  %v875_v48 = vadd.f32 %v874_v39, %v833_v46  ;;  %886 = sbr.rel (%p1101_p13) target bundleno = 347 (0x15b), region = 78 }
 0x148   : > { %v835_v49 = vpop.f32.mrf.mxu0 }
 0x149   : > { %881 = vst [vmem:[#allocation2] sm:$0xff] %v879_v47  ;;  %v880_v50 = vadd.f32 %v875_v48, %v495_v45 }
 0x14a   : > { %v836_v51 = vpop.f32.mrf.mxu0 }
 0x14b   : > { %882 = vst [vmem:[#allocation2 + $0x8] sm:$0xff] %v880_v50 }
 0x14c   : > { %v891_v52 = vlaneseq  ;;  %v889_v54 = vld [vmem:[%s475_s12] sm:$0x3] }
 0x14e   : > { %v892_v53 = vshrl.u32 %v891_v52, 7 }
 0x150   : > { %v893_v55 = vsub.s32 0, %v892_v53  ;;  %v897_v56 = vsub.s32 1, %v892_v53  ;;  %v887_v57 = vld [vmem:[#allocation2] sm:$0xff] }
 0x152   : > { %v888_v58 = vld [vmem:[#allocation2 + $0x8] sm:$0xff]  ;;  %v894_v59 = vrot.slane %v889_v54, %v893_v55  ;;  %v898_v60 = vrot.slane %v889_v54, %v897_v56 }
 0x154   : > { %v901_v61 = vadd.f32 %v894_v59, %v887_v57  ;;  %v902_v62 = vadd.f32 %v898_v60, %v888_v58 }
 0x156   : > { %v903_v63 = vmax.f32 %v901_v61, 0.0  ;;  %v904_v0 = vmax.f32 %v902_v62, 0.0 }
 0x158   : > { %v1106_v1 = vpack.c.bf16 %v904_v0, %v903_v63 }
 0x15a   : > { %913 = vst [vmem:[%s1500_s4] sm:$0xff] %v1106_v1 }
 0x15b PF: > { %s13_s18 = sadd.s32 1, %s1296_s18   ;;  %s1587_s12 = smov %s1276_s13 }
 0x15c   : > { %p10_p0 = scmp.ge.s32.totalorder %s13_s18, 14   ;;  %s1588_s13 = smov %s1371_s25 }
 0x15d   : > { %s1589_s14 = smov %s1288_s16  ;;  %s1590_s15 = smov %s1292_s17 }
 0x15e   : > { %s1591_s16 = smov %s1594_s19  ;;  %s1592_s17 = smov %s1598_s20 }
 0x15f   :  { %12 = sbr.rel (!%p10_p0) target bundleno = 4 (0x4), region = 119 }

// kernel: resnet_forward.41
= control target key start
LH: loop header
LB: loop body
LE: loop exit
PB: predicated region body
PF: predicated region fallthrough
CT: control target
= control target key end

     0   :  { %s1029_s12 = smov 0   ;;  %s1031_s13 = smov 0   ;;  %s1208_s0 = inlined_call_operand.vmem [shape: bf16[8,256], index: 0, kind: input, shape index: {}]   ;;  %s1209_s1 = inlined_call_operand.vmem [shape: bf16[256,512], index: 1, kind: input, shape index: {}]   ;;  %s1210_s2 = inlined_call_operand.vmem [shape: f32[1,512], index: 2, kind: input, shape index: {}]   ;;  %s1211_s3 = inlined_call_operand.vmem [shape: bf16[8,512], index: 3, kind: output, shape index: {}]  }
   0x1   :  { %s1033_s14 = smov 0   ;;  %s1035_s15 = smov 0  }
   0x2   :  { %s1037_s16 = smov 0  }
   0x3 LB: > { %s28_s17 = sadd.s32 1, %s1003_s15  ;;  %p76_p1 = scmp.ne.s32.totalorder %s995_s13, %s991_s12  ;;  %s1007_s16 = sphi %s1037_s16, %s13_s16   ;;  %s1003_s15 = sphi %s1035_s15, %s1215_s15   ;;  %s999_s14 = sphi %s1033_s14, %s1214_s14   ;;  %s995_s13 = sphi %s1031_s13, %s1213_s13   ;;  %s991_s12 = sphi %s1029_s12, %s1212_s12  }
   0x4   : > { %p30_p0 = scmp.ge.s32.totalorder %s28_s17, 2  ;;  %p77_p2 = scmp.eq.s32.totalorder %s1007_s16, 0 }
   0x5   : > { %s69_s19 = sadd.s32 1, %s995_s13  ;;  %p831_p5 = scmp.ge.s32.totalorder %s1007_s16, 2 }
   0x6   : > { %s1217_s17 = smov (%p30_p0, %s28_s17), 0  ;;  %p78_p3 = por %p77_p2, %p76_p1 }
   0x7   : > { %s65_s18 = ssub.s32 %s1003_s15, %s1217_s17  ;;  %169 = sbr.rel (%p831_p5) target bundleno = 32 (0x20), region = 20 }
   0x8   : > { %p67_p4 = scmp.eq.s32.totalorder %s65_s18, 0 }
   0xa   : > { %s1064_s20 = scalar_select %p67_p4, %s995_s13, %s69_s19  }
   0xc   : > { %172 = sbr.rel (!%p78_p3) target bundleno = 32 (0x20), region = 24  ;;  %s174_s21 = sand.u32 (%p78_p3), 1, %s995_s13  }
   0xd   : > { %s877_s22 = sshll.u32 (%p78_p3), %s1003_s15, 3  ;;  %s832_s23 = sshll.u32 (%p78_p3), %s174_s21, 8 }
   0xe   : > { %s1072_s26 = scalar_lea.vmem (%p78_p3), %s1209_s1, %s877_s22  ;;  %s1077_s27 = scalar_lea.vmem (%p78_p3), [#allocation3], %s832_s23 }
   0xf   : > { %v273_v0 = vld [vmem:[%s1072_s26] sm:$0xff] (%p78_p3)  ;;  %v275_v1 = vld [vmem:[%s1072_s26 + $0x10] sm:$0xff] (%p78_p3) }
  0x10   : > { %v277_v2 = vld [vmem:[%s1072_s26 + $0x20] sm:$0xff] (%p78_p3)  ;;  %274 = vst [vmem:[%s1077_s27] sm:$0xff] (%p78_p3), %v273_v0  ;;  %276 = vst [vmem:[%s1077_s27 + $0x8] sm:$0xff] (%p78_p3), %v275_v1  ;;  %v279_v3 = vld [vmem:[%s1072_s26 + $0x30] sm:$0xff] (%p78_p3) }
  0x11   : > { %278 = vst [vmem:[%s1077_s27 + $0x10] sm:$0xff] %v277_v2  ;;  %v281_v4 = vld [vmem:[%s1072_s26 + $0x40] sm:$0xff]  ;;  %v283_v5 = vld [vmem:[%s1072_s26 + $0x50] sm:$0xff]  ;;  %280 = vst [vmem:[%s1077_s27 + $0x18] sm:$0xff] %v279_v3 }
  0x12   : > { %282 = vst [vmem:[%s1077_s27 + $0x20] sm:$0xff] %v281_v4  ;;  %284 = vst [vmem:[%s1077_s27 + $0x28] sm:$0xff] %v283_v5  ;;  %v285_v6 = vld [vmem:[%s1072_s26 + $0x60] sm:$0xff]  ;;  %v287_v7 = vld [vmem:[%s1072_s26 + $0x70] sm:$0xff] }
  0x13   : > { %v289_v8 = vld [vmem:[%s1072_s26 + $0x80] sm:$0xff]  ;;  %286 = vst [vmem:[%s1077_s27 + $0x30] sm:$0xff] %v285_v6  ;;  %288 = vst [vmem:[%s1077_s27 + $0x38] sm:$0xff] %v287_v7  ;;  %v291_v9 = vld [vmem:[%s1072_s26 + $0x90] sm:$0xff] }
  0x14   : > { %290 = vst [vmem:[%s1077_s27 + $0x40] sm:$0xff] %v289_v8  ;;  %v293_v10 = vld [vmem:[%s1072_s26 + $0xa0] sm:$0xff]  ;;  %v295_v11 = vld [vmem:[%s1072_s26 + $0xb0] sm:$0xff]  ;;  %292 = vst [vmem:[%s1077_s27 + $0x48] sm:$0xff] %v291_v9 }
  0x15   : > { %294 = vst [vmem:[%s1077_s27 + $0x50] sm:$0xff] %v293_v10  ;;  %296 = vst [vmem:[%s1077_s27 + $0x58] sm:$0xff] %v295_v11  ;;  %v297_v12 = vld [vmem:[%s1072_s26 + $0xc0] sm:$0xff]  ;;  %v299_v13 = vld [vmem:[%s1072_s26 + $0xd0] sm:$0xff] }
  0x16   : > { %v301_v14 = vld [vmem:[%s1072_s26 + $0xe0] sm:$0xff]  ;;  %298 = vst [vmem:[%s1077_s27 + $0x60] sm:$0xff] %v297_v12  ;;  %300 = vst [vmem:[%s1077_s27 + $0x68] sm:$0xff] %v299_v13  ;;  %v303_v15 = vld [vmem:[%s1072_s26 + $0xf0] sm:$0xff] }
  0x17   : > { %302 = vst [vmem:[%s1077_s27 + $0x70] sm:$0xff] %v301_v14  ;;  %v305_v16 = vld [vmem:[%s1072_s26 + $0x100] sm:$0xff]  ;;  %v307_v17 = vld [vmem:[%s1072_s26 + $0x110] sm:$0xff]  ;;  %304 = vst [vmem:[%s1077_s27 + $0x78] sm:$0xff] %v303_v15 }
  0x18   : > { %306 = vst [vmem:[%s1077_s27 + $0x80] sm:$0xff] %v305_v16  ;;  %308 = vst [vmem:[%s1077_s27 + $0x88] sm:$0xff] %v307_v17  ;;  %v309_v18 = vld [vmem:[%s1072_s26 + $0x120] sm:$0xff]  ;;  %v311_v19 = vld [vmem:[%s1072_s26 + $0x130] sm:$0xff] }
  0x19   : > { %v313_v20 = vld [vmem:[%s1072_s26 + $0x140] sm:$0xff]  ;;  %310 = vst [vmem:[%s1077_s27 + $0x90] sm:$0xff] %v309_v18  ;;  %312 = vst [vmem:[%s1077_s27 + $0x98] sm:$0xff] %v311_v19  ;;  %v315_v21 = vld [vmem:[%s1072_s26 + $0x150] sm:$0xff] }
  0x1a   : > { %314 = vst [vmem:[%s1077_s27 + $0xa0] sm:$0xff] %v313_v20  ;;  %v317_v22 = vld [vmem:[%s1072_s26 + $0x160] sm:$0xff]  ;;  %v319_v23 = vld [vmem:[%s1072_s26 + $0x170] sm:$0xff]  ;;  %316 = vst [vmem:[%s1077_s27 + $0xa8] sm:$0xff] %v315_v21 }
  0x1b   : > { %318 = vst [vmem:[%s1077_s27 + $0xb0] sm:$0xff] %v317_v22  ;;  %320 = vst [vmem:[%s1077_s27 + $0xb8] sm:$0xff] %v319_v23  ;;  %v321_v24 = vld [vmem:[%s1072_s26 + $0x180] sm:$0xff]  ;;  %v323_v25 = vld [vmem:[%s1072_s26 + $0x190] sm:$0xff] }
  0x1c   : > { %v325_v26 = vld [vmem:[%s1072_s26 + $0x1a0] sm:$0xff]  ;;  %322 = vst [vmem:[%s1077_s27 + $0xc0] sm:$0xff] %v321_v24  ;;  %324 = vst [vmem:[%s1077_s27 + $0xc8] sm:$0xff] %v323_v25  ;;  %v327_v27 = vld [vmem:[%s1072_s26 + $0x1b0] sm:$0xff] }
  0x1d   : > { %326 = vst [vmem:[%s1077_s27 + $0xd0] sm:$0xff] %v325_v26  ;;  %v329_v28 = vld [vmem:[%s1072_s26 + $0x1c0] sm:$0xff]  ;;  %v331_v29 = vld [vmem:[%s1072_s26 + $0x1d0] sm:$0xff]  ;;  %328 = vst [vmem:[%s1077_s27 + $0xd8] sm:$0xff] %v327_v27 }
  0x1e   : > { %330 = vst [vmem:[%s1077_s27 + $0xe0] sm:$0xff] %v329_v28  ;;  %332 = vst [vmem:[%s1077_s27 + $0xe8] sm:$0xff] %v331_v29  ;;  %v333_v30 = vld [vmem:[%s1072_s26 + $0x1e0] sm:$0xff]  ;;  %v335_v31 = vld [vmem:[%s1072_s26 + $0x1f0] sm:$0xff] }
  0x1f   : > { %334 = vst [vmem:[%s1077_s27 + $0xf0] sm:$0xff] %v333_v30  ;;  %336 = vst [vmem:[%s1077_s27 + $0xf8] sm:$0xff] %v335_v31 }
  0x20 PF: > { %p835_p6 = scmp.ge.s32.totalorder %s1007_s16, 1  ;;  %p349_p7 = scmp.lt.s32.totalorder %s1007_s16, 3 }
  0x22   : > { %p350_p8 = pnand %p835_p6, %p349_p7 }
  0x23   : > { %s356_s28 = sand.u32 (!%p350_p8), 1, %s991_s12   ;;  %s837_s6 = sshll.u32 (!%p350_p8), %s999_s14, 1 }
  0x24   : > { %353 = sbr.rel (%p350_p8) target bundleno = 306 (0x132), region = 66  ;;  %s836_s4 = sshll.u32 (!%p350_p8), %s356_s28, 8 }
  0x25   : > { %s1150_s5 = scalar_lea.vmem (!%p350_p8), [#allocation3], %s836_s4  ;;  %p409_p9 = scmp.lt.s32.totalorder (!%p350_p8), %s837_s6, 3 }
  0x29   : > { %v1146_v32 = vld [vmem:[%s1208_s0] sm:$0xff]  ;;  %v919_v34 = vld [vmem:[%s1150_s5 + $0x74] ss:$8 sps:$4 sm:$0xff]   ;;  %v921_v35 = vld [vmem:[%s1150_s5 + $0x70] ss:$8 sps:$4 sm:$0xff]   ;;  %v683_v3 = vlaneseq  ;;  %s1219_s6 = smov (!%p409_p9, %s837_s6), 3 }
  0x2a   : > { %v841_v33 = vcombine.high %v1146_v32, %v1146_v32  ;;  %631 = vmatprep.subr.bf16.mxu0 %v919_v34  ;;  %v922_v36 = vld [vmem:[%s1150_s5 + $0x64] ss:$8 sps:$4 sm:$0xff]   ;;  %v924_v37 = vld [vmem:[%s1150_s5 + $0x60] ss:$8 sps:$4 sm:$0xff]   ;;  %v925_v38 = vld [vmem:[%s1150_s5 + $0x54] ss:$8 sps:$4 sm:$0xff]   ;;  %v840_v2 = vcombine.low %v1146_v32, %v1146_v32  ;;  %s411_s9 = scalar_lea.vmem %s1210_s2, %s1219_s6 }
  0x2b   : > { %632 = vmatpush1.bf16.msra.mxu0 %v921_v35  ;;  %v927_v39 = vld [vmem:[%s1150_s5 + $0x50] ss:$8 sps:$4 sm:$0xff]   ;;  %v928_v40 = vld [vmem:[%s1150_s5 + $0x44] ss:$8 sps:$4 sm:$0xff]   ;;  %v930_v41 = vld [vmem:[%s1150_s5 + $0x40] ss:$8 sps:$4 sm:$0xff]  }
  0x2c   : > { %663 = vmatprep.mubr.bf16.mxu0 %v841_v33  ;;  %633 = vmatprep.subr.bf16.mxu0 %v922_v36  ;;  %v931_v42 = vld [vmem:[%s1150_s5 + $0x34] ss:$8 sps:$4 sm:$0xff]   ;;  %v933_v43 = vld [vmem:[%s1150_s5 + $0x30] ss:$8 sps:$4 sm:$0xff]   ;;  %v934_v44 = vld [vmem:[%s1150_s5 + $0x24] ss:$8 sps:$4 sm:$0xff]  }
  0x2d   : > { %v936_v45 = vld [vmem:[%s1150_s5 + $0x20] ss:$8 sps:$4 sm:$0xff]   ;;  %v937_v46 = vld [vmem:[%s1150_s5 + $0x14] ss:$8 sps:$4 sm:$0xff]   ;;  %v939_v47 = vld [vmem:[%s1150_s5 + $0x10] ss:$8 sps:$4 sm:$0xff]  }
  0x2e   : > { %v940_v48 = vld [vmem:[%s1150_s5 + $0x4] ss:$8 sps:$4 sm:$0xff]   ;;  %v942_v49 = vld [vmem:[%s1150_s5] ss:$8 sps:$4 sm:$0xff]   ;;  %v943_v50 = vld [vmem:[%s1150_s5 + $0xf4] ss:$8 sps:$4 sm:$0xff]  }
  0x2f   : > { %634 = vmatpush1.bf16.msra.mxu0 %v924_v37  ;;  %v945_v51 = vld [vmem:[%s1150_s5 + $0xf0] ss:$8 sps:$4 sm:$0xff]   ;;  %v946_v52 = vld [vmem:[%s1150_s5 + $0xe4] ss:$8 sps:$4 sm:$0xff]   ;;  %v948_v53 = vld [vmem:[%s1150_s5 + $0xe0] ss:$8 sps:$4 sm:$0xff]  }
  0x30   : > { %635 = vmatprep.subr.bf16.mxu0 %v925_v38  ;;  %v949_v54 = vld [vmem:[%s1150_s5 + $0xd4] ss:$8 sps:$4 sm:$0xff]   ;;  %v951_v55 = vld [vmem:[%s1150_s5 + $0xd0] ss:$8 sps:$4 sm:$0xff]   ;;  %v952_v56 = vld [vmem:[%s1150_s5 + $0xc4] ss:$8 sps:$4 sm:$0xff]  }
  0x31   : > { %v954_v57 = vld [vmem:[%s1150_s5 + $0xc0] ss:$8 sps:$4 sm:$0xff]   ;;  %v955_v58 = vld [vmem:[%s1150_s5 + $0xb4] ss:$8 sps:$4 sm:$0xff]   ;;  %v957_v59 = vld [vmem:[%s1150_s5 + $0xb0] ss:$8 sps:$4 sm:$0xff]  }
  0x32   : > { %v958_v60 = vld [vmem:[%s1150_s5 + $0xa4] ss:$8 sps:$4 sm:$0xff]   ;;  %v960_v61 = vld [vmem:[%s1150_s5 + $0xa0] ss:$8 sps:$4 sm:$0xff]   ;;  %v961_v62 = vld [vmem:[%s1150_s5 + $0x94] ss:$8 sps:$4 sm:$0xff]  }
  0x33   : > { %636 = vmatpush1.bf16.msra.mxu0 %v927_v39  ;;  %v963_v63 = vld [vmem:[%s1150_s5 + $0x90] ss:$8 sps:$4 sm:$0xff]   ;;  %v964_v0 = vld [vmem:[%s1150_s5 + $0x84] ss:$8 sps:$4 sm:$0xff]   ;;  %v966_v1 = vld [vmem:[%s1150_s5 + $0x80] ss:$8 sps:$4 sm:$0xff]  }
  0x34   : > { %637 = vmatprep.subr.bf16.mxu0 %v928_v40  ;;  %v684_v4 = vshrl.u32 %v683_v3, 7  ;;  %v681_v7 = vld [vmem:[%s411_s9] sm:$0x3]  ;;  %s839_s10 = sshll.u32 %s1219_s6, 2 }
  0x35   : > { %s421_s14 = scalar_lea.vmem %s1211_s3, %s839_s10 }
  0x36   : > { %v685_v5 = vsub.s32 0, %v684_v4  ;;  %v689_v6 = vsub.s32 1, %v684_v4 }
  0x37   : > { %638 = vmatpush1.bf16.msra.mxu0 %v930_v41 }
  0x38   : > { %639 = vmatprep.subr.bf16.mxu0 %v931_v42  ;;  %v686_v8 = vrot.slane %v681_v7, %v685_v5  ;;  %v690_v9 = vrot.slane %v681_v7, %v689_v6 }
  0x3b   : > { %640 = vmatpush1.bf16.msra.mxu0 %v933_v43 }
  0x3c   : > { %641 = vmatprep.subr.bf16.mxu0 %v934_v44 }
  0x3f   : > { %642 = vmatpush1.bf16.msra.mxu0 %v936_v45 }
  0x40   : > { %643 = vmatprep.subr.bf16.mxu0 %v937_v46 }
  0x43   : > { %644 = vmatpush1.bf16.msra.mxu0 %v939_v47 }
  0x44   : > { %645 = vmatprep.subr.bf16.mxu0 %v940_v48 }
  0x47   : > { %646 = vmatpush1.bf16.msra.mxu0 %v942_v49 }
  0x48   : > { %647 = vmatprep.subr.bf16.mxu0 %v943_v50 }
  0x4b   : > { %648 = vmatpush2.bf16.msra.mxu0 %v945_v51 }
  0x4c   : > { %649 = vmatprep.subr.bf16.mxu0 %v946_v52 }
  0x4f   : > { %650 = vmatpush2.bf16.msra.mxu0 %v948_v53 }
  0x50   : > { %651 = vmatprep.subr.bf16.mxu0 %v949_v54 }
  0x53   : > { %652 = vmatpush2.bf16.msra.mxu0 %v951_v55 }
  0x54   : > { %653 = vmatprep.subr.bf16.mxu0 %v952_v56 }
  0x57   : > { %654 = vmatpush2.bf16.msra.mxu0 %v954_v57 }
  0x58   : > { %655 = vmatprep.subr.bf16.mxu0 %v955_v58 }
  0x5b   : > { %656 = vmatpush2.bf16.msra.mxu0 %v957_v59 }
  0x5c   : > { %657 = vmatprep.subr.bf16.mxu0 %v958_v60 }
  0x5f   : > { %658 = vmatpush2.bf16.msra.mxu0 %v960_v61 }
  0x60   : > { %659 = vmatprep.subr.bf16.mxu0 %v961_v62 }
  0x63   : > { %660 = vmatpush2.bf16.msra.mxu0 %v963_v63 }
  0x64   : > { %661 = vmatprep.subr.bf16.mxu0 %v964_v0 }
  0x67   : > { %662 = vmatpush2.bf16.msra.mxu0 %v966_v1 }
  0x6a   : > { %664 = vmatmul.mubr.bf16.vlgmr.msra.gmra.mxu0 %v840_v2 }
 0x12a   : > { %v665_v10 = vpop.f32.mrf.mxu0 }
 0x12b   : > { %v693_v12 = vadd.f32 %v686_v8, %v665_v10 }
 0x12c   : > { %v667_v11 = vpop.f32.mrf.mxu0 }
 0x12d   : > { %v694_v13 = vadd.f32 %v690_v9, %v667_v11 }
 0x12e   : > { %v669_v14 = vpop.f32.mrf.mxu0 }
 0x12f   : > { %v878_v15 = vpack.c.bf16 %v694_v13, %v693_v12 }
 0x130   : > { %v670_v16 = vpop.f32.mrf.mxu0 }
 0x131   : > { %703 = vst [vmem:[%s421_s14] sm:$0xff] %v878_v15 }
 0x132 PF: > { %s13_s16 = sadd.s32 1, %s1007_s16   ;;  %s1212_s12 = smov %s995_s13 }
 0x133   : > { %p10_p10 = scmp.ge.s32.totalorder %s13_s16, 4   ;;  %s1213_s13 = smov %s1064_s20 }
 0x134   : > { %s1214_s14 = smov %s1003_s15  ;;  %s1215_s15 = smov %s1217_s17 }
 0x135   :  { %12 = sbr.rel (!%p10_p10) target bundleno = 3 (0x3), region = 119 }

// kernel: resnet_forward.42
= control target key start
LH: loop header
LB: loop body
LE: loop exit
PB: predicated region body
PF: predicated region fallthrough
CT: control target
= control target key end

     0   :  { %s1617_s15 = smov 0   ;;  %s1619_s16 = smov 0   ;;  %s1934_s0 = inlined_call_operand.vmem [shape: bf16[8,4608], index: 0, kind: input, shape index: {}]   ;;  %s1935_s1 = inlined_call_operand.vmem [shape: bf16[4608,512], index: 1, kind: input, shape index: {}]   ;;  %s1936_s2 = inlined_call_operand.vmem [shape: f32[1,512], index: 2, kind: input, shape index: {}]   ;;  %s1937_s3 = inlined_call_operand.vmem [shape: bf16[8,512], index: 3, kind: input, shape index: {}]   ;;  %s1938_s4 = inlined_call_operand.vmem [shape: bf16[8,512], index: 4, kind: output, shape index: {}]  }
   0x1   :  { %s1621_s17 = smov 0   ;;  %s1623_s18 = smov 0  }
   0x2   :  { %s1625_s19 = smov 0   ;;  %s1627_s20 = smov 0  }
   0x3   :  { %s1629_s21 = smov 0  }
   0x4 LB: > { %s26_s22 = sadd.s32 1, %s1581_s19  ;;  %s29_s23 = sadd.s32 1, %s1585_s20  ;;  %s1589_s21 = sphi %s1629_s21, %s14_s21   ;;  %s1585_s20 = sphi %s1627_s20, %s1944_s20   ;;  %s1581_s19 = sphi %s1625_s19, %s1943_s19   ;;  %s1577_s18 = sphi %s1623_s18, %s1942_s18   ;;  %s1573_s17 = sphi %s1621_s17, %s1941_s17   ;;  %s1569_s16 = sphi %s1619_s16, %s1940_s16   ;;  %s1565_s15 = sphi %s1617_s15, %s1939_s15  }
   0x5   : > { %p27_p0 = scmp.ge.s32.totalorder %s26_s22, 9  ;;  %p77_p1 = scmp.ne.s32.totalorder %s1569_s16, %s1565_s15 }
   0x6   : > { %p78_p2 = scmp.eq.s32.totalorder %s1589_s21, 0  ;;  %s70_s27 = sadd.s32 1, %s1569_s16 }
   0x7   : > { %s1946_s22 = smov (%p27_p0, %s26_s22), 0  ;;  %s1948_s23 = smov (!%p27_p0, %s29_s23), %s1585_s20 }
   0x8   : > { %p79_p3 = por %p78_p2, %p77_p1  ;;  %p31_p4 = scmp.ge.s32.totalorder %s1948_s23, 2 }
   0x9   : > { %s65_s24 = ssub.s32 %s1581_s19, %s1946_s22  ;;  %p1288_p6 = scmp.ge.s32.totalorder %s1589_s21, 18 }
   0xa   : > { %s1950_s23 = smov (%p31_p4, %s1948_s23), 0 }
   0xb   : > { %s66_s25 = ssub.s32 %s1585_s20, %s1950_s23  ;;  %185 = sbr.rel (%p1288_p6) target bundleno = 55 (0x37), region = 16 }
   0xc   : > { %s67_s26 = sor.u32 %s66_s25, %s65_s24 }
   0xd   : > { %p68_p5 = scmp.eq.s32.totalorder %s67_s26, 0 }
   0xf   : > { %s1668_s28 = scalar_select %p68_p5, %s1569_s16, %s70_s27  }
  0x10   : > { %201 = sbr.rel (!%p79_p3) target bundleno = 55 (0x37), region = 24  ;;  %s203_s29 = sand.u32 (%p79_p3), 1, %s1569_s16  }
  0x11   : > { %s1291_s30 = sshll.u32 (%p79_p3), %s1585_s20, 1  ;;  %s1289_s5 = sshll.u32 (%p79_p3), %s203_s29, 9 }
  0x12   : > { %s1376_s6 = sshll.u32 (%p79_p3), %s1581_s19, 8  ;;  %s1682_s12 = scalar_lea.vmem (%p79_p3), [#allocation3], %s1289_s5 }
  0x13   : > { %s209_s7 = sadd.s32 (%p79_p3), %s1376_s6, %s1291_s30 }
  0x14   : > { %s1293_s8 = sshll.u32 (%p79_p3), %s209_s7, 2 }
  0x15   : > { %s1677_s11 = scalar_lea.vmem %s1935_s1, %s1293_s8 }
  0x16   : > { %v366_v0 = vld [vmem:[%s1677_s11] sm:$0xff]  ;;  %v368_v1 = vld [vmem:[%s1677_s11 + $0x10] sm:$0xff] }
  0x17   : > { %v370_v2 = vld [vmem:[%s1677_s11 + $0x20] sm:$0xff]  ;;  %367 = vst [vmem:[%s1682_s12] sm:$0xff] %v366_v0  ;;  %369 = vst [vmem:[%s1682_s12 + $0x8] sm:$0xff] %v368_v1  ;;  %v372_v3 = vld [vmem:[%s1677_s11 + $0x30] sm:$0xff] }
  0x18   : > { %371 = vst [vmem:[%s1682_s12 + $0x10] sm:$0xff] %v370_v2  ;;  %v374_v4 = vld [vmem:[%s1677_s11 + $0x40] sm:$0xff]  ;;  %v376_v5 = vld [vmem:[%s1677_s11 + $0x50] sm:$0xff]  ;;  %373 = vst [vmem:[%s1682_s12 + $0x18] sm:$0xff] %v372_v3 }
  0x19   : > { %375 = vst [vmem:[%s1682_s12 + $0x20] sm:$0xff] %v374_v4  ;;  %377 = vst [vmem:[%s1682_s12 + $0x28] sm:$0xff] %v376_v5  ;;  %v378_v6 = vld [vmem:[%s1677_s11 + $0x60] sm:$0xff]  ;;  %v380_v7 = vld [vmem:[%s1677_s11 + $0x70] sm:$0xff] }
  0x1a   : > { %v382_v8 = vld [vmem:[%s1677_s11 + $0x80] sm:$0xff]  ;;  %379 = vst [vmem:[%s1682_s12 + $0x30] sm:$0xff] %v378_v6  ;;  %381 = vst [vmem:[%s1682_s12 + $0x38] sm:$0xff] %v380_v7  ;;  %v384_v9 = vld [vmem:[%s1677_s11 + $0x90] sm:$0xff] }
  0x1b   : > { %383 = vst [vmem:[%s1682_s12 + $0x40] sm:$0xff] %v382_v8  ;;  %v386_v10 = vld [vmem:[%s1677_s11 + $0xa0] sm:$0xff]  ;;  %v388_v11 = vld [vmem:[%s1677_s11 + $0xb0] sm:$0xff]  ;;  %385 = vst [vmem:[%s1682_s12 + $0x48] sm:$0xff] %v384_v9 }
  0x1c   : > { %387 = vst [vmem:[%s1682_s12 + $0x50] sm:$0xff] %v386_v10  ;;  %389 = vst [vmem:[%s1682_s12 + $0x58] sm:$0xff] %v388_v11  ;;  %v390_v12 = vld [vmem:[%s1677_s11 + $0xc0] sm:$0xff]  ;;  %v392_v13 = vld [vmem:[%s1677_s11 + $0xd0] sm:$0xff] }
  0x1d   : > { %v394_v14 = vld [vmem:[%s1677_s11 + $0xe0] sm:$0xff]  ;;  %391 = vst [vmem:[%s1682_s12 + $0x60] sm:$0xff] %v390_v12  ;;  %393 = vst [vmem:[%s1682_s12 + $0x68] sm:$0xff] %v392_v13  ;;  %v396_v15 = vld [vmem:[%s1677_s11 + $0xf0] sm:$0xff] }
  0x1e   : > { %395 = vst [vmem:[%s1682_s12 + $0x70] sm:$0xff] %v394_v14  ;;  %v398_v16 = vld [vmem:[%s1677_s11 + $0x100] sm:$0xff]  ;;  %v400_v17 = vld [vmem:[%s1677_s11 + $0x110] sm:$0xff]  ;;  %397 = vst [vmem:[%s1682_s12 + $0x78] sm:$0xff] %v396_v15 }
  0x1f   : > { %399 = vst [vmem:[%s1682_s12 + $0x80] sm:$0xff] %v398_v16  ;;  %401 = vst [vmem:[%s1682_s12 + $0x88] sm:$0xff] %v400_v17  ;;  %v402_v18 = vld [vmem:[%s1677_s11 + $0x120] sm:$0xff]  ;;  %v404_v19 = vld [vmem:[%s1677_s11 + $0x130] sm:$0xff] }
  0x20   : > { %v406_v20 = vld [vmem:[%s1677_s11 + $0x140] sm:$0xff]  ;;  %403 = vst [vmem:[%s1682_s12 + $0x90] sm:$0xff] %v402_v18  ;;  %405 = vst [vmem:[%s1682_s12 + $0x98] sm:$0xff] %v404_v19  ;;  %v408_v21 = vld [vmem:[%s1677_s11 + $0x150] sm:$0xff] }
  0x21   : > { %407 = vst [vmem:[%s1682_s12 + $0xa0] sm:$0xff] %v406_v20  ;;  %v410_v22 = vld [vmem:[%s1677_s11 + $0x160] sm:$0xff]  ;;  %v412_v23 = vld [vmem:[%s1677_s11 + $0x170] sm:$0xff]  ;;  %409 = vst [vmem:[%s1682_s12 + $0xa8] sm:$0xff] %v408_v21 }
  0x22   : > { %411 = vst [vmem:[%s1682_s12 + $0xb0] sm:$0xff] %v410_v22  ;;  %413 = vst [vmem:[%s1682_s12 + $0xb8] sm:$0xff] %v412_v23  ;;  %v414_v24 = vld [vmem:[%s1677_s11 + $0x180] sm:$0xff]  ;;  %v416_v25 = vld [vmem:[%s1677_s11 + $0x190] sm:$0xff] }
  0x23   : > { %v418_v26 = vld [vmem:[%s1677_s11 + $0x1a0] sm:$0xff]  ;;  %415 = vst [vmem:[%s1682_s12 + $0xc0] sm:$0xff] %v414_v24  ;;  %417 = vst [vmem:[%s1682_s12 + $0xc8] sm:$0xff] %v416_v25  ;;  %v420_v27 = vld [vmem:[%s1677_s11 + $0x1b0] sm:$0xff] }
  0x24   : > { %419 = vst [vmem:[%s1682_s12 + $0xd0] sm:$0xff] %v418_v26  ;;  %v422_v28 = vld [vmem:[%s1677_s11 + $0x1c0] sm:$0xff]  ;;  %v424_v29 = vld [vmem:[%s1677_s11 + $0x1d0] sm:$0xff]  ;;  %421 = vst [vmem:[%s1682_s12 + $0xd8] sm:$0xff] %v420_v27 }
  0x25   : > { %423 = vst [vmem:[%s1682_s12 + $0xe0] sm:$0xff] %v422_v28  ;;  %425 = vst [vmem:[%s1682_s12 + $0xe8] sm:$0xff] %v424_v29  ;;  %v426_v30 = vld [vmem:[%s1677_s11 + $0x1e0] sm:$0xff]  ;;  %v428_v31 = vld [vmem:[%s1677_s11 + $0x1f0] sm:$0xff] }
  0x26   : > { %v430_v32 = vld [vmem:[%s1677_s11 + $0x200] sm:$0xff]  ;;  %427 = vst [vmem:[%s1682_s12 + $0xf0] sm:$0xff] %v426_v30  ;;  %429 = vst [vmem:[%s1682_s12 + $0xf8] sm:$0xff] %v428_v31  ;;  %v432_v33 = vld [vmem:[%s1677_s11 + $0x210] sm:$0xff] }
  0x27   : > { %431 = vst [vmem:[%s1682_s12 + $0x100] sm:$0xff] %v430_v32  ;;  %v434_v34 = vld [vmem:[%s1677_s11 + $0x220] sm:$0xff]  ;;  %v436_v35 = vld [vmem:[%s1677_s11 + $0x230] sm:$0xff]  ;;  %433 = vst [vmem:[%s1682_s12 + $0x108] sm:$0xff] %v432_v33 }
  0x28   : > { %435 = vst [vmem:[%s1682_s12 + $0x110] sm:$0xff] %v434_v34  ;;  %437 = vst [vmem:[%s1682_s12 + $0x118] sm:$0xff] %v436_v35  ;;  %v438_v36 = vld [vmem:[%s1677_s11 + $0x240] sm:$0xff]  ;;  %v440_v37 = vld [vmem:[%s1677_s11 + $0x250] sm:$0xff] }
  0x29   : > { %v442_v38 = vld [vmem:[%s1677_s11 + $0x260] sm:$0xff]  ;;  %439 = vst [vmem:[%s1682_s12 + $0x120] sm:$0xff] %v438_v36  ;;  %441 = vst [vmem:[%s1682_s12 + $0x128] sm:$0xff] %v440_v37  ;;  %v444_v39 = vld [vmem:[%s1677_s11 + $0x270] sm:$0xff] }
  0x2a   : > { %443 = vst [vmem:[%s1682_s12 + $0x130] sm:$0xff] %v442_v38  ;;  %v446_v40 = vld [vmem:[%s1677_s11 + $0x280] sm:$0xff]  ;;  %v448_v41 = vld [vmem:[%s1677_s11 + $0x290] sm:$0xff]  ;;  %445 = vst [vmem:[%s1682_s12 + $0x138] sm:$0xff] %v444_v39 }
  0x2b   : > { %447 = vst [vmem:[%s1682_s12 + $0x140] sm:$0xff] %v446_v40  ;;  %449 = vst [vmem:[%s1682_s12 + $0x148] sm:$0xff] %v448_v41  ;;  %v450_v42 = vld [vmem:[%s1677_s11 + $0x2a0] sm:$0xff]  ;;  %v452_v43 = vld [vmem:[%s1677_s11 + $0x2b0] sm:$0xff] }
  0x2c   : > { %v454_v44 = vld [vmem:[%s1677_s11 + $0x2c0] sm:$0xff]  ;;  %451 = vst [vmem:[%s1682_s12 + $0x150] sm:$0xff] %v450_v42  ;;  %453 = vst [vmem:[%s1682_s12 + $0x158] sm:$0xff] %v452_v43  ;;  %v456_v45 = vld [vmem:[%s1677_s11 + $0x2d0] sm:$0xff] }
  0x2d   : > { %455 = vst [vmem:[%s1682_s12 + $0x160] sm:$0xff] %v454_v44  ;;  %v458_v46 = vld [vmem:[%s1677_s11 + $0x2e0] sm:$0xff]  ;;  %v460_v47 = vld [vmem:[%s1677_s11 + $0x2f0] sm:$0xff]  ;;  %457 = vst [vmem:[%s1682_s12 + $0x168] sm:$0xff] %v456_v45 }
  0x2e   : > { %459 = vst [vmem:[%s1682_s12 + $0x170] sm:$0xff] %v458_v46  ;;  %461 = vst [vmem:[%s1682_s12 + $0x178] sm:$0xff] %v460_v47  ;;  %v462_v48 = vld [vmem:[%s1677_s11 + $0x300] sm:$0xff]  ;;  %v464_v49 = vld [vmem:[%s1677_s11 + $0x310] sm:$0xff] }
  0x2f   : > { %v466_v50 = vld [vmem:[%s1677_s11 + $0x320] sm:$0xff]  ;;  %463 = vst [vmem:[%s1682_s12 + $0x180] sm:$0xff] %v462_v48  ;;  %465 = vst [vmem:[%s1682_s12 + $0x188] sm:$0xff] %v464_v49  ;;  %v468_v51 = vld [vmem:[%s1677_s11 + $0x330] sm:$0xff] }
  0x30   : > { %467 = vst [vmem:[%s1682_s12 + $0x190] sm:$0xff] %v466_v50  ;;  %v470_v52 = vld [vmem:[%s1677_s11 + $0x340] sm:$0xff]  ;;  %v472_v53 = vld [vmem:[%s1677_s11 + $0x350] sm:$0xff]  ;;  %469 = vst [vmem:[%s1682_s12 + $0x198] sm:$0xff] %v468_v51 }
  0x31   : > { %471 = vst [vmem:[%s1682_s12 + $0x1a0] sm:$0xff] %v470_v52  ;;  %473 = vst [vmem:[%s1682_s12 + $0x1a8] sm:$0xff] %v472_v53  ;;  %v474_v54 = vld [vmem:[%s1677_s11 + $0x360] sm:$0xff]  ;;  %v476_v55 = vld [vmem:[%s1677_s11 + $0x370] sm:$0xff] }
  0x32   : > { %v478_v56 = vld [vmem:[%s1677_s11 + $0x380] sm:$0xff]  ;;  %475 = vst [vmem:[%s1682_s12 + $0x1b0] sm:$0xff] %v474_v54  ;;  %477 = vst [vmem:[%s1682_s12 + $0x1b8] sm:$0xff] %v476_v55  ;;  %v480_v57 = vld [vmem:[%s1677_s11 + $0x390] sm:$0xff] }
  0x33   : > { %479 = vst [vmem:[%s1682_s12 + $0x1c0] sm:$0xff] %v478_v56  ;;  %v482_v58 = vld [vmem:[%s1677_s11 + $0x3a0] sm:$0xff]  ;;  %v484_v59 = vld [vmem:[%s1677_s11 + $0x3b0] sm:$0xff]  ;;  %481 = vst [vmem:[%s1682_s12 + $0x1c8] sm:$0xff] %v480_v57 }
  0x34   : > { %483 = vst [vmem:[%s1682_s12 + $0x1d0] sm:$0xff] %v482_v58  ;;  %485 = vst [vmem:[%s1682_s12 + $0x1d8] sm:$0xff] %v484_v59  ;;  %v486_v60 = vld [vmem:[%s1677_s11 + $0x3c0] sm:$0xff]  ;;  %v488_v61 = vld [vmem:[%s1677_s11 + $0x3d0] sm:$0xff] }
  0x35   : > { %v490_v62 = vld [vmem:[%s1677_s11 + $0x3e0] sm:$0xff]  ;;  %487 = vst [vmem:[%s1682_s12 + $0x1e0] sm:$0xff] %v486_v60  ;;  %489 = vst [vmem:[%s1682_s12 + $0x1e8] sm:$0xff] %v488_v61  ;;  %v492_v63 = vld [vmem:[%s1677_s11 + $0x3f0] sm:$0xff] }
  0x36   : > { %491 = vst [vmem:[%s1682_s12 + $0x1f0] sm:$0xff] %v490_v62  ;;  %493 = vst [vmem:[%s1682_s12 + $0x1f8] sm:$0xff] %v492_v63 }
  0x37 PF: > { %p1294_p7 = scmp.ge.s32.totalorder %s1589_s21, 1  ;;  %p519_p8 = scmp.lt.s32.totalorder %s1589_s21, 19 }
  0x39   : > { %p520_p9 = pnand %p1294_p7, %p519_p8 }
  0x3a   : > { %s526_s13 = sand.u32 (!%p520_p9), 1, %s1565_s15   ;;  %s1296_s14 = sshll.u32 (!%p520_p9), %s1573_s17, 2 }
  0x3b   : > { %523 = sbr.rel (%p520_p9) target bundleno = 358 (0x166), region = 70  ;;  %s1295_s24 = sshll.u32 (!%p520_p9), %s526_s13, 9 }
  0x3c   : > { %p580_p10 = scmp.lt.s32.totalorder (!%p520_p9), %s1296_s14, 35  ;;  %s1298_s25 = sshll.u32 (!%p520_p9), %s1577_s18, 1 }
  0x3d   : > { %p590_p11 = scmp.lt.s32.totalorder (!%p520_p9), %s1298_s25, 3  ;;  %s1836_s13 = scalar_lea.vmem (!%p520_p9), [#allocation3], %s1295_s24 }
  0x3e   : > { %p1303_p12 = scmp.ne.s32.totalorder (!%p520_p9), %s1573_s17, 0 }
  0x40   : > { %s1952_s14 = smov (!%p580_p10, %s1296_s14), 35  ;;  %s1954_s25 = smov (!%p590_p11, %s1298_s25), 3 }
  0x41   : > { %s1297_s26 = sshll.u32 %s1952_s14, 2  ;;  %s592_s15 = scalar_lea.vmem %s1936_s2, %s1954_s25 }
  0x42   : > { %s1817_s30 = scalar_lea.vmem %s1934_s0, %s1297_s26  ;;  %s1300_s7 = sshll.u32 %s1954_s25, 2 }
  0x43   : > { %s1829_s18 = scalar_lea.vmem %s1937_s3, %s1300_s7  ;;  %s1834_s12 = scalar_lea.vmem %s1938_s4, %s1300_s7 }
  0x44   : > { %617 = sbr.rel (%p1303_p12) target bundleno = 75 (0x4b), region = 78 }
  0x49   : > { %v1591_v0 = vmov 0.0  }
  0x4a   : > { %618 = vst [vmem:[#allocation2] sm:$0xff] %v1591_v0  ;;  %619 = vst [vmem:[#allocation2 + $0x8] sm:$0xff] %v1591_v0 }
  0x4b PF: > { %v1435_v1 = vld [vmem:[%s1836_s13 + $0x74] ss:$8 sps:$4 sm:$0xff]   ;;  %v1439_v3 = vld [vmem:[%s1836_s13 + $0x70] ss:$8 sps:$4 sm:$0xff]   ;;  %v1441_v5 = vld [vmem:[%s1836_s13 + $0x64] ss:$8 sps:$4 sm:$0xff]  }
  0x4c   : > { %v1437_v2 = vld [vmem:[%s1836_s13 + $0x174] ss:$8 sps:$4 sm:$0xff]   ;;  %1022 = vmatprep.subr.bf16.mxu0 %v1435_v1  ;;  %v1440_v4 = vld [vmem:[%s1836_s13 + $0x170] ss:$8 sps:$4 sm:$0xff]   ;;  %v1443_v6 = vld [vmem:[%s1836_s13 + $0x164] ss:$8 sps:$4 sm:$0xff]  }
  0x4d   : > { %1063 = vmatprep.subr.bf16.mxu1 %v1437_v2  ;;  %1023 = vmatpush1.bf16.msra.mxu0 %v1439_v3  ;;  %v1445_v7 = vld [vmem:[%s1836_s13 + $0x60] ss:$8 sps:$4 sm:$0xff]   ;;  %v1447_v9 = vld [vmem:[%s1836_s13 + $0x54] ss:$8 sps:$4 sm:$0xff]   ;;  %v1451_v11 = vld [vmem:[%s1836_s13 + $0x50] ss:$8 sps:$4 sm:$0xff]  }
  0x4e   : > { %1064 = vmatpush1.bf16.msra.mxu1 %v1440_v4  ;;  %1024 = vmatprep.subr.bf16.mxu0 %v1441_v5  ;;  %v1446_v8 = vld [vmem:[%s1836_s13 + $0x160] ss:$8 sps:$4 sm:$0xff]   ;;  %v1449_v10 = vld [vmem:[%s1836_s13 + $0x154] ss:$8 sps:$4 sm:$0xff]   ;;  %v1452_v12 = vld [vmem:[%s1836_s13 + $0x150] ss:$8 sps:$4 sm:$0xff]  }
  0x4f   : > { %1065 = vmatprep.subr.bf16.mxu1 %v1443_v6  ;;  %v1453_v13 = vld [vmem:[%s1836_s13 + $0x44] ss:$8 sps:$4 sm:$0xff]   ;;  %v1457_v15 = vld [vmem:[%s1836_s13 + $0x40] ss:$8 sps:$4 sm:$0xff]   ;;  %v1459_v17 = vld [vmem:[%s1836_s13 + $0x34] ss:$8 sps:$4 sm:$0xff]  }
  0x50   : > { %v1455_v14 = vld [vmem:[%s1836_s13 + $0x144] ss:$8 sps:$4 sm:$0xff]   ;;  %v1458_v16 = vld [vmem:[%s1836_s13 + $0x140] ss:$8 sps:$4 sm:$0xff]   ;;  %v1461_v18 = vld [vmem:[%s1836_s13 + $0x134] ss:$8 sps:$4 sm:$0xff]  }
  0x51   : > { %1025 = vmatpush1.bf16.msra.mxu0 %v1445_v7  ;;  %v1463_v19 = vld [vmem:[%s1836_s13 + $0x30] ss:$8 sps:$4 sm:$0xff]   ;;  %v1465_v21 = vld [vmem:[%s1836_s13 + $0x24] ss:$8 sps:$4 sm:$0xff]   ;;  %v1469_v23 = vld [vmem:[%s1836_s13 + $0x20] ss:$8 sps:$4 sm:$0xff]  }
  0x52   : > { %1066 = vmatpush1.bf16.msra.mxu1 %v1446_v8  ;;  %1026 = vmatprep.subr.bf16.mxu0 %v1447_v9  ;;  %v1464_v20 = vld [vmem:[%s1836_s13 + $0x130] ss:$8 sps:$4 sm:$0xff]   ;;  %v1467_v22 = vld [vmem:[%s1836_s13 + $0x124] ss:$8 sps:$4 sm:$0xff]   ;;  %v1470_v24 = vld [vmem:[%s1836_s13 + $0x120] ss:$8 sps:$4 sm:$0xff]  }
  0x53   : > { %1067 = vmatprep.subr.bf16.mxu1 %v1449_v10  ;;  %v1471_v25 = vld [vmem:[%s1836_s13 + $0x14] ss:$8 sps:$4 sm:$0xff]   ;;  %v1475_v27 = vld [vmem:[%s1836_s13 + $0x10] ss:$8 sps:$4 sm:$0xff]   ;;  %v1477_v29 = vld [vmem:[%s1836_s13 + $0x4] ss:$8 sps:$4 sm:$0xff]  }
  0x54   : > { %v1473_v26 = vld [vmem:[%s1836_s13 + $0x114] ss:$8 sps:$4 sm:$0xff]   ;;  %v1476_v28 = vld [vmem:[%s1836_s13 + $0x110] ss:$8 sps:$4 sm:$0xff]   ;;  %v1479_v30 = vld [vmem:[%s1836_s13 + $0x104] ss:$8 sps:$4 sm:$0xff]  }
  0x55   : > { %1027 = vmatpush1.bf16.msra.mxu0 %v1451_v11  ;;  %v1481_v31 = vld [vmem:[%s1836_s13] ss:$8 sps:$4 sm:$0xff]   ;;  %v1483_v33 = vld [vmem:[%s1836_s13 + $0xf4] ss:$8 sps:$4 sm:$0xff]   ;;  %v1487_v35 = vld [vmem:[%s1836_s13 + $0xf0] ss:$8 sps:$4 sm:$0xff]  }
  0x56   : > { %1068 = vmatpush1.bf16.msra.mxu1 %v1452_v12  ;;  %1028 = vmatprep.subr.bf16.mxu0 %v1453_v13  ;;  %v1482_v32 = vld [vmem:[%s1836_s13 + $0x100] ss:$8 sps:$4 sm:$0xff]   ;;  %v1485_v34 = vld [vmem:[%s1836_s13 + $0x1f4] ss:$8 sps:$4 sm:$0xff]   ;;  %v1488_v36 = vld [vmem:[%s1836_s13 + $0x1f0] ss:$8 sps:$4 sm:$0xff]  }
  0x57   : > { %1069 = vmatprep.subr.bf16.mxu1 %v1455_v14  ;;  %v1489_v37 = vld [vmem:[%s1836_s13 + $0xe4] ss:$8 sps:$4 sm:$0xff]   ;;  %v1493_v39 = vld [vmem:[%s1836_s13 + $0xe0] ss:$8 sps:$4 sm:$0xff]   ;;  %v1495_v41 = vld [vmem:[%s1836_s13 + $0xd4] ss:$8 sps:$4 sm:$0xff]  }
  0x58   : > { %v1491_v38 = vld [vmem:[%s1836_s13 + $0x1e4] ss:$8 sps:$4 sm:$0xff]   ;;  %v1494_v40 = vld [vmem:[%s1836_s13 + $0x1e0] ss:$8 sps:$4 sm:$0xff]   ;;  %v1497_v42 = vld [vmem:[%s1836_s13 + $0x1d4] ss:$8 sps:$4 sm:$0xff]  }
  0x59   : > { %1029 = vmatpush1.bf16.msra.mxu0 %v1457_v15  ;;  %v1499_v43 = vld [vmem:[%s1836_s13 + $0xd0] ss:$8 sps:$4 sm:$0xff]   ;;  %v1501_v45 = vld [vmem:[%s1836_s13 + $0xc4] ss:$8 sps:$4 sm:$0xff]   ;;  %v1505_v50 = vld [vmem:[%s1836_s13 + $0xc0] ss:$8 sps:$4 sm:$0xff]  }
  0x5a   : > { %1070 = vmatpush1.bf16.msra.mxu1 %v1458_v16  ;;  %1030 = vmatprep.subr.bf16.mxu0 %v1459_v17  ;;  %v1500_v44 = vld [vmem:[%s1836_s13 + $0x1d0] ss:$8 sps:$4 sm:$0xff]   ;;  %v1503_v46 = vld [vmem:[%s1836_s13 + $0x1c4] ss:$8 sps:$4 sm:$0xff]   ;;  %v1506_v51 = vld [vmem:[%s1836_s13 + $0x1c0] ss:$8 sps:$4 sm:$0xff]  }
  0x5b   : > { %1071 = vmatprep.subr.bf16.mxu1 %v1461_v18  ;;  %v622_v47 = vld [vmem:[%s1817_s30] sm:$0xff]  ;;  %v623_v49 = vld [vmem:[%s1817_s30 + $0x8] sm:$0xff]  ;;  %v1513_v57 = vld [vmem:[%s1836_s13 + $0xa4] ss:$8 sps:$4 sm:$0xff]   ;;  %p1372_p13 = scmp.ne.s32.totalorder %s1573_s17, 8 }
  0x5c   : > { %v1305_v48 = vcombine.high %v622_v47, %v622_v47  ;;  %v1307_v52 = vcombine.high %v623_v49, %v623_v49  ;;  %v1507_v53 = vld [vmem:[%s1836_s13 + $0xb4] ss:$8 sps:$4 sm:$0xff]   ;;  %v1511_v55 = vld [vmem:[%s1836_s13 + $0xb0] ss:$8 sps:$4 sm:$0xff]   ;;  %v1515_v58 = vld [vmem:[%s1836_s13 + $0x1a4] ss:$8 sps:$4 sm:$0xff]   ;;  %v1304_v5 = vcombine.low %v622_v47, %v622_v47  ;;  %v1306_v6 = vcombine.low %v623_v49, %v623_v49 }
  0x5d   : > { %1031 = vmatpush1.bf16.msra.mxu0 %v1463_v19  ;;  %v1509_v54 = vld [vmem:[%s1836_s13 + $0x1b4] ss:$8 sps:$4 sm:$0xff]   ;;  %v1512_v56 = vld [vmem:[%s1836_s13 + $0x1b0] ss:$8 sps:$4 sm:$0xff]   ;;  %v1517_v59 = vld [vmem:[%s1836_s13 + $0xa0] ss:$8 sps:$4 sm:$0xff]  }
  0x5e   : > { %1072 = vmatpush1.bf16.msra.mxu1 %v1464_v20  ;;  %1032 = vmatprep.subr.bf16.mxu0 %v1465_v21  ;;  %v1518_v60 = vld [vmem:[%s1836_s13 + $0x1a0] ss:$8 sps:$4 sm:$0xff]   ;;  %v1519_v61 = vld [vmem:[%s1836_s13 + $0x94] ss:$8 sps:$4 sm:$0xff]   ;;  %v1523_v63 = vld [vmem:[%s1836_s13 + $0x90] ss:$8 sps:$4 sm:$0xff]  }
  0x5f   : > { %1073 = vmatprep.subr.bf16.mxu1 %v1467_v22  ;;  %1054 = vmatprep.mubr.bf16.mxu0 %v1305_v48  ;;  %v1521_v62 = vld [vmem:[%s1836_s13 + $0x194] ss:$8 sps:$4 sm:$0xff]   ;;  %v1524_v0 = vld [vmem:[%s1836_s13 + $0x190] ss:$8 sps:$4 sm:$0xff]   ;;  %v1525_v1 = vld [vmem:[%s1836_s13 + $0x84] ss:$8 sps:$4 sm:$0xff]  }
  0x60   : > { %1095 = vmatprep.mubr.bf16.mxu1 %v1307_v52  ;;  %v1527_v2 = vld [vmem:[%s1836_s13 + $0x184] ss:$8 sps:$4 sm:$0xff]   ;;  %v1529_v3 = vld [vmem:[%s1836_s13 + $0x80] ss:$8 sps:$4 sm:$0xff]   ;;  %v620_v8 = vld [vmem:[#allocation2] sm:$0xff] }
  0x61   : > { %1033 = vmatpush1.bf16.msra.mxu0 %v1469_v23  ;;  %v1530_v4 = vld [vmem:[%s1836_s13 + $0x180] ss:$8 sps:$4 sm:$0xff]   ;;  %v621_v12 = vld [vmem:[#allocation2 + $0x8] sm:$0xff] }
  0x62   : > { %1074 = vmatpush1.bf16.msra.mxu1 %v1470_v24  ;;  %1034 = vmatprep.subr.bf16.mxu0 %v1471_v25 }
  0x63   : > { %1075 = vmatprep.subr.bf16.mxu1 %v1473_v26 }
  0x65   : > { %1035 = vmatpush1.bf16.msra.mxu0 %v1475_v27 }
  0x66   : > { %1076 = vmatpush1.bf16.msra.mxu1 %v1476_v28  ;;  %1036 = vmatprep.subr.bf16.mxu0 %v1477_v29 }
  0x67   : > { %1077 = vmatprep.subr.bf16.mxu1 %v1479_v30 }
  0x69   : > { %1037 = vmatpush1.bf16.msra.mxu0 %v1481_v31 }
  0x6a   : > { %1078 = vmatpush1.bf16.msra.mxu1 %v1482_v32  ;;  %1038 = vmatprep.subr.bf16.mxu0 %v1483_v33 }
  0x6b   : > { %1079 = vmatprep.subr.bf16.mxu1 %v1485_v34 }
  0x6d   : > { %1039 = vmatpush2.bf16.msra.mxu0 %v1487_v35 }
  0x6e   : > { %1080 = vmatpush2.bf16.msra.mxu1 %v1488_v36  ;;  %1040 = vmatprep.subr.bf16.mxu0 %v1489_v37 }
  0x6f   : > { %1081 = vmatprep.subr.bf16.mxu1 %v1491_v38 }
  0x71   : > { %1041 = vmatpush2.bf16.msra.mxu0 %v1493_v39 }
  0x72   : > { %1082 = vmatpush2.bf16.msra.mxu1 %v1494_v40  ;;  %1042 = vmatprep.subr.bf16.mxu0 %v1495_v41 }
  0x73   : > { %1083 = vmatprep.subr.bf16.mxu1 %v1497_v42 }
  0x75   : > { %1043 = vmatpush2.bf16.msra.mxu0 %v1499_v43 }
  0x76   : > { %1084 = vmatpush2.bf16.msra.mxu1 %v1500_v44  ;;  %1044 = vmatprep.subr.bf16.mxu0 %v1501_v45 }
  0x77   : > { %1085 = vmatprep.subr.bf16.mxu1 %v1503_v46 }
  0x79   : > { %1045 = vmatpush2.bf16.msra.mxu0 %v1505_v50 }
  0x7a   : > { %1086 = vmatpush2.bf16.msra.mxu1 %v1506_v51  ;;  %1046 = vmatprep.subr.bf16.mxu0 %v1507_v53 }
  0x7b   : > { %1087 = vmatprep.subr.bf16.mxu1 %v1509_v54 }
  0x7d   : > { %1047 = vmatpush2.bf16.msra.mxu0 %v1511_v55 }
  0x7e   : > { %1088 = vmatpush2.bf16.msra.mxu1 %v1512_v56  ;;  %1048 = vmatprep.subr.bf16.mxu0 %v1513_v57 }
  0x7f   : > { %1089 = vmatprep.subr.bf16.mxu1 %v1515_v58 }
  0x81   : > { %1049 = vmatpush2.bf16.msra.mxu0 %v1517_v59 }
  0x82   : > { %1090 = vmatpush2.bf16.msra.mxu1 %v1518_v60  ;;  %1050 = vmatprep.subr.bf16.mxu0 %v1519_v61 }
  0x83   : > { %1091 = vmatprep.subr.bf16.mxu1 %v1521_v62 }
  0x85   : > { %1051 = vmatpush2.bf16.msra.mxu0 %v1523_v63 }
  0x86   : > { %1092 = vmatpush2.bf16.msra.mxu1 %v1524_v0  ;;  %1052 = vmatprep.subr.bf16.mxu0 %v1525_v1 }
  0x87   : > { %1093 = vmatprep.subr.bf16.mxu1 %v1527_v2 }
  0x89   : > { %1053 = vmatpush2.bf16.msra.mxu0 %v1529_v3 }
  0x8a   : > { %1094 = vmatpush2.bf16.msra.mxu1 %v1530_v4 }
  0x8c   : > { %1055 = vmatmul.mubr.bf16.vlgmr.msra.gmra.mxu0 %v1304_v5 }
  0x8d   : > { %1096 = vmatmul.mubr.bf16.vlgmr.msra.gmra.mxu1 %v1306_v6 }
 0x14c   : > { %v1056_v7 = vpop.f32.mrf.mxu0 }
 0x14d   : > { %v1097_v9 = vpop.f32.mrf.mxu1 }
 0x14e   : > { %v1098_v10 = vadd.f32 %v1097_v9, %v1056_v7  ;;  %v1058_v11 = vpop.f32.mrf.mxu0 }
 0x14f   : > { %v1099_v13 = vpop.f32.mrf.mxu1 }
 0x150   : > { %v1104_v14 = vadd.f32 %v1098_v10, %v620_v8  ;;  %v1100_v15 = vadd.f32 %v1099_v13, %v1058_v11  ;;  %v1060_v16 = vpop.f32.mrf.mxu0  ;;  %1111 = sbr.rel (%p1372_p13) target bundleno = 358 (0x166), region = 82 }
 0x151   : > { %v1101_v17 = vpop.f32.mrf.mxu1 }
 0x152   : > { %1106 = vst [vmem:[#allocation2] sm:$0xff] %v1104_v14  ;;  %v1105_v18 = vadd.f32 %v1100_v15, %v621_v12  ;;  %v1061_v19 = vpop.f32.mrf.mxu0 }
 0x153   : > { %v1102_v20 = vpop.f32.mrf.mxu1 }
 0x154   : > { %1107 = vst [vmem:[#allocation2 + $0x8] sm:$0xff] %v1105_v18 }
 0x155   : > { %v1116_v21 = vlaneseq  ;;  %v1114_v23 = vld [vmem:[%s592_s15] sm:$0x3] }
 0x156   : > { %v1128_v24 = vld [vmem:[%s1829_s18] sm:$0xff] }
 0x157   : > { %v1117_v22 = vshrl.u32 %v1116_v21, 7  ;;  %v1129_v31 = vunpack.c.l.bf16 %v1128_v24  ;;  %v1130_v32 = vunpack.c.h.bf16 %v1128_v24 }
 0x159   : > { %v1118_v25 = vsub.s32 0, %v1117_v22  ;;  %v1122_v26 = vsub.s32 1, %v1117_v22  ;;  %v1112_v27 = vld [vmem:[#allocation2] sm:$0xff] }
 0x15b   : > { %v1113_v28 = vld [vmem:[#allocation2 + $0x8] sm:$0xff]  ;;  %v1119_v29 = vrot.slane %v1114_v23, %v1118_v25  ;;  %v1123_v30 = vrot.slane %v1114_v23, %v1122_v26 }
 0x15d   : > { %v1126_v33 = vadd.f32 %v1119_v29, %v1112_v27  ;;  %v1127_v34 = vadd.f32 %v1123_v30, %v1113_v28 }
 0x15f   : > { %v1131_v35 = vadd.f32 %v1129_v31, %v1126_v33  ;;  %v1132_v36 = vadd.f32 %v1130_v32, %v1127_v34 }
 0x161   : > { %v1133_v37 = vmax.f32 %v1131_v35, 0.0  ;;  %v1134_v38 = vmax.f32 %v1132_v36, 0.0 }
 0x163   : > { %v1377_v39 = vpack.c.bf16 %v1134_v38, %v1133_v37 }
 0x165   : > { %1143 = vst [vmem:[%s1834_s12] sm:$0xff] %v1377_v39 }
 0x166 PF: > { %s14_s21 = sadd.s32 1, %s1589_s21   ;;  %s1939_s15 = smov %s1569_s16 }
 0x167   : > { %p11_p0 = scmp.ge.s32.totalorder %s14_s21, 20   ;;  %s1940_s16 = smov %s1668_s28 }
 0x168   : > { %s1941_s17 = smov %s1581_s19  ;;  %s1942_s18 = smov %s1585_s20 }
 0x169   : > { %s1943_s19 = smov %s1946_s22  ;;  %s1944_s20 = smov %s1950_s23 }
 0x16a   :  { %13 = sbr.rel (!%p11_p0) target bundleno = 4 (0x4), region = 126 }

// kernel: resnet_forward.43
= control target key start
LH: loop header
LB: loop body
LE: loop exit
PB: predicated region body
PF: predicated region fallthrough
CT: control target
= control target key end

     0   :  { %s1524_s12 = smov 0   ;;  %s1526_s13 = smov 0   ;;  %s1835_s0 = inlined_call_operand.vmem [shape: bf16[8,4608], index: 0, kind: input, shape index: {}]   ;;  %s1836_s1 = inlined_call_operand.vmem [shape: bf16[4608,512], index: 1, kind: input, shape index: {}]   ;;  %s1837_s2 = inlined_call_operand.vmem [shape: f32[1,512], index: 2, kind: input, shape index: {}]   ;;  %s1838_s3 = inlined_call_operand.vmem [shape: bf16[8,512], index: 3, kind: output, shape index: {}]  }
   0x1   :  { %s1528_s14 = smov 0   ;;  %s1530_s15 = smov 0  }
   0x2   :  { %s1532_s16 = smov 0   ;;  %s1534_s17 = smov 0  }
   0x3   :  { %s1536_s18 = smov 0  }
   0x4 LB: > { %s25_s19 = sadd.s32 1, %s1493_s16  ;;  %s28_s20 = sadd.s32 1, %s1497_s17  ;;  %s1501_s18 = sphi %s1536_s18, %s13_s18   ;;  %s1497_s17 = sphi %s1534_s17, %s1844_s17   ;;  %s1493_s16 = sphi %s1532_s16, %s1843_s16   ;;  %s1489_s15 = sphi %s1530_s15, %s1842_s15   ;;  %s1485_s14 = sphi %s1528_s14, %s1841_s14   ;;  %s1481_s13 = sphi %s1526_s13, %s1840_s13   ;;  %s1477_s12 = sphi %s1524_s12, %s1839_s12  }
   0x5   : > { %p26_p0 = scmp.ge.s32.totalorder %s25_s19, 9  ;;  %p76_p1 = scmp.ne.s32.totalorder %s1481_s13, %s1477_s12 }
   0x6   : > { %p77_p2 = scmp.eq.s32.totalorder %s1501_s18, 0  ;;  %s69_s24 = sadd.s32 1, %s1481_s13 }
   0x7   : > { %s1846_s19 = smov (%p26_p0, %s25_s19), 0  ;;  %s1848_s20 = smov (!%p26_p0, %s28_s20), %s1497_s17 }
   0x8   : > { %p78_p3 = por %p77_p2, %p76_p1  ;;  %p30_p4 = scmp.ge.s32.totalorder %s1848_s20, 2 }
   0x9   : > { %s64_s21 = ssub.s32 %s1493_s16, %s1846_s19  ;;  %p1202_p6 = scmp.ge.s32.totalorder %s1501_s18, 18 }
   0xa   : > { %s1850_s20 = smov (%p30_p4, %s1848_s20), 0 }
   0xb   : > { %s65_s22 = ssub.s32 %s1497_s17, %s1850_s20  ;;  %156 = sbr.rel (%p1202_p6) target bundleno = 55 (0x37), region = 16 }
   0xc   : > { %s66_s23 = sor.u32 %s65_s22, %s64_s21 }
   0xd   : > { %p67_p5 = scmp.eq.s32.totalorder %s66_s23, 0 }
   0xf   : > { %s1575_s25 = scalar_select %p67_p5, %s1481_s13, %s69_s24  }
  0x10   : > { %172 = sbr.rel (!%p78_p3) target bundleno = 55 (0x37), region = 24  ;;  %s174_s26 = sand.u32 (%p78_p3), 1, %s1481_s13  }
  0x11   : > { %s1205_s27 = sshll.u32 (%p78_p3), %s1497_s17, 1  ;;  %s1203_s28 = sshll.u32 (%p78_p3), %s174_s26, 9 }
  0x12   : > { %s1288_s29 = sshll.u32 (%p78_p3), %s1493_s16, 8  ;;  %s1589_s8 = scalar_lea.vmem (%p78_p3), [#allocation3], %s1203_s28 }
  0x13   : > { %s180_s30 = sadd.s32 (%p78_p3), %s1288_s29, %s1205_s27 }
  0x14   : > { %s1207_s4 = sshll.u32 (%p78_p3), %s180_s30, 2 }
  0x15   : > { %s1584_s7 = scalar_lea.vmem %s1836_s1, %s1207_s4 }
  0x16   : > { %v337_v0 = vld [vmem:[%s1584_s7] sm:$0xff]  ;;  %v339_v1 = vld [vmem:[%s1584_s7 + $0x10] sm:$0xff] }
  0x17   : > { %v341_v2 = vld [vmem:[%s1584_s7 + $0x20] sm:$0xff]  ;;  %338 = vst [vmem:[%s1589_s8] sm:$0xff] %v337_v0  ;;  %340 = vst [vmem:[%s1589_s8 + $0x8] sm:$0xff] %v339_v1  ;;  %v343_v3 = vld [vmem:[%s1584_s7 + $0x30] sm:$0xff] }
  0x18   : > { %342 = vst [vmem:[%s1589_s8 + $0x10] sm:$0xff] %v341_v2  ;;  %v345_v4 = vld [vmem:[%s1584_s7 + $0x40] sm:$0xff]  ;;  %v347_v5 = vld [vmem:[%s1584_s7 + $0x50] sm:$0xff]  ;;  %344 = vst [vmem:[%s1589_s8 + $0x18] sm:$0xff] %v343_v3 }
  0x19   : > { %346 = vst [vmem:[%s1589_s8 + $0x20] sm:$0xff] %v345_v4  ;;  %348 = vst [vmem:[%s1589_s8 + $0x28] sm:$0xff] %v347_v5  ;;  %v349_v6 = vld [vmem:[%s1584_s7 + $0x60] sm:$0xff]  ;;  %v351_v7 = vld [vmem:[%s1584_s7 + $0x70] sm:$0xff] }
  0x1a   : > { %v353_v8 = vld [vmem:[%s1584_s7 + $0x80] sm:$0xff]  ;;  %350 = vst [vmem:[%s1589_s8 + $0x30] sm:$0xff] %v349_v6  ;;  %352 = vst [vmem:[%s1589_s8 + $0x38] sm:$0xff] %v351_v7  ;;  %v355_v9 = vld [vmem:[%s1584_s7 + $0x90] sm:$0xff] }
  0x1b   : > { %354 = vst [vmem:[%s1589_s8 + $0x40] sm:$0xff] %v353_v8  ;;  %v357_v10 = vld [vmem:[%s1584_s7 + $0xa0] sm:$0xff]  ;;  %v359_v11 = vld [vmem:[%s1584_s7 + $0xb0] sm:$0xff]  ;;  %356 = vst [vmem:[%s1589_s8 + $0x48] sm:$0xff] %v355_v9 }
  0x1c   : > { %358 = vst [vmem:[%s1589_s8 + $0x50] sm:$0xff] %v357_v10  ;;  %360 = vst [vmem:[%s1589_s8 + $0x58] sm:$0xff] %v359_v11  ;;  %v361_v12 = vld [vmem:[%s1584_s7 + $0xc0] sm:$0xff]  ;;  %v363_v13 = vld [vmem:[%s1584_s7 + $0xd0] sm:$0xff] }
  0x1d   : > { %v365_v14 = vld [vmem:[%s1584_s7 + $0xe0] sm:$0xff]  ;;  %362 = vst [vmem:[%s1589_s8 + $0x60] sm:$0xff] %v361_v12  ;;  %364 = vst [vmem:[%s1589_s8 + $0x68] sm:$0xff] %v363_v13  ;;  %v367_v15 = vld [vmem:[%s1584_s7 + $0xf0] sm:$0xff] }
  0x1e   : > { %366 = vst [vmem:[%s1589_s8 + $0x70] sm:$0xff] %v365_v14  ;;  %v369_v16 = vld [vmem:[%s1584_s7 + $0x100] sm:$0xff]  ;;  %v371_v17 = vld [vmem:[%s1584_s7 + $0x110] sm:$0xff]  ;;  %368 = vst [vmem:[%s1589_s8 + $0x78] sm:$0xff] %v367_v15 }
  0x1f   : > { %370 = vst [vmem:[%s1589_s8 + $0x80] sm:$0xff] %v369_v16  ;;  %372 = vst [vmem:[%s1589_s8 + $0x88] sm:$0xff] %v371_v17  ;;  %v373_v18 = vld [vmem:[%s1584_s7 + $0x120] sm:$0xff]  ;;  %v375_v19 = vld [vmem:[%s1584_s7 + $0x130] sm:$0xff] }
  0x20   : > { %v377_v20 = vld [vmem:[%s1584_s7 + $0x140] sm:$0xff]  ;;  %374 = vst [vmem:[%s1589_s8 + $0x90] sm:$0xff] %v373_v18  ;;  %376 = vst [vmem:[%s1589_s8 + $0x98] sm:$0xff] %v375_v19  ;;  %v379_v21 = vld [vmem:[%s1584_s7 + $0x150] sm:$0xff] }
  0x21   : > { %378 = vst [vmem:[%s1589_s8 + $0xa0] sm:$0xff] %v377_v20  ;;  %v381_v22 = vld [vmem:[%s1584_s7 + $0x160] sm:$0xff]  ;;  %v383_v23 = vld [vmem:[%s1584_s7 + $0x170] sm:$0xff]  ;;  %380 = vst [vmem:[%s1589_s8 + $0xa8] sm:$0xff] %v379_v21 }
  0x22   : > { %382 = vst [vmem:[%s1589_s8 + $0xb0] sm:$0xff] %v381_v22  ;;  %384 = vst [vmem:[%s1589_s8 + $0xb8] sm:$0xff] %v383_v23  ;;  %v385_v24 = vld [vmem:[%s1584_s7 + $0x180] sm:$0xff]  ;;  %v387_v25 = vld [vmem:[%s1584_s7 + $0x190] sm:$0xff] }
  0x23   : > { %v389_v26 = vld [vmem:[%s1584_s7 + $0x1a0] sm:$0xff]  ;;  %386 = vst [vmem:[%s1589_s8 + $0xc0] sm:$0xff] %v385_v24  ;;  %388 = vst [vmem:[%s1589_s8 + $0xc8] sm:$0xff] %v387_v25  ;;  %v391_v27 = vld [vmem:[%s1584_s7 + $0x1b0] sm:$0xff] }
  0x24   : > { %390 = vst [vmem:[%s1589_s8 + $0xd0] sm:$0xff] %v389_v26  ;;  %v393_v28 = vld [vmem:[%s1584_s7 + $0x1c0] sm:$0xff]  ;;  %v395_v29 = vld [vmem:[%s1584_s7 + $0x1d0] sm:$0xff]  ;;  %392 = vst [vmem:[%s1589_s8 + $0xd8] sm:$0xff] %v391_v27 }
  0x25   : > { %394 = vst [vmem:[%s1589_s8 + $0xe0] sm:$0xff] %v393_v28  ;;  %396 = vst [vmem:[%s1589_s8 + $0xe8] sm:$0xff] %v395_v29  ;;  %v397_v30 = vld [vmem:[%s1584_s7 + $0x1e0] sm:$0xff]  ;;  %v399_v31 = vld [vmem:[%s1584_s7 + $0x1f0] sm:$0xff] }
  0x26   : > { %v401_v32 = vld [vmem:[%s1584_s7 + $0x200] sm:$0xff]  ;;  %398 = vst [vmem:[%s1589_s8 + $0xf0] sm:$0xff] %v397_v30  ;;  %400 = vst [vmem:[%s1589_s8 + $0xf8] sm:$0xff] %v399_v31  ;;  %v403_v33 = vld [vmem:[%s1584_s7 + $0x210] sm:$0xff] }
  0x27   : > { %402 = vst [vmem:[%s1589_s8 + $0x100] sm:$0xff] %v401_v32  ;;  %v405_v34 = vld [vmem:[%s1584_s7 + $0x220] sm:$0xff]  ;;  %v407_v35 = vld [vmem:[%s1584_s7 + $0x230] sm:$0xff]  ;;  %404 = vst [vmem:[%s1589_s8 + $0x108] sm:$0xff] %v403_v33 }
  0x28   : > { %406 = vst [vmem:[%s1589_s8 + $0x110] sm:$0xff] %v405_v34  ;;  %408 = vst [vmem:[%s1589_s8 + $0x118] sm:$0xff] %v407_v35  ;;  %v409_v36 = vld [vmem:[%s1584_s7 + $0x240] sm:$0xff]  ;;  %v411_v37 = vld [vmem:[%s1584_s7 + $0x250] sm:$0xff] }
  0x29   : > { %v413_v38 = vld [vmem:[%s1584_s7 + $0x260] sm:$0xff]  ;;  %410 = vst [vmem:[%s1589_s8 + $0x120] sm:$0xff] %v409_v36  ;;  %412 = vst [vmem:[%s1589_s8 + $0x128] sm:$0xff] %v411_v37  ;;  %v415_v39 = vld [vmem:[%s1584_s7 + $0x270] sm:$0xff] }
  0x2a   : > { %414 = vst [vmem:[%s1589_s8 + $0x130] sm:$0xff] %v413_v38  ;;  %v417_v40 = vld [vmem:[%s1584_s7 + $0x280] sm:$0xff]  ;;  %v419_v41 = vld [vmem:[%s1584_s7 + $0x290] sm:$0xff]  ;;  %416 = vst [vmem:[%s1589_s8 + $0x138] sm:$0xff] %v415_v39 }
  0x2b   : > { %418 = vst [vmem:[%s1589_s8 + $0x140] sm:$0xff] %v417_v40  ;;  %420 = vst [vmem:[%s1589_s8 + $0x148] sm:$0xff] %v419_v41  ;;  %v421_v42 = vld [vmem:[%s1584_s7 + $0x2a0] sm:$0xff]  ;;  %v423_v43 = vld [vmem:[%s1584_s7 + $0x2b0] sm:$0xff] }
  0x2c   : > { %v425_v44 = vld [vmem:[%s1584_s7 + $0x2c0] sm:$0xff]  ;;  %422 = vst [vmem:[%s1589_s8 + $0x150] sm:$0xff] %v421_v42  ;;  %424 = vst [vmem:[%s1589_s8 + $0x158] sm:$0xff] %v423_v43  ;;  %v427_v45 = vld [vmem:[%s1584_s7 + $0x2d0] sm:$0xff] }
  0x2d   : > { %426 = vst [vmem:[%s1589_s8 + $0x160] sm:$0xff] %v425_v44  ;;  %v429_v46 = vld [vmem:[%s1584_s7 + $0x2e0] sm:$0xff]  ;;  %v431_v47 = vld [vmem:[%s1584_s7 + $0x2f0] sm:$0xff]  ;;  %428 = vst [vmem:[%s1589_s8 + $0x168] sm:$0xff] %v427_v45 }
  0x2e   : > { %430 = vst [vmem:[%s1589_s8 + $0x170] sm:$0xff] %v429_v46  ;;  %432 = vst [vmem:[%s1589_s8 + $0x178] sm:$0xff] %v431_v47  ;;  %v433_v48 = vld [vmem:[%s1584_s7 + $0x300] sm:$0xff]  ;;  %v435_v49 = vld [vmem:[%s1584_s7 + $0x310] sm:$0xff] }
  0x2f   : > { %v437_v50 = vld [vmem:[%s1584_s7 + $0x320] sm:$0xff]  ;;  %434 = vst [vmem:[%s1589_s8 + $0x180] sm:$0xff] %v433_v48  ;;  %436 = vst [vmem:[%s1589_s8 + $0x188] sm:$0xff] %v435_v49  ;;  %v439_v51 = vld [vmem:[%s1584_s7 + $0x330] sm:$0xff] }
  0x30   : > { %438 = vst [vmem:[%s1589_s8 + $0x190] sm:$0xff] %v437_v50  ;;  %v441_v52 = vld [vmem:[%s1584_s7 + $0x340] sm:$0xff]  ;;  %v443_v53 = vld [vmem:[%s1584_s7 + $0x350] sm:$0xff]  ;;  %440 = vst [vmem:[%s1589_s8 + $0x198] sm:$0xff] %v439_v51 }
  0x31   : > { %442 = vst [vmem:[%s1589_s8 + $0x1a0] sm:$0xff] %v441_v52  ;;  %444 = vst [vmem:[%s1589_s8 + $0x1a8] sm:$0xff] %v443_v53  ;;  %v445_v54 = vld [vmem:[%s1584_s7 + $0x360] sm:$0xff]  ;;  %v447_v55 = vld [vmem:[%s1584_s7 + $0x370] sm:$0xff] }
  0x32   : > { %v449_v56 = vld [vmem:[%s1584_s7 + $0x380] sm:$0xff]  ;;  %446 = vst [vmem:[%s1589_s8 + $0x1b0] sm:$0xff] %v445_v54  ;;  %448 = vst [vmem:[%s1589_s8 + $0x1b8] sm:$0xff] %v447_v55  ;;  %v451_v57 = vld [vmem:[%s1584_s7 + $0x390] sm:$0xff] }
  0x33   : > { %450 = vst [vmem:[%s1589_s8 + $0x1c0] sm:$0xff] %v449_v56  ;;  %v453_v58 = vld [vmem:[%s1584_s7 + $0x3a0] sm:$0xff]  ;;  %v455_v59 = vld [vmem:[%s1584_s7 + $0x3b0] sm:$0xff]  ;;  %452 = vst [vmem:[%s1589_s8 + $0x1c8] sm:$0xff] %v451_v57 }
  0x34   : > { %454 = vst [vmem:[%s1589_s8 + $0x1d0] sm:$0xff] %v453_v58  ;;  %456 = vst [vmem:[%s1589_s8 + $0x1d8] sm:$0xff] %v455_v59  ;;  %v457_v60 = vld [vmem:[%s1584_s7 + $0x3c0] sm:$0xff]  ;;  %v459_v61 = vld [vmem:[%s1584_s7 + $0x3d0] sm:$0xff] }
  0x35   : > { %v461_v62 = vld [vmem:[%s1584_s7 + $0x3e0] sm:$0xff]  ;;  %458 = vst [vmem:[%s1589_s8 + $0x1e0] sm:$0xff] %v457_v60  ;;  %460 = vst [vmem:[%s1589_s8 + $0x1e8] sm:$0xff] %v459_v61  ;;  %v463_v63 = vld [vmem:[%s1584_s7 + $0x3f0] sm:$0xff] }
  0x36   : > { %462 = vst [vmem:[%s1589_s8 + $0x1f0] sm:$0xff] %v461_v62  ;;  %464 = vst [vmem:[%s1589_s8 + $0x1f8] sm:$0xff] %v463_v63 }
  0x37 PF: > { %p1208_p7 = scmp.ge.s32.totalorder %s1501_s18, 1  ;;  %p477_p8 = scmp.lt.s32.totalorder %s1501_s18, 19 }
  0x39   : > { %p478_p9 = pnand %p1208_p7, %p477_p8 }
  0x3a   : > { %s484_s9 = sand.u32 (!%p478_p9), 1, %s1477_s12   ;;  %s1210_s10 = sshll.u32 (!%p478_p9), %s1485_s14, 2 }
  0x3b   : > { %481 = sbr.rel (%p478_p9) target bundleno = 355 (0x163), region = 66  ;;  %s1209_s11 = sshll.u32 (!%p478_p9), %s484_s9, 9 }
  0x3c   : > { %p527_p10 = scmp.lt.s32.totalorder (!%p478_p9), %s1210_s10, 35  ;;  %s1212_s21 = sshll.u32 (!%p478_p9), %s1489_s15, 1 }
  0x3d   : > { %p537_p11 = scmp.lt.s32.totalorder (!%p478_p9), %s1212_s21, 3  ;;  %s1738_s5 = scalar_lea.vmem (!%p478_p9), [#allocation3], %s1209_s11 }
  0x3e   : > { %p1215_p12 = scmp.ne.s32.totalorder (!%p478_p9), %s1485_s14, 0 }
  0x40   : > { %s1852_s10 = smov (!%p527_p10, %s1210_s10), 35  ;;  %s1854_s21 = smov (!%p537_p11, %s1212_s21), 3 }
  0x41   : > { %s1211_s22 = sshll.u32 %s1852_s10, 2  ;;  %s539_s12 = scalar_lea.vmem %s1837_s2, %s1854_s21 }
  0x42   : > { %s1724_s26 = scalar_lea.vmem %s1835_s0, %s1211_s22  ;;  %s1214_s29 = sshll.u32 %s1854_s21, 2 }
  0x43   : > { %s1736_s15 = scalar_lea.vmem %s1838_s3, %s1214_s29  ;;  %554 = sbr.rel (%p1215_p12) target bundleno = 74 (0x4a), region = 74 }
  0x48   : > { %v1503_v0 = vmov 0.0  }
  0x49   : > { %555 = vst [vmem:[#allocation2] sm:$0xff] %v1503_v0  ;;  %556 = vst [vmem:[#allocation2 + $0x8] sm:$0xff] %v1503_v0 }
  0x4a PF: > { %v1347_v1 = vld [vmem:[%s1738_s5 + $0x74] ss:$8 sps:$4 sm:$0xff]   ;;  %v1351_v3 = vld [vmem:[%s1738_s5 + $0x70] ss:$8 sps:$4 sm:$0xff]   ;;  %v1353_v5 = vld [vmem:[%s1738_s5 + $0x64] ss:$8 sps:$4 sm:$0xff]  }
  0x4b   : > { %v1349_v2 = vld [vmem:[%s1738_s5 + $0x174] ss:$8 sps:$4 sm:$0xff]   ;;  %959 = vmatprep.subr.bf16.mxu0 %v1347_v1  ;;  %v1352_v4 = vld [vmem:[%s1738_s5 + $0x170] ss:$8 sps:$4 sm:$0xff]   ;;  %v1355_v6 = vld [vmem:[%s1738_s5 + $0x164] ss:$8 sps:$4 sm:$0xff]  }
  0x4c   : > { %1000 = vmatprep.subr.bf16.mxu1 %v1349_v2  ;;  %960 = vmatpush1.bf16.msra.mxu0 %v1351_v3  ;;  %v1357_v7 = vld [vmem:[%s1738_s5 + $0x60] ss:$8 sps:$4 sm:$0xff]   ;;  %v1359_v9 = vld [vmem:[%s1738_s5 + $0x54] ss:$8 sps:$4 sm:$0xff]   ;;  %v1363_v11 = vld [vmem:[%s1738_s5 + $0x50] ss:$8 sps:$4 sm:$0xff]  }
  0x4d   : > { %1001 = vmatpush1.bf16.msra.mxu1 %v1352_v4  ;;  %961 = vmatprep.subr.bf16.mxu0 %v1353_v5  ;;  %v1358_v8 = vld [vmem:[%s1738_s5 + $0x160] ss:$8 sps:$4 sm:$0xff]   ;;  %v1361_v10 = vld [vmem:[%s1738_s5 + $0x154] ss:$8 sps:$4 sm:$0xff]   ;;  %v1364_v12 = vld [vmem:[%s1738_s5 + $0x150] ss:$8 sps:$4 sm:$0xff]  }
  0x4e   : > { %1002 = vmatprep.subr.bf16.mxu1 %v1355_v6  ;;  %v1365_v13 = vld [vmem:[%s1738_s5 + $0x44] ss:$8 sps:$4 sm:$0xff]   ;;  %v1369_v15 = vld [vmem:[%s1738_s5 + $0x40] ss:$8 sps:$4 sm:$0xff]   ;;  %v1371_v17 = vld [vmem:[%s1738_s5 + $0x34] ss:$8 sps:$4 sm:$0xff]  }
  0x4f   : > { %v1367_v14 = vld [vmem:[%s1738_s5 + $0x144] ss:$8 sps:$4 sm:$0xff]   ;;  %v1370_v16 = vld [vmem:[%s1738_s5 + $0x140] ss:$8 sps:$4 sm:$0xff]   ;;  %v1373_v18 = vld [vmem:[%s1738_s5 + $0x134] ss:$8 sps:$4 sm:$0xff]  }
  0x50   : > { %962 = vmatpush1.bf16.msra.mxu0 %v1357_v7  ;;  %v1375_v19 = vld [vmem:[%s1738_s5 + $0x30] ss:$8 sps:$4 sm:$0xff]   ;;  %v1377_v21 = vld [vmem:[%s1738_s5 + $0x24] ss:$8 sps:$4 sm:$0xff]   ;;  %v1381_v23 = vld [vmem:[%s1738_s5 + $0x20] ss:$8 sps:$4 sm:$0xff]  }
  0x51   : > { %1003 = vmatpush1.bf16.msra.mxu1 %v1358_v8  ;;  %963 = vmatprep.subr.bf16.mxu0 %v1359_v9  ;;  %v1376_v20 = vld [vmem:[%s1738_s5 + $0x130] ss:$8 sps:$4 sm:$0xff]   ;;  %v1379_v22 = vld [vmem:[%s1738_s5 + $0x124] ss:$8 sps:$4 sm:$0xff]   ;;  %v1382_v24 = vld [vmem:[%s1738_s5 + $0x120] ss:$8 sps:$4 sm:$0xff]  }
  0x52   : > { %1004 = vmatprep.subr.bf16.mxu1 %v1361_v10  ;;  %v1383_v25 = vld [vmem:[%s1738_s5 + $0x14] ss:$8 sps:$4 sm:$0xff]   ;;  %v1387_v27 = vld [vmem:[%s1738_s5 + $0x10] ss:$8 sps:$4 sm:$0xff]   ;;  %v1389_v29 = vld [vmem:[%s1738_s5 + $0x4] ss:$8 sps:$4 sm:$0xff]  }
  0x53   : > { %v1385_v26 = vld [vmem:[%s1738_s5 + $0x114] ss:$8 sps:$4 sm:$0xff]   ;;  %v1388_v28 = vld [vmem:[%s1738_s5 + $0x110] ss:$8 sps:$4 sm:$0xff]   ;;  %v1391_v30 = vld [vmem:[%s1738_s5 + $0x104] ss:$8 sps:$4 sm:$0xff]  }
  0x54   : > { %964 = vmatpush1.bf16.msra.mxu0 %v1363_v11  ;;  %v1393_v31 = vld [vmem:[%s1738_s5] ss:$8 sps:$4 sm:$0xff]   ;;  %v1395_v33 = vld [vmem:[%s1738_s5 + $0xf4] ss:$8 sps:$4 sm:$0xff]   ;;  %v1399_v35 = vld [vmem:[%s1738_s5 + $0xf0] ss:$8 sps:$4 sm:$0xff]  }
  0x55   : > { %1005 = vmatpush1.bf16.msra.mxu1 %v1364_v12  ;;  %965 = vmatprep.subr.bf16.mxu0 %v1365_v13  ;;  %v1394_v32 = vld [vmem:[%s1738_s5 + $0x100] ss:$8 sps:$4 sm:$0xff]   ;;  %v1397_v34 = vld [vmem:[%s1738_s5 + $0x1f4] ss:$8 sps:$4 sm:$0xff]   ;;  %v1400_v36 = vld [vmem:[%s1738_s5 + $0x1f0] ss:$8 sps:$4 sm:$0xff]  }
  0x56   : > { %1006 = vmatprep.subr.bf16.mxu1 %v1367_v14  ;;  %v1401_v37 = vld [vmem:[%s1738_s5 + $0xe4] ss:$8 sps:$4 sm:$0xff]   ;;  %v1405_v39 = vld [vmem:[%s1738_s5 + $0xe0] ss:$8 sps:$4 sm:$0xff]   ;;  %v1407_v41 = vld [vmem:[%s1738_s5 + $0xd4] ss:$8 sps:$4 sm:$0xff]  }
  0x57   : > { %v1403_v38 = vld [vmem:[%s1738_s5 + $0x1e4] ss:$8 sps:$4 sm:$0xff]   ;;  %v1406_v40 = vld [vmem:[%s1738_s5 + $0x1e0] ss:$8 sps:$4 sm:$0xff]   ;;  %v1409_v42 = vld [vmem:[%s1738_s5 + $0x1d4] ss:$8 sps:$4 sm:$0xff]  }
  0x58   : > { %966 = vmatpush1.bf16.msra.mxu0 %v1369_v15  ;;  %v1411_v43 = vld [vmem:[%s1738_s5 + $0xd0] ss:$8 sps:$4 sm:$0xff]   ;;  %v1413_v45 = vld [vmem:[%s1738_s5 + $0xc4] ss:$8 sps:$4 sm:$0xff]   ;;  %v1417_v50 = vld [vmem:[%s1738_s5 + $0xc0] ss:$8 sps:$4 sm:$0xff]  }
  0x59   : > { %1007 = vmatpush1.bf16.msra.mxu1 %v1370_v16  ;;  %967 = vmatprep.subr.bf16.mxu0 %v1371_v17  ;;  %v1412_v44 = vld [vmem:[%s1738_s5 + $0x1d0] ss:$8 sps:$4 sm:$0xff]   ;;  %v1415_v46 = vld [vmem:[%s1738_s5 + $0x1c4] ss:$8 sps:$4 sm:$0xff]   ;;  %v1418_v51 = vld [vmem:[%s1738_s5 + $0x1c0] ss:$8 sps:$4 sm:$0xff]  }
  0x5a   : > { %1008 = vmatprep.subr.bf16.mxu1 %v1373_v18  ;;  %v559_v47 = vld [vmem:[%s1724_s26] sm:$0xff]  ;;  %v560_v49 = vld [vmem:[%s1724_s26 + $0x8] sm:$0xff]  ;;  %v1425_v57 = vld [vmem:[%s1738_s5 + $0xa4] ss:$8 sps:$4 sm:$0xff]   ;;  %p1284_p13 = scmp.ne.s32.totalorder %s1485_s14, 8 }
  0x5b   : > { %v1217_v48 = vcombine.high %v559_v47, %v559_v47  ;;  %v1219_v52 = vcombine.high %v560_v49, %v560_v49  ;;  %v1419_v53 = vld [vmem:[%s1738_s5 + $0xb4] ss:$8 sps:$4 sm:$0xff]   ;;  %v1423_v55 = vld [vmem:[%s1738_s5 + $0xb0] ss:$8 sps:$4 sm:$0xff]   ;;  %v1427_v58 = vld [vmem:[%s1738_s5 + $0x1a4] ss:$8 sps:$4 sm:$0xff]   ;;  %v1216_v5 = vcombine.low %v559_v47, %v559_v47  ;;  %v1218_v6 = vcombine.low %v560_v49, %v560_v49 }
  0x5c   : > { %968 = vmatpush1.bf16.msra.mxu0 %v1375_v19  ;;  %v1421_v54 = vld [vmem:[%s1738_s5 + $0x1b4] ss:$8 sps:$4 sm:$0xff]   ;;  %v1424_v56 = vld [vmem:[%s1738_s5 + $0x1b0] ss:$8 sps:$4 sm:$0xff]   ;;  %v1429_v59 = vld [vmem:[%s1738_s5 + $0xa0] ss:$8 sps:$4 sm:$0xff]  }
  0x5d   : > { %1009 = vmatpush1.bf16.msra.mxu1 %v1376_v20  ;;  %969 = vmatprep.subr.bf16.mxu0 %v1377_v21  ;;  %v1430_v60 = vld [vmem:[%s1738_s5 + $0x1a0] ss:$8 sps:$4 sm:$0xff]   ;;  %v1431_v61 = vld [vmem:[%s1738_s5 + $0x94] ss:$8 sps:$4 sm:$0xff]   ;;  %v1435_v63 = vld [vmem:[%s1738_s5 + $0x90] ss:$8 sps:$4 sm:$0xff]  }
  0x5e   : > { %1010 = vmatprep.subr.bf16.mxu1 %v1379_v22  ;;  %991 = vmatprep.mubr.bf16.mxu0 %v1217_v48  ;;  %v1433_v62 = vld [vmem:[%s1738_s5 + $0x194] ss:$8 sps:$4 sm:$0xff]   ;;  %v1436_v0 = vld [vmem:[%s1738_s5 + $0x190] ss:$8 sps:$4 sm:$0xff]   ;;  %v1437_v1 = vld [vmem:[%s1738_s5 + $0x84] ss:$8 sps:$4 sm:$0xff]  }
  0x5f   : > { %1032 = vmatprep.mubr.bf16.mxu1 %v1219_v52  ;;  %v1439_v2 = vld [vmem:[%s1738_s5 + $0x184] ss:$8 sps:$4 sm:$0xff]   ;;  %v1441_v3 = vld [vmem:[%s1738_s5 + $0x80] ss:$8 sps:$4 sm:$0xff]   ;;  %v557_v8 = vld [vmem:[#allocation2] sm:$0xff] }
  0x60   : > { %970 = vmatpush1.bf16.msra.mxu0 %v1381_v23  ;;  %v1442_v4 = vld [vmem:[%s1738_s5 + $0x180] ss:$8 sps:$4 sm:$0xff]   ;;  %v558_v12 = vld [vmem:[#allocation2 + $0x8] sm:$0xff] }
  0x61   : > { %1011 = vmatpush1.bf16.msra.mxu1 %v1382_v24  ;;  %971 = vmatprep.subr.bf16.mxu0 %v1383_v25 }
  0x62   : > { %1012 = vmatprep.subr.bf16.mxu1 %v1385_v26 }
  0x64   : > { %972 = vmatpush1.bf16.msra.mxu0 %v1387_v27 }
  0x65   : > { %1013 = vmatpush1.bf16.msra.mxu1 %v1388_v28  ;;  %973 = vmatprep.subr.bf16.mxu0 %v1389_v29 }
  0x66   : > { %1014 = vmatprep.subr.bf16.mxu1 %v1391_v30 }
  0x68   : > { %974 = vmatpush1.bf16.msra.mxu0 %v1393_v31 }
  0x69   : > { %1015 = vmatpush1.bf16.msra.mxu1 %v1394_v32  ;;  %975 = vmatprep.subr.bf16.mxu0 %v1395_v33 }
  0x6a   : > { %1016 = vmatprep.subr.bf16.mxu1 %v1397_v34 }
  0x6c   : > { %976 = vmatpush2.bf16.msra.mxu0 %v1399_v35 }
  0x6d   : > { %1017 = vmatpush2.bf16.msra.mxu1 %v1400_v36  ;;  %977 = vmatprep.subr.bf16.mxu0 %v1401_v37 }
  0x6e   : > { %1018 = vmatprep.subr.bf16.mxu1 %v1403_v38 }
  0x70   : > { %978 = vmatpush2.bf16.msra.mxu0 %v1405_v39 }
  0x71   : > { %1019 = vmatpush2.bf16.msra.mxu1 %v1406_v40  ;;  %979 = vmatprep.subr.bf16.mxu0 %v1407_v41 }
  0x72   : > { %1020 = vmatprep.subr.bf16.mxu1 %v1409_v42 }
  0x74   : > { %980 = vmatpush2.bf16.msra.mxu0 %v1411_v43 }
  0x75   : > { %1021 = vmatpush2.bf16.msra.mxu1 %v1412_v44  ;;  %981 = vmatprep.subr.bf16.mxu0 %v1413_v45 }
  0x76   : > { %1022 = vmatprep.subr.bf16.mxu1 %v1415_v46 }
  0x78   : > { %982 = vmatpush2.bf16.msra.mxu0 %v1417_v50 }
  0x79   : > { %1023 = vmatpush2.bf16.msra.mxu1 %v1418_v51  ;;  %983 = vmatprep.subr.bf16.mxu0 %v1419_v53 }
  0x7a   : > { %1024 = vmatprep.subr.bf16.mxu1 %v1421_v54 }
  0x7c   : > { %984 = vmatpush2.bf16.msra.mxu0 %v1423_v55 }
  0x7d   : > { %1025 = vmatpush2.bf16.msra.mxu1 %v1424_v56  ;;  %985 = vmatprep.subr.bf16.mxu0 %v1425_v57 }
  0x7e   : > { %1026 = vmatprep.subr.bf16.mxu1 %v1427_v58 }
  0x80   : > { %986 = vmatpush2.bf16.msra.mxu0 %v1429_v59 }
  0x81   : > { %1027 = vmatpush2.bf16.msra.mxu1 %v1430_v60  ;;  %987 = vmatprep.subr.bf16.mxu0 %v1431_v61 }
  0x82   : > { %1028 = vmatprep.subr.bf16.mxu1 %v1433_v62 }
  0x84   : > { %988 = vmatpush2.bf16.msra.mxu0 %v1435_v63 }
  0x85   : > { %1029 = vmatpush2.bf16.msra.mxu1 %v1436_v0  ;;  %989 = vmatprep.subr.bf16.mxu0 %v1437_v1 }
  0x86   : > { %1030 = vmatprep.subr.bf16.mxu1 %v1439_v2 }
  0x88   : > { %990 = vmatpush2.bf16.msra.mxu0 %v1441_v3 }
  0x89   : > { %1031 = vmatpush2.bf16.msra.mxu1 %v1442_v4 }
  0x8b   : > { %992 = vmatmul.mubr.bf16.vlgmr.msra.gmra.mxu0 %v1216_v5 }
  0x8c   : > { %1033 = vmatmul.mubr.bf16.vlgmr.msra.gmra.mxu1 %v1218_v6 }
 0x14b   : > { %v993_v7 = vpop.f32.mrf.mxu0 }
 0x14c   : > { %v1034_v9 = vpop.f32.mrf.mxu1 }
 0x14d   : > { %v1035_v10 = vadd.f32 %v1034_v9, %v993_v7  ;;  %v995_v11 = vpop.f32.mrf.mxu0 }
 0x14e   : > { %v1036_v13 = vpop.f32.mrf.mxu1 }
 0x14f   : > { %v1041_v14 = vadd.f32 %v1035_v10, %v557_v8  ;;  %v1037_v15 = vadd.f32 %v1036_v13, %v995_v11  ;;  %v997_v16 = vpop.f32.mrf.mxu0  ;;  %1048 = sbr.rel (%p1284_p13) target bundleno = 355 (0x163), region = 78 }
 0x150   : > { %v1038_v17 = vpop.f32.mrf.mxu1 }
 0x151   : > { %1043 = vst [vmem:[#allocation2] sm:$0xff] %v1041_v14  ;;  %v1042_v18 = vadd.f32 %v1037_v15, %v558_v12  ;;  %v998_v19 = vpop.f32.mrf.mxu0 }
 0x152   : > { %v1039_v20 = vpop.f32.mrf.mxu1 }
 0x153   : > { %1044 = vst [vmem:[#allocation2 + $0x8] sm:$0xff] %v1042_v18 }
 0x154   : > { %v1053_v21 = vlaneseq  ;;  %v1051_v23 = vld [vmem:[%s539_s12] sm:$0x3] }
 0x156   : > { %v1054_v22 = vshrl.u32 %v1053_v21, 7 }
 0x158   : > { %v1055_v24 = vsub.s32 0, %v1054_v22  ;;  %v1059_v25 = vsub.s32 1, %v1054_v22  ;;  %v1049_v26 = vld [vmem:[#allocation2] sm:$0xff] }
 0x15a   : > { %v1050_v27 = vld [vmem:[#allocation2 + $0x8] sm:$0xff]  ;;  %v1056_v28 = vrot.slane %v1051_v23, %v1055_v24  ;;  %v1060_v29 = vrot.slane %v1051_v23, %v1059_v25 }
 0x15c   : > { %v1063_v30 = vadd.f32 %v1056_v28, %v1049_v26  ;;  %v1064_v31 = vadd.f32 %v1060_v29, %v1050_v27 }
 0x15e   : > { %v1065_v32 = vmax.f32 %v1063_v30, 0.0  ;;  %v1066_v33 = vmax.f32 %v1064_v31, 0.0 }
 0x160   : > { %v1289_v34 = vpack.c.bf16 %v1066_v33, %v1065_v32 }
 0x162   : > { %1075 = vst [vmem:[%s1736_s15] sm:$0xff] %v1289_v34 }
 0x163 PF: > { %s13_s18 = sadd.s32 1, %s1501_s18   ;;  %s1839_s12 = smov %s1481_s13 }
 0x164   : > { %p10_p0 = scmp.ge.s32.totalorder %s13_s18, 20   ;;  %s1840_s13 = smov %s1575_s25 }
 0x165   : > { %s1841_s14 = smov %s1493_s16  ;;  %s1842_s15 = smov %s1497_s17 }
 0x166   : > { %s1843_s16 = smov %s1846_s19  ;;  %s1844_s17 = smov %s1850_s20 }
 0x167   :  { %12 = sbr.rel (!%p10_p0) target bundleno = 4 (0x4), region = 119 }

// kernel: resnet_forward.45
= control target key start
LH: loop header
LB: loop body
LE: loop exit
PB: predicated region body
PF: predicated region fallthrough
CT: control target
= control target key end

     0   :  { %v24_v23 = vlaneseq  ;;  %s740_s0 = inlined_call_operand.vmem [shape: bf16[2,1,512], index: 0, kind: input, shape index: {}]   ;;  %s741_s1 = inlined_call_operand.vmem [shape: bf16[512,128], index: 1, kind: input, shape index: {}]   ;;  %s742_s2 = inlined_call_operand.vmem [shape: f32[1,128], index: 2, kind: input, shape index: {}]   ;;  %s743_s3 = inlined_call_operand.hbm [shape: f32[2,128], index: 3, kind: output, shape index: {}]  }
   0x1   :  { %v552_v0 = vld [vmem:[%s741_s1 + $0x78] sm:$0xff]   ;;  %v556_v4 = vld [vmem:[%s741_s1 + $0x70] sm:$0xff]   ;;  %v560_v8 = vld [vmem:[%s741_s1 + $0x68] sm:$0xff]  }
   0x2   :  { %v553_v1 = vld [vmem:[%s741_s1 + $0xf8] sm:$0xff]   ;;  %507 = vmatprep.subr.bf16.mxu0 %v552_v0  ;;  %v557_v5 = vld [vmem:[%s741_s1 + $0xf0] sm:$0xff]   ;;  %v561_v9 = vld [vmem:[%s741_s1 + $0xe8] sm:$0xff]   ;;  %v25_v28 = vshrl.u32 %v24_v23, 7 }
   0x3   :  { %v554_v2 = vld [vmem:[%s741_s1 + $0x38] sm:$0xff]   ;;  %529 = vmatprep.subr.bf16.mxu1 %v553_v1  ;;  %v558_v6 = vld [vmem:[%s741_s1 + $0x30] sm:$0xff]   ;;  %v562_v10 = vld [vmem:[%s741_s1 + $0x28] sm:$0xff]  }
   0x4   :  { %v555_v3 = vld [vmem:[%s741_s1 + $0xb8] sm:$0xff]   ;;  %508 = vmatpush3.bf16.msra.mxu0 %v554_v2  ;;  %v559_v7 = vld [vmem:[%s741_s1 + $0xb0] sm:$0xff]   ;;  %v563_v11 = vld [vmem:[%s741_s1 + $0xa8] sm:$0xff]   ;;  %v30_v33 = vsub.s32 2, %v25_v28  ;;  %v38_v35 = vsub.s32 6, %v25_v28  ;;  %v26_v37 = vsub.s32 0, %v25_v28 }
   0x5   :  { %530 = vmatpush3.bf16.msra.mxu1 %v555_v3  ;;  %509 = vmatprep.subr.bf16.mxu0 %v556_v4  ;;  %v564_v12 = vld [vmem:[%s741_s1 + $0x60] sm:$0xff]   ;;  %v568_v16 = vld [vmem:[%s741_s1 + $0x58] sm:$0xff]   ;;  %v572_v20 = vld [vmem:[%s741_s1 + $0x50] sm:$0xff]   ;;  %v34_v38 = vsub.s32 4, %v25_v28 }
   0x6   :  { %531 = vmatprep.subr.bf16.mxu1 %v557_v5  ;;  %v565_v13 = vld [vmem:[%s741_s1 + $0xe0] sm:$0xff]   ;;  %v569_v17 = vld [vmem:[%s741_s1 + $0xd8] sm:$0xff]   ;;  %v573_v21 = vld [vmem:[%s741_s1 + $0xd0] sm:$0xff]  }
   0x7   :  { %v566_v14 = vld [vmem:[%s741_s1 + $0x20] sm:$0xff]   ;;  %v570_v18 = vld [vmem:[%s741_s1 + $0x18] sm:$0xff]   ;;  %v574_v22 = vld [vmem:[%s741_s1 + $0x10] sm:$0xff]  }
   0x8   :  { %510 = vmatpush3.bf16.msra.mxu0 %v558_v6  ;;  %v567_v15 = vld [vmem:[%s741_s1 + $0xa0] sm:$0xff]   ;;  %v571_v19 = vld [vmem:[%s741_s1 + $0x98] sm:$0xff]   ;;  %v575_v24 = vld [vmem:[%s741_s1 + $0x90] sm:$0xff]  }
   0x9   :  { %532 = vmatpush3.bf16.msra.mxu1 %v559_v7  ;;  %511 = vmatprep.subr.bf16.mxu0 %v560_v8  ;;  %v576_v25 = vld [vmem:[%s741_s1 + $0x48] sm:$0xff]   ;;  %v580_v30 = vld [vmem:[%s741_s1 + $0x40] sm:$0xff]  }
   0xa   :  { %533 = vmatprep.subr.bf16.mxu1 %v561_v9  ;;  %v577_v26 = vld [vmem:[%s741_s1 + $0xc8] sm:$0xff]   ;;  %v581_v31 = vld [vmem:[%s741_s1 + $0xc0] sm:$0xff]  }
   0xb   :  { %v578_v27 = vld [vmem:[%s741_s1 + $0x8] sm:$0xff]   ;;  %v582_v32 = vld [vmem:[%s741_s1] sm:$0xff]  }
   0xc   :  { %512 = vmatpush3.bf16.msra.mxu0 %v562_v10  ;;  %v579_v29 = vld [vmem:[%s741_s1 + $0x88] sm:$0xff]   ;;  %v583_v34 = vld [vmem:[%s741_s1 + $0x80] sm:$0xff]  }
   0xd   :  { %534 = vmatpush3.bf16.msra.mxu1 %v563_v11  ;;  %513 = vmatprep.subr.bf16.mxu0 %v564_v12  ;;  %v504_v36 = vld [vmem:[%s740_s0] sm:$0xff]  }
   0xe   :  { %535 = vmatprep.subr.bf16.mxu1 %v565_v13 }
  0x10   :  { %514 = vmatpush3.bf16.msra.mxu0 %v566_v14 }
  0x11   :  { %536 = vmatpush3.bf16.msra.mxu1 %v567_v15  ;;  %515 = vmatprep.subr.bf16.mxu0 %v568_v16 }
  0x12   :  { %537 = vmatprep.subr.bf16.mxu1 %v569_v17 }
  0x14   :  { %516 = vmatpush3.bf16.msra.mxu0 %v570_v18 }
  0x15   :  { %538 = vmatpush3.bf16.msra.mxu1 %v571_v19  ;;  %517 = vmatprep.subr.bf16.mxu0 %v572_v20 }
  0x16   :  { %539 = vmatprep.subr.bf16.mxu1 %v573_v21 }
  0x18   :  { %518 = vmatpush3.bf16.msra.mxu0 %v574_v22 }
  0x19   :  { %540 = vmatpush3.bf16.msra.mxu1 %v575_v24  ;;  %519 = vmatprep.subr.bf16.mxu0 %v576_v25 }
  0x1a   :  { %541 = vmatprep.subr.bf16.mxu1 %v577_v26 }
  0x1c   :  { %520 = vmatpush3.bf16.msra.mxu0 %v578_v27 }
  0x1d   :  { %542 = vmatpush3.bf16.msra.mxu1 %v579_v29  ;;  %521 = vmatprep.subr.bf16.mxu0 %v580_v30 }
  0x1e   :  { %543 = vmatprep.subr.bf16.mxu1 %v581_v31 }
  0x20   :  { %522 = vmatpush3.bf16.msra.mxu0 %v582_v32 }
  0x21   :  { %8 = vsyncpa [#allocation3], 0  ;;  %544 = vmatpush3.bf16.msra.mxu1 %v583_v34  ;;  %v505_v39 = vunpack.c.l.bf16 %v504_v36  ;;  %v506_v40 = vunpack.c.h.bf16 %v504_v36  ;;  %vm160_vm0 = vcmask 1041409   ;;  %v469_v15 = vld [vmem:[%s742_s2] ss:$0 sm:$0xff]  ;;  %s610_s24 = smov [#allocation2]  }
  0x22   :  { %s461_s25 = sshll.u32 %s610_s24, 4  ;;  %s462_s25 = int_to_ptr.vmem [resolvable:$true] %s461_s25 }
  0x23   :  { %v31_v41 = vrot.slane %v505_v39, %v30_v33  ;;  %v47_v42 = vrot.slane %v506_v40, %v30_v33  ;;  %v39_v43 = vrot.slane %v505_v39, %v38_v35  ;;  %v55_v44 = vrot.slane %v506_v40, %v38_v35  ;;  %s588_s2 = scalar_lea.vmem %s462_s25, 32  ;;  %p593_p1 = scmp.lt.s32.totalorder %s462_s25, %s462_s25 }
  0x24   :  { %v27_v45 = vrot.slane %v505_v39, %v26_v37  ;;  %v43_v46 = vrot.slane %v506_v40, %v26_v37  ;;  %v35_v47 = vrot.slane %v505_v39, %v34_v38  ;;  %v51_v48 = vrot.slane %v506_v40, %v34_v38  ;;  %p589_p0 = scmp.ne.s32.totalorder %s462_s25, %s588_s2  ;;  %p594_p2 = scmp.lt.s32.totalorder %s588_s2, %s588_s2 }
  0x25   :  { %v65_v49 = vpack.c.bf16 %v31_v41, %v31_v41  ;;  %v69_v50 = vpack.c.bf16 %v47_v42, %v47_v42  ;;  %v67_v51 = vpack.c.bf16 %v39_v43, %v39_v43  ;;  %v71_v52 = vpack.c.bf16 %v55_v44, %v55_v44 }
  0x26   :  { %v64_v53 = vpack.c.bf16 %v27_v45, %v27_v45  ;;  %v68_v54 = vpack.c.bf16 %v43_v46, %v43_v46  ;;  %v66_v55 = vpack.c.bf16 %v35_v47, %v35_v47  ;;  %v70_v56 = vpack.c.bf16 %v51_v48, %v51_v48  ;;  %p595_p3 = por %p594_p2, %p593_p1 }
  0x27   :  { %v152_v57 = vunpack.c.l.b16 %v65_v49  ;;  %v156_v58 = vunpack.c.l.b16 %v69_v50  ;;  %v154_v59 = vunpack.c.l.b16 %v67_v51  ;;  %v158_v60 = vunpack.c.l.b16 %v71_v52 }
  0x28   :  { %v151_v61 = vunpack.c.l.b16 %v64_v53  ;;  %v155_v62 = vunpack.c.l.b16 %v68_v54  ;;  %v153_v63 = vunpack.c.l.b16 %v66_v55  ;;  %v157_v0 = vunpack.c.l.b16 %v70_v56  ;;  %p596_p4 = pnand %p595_p3, %p589_p0 }
  0x29   :  { %v162_v1 = vrot.slane %v156_v58, 7  ;;  %v166_v2 = vrot.slane %v158_v60, 7 }
  0x2a   :  { %v159_v3 = vrot.slane %v155_v62, 7  ;;  %v164_v4 = vrot.slane %v157_v0, 7 }
  0x2b   :  { %v163_v5 = vsel %vm160_vm0, %v162_v1, %v152_v57  ;;  %v167_v6 = vsel %vm160_vm0, %v166_v2, %v154_v59 }
  0x2c   :  { %v169_v7 = vpack.c.b16 %v163_v5, %v163_v5  ;;  %v171_v8 = vpack.c.b16 %v167_v6, %v167_v6  ;;  %v161_v9 = vsel %vm160_vm0, %v159_v3, %v151_v61  ;;  %v165_v10 = vsel %vm160_vm0, %v164_v4, %v153_v63 }
  0x2d   :  { %v168_v11 = vpack.c.b16 %v161_v9, %v161_v9  ;;  %v170_v12 = vpack.c.b16 %v165_v10, %v165_v10 }
  0x2e   :  { %400 = vmatprep.mubr.bf16.mxu0 %v169_v7  ;;  %440 = vmatprep.mubr.bf16.mxu1 %v171_v8 }
  0x2f   :  { %401 = vmatmul.mubr.bf16.vlgmr.msra.gmra.mxu0 %v168_v11  ;;  %441 = vmatmul.mubr.bf16.vlgmr.msra.gmra.mxu1 %v170_v12 }
  0xef   :  { %v523_v13 = vpop.f32.mrf.mxu0  ;;  %v545_v14 = vpop.f32.mrf.mxu1 }
  0xf1   :  { %v524_v16 = vpop.f32.mrf.mxu0  ;;  %v546_v17 = vpop.f32.mrf.mxu1 }
  0xf2   :  { %v525_v18 = vadd.f32 %v524_v16, %v523_v13  ;;  %v547_v22 = vadd.f32 %v546_v17, %v545_v14 }
  0xf3   :  { %v526_v19 = vpop.f32.mrf.mxu0  ;;  %v548_v20 = vpop.f32.mrf.mxu1 }
  0xf4   :  { %v403_v21 = vadd.f32 %v525_v18, %v469_v15 }
  0xf5   :  { %v527_v23 = vpop.f32.mrf.mxu0  ;;  %v549_v24 = vpop.f32.mrf.mxu1 }
  0xf6   :  { %v443_v25 = vadd.f32 %v547_v22, %v403_v21 }
  0xf8   :  { %v502_v26 = vmul.f32 -1.442695, %v443_v25 }
  0xfa   :  { %584 = vpow2.f32 %v502_v26 }
 0x107   :  { %v585_v27 = vpop.eup %584 }
 0x108   :  { %v451_v28 = vadd.f32 1.0, %v585_v27 }
 0x10a   :  { %586 = vrcp.f32 %v451_v28 }
 0x117   :  { %v587_v29 = vpop.eup %586 }
 0x118   :  { %454 = vst [vmem:[#allocation2] sm:$0x3] %v587_v29 }
 0x119   :  { %599 = shalt.err (!%p596_p4)
}
 0x11a   :  { %464 = dma.vmem_to_hbm [thread:$0]  %s462_s25, 32, %s743_s3, [#allocation3]  }
 0x11b   :  { %608 = dma.done.wait [#allocation3], 32  }
 0x11c   :  { %609 = vsyncadd [#allocation3], 4294967264 }
 0x11d   :  { %468 = vsyncpa [#allocation3], 1 }

</bundles_post_ra>
